<compile_context>
chip_gen: v7x
topology: tpu7x:2x2x1
jax: 0.10.0
libtpu: 0.0.40
codegen_flags: <defaults>
</compile_context>

<pallas_src>
import math
import numpy as np
import jax
import jax.numpy as jnp
from jax.experimental import pallas as pl
from jax.experimental.pallas import tpu as pltpu

BN_EPS = 1e-5


# ---------------------------------------------------------------------------
# In-kernel helpers (operate on values / refs with layout (C, H*W))
# ---------------------------------------------------------------------------
def _lane_masks(HW, W):
    """Boolean (1, HW) masks: column > 0 and column < W-1 of the row-major flattening."""
    lane = jax.lax.broadcasted_iota(jnp.int32, (1, HW), 1)
    wpos = (lane & (W - 1)) if (W & (W - 1)) == 0 else lane % W
    return wpos > 0, wpos < (W - 1)


def _shift_flat(a, dh, dw, W, mask_left, mask_right):
    """Return value v with v[c, h*W+w] = a[c, (h+dh)*W + (w+dw)], zero outside the image."""
    C, HW = a.shape
    s = dh * W + dw
    if s > 0:
        a = jnp.concatenate([a[:, s:], jnp.zeros((C, s), a.dtype)], axis=1)
    elif s < 0:
        a = jnp.concatenate([jnp.zeros((C, -s), a.dtype), a[:, :HW + s]], axis=1)
    if dw == 1:                       # w+1 out of range at the last column
        a = jnp.where(mask_right, a, 0.0)
    elif dw == -1:                    # w-1 out of range at the first column
        a = jnp.where(mask_left, a, 0.0)
    return a


def _conv3x3_lane(a, w_ref, b_ref, W, mask_left, mask_right):
    """3x3 conv, stride 1, zero padding 1.  a: (Cin, H*W); w_ref: (9, Cout, Cin);
    b_ref: (Cout, 1).  9 lane-shifted matmuls accumulated in registers."""
    acc = None
    for kh in range(3):
        for kw in range(3):
            sh = _shift_flat(a, kh - 1, kw - 1, W, mask_left, mask_right)
            d = jnp.dot(w_ref[kh * 3 + kw], sh, preferred_element_type=jnp.float32)
            acc = d if acc is None else acc + d
    return acc + b_ref[...]


# ---------------------------------------------------------------------------
# Fused stage kernels
# ---------------------------------------------------------------------------
def _make_dense_stage_kernel(H, W, c0, growth, n_layers, *, has_init_conv, with_transition):
    """[init 3x3 conv] -> n_layers dense layers -> [BN/ReLU/1x1 conv + 2x2 max-pool]."""
    HW = H * W

    def kernel(*refs):
        idx = 0
        x_ref = refs[idx]; idx += 1
        if has_init_conv:
            iw_ref, ib_ref = refs[idx], refs[idx + 1]; idx += 2
        layer_refs = [refs[idx + 4 * j: idx + 4 * j + 4] for j in range(n_layers)]
        idx += 4 * n_layers
        if with_transition:
            td_sc, td_sh, td_w, td_b, s_pool = refs[idx: idx + 5]; idx += 5
        feat_ref = refs[idx]; idx += 1            # (c_blk, HW): output = VMEM concat buffer
        if with_transition:
            pool_ref = refs[idx]; idx += 1        # (c_blk, HW // 4)

        mask_l, mask_r = _lane_masks(HW, W)

        if has_init_conv:
            feat_ref[0:c0, :] = _conv3x3_lane(x_ref[...], iw_ref, ib_ref, W, mask_l, mask_r)
        else:
            feat_ref[0:c0, :] = x_ref[...]

        c = c0
        for (sc, sf, w, b) in layer_refs:
            xin = feat_ref[0:c, :]
            act = jnp.maximum(xin * sc[...] + sf[...], 0.0)       # BN (running stats) + ReLU
            feat_ref[c:c + growth, :] = _conv3x3_lane(act, w, b, W, mask_l, mask_r)
            c += growth

        if with_transition:
            feats = feat_ref[...]
            act = jnp.maximum(feats * td_sc[...] + td_sh[...], 0.0)
            z = jnp.dot(td_w[...], act, preferred_element_type=jnp.float32) + td_b[...]
            # 2x2 max-pool: max of the 4 shifted copies, then gather the even (h, w)
            # positions with a constant 0/1 selection matmul.
            zm = jnp.maximum(
                jnp.maximum(z, _shift_flat(z, 0, 1, W, mask_l, mask_r)),
                jnp.maximum(_shift_flat(z, 1, 0, W, mask_l, mask_r),
                            _shift_flat(z, 1, 1, W, mask_l, mask_r)))
            pool_ref[...] = jnp.dot(zm, s_pool[...], preferred_element_type=jnp.float32)

    return kernel


def _make_up_stage_kernel(Hs, Ws, c_prev, nlast, c_skip, growth, n_layers, final_cout):
    """Stride-2 3x3 transposed conv (sub-pixel form) -> concat(skip) -> dense block
    [-> final 1x1 conv]."""
    H, W = 2 * Hs, 2 * Ws
    HWs, HW = Hs * Ws, H * W
    c_cat = nlast + c_skip

    def kernel(*refs):
        idx = 0
        feats_ref, skip_ref, tw_ref, tb_ref, s_up = refs[idx: idx + 5]; idx += 5
        layer_refs = [refs[idx + 4 * j: idx + 4 * j + 4] for j in range(n_layers)]
        idx += 4 * n_layers
        if final_cout is not None:
            fw_ref, fb_ref = refs[idx], refs[idx + 1]; idx += 2
        out_ref = refs[idx]; idx += 1
        buf_ref = refs[idx] if final_cout is not None else out_ref   # (c_out, HW)

        # ---- ConvTranspose2d(k=3, s=2, p=1, output_padding=1): sub-pixel decomposition ----
        ml_s, mr_s = _lane_masks(HWs, Ws)
        x00 = feats_ref[c_prev - nlast:c_prev, :]                    # x[:, i  , j  ]
        x01 = _shift_flat(x00, 0, 1, Ws, ml_s, mr_s)                 # x[:, i  , j+1]
        x10 = _shift_flat(x00, 1, 0, Ws, ml_s, mr_s)                 # x[:, i+1, j  ]
        x11 = _shift_flat(x00, 1, 1, Ws, ml_s, mr_s)                 # x[:, i+1, j+1]

        def mm(a, b):
            return jnp.dot(a, b, preferred_element_type=jnp.float32)

        w2 = lambda kh, kw: tw_ref[kh * 3 + kw]                      # (Cout, Cin) of tap
        img00 = mm(w2(1, 1), x00)                                    # out[2i  , 2j  ]
        img01 = mm(w2(1, 0), x01) + mm(w2(1, 2), x00)                # out[2i  , 2j+1]
        img10 = mm(w2(0, 1), x10) + mm(w2(2, 1), x00)                # out[2i+1, 2j  ]
        img11 = (mm(w2(0, 0), x11) + mm(w2(0, 2), x10)
                 + mm(w2(2, 0), x01) + mm(w2(2, 2), x00))            # out[2i+1, 2j+1]
        up = (mm(img00, s_up[0]) + mm(img01, s_up[1])
              + mm(img10, s_up[2]) + mm(img11, s_up[3]) + tb_ref[...])

        # ---- concat([up, skip], channel dim) directly into the VMEM feature buffer ----
        buf_ref[0:nlast, :] = up
        buf_ref[nlast:c_cat, :] = skip_ref[...]

        # ---- dense block at the upsampled resolution ----
        mask_l, mask_r = _lane_masks(HW, W)
        c = c_cat
        for (sc, sf, w, b) in layer_refs:
            xin = buf_ref[0:c, :]
            act = jnp.maximum(xin * sc[...] + sf[...], 0.0)
            buf_ref[c:c + growth, :] = _conv3x3_lane(act, w, b, W, mask_l, mask_r)
            c += growth

        if final_cout is not None:                                   # fused 1x1 output conv
            out_ref[...] = (jnp.dot(fw_ref[...], buf_ref[...],
                                    preferred_element_type=jnp.float32) + fb_ref[...])

    return kernel


# ---------------------------------------------------------------------------
# pallas_call wrappers
# ---------------------------------------------------------------------------
def _bc_spec(arr):
    r = arr.ndim
    return pl.BlockSpec(arr.shape, lambda n, _r=r: (0,) * _r)


def dense_stage(x, layers, growth, H, W, *, init_conv=None, transition=None,
                pool_select=None):
    """Down stage (init_conv/transition given) or bottleneck (plain dense block)."""
    N, c_in, HW = x.shape
    n_layers = len(layers)
    c0 = init_conv["w"].shape[1] if init_conv is not None else c_in
    c_blk = c0 + growth * n_layers

    inputs = [x]
    in_specs = [pl.BlockSpec((None, c_in, HW), lambda n: (n, 0, 0))]

    def add(*arrs):
        for a in arrs:
            inputs.append(a)
            in_specs.append(_bc_spec(a))

    if init_conv is not None:
        add(init_conv["w"], init_conv["b"])
    for lp in layers:
        add(lp["bn_scale"], lp["bn_shift"], lp["w"], lp["b"])
    if transition is not None:
        add(transition["bn_scale"], transition["bn_shift"], transition["w"],
            transition["b"], pool_select)

    if transition is not None:
        HWo = (H // 2) * (W // 2)
        out_shape = (jax.ShapeDtypeStruct((N, c_blk, HW), jnp.float32),
                     jax.ShapeDtypeStruct((N, c_blk, HWo), jnp.float32))
        out_specs = (pl.BlockSpec((None, c_blk, HW), lambda n: (n, 0, 0)),
                     pl.BlockSpec((None, c_blk, HWo), lambda n: (n, 0, 0)))
    else:
        out_shape = jax.ShapeDtypeStruct((N, c_blk, HW), jnp.float32)
        out_specs = pl.BlockSpec((None, c_blk, HW), lambda n: (n, 0, 0))

    kernel = _make_dense_stage_kernel(H, W, c0, growth, n_layers,
                                      has_init_conv=init_conv is not None,
                                      with_transition=transition is not None)
    return pl.pallas_call(
        kernel,
        out_shape=out_shape,
        grid=(N,),
        in_specs=in_specs,
        out_specs=out_specs,
        compiler_params=pltpu.CompilerParams(dimension_semantics=("parallel",)),
    )(*inputs)


def up_stage(feats, skip, trans, layers, up_select, growth, Hs, Ws, final_conv=None):
    N, c_prev, HWs = feats.shape
    _, c_skip, HW = skip.shape
    nlast = trans["w"].shape[1]
    n_layers = len(layers)
    c_cat = nlast + c_skip
    c_out = c_cat + growth * n_layers
    final_cout = final_conv["w"].shape[0] if final_conv is not None else None

    inputs = [feats, skip, trans["w"], trans["b"], up_select]
    in_specs = [pl.BlockSpec((None, c_prev, HWs), lambda n: (n, 0, 0)),
                pl.BlockSpec((None, c_skip, HW), lambda n: (n, 0, 0)),
                _bc_spec(trans["w"]), _bc_spec(trans["b"]), _bc_spec(up_select)]
    for lp in layers:
        for a in (lp["bn_scale"], lp["bn_shift"], lp["w"], lp["b"]):
            inputs.append(a); in_specs.append(_bc_spec(a))
    if final_conv is not None:
        for a in (final_conv["w"], final_conv["b"]):
            inputs.append(a); in_specs.append(_bc_spec(a))

    c_res = final_cout if final_conv is not None else c_out
    out_shape = jax.ShapeDtypeStruct((N, c_res, HW), jnp.float32)
    out_specs = pl.BlockSpec((None, c_res, HW), lambda n: (n, 0, 0))
    scratch = [pltpu.VMEM((c_out, HW), jnp.float32)] if final_conv is not None else []

    kernel = _make_up_stage_kernel(Hs, Ws, c_prev, nlast, c_skip, growth,
                                   n_layers, final_cout)
    return pl.pallas_call(
        kernel,
        out_shape=out_shape,
        grid=(N,),
        in_specs=in_specs,
        out_specs=out_specs,
        scratch_shapes=scratch,
        compiler_params=pltpu.CompilerParams(dimension_semantics=("parallel",)),
    )(*inputs)


# ---------------------------------------------------------------------------
# Constant selection matrices (pool compaction / sub-pixel interleave)
# ---------------------------------------------------------------------------
def _pool_select_matrix(H, W):
    """S[(2qh)*W + 2qw, qh*(W//2) + qw] = 1  (select top-left of each 2x2 window)."""
    Ho, Wo = H // 2, W // 2
    S = np.zeros((H * W, Ho * Wo), np.float32)
    qh, qw = np.meshgrid(np.arange(Ho), np.arange(Wo), indexing="ij")
    S[((2 * qh) * W + 2 * qw).ravel(), (qh * Wo + qw).ravel()] = 1.0
    return jnp.asarray(S)


def _up_select_matrix(Hs, Ws):
    """S[a*2+b, i*Ws+j, (2i+a)*(2Ws) + (2j+b)] = 1  (scatter parity images into 2H x 2W)."""
    H, W = 2 * Hs, 2 * Ws
    S = np.zeros((4, Hs * Ws, H * W), np.float32)
    i, j = np.meshgrid(np.arange(Hs), np.arange(Ws), indexing="ij")
    p = (i * Ws + j).ravel()
    for a in range(2):
        for b in range(2):
            S[a * 2 + b, p, ((2 * i + a) * W + (2 * j + b)).ravel()] = 1.0
    return jnp.asarray(S)


# ---------------------------------------------------------------------------
# Parameter initialization (mirrors the PyTorch __init__ weight init)
# ---------------------------------------------------------------------------
class _KeyGen:
    def __init__(self, key):
        self.key = key

    def __call__(self):
        self.key, sub = jax.random.split(self.key)
        return sub


def _conv3x3_init(key, cin, cout):
    std = math.sqrt(2.0 / (9 * cout))
    return {"w": jax.random.normal(key, (9, cout, cin), jnp.float32) * std,
            "b": jnp.zeros((cout, 1), jnp.float32)}


def _conv1x1_init(key, cin, cout):
    std = math.sqrt(2.0 / (1 * 1 * cout))
    return {"w": jax.random.normal(key, (cout, cin), jnp.float32) * std,
            "b": jnp.zeros((cout, 1), jnp.float32)}


def _bn_params(cin):
    # gamma=1, beta=0, running_mean=0, running_var=1 -> scale = 1/sqrt(1+eps), shift = 0
    return {"bn_scale": jnp.full((cin, 1), 1.0 / math.sqrt(1.0 + BN_EPS), jnp.float32),
            "bn_shift": jnp.zeros((cin, 1), jnp.float32)}


def _bn_relu_conv3_init(key, cin, cout):
    p = _conv3x3_init(key, cin, cout); p.update(_bn_params(cin)); return p


def _bn_relu_conv1_init(key, cin, cout):
    p = _conv1x1_init(key, cin, cout); p.update(_bn_params(cin)); return p


def _convT_init(key, c):
    std = math.sqrt(2.0 / (9 * c))
    # [kh*3+kw, cout, cin] layout of the ConvTranspose2d(c, c, 3) weight.
    return {"w": jax.random.normal(key, (9, c, c), jnp.float32) * std,
            "b": jnp.zeros((c, 1), jnp.float32)}


def init_densenet_params(key, num_input_features, num_output_features, growth_rate,
                         num_transitions, block_config, num_init_features):
    kg = _KeyGen(key)
    params = {"down_blocks": [], "down_trans": [], "up_blocks": [], "up_trans": []}
    num_features = num_init_features
    params["init_conv"] = _conv3x3_init(kg(), num_input_features, num_features)
    skip_feats = []
    for i in range(num_transitions):
        nl = block_config[i]
        params["down_blocks"].append(
            [_bn_relu_conv3_init(kg(), num_features + j * growth_rate, growth_rate)
             for j in range(nl)])
        num_features += growth_rate * nl
        params["down_trans"].append(_bn_relu_conv1_init(kg(), num_features, num_features))
        skip_feats.append(num_features)
    nl = block_config[num_transitions]
    params["bottleneck"] = [
        _bn_relu_conv3_init(kg(), num_features + j * growth_rate, growth_rate)
        for j in range(nl)]
    skip_feats = skip_feats[::-1]
    for i in range(num_transitions):
        nlast = growth_rate * block_config[num_transitions + i]
        params["up_trans"].append(_convT_init(kg(), nlast))
        num_features = nlast + skip_feats[i]
        nl = block_config[num_transitions + 1 + i]
        params["up_blocks"].append(
            [_bn_relu_conv3_init(kg(), num_features + j * growth_rate, growth_rate)
             for j in range(nl)])
        num_features += growth_rate * nl
    params["output_conv"] = _conv1x1_init(kg(), num_features, num_output_features)
    return params


# ---------------------------------------------------------------------------
# Forward pass (mirrors DenseNet.forward)
# ---------------------------------------------------------------------------
def densenet_forward(params, x_flat, growth, num_transitions, block_config, H, W):
    """x_flat: (N, Cin, H*W) float32; returns (N, num_output_features, H*W)."""
    feats = x_flat
    skips = []
    h, w = H, W
    for i in range(num_transitions):
        skip, pooled = dense_stage(
            feats, params["down_blocks"][i], growth, h, w,
            init_conv=params["init_conv"] if i == 0 else None,
            transition=params["down_trans"][i],
            pool_select=_pool_select_matrix(h, w))
        skips.append(skip)
        feats = pooled
        h, w = h // 2, w // 2

    feats = dense_stage(feats, params["bottleneck"], growth, h, w)

    for i in range(num_transitions):
        skip = skips.pop()
        final = params["output_conv"] if i == num_transitions - 1 else None
        feats = up_stage(feats, skip, params["up_trans"][i], params["up_blocks"][i],
                         _up_select_matrix(h, w), growth, h, w, final_conv=final)
        h, w = 2 * h, 2 * w
    return feats


# ---------------------------------------------------------------------------
# Main
# ---------------------------------------------------------------------------
if __name__ == "__main__":
    GROWTH = 4
    NUM_TRANS = 2
    BLOCK_CFG = [2, 2, 3, 2, 2]          # length = 2 * num_transitions + 1
    NUM_INIT = 8
    IN_CH, OUT_CH = 3, 1
    N, H, W = 2, 32, 32                  # spatial divisible by 2**NUM_TRANS

    root = jax.random.PRNGKey(0)
    pkey, xkey = jax.random.split(root)
    params = init_densenet_params(pkey, IN_CH, OUT_CH, GROWTH, NUM_TRANS, BLOCK_CFG, NUM_INIT)

    x_nchw = jax.random.normal(xkey, (N, IN_CH, H, W), jnp.float32)   # PyTorch NCHW input
    x_flat = x_nchw.reshape(N, IN_CH, H * W)                          # exact row-major view

    y_flat = densenet_forward(params, x_flat, GROWTH, NUM_TRANS, BLOCK_CFG, H, W)
    y_nchw = y_flat.reshape(N, OUT_CH, H, W)                          # back to NCHW
    jax.block_until_ready(y_nchw)

    assert y_nchw.shape == (N, OUT_CH, H, W), y_nchw.shape
    assert bool(jnp.all(jnp.isfinite(y_nchw)))
    print("KERNEL_OK")
</pallas_src>

<mosaic_0001>
module attributes {stable_mosaic.version = 11 : i64} {
  func.func @kernel(%arg0: i32, %arg1: memref<1x3x1024xf32, #tpu.memory_space<vmem>>, %arg2: memref<9x8x3xf32, #tpu.memory_space<vmem>>, %arg3: memref<8x1xf32, #tpu.memory_space<vmem>>, %arg4: memref<8x1xf32, #tpu.memory_space<vmem>>, %arg5: memref<8x1xf32, #tpu.memory_space<vmem>>, %arg6: memref<9x4x8xf32, #tpu.memory_space<vmem>>, %arg7: memref<4x1xf32, #tpu.memory_space<vmem>>, %arg8: memref<12x1xf32, #tpu.memory_space<vmem>>, %arg9: memref<12x1xf32, #tpu.memory_space<vmem>>, %arg10: memref<9x4x12xf32, #tpu.memory_space<vmem>>, %arg11: memref<4x1xf32, #tpu.memory_space<vmem>>, %arg12: memref<16x1xf32, #tpu.memory_space<vmem>>, %arg13: memref<16x1xf32, #tpu.memory_space<vmem>>, %arg14: memref<16x16xf32, #tpu.memory_space<vmem>>, %arg15: memref<16x1xf32, #tpu.memory_space<vmem>>, %arg16: memref<1024x256xf32, #tpu.memory_space<vmem>>, %arg17: memref<1x16x1024xf32, #tpu.memory_space<vmem>>, %arg18: memref<1x16x256xf32, #tpu.memory_space<vmem>>) attributes {dimension_semantics = [#tpu.dimension_semantics<parallel>], iteration_bounds = array<i64: 2>, scalar_prefetch = 0 : i64, scratch_operands = 0 : i64, tpu.core_type = #tpu.core_type<tc>, window_params = [{transform_indices = @transform_0, window_bounds = array<i64: 1, 3, 1024>}, {pipeline_mode = #tpu.pipeline_mode<synchronous>, transform_indices = @transform_1, window_bounds = array<i64: 9, 8, 3>}, {pipeline_mode = #tpu.pipeline_mode<synchronous>, transform_indices = @transform_2, window_bounds = array<i64: 8, 1>}, {pipeline_mode = #tpu.pipeline_mode<synchronous>, transform_indices = @transform_3, window_bounds = array<i64: 8, 1>}, {pipeline_mode = #tpu.pipeline_mode<synchronous>, transform_indices = @transform_4, window_bounds = array<i64: 8, 1>}, {pipeline_mode = #tpu.pipeline_mode<synchronous>, transform_indices = @transform_5, window_bounds = array<i64: 9, 4, 8>}, {pipeline_mode = #tpu.pipeline_mode<synchronous>, transform_indices = @transform_6, window_bounds = array<i64: 4, 1>}, {pipeline_mode = #tpu.pipeline_mode<synchronous>, transform_indices = @transform_7, window_bounds = array<i64: 12, 1>}, {pipeline_mode = #tpu.pipeline_mode<synchronous>, transform_indices = @transform_8, window_bounds = array<i64: 12, 1>}, {pipeline_mode = #tpu.pipeline_mode<synchronous>, transform_indices = @transform_9, window_bounds = array<i64: 9, 4, 12>}, {pipeline_mode = #tpu.pipeline_mode<synchronous>, transform_indices = @transform_10, window_bounds = array<i64: 4, 1>}, {pipeline_mode = #tpu.pipeline_mode<synchronous>, transform_indices = @transform_11, window_bounds = array<i64: 16, 1>}, {pipeline_mode = #tpu.pipeline_mode<synchronous>, transform_indices = @transform_12, window_bounds = array<i64: 16, 1>}, {pipeline_mode = #tpu.pipeline_mode<synchronous>, transform_indices = @transform_13, window_bounds = array<i64: 16, 16>}, {pipeline_mode = #tpu.pipeline_mode<synchronous>, transform_indices = @transform_14, window_bounds = array<i64: 16, 1>}, {pipeline_mode = #tpu.pipeline_mode<synchronous>, transform_indices = @transform_15, window_bounds = array<i64: 1024, 256>}, {transform_indices = @transform_16, window_bounds = array<i64: 1, 16, 1024>}, {transform_indices = @transform_17, window_bounds = array<i64: 1, 16, 256>}]} {
    %0 = tpu.iota {dimensions = array<i32: 1>} : vector<1x1024xi32>
    %c31_i32 = arith.constant 31 : i32
    %1 = vector.broadcast %c31_i32 : i32 to vector<1x1024xi32>
    %2 = arith.andi %0, %1 : vector<1x1024xi32>
    %c0_i32 = arith.constant 0 : i32
    %3 = vector.broadcast %c0_i32 : i32 to vector<1x1024xi32>
    %4 = arith.cmpi sgt, %2, %3 : vector<1x1024xi32>
    %c31_i32_0 = arith.constant 31 : i32
    %5 = vector.broadcast %c31_i32_0 : i32 to vector<1x1024xi32>
    %6 = arith.cmpi slt, %2, %5 : vector<1x1024xi32>
    %c0 = arith.constant 0 : index
    %c0_1 = arith.constant 0 : index
    %c0_2 = arith.constant 0 : index
    %7 = vector.load %arg1[%c0, %c0_1, %c0_2] : memref<1x3x1024xf32, #tpu.memory_space<vmem>>, vector<1x3x1024xf32>
    %8 = vector.shape_cast %7 : vector<1x3x1024xf32> to vector<3x1024xf32>
    %cst = arith.constant 0.000000e+00 : f32
    %9 = vector.broadcast %cst : f32 to vector<3x33xf32>
    %10 = vector.extract_strided_slice %8 {offsets = [0, 0], sizes = [3, 991], strides = [1, 1]} : vector<3x1024xf32> to vector<3x991xf32>
    %11 = tpu.concatenate %9, %10 in 1 : vector<3x33xf32>, vector<3x991xf32> -> vector<3x1024xf32>
    %cst_3 = arith.constant 0.000000e+00 : f32
    %12 = vector.shape_cast %4 : vector<1x1024xi1> to vector<1x1024xi1>
    %13 = vector.broadcast %12 : vector<1x1024xi1> to vector<3x1024xi1>
    %14 = vector.broadcast %cst_3 : f32 to vector<3x1024xf32>
    %15 = arith.select %13, %11, %14 : vector<3x1024xi1>, vector<3x1024xf32>
    %c0_4 = arith.constant 0 : index
    %c0_5 = arith.constant 0 : index
    %c0_6 = arith.constant 0 : index
    %16 = vector.load %arg2[%c0_4, %c0_5, %c0_6] : memref<9x8x3xf32, #tpu.memory_space<vmem>>, vector<1x8x3xf32>
    %17 = vector.shape_cast %16 : vector<1x8x3xf32> to vector<8x3xf32>
    %cst_7 = arith.constant dense<0.000000e+00> : vector<8x1024xf32>
    %18 = tpu.matmul %17, %15, %cst_7 {dimension_numbers = #tpu.dot_dimension_numbers<[1], [0], [0], [1], [0, 0, 1, 1], [], []>} : vector<8x3xf32>, vector<3x1024xf32>, vector<8x1024xf32> -> vector<8x1024xf32>
    %cst_8 = arith.constant 0.000000e+00 : f32
    %19 = vector.broadcast %cst_8 : f32 to vector<3x32xf32>
    %20 = vector.extract_strided_slice %8 {offsets = [0, 0], sizes = [3, 992], strides = [1, 1]} : vector<3x1024xf32> to vector<3x992xf32>
    %21 = tpu.concatenate %19, %20 in 1 : vector<3x32xf32>, vector<3x992xf32> -> vector<3x1024xf32>
    %c1 = arith.constant 1 : index
    %c0_9 = arith.constant 0 : index
    %c0_10 = arith.constant 0 : index
    %22 = vector.load %arg2[%c1, %c0_9, %c0_10] : memref<9x8x3xf32, #tpu.memory_space<vmem>>, vector<1x8x3xf32>
    %23 = vector.shape_cast %22 : vector<1x8x3xf32> to vector<8x3xf32>
    %cst_11 = arith.constant dense<0.000000e+00> : vector<8x1024xf32>
    %24 = tpu.matmul %23, %21, %cst_11 {dimension_numbers = #tpu.dot_dimension_numbers<[1], [0], [0], [1], [0, 0, 1, 1], [], []>} : vector<8x3xf32>, vector<3x1024xf32>, vector<8x1024xf32> -> vector<8x1024xf32>
    %25 = arith.addf %18, %24 : vector<8x1024xf32>
    %cst_12 = arith.constant 0.000000e+00 : f32
    %26 = vector.broadcast %cst_12 : f32 to vector<3x31xf32>
    %27 = vector.extract_strided_slice %8 {offsets = [0, 0], sizes = [3, 993], strides = [1, 1]} : vector<3x1024xf32> to vector<3x993xf32>
    %28 = tpu.concatenate %26, %27 in 1 : vector<3x31xf32>, vector<3x993xf32> -> vector<3x1024xf32>
    %cst_13 = arith.constant 0.000000e+00 : f32
    %29 = vector.shape_cast %6 : vector<1x1024xi1> to vector<1x1024xi1>
    %30 = vector.broadcast %29 : vector<1x1024xi1> to vector<3x1024xi1>
    %31 = vector.broadcast %cst_13 : f32 to vector<3x1024xf32>
    %32 = arith.select %30, %28, %31 : vector<3x1024xi1>, vector<3x1024xf32>
    %c2 = arith.constant 2 : index
    %c0_14 = arith.constant 0 : index
    %c0_15 = arith.constant 0 : index
    %33 = vector.load %arg2[%c2, %c0_14, %c0_15] : memref<9x8x3xf32, #tpu.memory_space<vmem>>, vector<1x8x3xf32>
    %34 = vector.shape_cast %33 : vector<1x8x3xf32> to vector<8x3xf32>
    %cst_16 = arith.constant dense<0.000000e+00> : vector<8x1024xf32>
    %35 = tpu.matmul %34, %32, %cst_16 {dimension_numbers = #tpu.dot_dimension_numbers<[1], [0], [0], [1], [0, 0, 1, 1], [], []>} : vector<8x3xf32>, vector<3x1024xf32>, vector<8x1024xf32> -> vector<8x1024xf32>
    %36 = arith.addf %25, %35 : vector<8x1024xf32>
    %cst_17 = arith.constant 0.000000e+00 : f32
    %37 = vector.broadcast %cst_17 : f32 to vector<3x1xf32>
    %38 = vector.extract_strided_slice %8 {offsets = [0, 0], sizes = [3, 1023], strides = [1, 1]} : vector<3x1024xf32> to vector<3x1023xf32>
    %39 = tpu.concatenate %37, %38 in 1 : vector<3x1xf32>, vector<3x1023xf32> -> vector<3x1024xf32>
    %cst_18 = arith.constant 0.000000e+00 : f32
    %40 = vector.shape_cast %4 : vector<1x1024xi1> to vector<1x1024xi1>
    %41 = vector.broadcast %40 : vector<1x1024xi1> to vector<3x1024xi1>
    %42 = vector.broadcast %cst_18 : f32 to vector<3x1024xf32>
    %43 = arith.select %41, %39, %42 : vector<3x1024xi1>, vector<3x1024xf32>
    %c3 = arith.constant 3 : index
    %c0_19 = arith.constant 0 : index
    %c0_20 = arith.constant 0 : index
    %44 = vector.load %arg2[%c3, %c0_19, %c0_20] : memref<9x8x3xf32, #tpu.memory_space<vmem>>, vector<1x8x3xf32>
    %45 = vector.shape_cast %44 : vector<1x8x3xf32> to vector<8x3xf32>
    %cst_21 = arith.constant dense<0.000000e+00> : vector<8x1024xf32>
    %46 = tpu.matmul %45, %43, %cst_21 {dimension_numbers = #tpu.dot_dimension_numbers<[1], [0], [0], [1], [0, 0, 1, 1], [], []>} : vector<8x3xf32>, vector<3x1024xf32>, vector<8x1024xf32> -> vector<8x1024xf32>
    %47 = arith.addf %36, %46 : vector<8x1024xf32>
    %c4 = arith.constant 4 : index
    %c0_22 = arith.constant 0 : index
    %c0_23 = arith.constant 0 : index
    %48 = vector.load %arg2[%c4, %c0_22, %c0_23] : memref<9x8x3xf32, #tpu.memory_space<vmem>>, vector<1x8x3xf32>
    %49 = vector.shape_cast %48 : vector<1x8x3xf32> to vector<8x3xf32>
    %cst_24 = arith.constant dense<0.000000e+00> : vector<8x1024xf32>
    %50 = tpu.matmul %49, %8, %cst_24 {dimension_numbers = #tpu.dot_dimension_numbers<[1], [0], [0], [1], [0, 0, 1, 1], [], []>} : vector<8x3xf32>, vector<3x1024xf32>, vector<8x1024xf32> -> vector<8x1024xf32>
    %51 = arith.addf %47, %50 : vector<8x1024xf32>
    %52 = vector.extract_strided_slice %8 {offsets = [0, 1], sizes = [3, 1023], strides = [1, 1]} : vector<3x1024xf32> to vector<3x1023xf32>
    %cst_25 = arith.constant 0.000000e+00 : f32
    %53 = vector.broadcast %cst_25 : f32 to vector<3x1xf32>
    %54 = tpu.concatenate %52, %53 in 1 : vector<3x1023xf32>, vector<3x1xf32> -> vector<3x1024xf32>
    %cst_26 = arith.constant 0.000000e+00 : f32
    %55 = vector.shape_cast %6 : vector<1x1024xi1> to vector<1x1024xi1>
    %56 = vector.broadcast %55 : vector<1x1024xi1> to vector<3x1024xi1>
    %57 = vector.broadcast %cst_26 : f32 to vector<3x1024xf32>
    %58 = arith.select %56, %54, %57 : vector<3x1024xi1>, vector<3x1024xf32>
    %c5 = arith.constant 5 : index
    %c0_27 = arith.constant 0 : index
    %c0_28 = arith.constant 0 : index
    %59 = vector.load %arg2[%c5, %c0_27, %c0_28] : memref<9x8x3xf32, #tpu.memory_space<vmem>>, vector<1x8x3xf32>
    %60 = vector.shape_cast %59 : vector<1x8x3xf32> to vector<8x3xf32>
    %cst_29 = arith.constant dense<0.000000e+00> : vector<8x1024xf32>
    %61 = tpu.matmul %60, %58, %cst_29 {dimension_numbers = #tpu.dot_dimension_numbers<[1], [0], [0], [1], [0, 0, 1, 1], [], []>} : vector<8x3xf32>, vector<3x1024xf32>, vector<8x1024xf32> -> vector<8x1024xf32>
    %62 = arith.addf %51, %61 : vector<8x1024xf32>
    %63 = vector.extract_strided_slice %8 {offsets = [0, 31], sizes = [3, 993], strides = [1, 1]} : vector<3x1024xf32> to vector<3x993xf32>
    %cst_30 = arith.constant 0.000000e+00 : f32
    %64 = vector.broadcast %cst_30 : f32 to vector<3x31xf32>
    %65 = tpu.concatenate %63, %64 in 1 : vector<3x993xf32>, vector<3x31xf32> -> vector<3x1024xf32>
    %cst_31 = arith.constant 0.000000e+00 : f32
    %66 = vector.shape_cast %4 : vector<1x1024xi1> to vector<1x1024xi1>
    %67 = vector.broadcast %66 : vector<1x1024xi1> to vector<3x1024xi1>
    %68 = vector.broadcast %cst_31 : f32 to vector<3x1024xf32>
    %69 = arith.select %67, %65, %68 : vector<3x1024xi1>, vector<3x1024xf32>
    %c6 = arith.constant 6 : index
    %c0_32 = arith.constant 0 : index
    %c0_33 = arith.constant 0 : index
    %70 = vector.load %arg2[%c6, %c0_32, %c0_33] : memref<9x8x3xf32, #tpu.memory_space<vmem>>, vector<1x8x3xf32>
    %71 = vector.shape_cast %70 : vector<1x8x3xf32> to vector<8x3xf32>
    %cst_34 = arith.constant dense<0.000000e+00> : vector<8x1024xf32>
    %72 = tpu.matmul %71, %69, %cst_34 {dimension_numbers = #tpu.dot_dimension_numbers<[1], [0], [0], [1], [0, 0, 1, 1], [], []>} : vector<8x3xf32>, vector<3x1024xf32>, vector<8x1024xf32> -> vector<8x1024xf32>
    %73 = arith.addf %62, %72 : vector<8x1024xf32>
    %74 = vector.extract_strided_slice %8 {offsets = [0, 32], sizes = [3, 992], strides = [1, 1]} : vector<3x1024xf32> to vector<3x992xf32>
    %cst_35 = arith.constant 0.000000e+00 : f32
    %75 = vector.broadcast %cst_35 : f32 to vector<3x32xf32>
    %76 = tpu.concatenate %74, %75 in 1 : vector<3x992xf32>, vector<3x32xf32> -> vector<3x1024xf32>
    %c7 = arith.constant 7 : index
    %c0_36 = arith.constant 0 : index
    %c0_37 = arith.constant 0 : index
    %77 = vector.load %arg2[%c7, %c0_36, %c0_37] : memref<9x8x3xf32, #tpu.memory_space<vmem>>, vector<1x8x3xf32>
    %78 = vector.shape_cast %77 : vector<1x8x3xf32> to vector<8x3xf32>
    %cst_38 = arith.constant dense<0.000000e+00> : vector<8x1024xf32>
    %79 = tpu.matmul %78, %76, %cst_38 {dimension_numbers = #tpu.dot_dimension_numbers<[1], [0], [0], [1], [0, 0, 1, 1], [], []>} : vector<8x3xf32>, vector<3x1024xf32>, vector<8x1024xf32> -> vector<8x1024xf32>
    %80 = arith.addf %73, %79 : vector<8x1024xf32>
    %81 = vector.extract_strided_slice %8 {offsets = [0, 33], sizes = [3, 991], strides = [1, 1]} : vector<3x1024xf32> to vector<3x991xf32>
    %cst_39 = arith.constant 0.000000e+00 : f32
    %82 = vector.broadcast %cst_39 : f32 to vector<3x33xf32>
    %83 = tpu.concatenate %81, %82 in 1 : vector<3x991xf32>, vector<3x33xf32> -> vector<3x1024xf32>
    %cst_40 = arith.constant 0.000000e+00 : f32
    %84 = vector.shape_cast %6 : vector<1x1024xi1> to vector<1x1024xi1>
    %85 = vector.broadcast %84 : vector<1x1024xi1> to vector<3x1024xi1>
    %86 = vector.broadcast %cst_40 : f32 to vector<3x1024xf32>
    %87 = arith.select %85, %83, %86 : vector<3x1024xi1>, vector<3x1024xf32>
    %c8 = arith.constant 8 : index
    %c0_41 = arith.constant 0 : index
    %c0_42 = arith.constant 0 : index
    %88 = vector.load %arg2[%c8, %c0_41, %c0_42] : memref<9x8x3xf32, #tpu.memory_space<vmem>>, vector<1x8x3xf32>
    %89 = vector.shape_cast %88 : vector<1x8x3xf32> to vector<8x3xf32>
    %cst_43 = arith.constant dense<0.000000e+00> : vector<8x1024xf32>
    %90 = tpu.matmul %89, %87, %cst_43 {dimension_numbers = #tpu.dot_dimension_numbers<[1], [0], [0], [1], [0, 0, 1, 1], [], []>} : vector<8x3xf32>, vector<3x1024xf32>, vector<8x1024xf32> -> vector<8x1024xf32>
    %91 = arith.addf %80, %90 : vector<8x1024xf32>
    %c0_44 = arith.constant 0 : index
    %c0_45 = arith.constant 0 : index
    %92 = vector.load %arg3[%c0_44, %c0_45] : memref<8x1xf32, #tpu.memory_space<vmem>>, vector<8x1xf32>
    %93 = vector.broadcast %92 : vector<8x1xf32> to vector<8x1024xf32>
    %94 = arith.addf %91, %93 : vector<8x1024xf32>
    %c0_46 = arith.constant 0 : index
    %c0_47 = arith.constant 0 : index
    %c0_48 = arith.constant 0 : index
    %95 = vector.load %arg17[%c0_46, %c0_47, %c0_48] : memref<1x16x1024xf32, #tpu.memory_space<vmem>>, vector<1x8x1024xf32>
    %96 = vector.shape_cast %95 : vector<1x8x1024xf32> to vector<8x1024xf32>
    %97 = vector.shape_cast %94 : vector<8x1024xf32> to vector<1x8x1024xf32>
    tpu.vector_store %arg17[%c0_46, %c0_47, %c0_48], %97 {strides = array<i32>} : memref<1x16x1024xf32, #tpu.memory_space<vmem>>, vector<1x8x1024xf32>,
    %c0_49 = arith.constant 0 : index
    %c0_50 = arith.constant 0 : index
    %c0_51 = arith.constant 0 : index
    %98 = vector.load %arg17[%c0_49, %c0_50, %c0_51] : memref<1x16x1024xf32, #tpu.memory_space<vmem>>, vector<1x8x1024xf32>
    %99 = vector.shape_cast %98 : vector<1x8x1024xf32> to vector<8x1024xf32>
    %c0_52 = arith.constant 0 : index
    %c0_53 = arith.constant 0 : index
    %100 = vector.load %arg4[%c0_52, %c0_53] : memref<8x1xf32, #tpu.memory_space<vmem>>, vector<8x1xf32>
    %101 = vector.broadcast %100 : vector<8x1xf32> to vector<8x1024xf32>
    %102 = arith.mulf %99, %101 : vector<8x1024xf32>
    %c0_54 = arith.constant 0 : index
    %c0_55 = arith.constant 0 : index
    %103 = vector.load %arg5[%c0_54, %c0_55] : memref<8x1xf32, #tpu.memory_space<vmem>>, vector<8x1xf32>
    %104 = vector.broadcast %103 : vector<8x1xf32> to vector<8x1024xf32>
    %105 = arith.addf %102, %104 : vector<8x1024xf32>
    %cst_56 = arith.constant 0.000000e+00 : f32
    %106 = vector.broadcast %cst_56 : f32 to vector<8x1024xf32>
    %107 = arith.maximumf %105, %106 : vector<8x1024xf32>
    %cst_57 = arith.constant 0.000000e+00 : f32
    %108 = vector.broadcast %cst_57 : f32 to vector<8x33xf32>
    %109 = vector.extract_strided_slice %107 {offsets = [0, 0], sizes = [8, 991], strides = [1, 1]} : vector<8x1024xf32> to vector<8x991xf32>
    %110 = tpu.concatenate %108, %109 in 1 : vector<8x33xf32>, vector<8x991xf32> -> vector<8x1024xf32>
    %cst_58 = arith.constant 0.000000e+00 : f32
    %111 = vector.shape_cast %4 : vector<1x1024xi1> to vector<1x1024xi1>
    %112 = vector.broadcast %111 : vector<1x1024xi1> to vector<8x1024xi1>
    %113 = vector.broadcast %cst_58 : f32 to vector<8x1024xf32>
    %114 = arith.select %112, %110, %113 : vector<8x1024xi1>, vector<8x1024xf32>
    %c0_59 = arith.constant 0 : index
    %c0_60 = arith.constant 0 : index
    %c0_61 = arith.constant 0 : index
    %115 = vector.load %arg6[%c0_59, %c0_60, %c0_61] : memref<9x4x8xf32, #tpu.memory_space<vmem>>, vector<1x4x8xf32>
    %116 = vector.shape_cast %115 : vector<1x4x8xf32> to vector<4x8xf32>
    %cst_62 = arith.constant dense<0.000000e+00> : vector<4x1024xf32>
    %117 = tpu.matmul %116, %114, %cst_62 {dimension_numbers = #tpu.dot_dimension_numbers<[1], [0], [0], [1], [0, 0, 1, 1], [], []>} : vector<4x8xf32>, vector<8x1024xf32>, vector<4x1024xf32> -> vector<4x1024xf32>
    %cst_63 = arith.constant 0.000000e+00 : f32
    %118 = vector.broadcast %cst_63 : f32 to vector<8x32xf32>
    %119 = vector.extract_strided_slice %107 {offsets = [0, 0], sizes = [8, 992], strides = [1, 1]} : vector<8x1024xf32> to vector<8x992xf32>
    %120 = tpu.concatenate %118, %119 in 1 : vector<8x32xf32>, vector<8x992xf32> -> vector<8x1024xf32>
    %c1_64 = arith.constant 1 : index
    %c0_65 = arith.constant 0 : index
    %c0_66 = arith.constant 0 : index
    %121 = vector.load %arg6[%c1_64, %c0_65, %c0_66] : memref<9x4x8xf32, #tpu.memory_space<vmem>>, vector<1x4x8xf32>
    %122 = vector.shape_cast %121 : vector<1x4x8xf32> to vector<4x8xf32>
    %cst_67 = arith.constant dense<0.000000e+00> : vector<4x1024xf32>
    %123 = tpu.matmul %122, %120, %cst_67 {dimension_numbers = #tpu.dot_dimension_numbers<[1], [0], [0], [1], [0, 0, 1, 1], [], []>} : vector<4x8xf32>, vector<8x1024xf32>, vector<4x1024xf32> -> vector<4x1024xf32>
    %124 = arith.addf %117, %123 : vector<4x1024xf32>
    %cst_68 = arith.constant 0.000000e+00 : f32
    %125 = vector.broadcast %cst_68 : f32 to vector<8x31xf32>
    %126 = vector.extract_strided_slice %107 {offsets = [0, 0], sizes = [8, 993], strides = [1, 1]} : vector<8x1024xf32> to vector<8x993xf32>
    %127 = tpu.concatenate %125, %126 in 1 : vector<8x31xf32>, vector<8x993xf32> -> vector<8x1024xf32>
    %cst_69 = arith.constant 0.000000e+00 : f32
    %128 = vector.shape_cast %6 : vector<1x1024xi1> to vector<1x1024xi1>
    %129 = vector.broadcast %128 : vector<1x1024xi1> to vector<8x1024xi1>
    %130 = vector.broadcast %cst_69 : f32 to vector<8x1024xf32>
    %131 = arith.select %129, %127, %130 : vector<8x1024xi1>, vector<8x1024xf32>
    %c2_70 = arith.constant 2 : index
    %c0_71 = arith.constant 0 : index
    %c0_72 = arith.constant 0 : index
    %132 = vector.load %arg6[%c2_70, %c0_71, %c0_72] : memref<9x4x8xf32, #tpu.memory_space<vmem>>, vector<1x4x8xf32>
    %133 = vector.shape_cast %132 : vector<1x4x8xf32> to vector<4x8xf32>
    %cst_73 = arith.constant dense<0.000000e+00> : vector<4x1024xf32>
    %134 = tpu.matmul %133, %131, %cst_73 {dimension_numbers = #tpu.dot_dimension_numbers<[1], [0], [0], [1], [0, 0, 1, 1], [], []>} : vector<4x8xf32>, vector<8x1024xf32>, vector<4x1024xf32> -> vector<4x1024xf32>
    %135 = arith.addf %124, %134 : vector<4x1024xf32>
    %cst_74 = arith.constant 0.000000e+00 : f32
    %136 = vector.broadcast %cst_74 : f32 to vector<8x1xf32>
    %137 = vector.extract_strided_slice %107 {offsets = [0, 0], sizes = [8, 1023], strides = [1, 1]} : vector<8x1024xf32> to vector<8x1023xf32>
    %138 = tpu.concatenate %136, %137 in 1 : vector<8x1xf32>, vector<8x1023xf32> -> vector<8x1024xf32>
    %cst_75 = arith.constant 0.000000e+00 : f32
    %139 = vector.shape_cast %4 : vector<1x1024xi1> to vector<1x1024xi1>
    %140 = vector.broadcast %139 : vector<1x1024xi1> to vector<8x1024xi1>
    %141 = vector.broadcast %cst_75 : f32 to vector<8x1024xf32>
    %142 = arith.select %140, %138, %141 : vector<8x1024xi1>, vector<8x1024xf32>
    %c3_76 = arith.constant 3 : index
    %c0_77 = arith.constant 0 : index
    %c0_78 = arith.constant 0 : index
    %143 = vector.load %arg6[%c3_76, %c0_77, %c0_78] : memref<9x4x8xf32, #tpu.memory_space<vmem>>, vector<1x4x8xf32>
    %144 = vector.shape_cast %143 : vector<1x4x8xf32> to vector<4x8xf32>
    %cst_79 = arith.constant dense<0.000000e+00> : vector<4x1024xf32>
    %145 = tpu.matmul %144, %142, %cst_79 {dimension_numbers = #tpu.dot_dimension_numbers<[1], [0], [0], [1], [0, 0, 1, 1], [], []>} : vector<4x8xf32>, vector<8x1024xf32>, vector<4x1024xf32> -> vector<4x1024xf32>
    %146 = arith.addf %135, %145 : vector<4x1024xf32>
    %c4_80 = arith.constant 4 : index
    %c0_81 = arith.constant 0 : index
    %c0_82 = arith.constant 0 : index
    %147 = vector.load %arg6[%c4_80, %c0_81, %c0_82] : memref<9x4x8xf32, #tpu.memory_space<vmem>>, vector<1x4x8xf32>
    %148 = vector.shape_cast %147 : vector<1x4x8xf32> to vector<4x8xf32>
    %cst_83 = arith.constant dense<0.000000e+00> : vector<4x1024xf32>
    %149 = tpu.matmul %148, %107, %cst_83 {dimension_numbers = #tpu.dot_dimension_numbers<[1], [0], [0], [1], [0, 0, 1, 1], [], []>} : vector<4x8xf32>, vector<8x1024xf32>, vector<4x1024xf32> -> vector<4x1024xf32>
    %150 = arith.addf %146, %149 : vector<4x1024xf32>
    %151 = vector.extract_strided_slice %107 {offsets = [0, 1], sizes = [8, 1023], strides = [1, 1]} : vector<8x1024xf32> to vector<8x1023xf32>
    %cst_84 = arith.constant 0.000000e+00 : f32
    %152 = vector.broadcast %cst_84 : f32 to vector<8x1xf32>
    %153 = tpu.concatenate %151, %152 in 1 : vector<8x1023xf32>, vector<8x1xf32> -> vector<8x1024xf32>
    %cst_85 = arith.constant 0.000000e+00 : f32
    %154 = vector.shape_cast %6 : vector<1x1024xi1> to vector<1x1024xi1>
    %155 = vector.broadcast %154 : vector<1x1024xi1> to vector<8x1024xi1>
    %156 = vector.broadcast %cst_85 : f32 to vector<8x1024xf32>
    %157 = arith.select %155, %153, %156 : vector<8x1024xi1>, vector<8x1024xf32>
    %c5_86 = arith.constant 5 : index
    %c0_87 = arith.constant 0 : index
    %c0_88 = arith.constant 0 : index
    %158 = vector.load %arg6[%c5_86, %c0_87, %c0_88] : memref<9x4x8xf32, #tpu.memory_space<vmem>>, vector<1x4x8xf32>
    %159 = vector.shape_cast %158 : vector<1x4x8xf32> to vector<4x8xf32>
    %cst_89 = arith.constant dense<0.000000e+00> : vector<4x1024xf32>
    %160 = tpu.matmul %159, %157, %cst_89 {dimension_numbers = #tpu.dot_dimension_numbers<[1], [0], [0], [1], [0, 0, 1, 1], [], []>} : vector<4x8xf32>, vector<8x1024xf32>, vector<4x1024xf32> -> vector<4x1024xf32>
    %161 = arith.addf %150, %160 : vector<4x1024xf32>
    %162 = vector.extract_strided_slice %107 {offsets = [0, 31], sizes = [8, 993], strides = [1, 1]} : vector<8x1024xf32> to vector<8x993xf32>
    %cst_90 = arith.constant 0.000000e+00 : f32
    %163 = vector.broadcast %cst_90 : f32 to vector<8x31xf32>
    %164 = tpu.concatenate %162, %163 in 1 : vector<8x993xf32>, vector<8x31xf32> -> vector<8x1024xf32>
    %cst_91 = arith.constant 0.000000e+00 : f32
    %165 = vector.shape_cast %4 : vector<1x1024xi1> to vector<1x1024xi1>
    %166 = vector.broadcast %165 : vector<1x1024xi1> to vector<8x1024xi1>
    %167 = vector.broadcast %cst_91 : f32 to vector<8x1024xf32>
    %168 = arith.select %166, %164, %167 : vector<8x1024xi1>, vector<8x1024xf32>
    %c6_92 = arith.constant 6 : index
    %c0_93 = arith.constant 0 : index
    %c0_94 = arith.constant 0 : index
    %169 = vector.load %arg6[%c6_92, %c0_93, %c0_94] : memref<9x4x8xf32, #tpu.memory_space<vmem>>, vector<1x4x8xf32>
    %170 = vector.shape_cast %169 : vector<1x4x8xf32> to vector<4x8xf32>
    %cst_95 = arith.constant dense<0.000000e+00> : vector<4x1024xf32>
    %171 = tpu.matmul %170, %168, %cst_95 {dimension_numbers = #tpu.dot_dimension_numbers<[1], [0], [0], [1], [0, 0, 1, 1], [], []>} : vector<4x8xf32>, vector<8x1024xf32>, vector<4x1024xf32> -> vector<4x1024xf32>
    %172 = arith.addf %161, %171 : vector<4x1024xf32>
    %173 = vector.extract_strided_slice %107 {offsets = [0, 32], sizes = [8, 992], strides = [1, 1]} : vector<8x1024xf32> to vector<8x992xf32>
    %cst_96 = arith.constant 0.000000e+00 : f32
    %174 = vector.broadcast %cst_96 : f32 to vector<8x32xf32>
    %175 = tpu.concatenate %173, %174 in 1 : vector<8x992xf32>, vector<8x32xf32> -> vector<8x1024xf32>
    %c7_97 = arith.constant 7 : index
    %c0_98 = arith.constant 0 : index
    %c0_99 = arith.constant 0 : index
    %176 = vector.load %arg6[%c7_97, %c0_98, %c0_99] : memref<9x4x8xf32, #tpu.memory_space<vmem>>, vector<1x4x8xf32>
    %177 = vector.shape_cast %176 : vector<1x4x8xf32> to vector<4x8xf32>
    %cst_100 = arith.constant dense<0.000000e+00> : vector<4x1024xf32>
    %178 = tpu.matmul %177, %175, %cst_100 {dimension_numbers = #tpu.dot_dimension_numbers<[1], [0], [0], [1], [0, 0, 1, 1], [], []>} : vector<4x8xf32>, vector<8x1024xf32>, vector<4x1024xf32> -> vector<4x1024xf32>
    %179 = arith.addf %172, %178 : vector<4x1024xf32>
    %180 = vector.extract_strided_slice %107 {offsets = [0, 33], sizes = [8, 991], strides = [1, 1]} : vector<8x1024xf32> to vector<8x991xf32>
    %cst_101 = arith.constant 0.000000e+00 : f32
    %181 = vector.broadcast %cst_101 : f32 to vector<8x33xf32>
    %182 = tpu.concatenate %180, %181 in 1 : vector<8x991xf32>, vector<8x33xf32> -> vector<8x1024xf32>
    %cst_102 = arith.constant 0.000000e+00 : f32
    %183 = vector.shape_cast %6 : vector<1x1024xi1> to vector<1x1024xi1>
    %184 = vector.broadcast %183 : vector<1x1024xi1> to vector<8x1024xi1>
    %185 = vector.broadcast %cst_102 : f32 to vector<8x1024xf32>
    %186 = arith.select %184, %182, %185 : vector<8x1024xi1>, vector<8x1024xf32>
    %c8_103 = arith.constant 8 : index
    %c0_104 = arith.constant 0 : index
    %c0_105 = arith.constant 0 : index
    %187 = vector.load %arg6[%c8_103, %c0_104, %c0_105] : memref<9x4x8xf32, #tpu.memory_space<vmem>>, vector<1x4x8xf32>
    %188 = vector.shape_cast %187 : vector<1x4x8xf32> to vector<4x8xf32>
    %cst_106 = arith.constant dense<0.000000e+00> : vector<4x1024xf32>
    %189 = tpu.matmul %188, %186, %cst_106 {dimension_numbers = #tpu.dot_dimension_numbers<[1], [0], [0], [1], [0, 0, 1, 1], [], []>} : vector<4x8xf32>, vector<8x1024xf32>, vector<4x1024xf32> -> vector<4x1024xf32>
    %190 = arith.addf %179, %189 : vector<4x1024xf32>
    %c0_107 = arith.constant 0 : index
    %c0_108 = arith.constant 0 : index
    %191 = vector.load %arg7[%c0_107, %c0_108] : memref<4x1xf32, #tpu.memory_space<vmem>>, vector<4x1xf32>
    %192 = vector.broadcast %191 : vector<4x1xf32> to vector<4x1024xf32>
    %193 = arith.addf %190, %192 : vector<4x1024xf32>
    %c0_109 = arith.constant 0 : index
    %c8_110 = arith.constant 8 : index
    %c0_111 = arith.constant 0 : index
    %194 = vector.load %arg17[%c0_109, %c8_110, %c0_111] : memref<1x16x1024xf32, #tpu.memory_space<vmem>>, vector<1x4x1024xf32>
    %195 = vector.shape_cast %194 : vector<1x4x1024xf32> to vector<4x1024xf32>
    %196 = vector.shape_cast %193 : vector<4x1024xf32> to vector<1x4x1024xf32>
    tpu.vector_store %arg17[%c0_109, %c8_110, %c0_111], %196 {strides = array<i32>} : memref<1x16x1024xf32, #tpu.memory_space<vmem>>, vector<1x4x1024xf32>,
    %c0_112 = arith.constant 0 : index
    %c0_113 = arith.constant 0 : index
    %c0_114 = arith.constant 0 : index
    %197 = vector.load %arg17[%c0_112, %c0_113, %c0_114] : memref<1x16x1024xf32, #tpu.memory_space<vmem>>, vector<1x12x1024xf32>
    %198 = vector.shape_cast %197 : vector<1x12x1024xf32> to vector<12x1024xf32>
    %c0_115 = arith.constant 0 : index
    %c0_116 = arith.constant 0 : index
    %199 = vector.load %arg8[%c0_115, %c0_116] : memref<12x1xf32, #tpu.memory_space<vmem>>, vector<12x1xf32>
    %200 = vector.broadcast %199 : vector<12x1xf32> to vector<12x1024xf32>
    %201 = arith.mulf %198, %200 : vector<12x1024xf32>
    %c0_117 = arith.constant 0 : index
    %c0_118 = arith.constant 0 : index
    %202 = vector.load %arg9[%c0_117, %c0_118] : memref<12x1xf32, #tpu.memory_space<vmem>>, vector<12x1xf32>
    %203 = vector.broadcast %202 : vector<12x1xf32> to vector<12x1024xf32>
    %204 = arith.addf %201, %203 : vector<12x1024xf32>
    %cst_119 = arith.constant 0.000000e+00 : f32
    %205 = vector.broadcast %cst_119 : f32 to vector<12x1024xf32>
    %206 = arith.maximumf %204, %205 : vector<12x1024xf32>
    %cst_120 = arith.constant 0.000000e+00 : f32
    %207 = vector.broadcast %cst_120 : f32 to vector<12x33xf32>
    %208 = vector.extract_strided_slice %206 {offsets = [0, 0], sizes = [12, 991], strides = [1, 1]} : vector<12x1024xf32> to vector<12x991xf32>
    %209 = tpu.concatenate %207, %208 in 1 : vector<12x33xf32>, vector<12x991xf32> -> vector<12x1024xf32>
    %cst_121 = arith.constant 0.000000e+00 : f32
    %210 = vector.shape_cast %4 : vector<1x1024xi1> to vector<1x1024xi1>
    %211 = vector.broadcast %210 : vector<1x1024xi1> to vector<12x1024xi1>
    %212 = vector.broadcast %cst_121 : f32 to vector<12x1024xf32>
    %213 = arith.select %211, %209, %212 : vector<12x1024xi1>, vector<12x1024xf32>
    %c0_122 = arith.constant 0 : index
    %c0_123 = arith.constant 0 : index
    %c0_124 = arith.constant 0 : index
    %214 = vector.load %arg10[%c0_122, %c0_123, %c0_124] : memref<9x4x12xf32, #tpu.memory_space<vmem>>, vector<1x4x12xf32>
    %215 = vector.shape_cast %214 : vector<1x4x12xf32> to vector<4x12xf32>
    %cst_125 = arith.constant dense<0.000000e+00> : vector<4x1024xf32>
    %216 = tpu.matmul %215, %213, %cst_125 {dimension_numbers = #tpu.dot_dimension_numbers<[1], [0], [0], [1], [0, 0, 1, 1], [], []>} : vector<4x12xf32>, vector<12x1024xf32>, vector<4x1024xf32> -> vector<4x1024xf32>
    %cst_126 = arith.constant 0.000000e+00 : f32
    %217 = vector.broadcast %cst_126 : f32 to vector<12x32xf32>
    %218 = vector.extract_strided_slice %206 {offsets = [0, 0], sizes = [12, 992], strides = [1, 1]} : vector<12x1024xf32> to vector<12x992xf32>
    %219 = tpu.concatenate %217, %218 in 1 : vector<12x32xf32>, vector<12x992xf32> -> vector<12x1024xf32>
    %c1_127 = arith.constant 1 : index
    %c0_128 = arith.constant 0 : index
    %c0_129 = arith.constant 0 : index
    %220 = vector.load %arg10[%c1_127, %c0_128, %c0_129] : memref<9x4x12xf32, #tpu.memory_space<vmem>>, vector<1x4x12xf32>
    %221 = vector.shape_cast %220 : vector<1x4x12xf32> to vector<4x12xf32>
    %cst_130 = arith.constant dense<0.000000e+00> : vector<4x1024xf32>
    %222 = tpu.matmul %221, %219, %cst_130 {dimension_numbers = #tpu.dot_dimension_numbers<[1], [0], [0], [1], [0, 0, 1, 1], [], []>} : vector<4x12xf32>, vector<12x1024xf32>, vector<4x1024xf32> -> vector<4x1024xf32>
    %223 = arith.addf %216, %222 : vector<4x1024xf32>
    %cst_131 = arith.constant 0.000000e+00 : f32
    %224 = vector.broadcast %cst_131 : f32 to vector<12x31xf32>
    %225 = vector.extract_strided_slice %206 {offsets = [0, 0], sizes = [12, 993], strides = [1, 1]} : vector<12x1024xf32> to vector<12x993xf32>
    %226 = tpu.concatenate %224, %225 in 1 : vector<12x31xf32>, vector<12x993xf32> -> vector<12x1024xf32>
    %cst_132 = arith.constant 0.000000e+00 : f32
    %227 = vector.shape_cast %6 : vector<1x1024xi1> to vector<1x1024xi1>
    %228 = vector.broadcast %227 : vector<1x1024xi1> to vector<12x1024xi1>
    %229 = vector.broadcast %cst_132 : f32 to vector<12x1024xf32>
    %230 = arith.select %228, %226, %229 : vector<12x1024xi1>, vector<12x1024xf32>
    %c2_133 = arith.constant 2 : index
    %c0_134 = arith.constant 0 : index
    %c0_135 = arith.constant 0 : index
    %231 = vector.load %arg10[%c2_133, %c0_134, %c0_135] : memref<9x4x12xf32, #tpu.memory_space<vmem>>, vector<1x4x12xf32>
    %232 = vector.shape_cast %231 : vector<1x4x12xf32> to vector<4x12xf32>
    %cst_136 = arith.constant dense<0.000000e+00> : vector<4x1024xf32>
    %233 = tpu.matmul %232, %230, %cst_136 {dimension_numbers = #tpu.dot_dimension_numbers<[1], [0], [0], [1], [0, 0, 1, 1], [], []>} : vector<4x12xf32>, vector<12x1024xf32>, vector<4x1024xf32> -> vector<4x1024xf32>
    %234 = arith.addf %223, %233 : vector<4x1024xf32>
    %cst_137 = arith.constant 0.000000e+00 : f32
    %235 = vector.broadcast %cst_137 : f32 to vector<12x1xf32>
    %236 = vector.extract_strided_slice %206 {offsets = [0, 0], sizes = [12, 1023], strides = [1, 1]} : vector<12x1024xf32> to vector<12x1023xf32>
    %237 = tpu.concatenate %235, %236 in 1 : vector<12x1xf32>, vector<12x1023xf32> -> vector<12x1024xf32>
    %cst_138 = arith.constant 0.000000e+00 : f32
    %238 = vector.shape_cast %4 : vector<1x1024xi1> to vector<1x1024xi1>
    %239 = vector.broadcast %238 : vector<1x1024xi1> to vector<12x1024xi1>
    %240 = vector.broadcast %cst_138 : f32 to vector<12x1024xf32>
    %241 = arith.select %239, %237, %240 : vector<12x1024xi1>, vector<12x1024xf32>
    %c3_139 = arith.constant 3 : index
    %c0_140 = arith.constant 0 : index
    %c0_141 = arith.constant 0 : index
    %242 = vector.load %arg10[%c3_139, %c0_140, %c0_141] : memref<9x4x12xf32, #tpu.memory_space<vmem>>, vector<1x4x12xf32>
    %243 = vector.shape_cast %242 : vector<1x4x12xf32> to vector<4x12xf32>
    %cst_142 = arith.constant dense<0.000000e+00> : vector<4x1024xf32>
    %244 = tpu.matmul %243, %241, %cst_142 {dimension_numbers = #tpu.dot_dimension_numbers<[1], [0], [0], [1], [0, 0, 1, 1], [], []>} : vector<4x12xf32>, vector<12x1024xf32>, vector<4x1024xf32> -> vector<4x1024xf32>
    %245 = arith.addf %234, %244 : vector<4x1024xf32>
    %c4_143 = arith.constant 4 : index
    %c0_144 = arith.constant 0 : index
    %c0_145 = arith.constant 0 : index
    %246 = vector.load %arg10[%c4_143, %c0_144, %c0_145] : memref<9x4x12xf32, #tpu.memory_space<vmem>>, vector<1x4x12xf32>
    %247 = vector.shape_cast %246 : vector<1x4x12xf32> to vector<4x12xf32>
    %cst_146 = arith.constant dense<0.000000e+00> : vector<4x1024xf32>
    %248 = tpu.matmul %247, %206, %cst_146 {dimension_numbers = #tpu.dot_dimension_numbers<[1], [0], [0], [1], [0, 0, 1, 1], [], []>} : vector<4x12xf32>, vector<12x1024xf32>, vector<4x1024xf32> -> vector<4x1024xf32>
    %249 = arith.addf %245, %248 : vector<4x1024xf32>
    %250 = vector.extract_strided_slice %206 {offsets = [0, 1], sizes = [12, 1023], strides = [1, 1]} : vector<12x1024xf32> to vector<12x1023xf32>
    %cst_147 = arith.constant 0.000000e+00 : f32
    %251 = vector.broadcast %cst_147 : f32 to vector<12x1xf32>
    %252 = tpu.concatenate %250, %251 in 1 : vector<12x1023xf32>, vector<12x1xf32> -> vector<12x1024xf32>
    %cst_148 = arith.constant 0.000000e+00 : f32
    %253 = vector.shape_cast %6 : vector<1x1024xi1> to vector<1x1024xi1>
    %254 = vector.broadcast %253 : vector<1x1024xi1> to vector<12x1024xi1>
    %255 = vector.broadcast %cst_148 : f32 to vector<12x1024xf32>
    %256 = arith.select %254, %252, %255 : vector<12x1024xi1>, vector<12x1024xf32>
    %c5_149 = arith.constant 5 : index
    %c0_150 = arith.constant 0 : index
    %c0_151 = arith.constant 0 : index
    %257 = vector.load %arg10[%c5_149, %c0_150, %c0_151] : memref<9x4x12xf32, #tpu.memory_space<vmem>>, vector<1x4x12xf32>
    %258 = vector.shape_cast %257 : vector<1x4x12xf32> to vector<4x12xf32>
    %cst_152 = arith.constant dense<0.000000e+00> : vector<4x1024xf32>
    %259 = tpu.matmul %258, %256, %cst_152 {dimension_numbers = #tpu.dot_dimension_numbers<[1], [0], [0], [1], [0, 0, 1, 1], [], []>} : vector<4x12xf32>, vector<12x1024xf32>, vector<4x1024xf32> -> vector<4x1024xf32>
    %260 = arith.addf %249, %259 : vector<4x1024xf32>
    %261 = vector.extract_strided_slice %206 {offsets = [0, 31], sizes = [12, 993], strides = [1, 1]} : vector<12x1024xf32> to vector<12x993xf32>
    %cst_153 = arith.constant 0.000000e+00 : f32
    %262 = vector.broadcast %cst_153 : f32 to vector<12x31xf32>
    %263 = tpu.concatenate %261, %262 in 1 : vector<12x993xf32>, vector<12x31xf32> -> vector<12x1024xf32>
    %cst_154 = arith.constant 0.000000e+00 : f32
    %264 = vector.shape_cast %4 : vector<1x1024xi1> to vector<1x1024xi1>
    %265 = vector.broadcast %264 : vector<1x1024xi1> to vector<12x1024xi1>
    %266 = vector.broadcast %cst_154 : f32 to vector<12x1024xf32>
    %267 = arith.select %265, %263, %266 : vector<12x1024xi1>, vector<12x1024xf32>
    %c6_155 = arith.constant 6 : index
    %c0_156 = arith.constant 0 : index
    %c0_157 = arith.constant 0 : index
    %268 = vector.load %arg10[%c6_155, %c0_156, %c0_157] : memref<9x4x12xf32, #tpu.memory_space<vmem>>, vector<1x4x12xf32>
    %269 = vector.shape_cast %268 : vector<1x4x12xf32> to vector<4x12xf32>
    %cst_158 = arith.constant dense<0.000000e+00> : vector<4x1024xf32>
    %270 = tpu.matmul %269, %267, %cst_158 {dimension_numbers = #tpu.dot_dimension_numbers<[1], [0], [0], [1], [0, 0, 1, 1], [], []>} : vector<4x12xf32>, vector<12x1024xf32>, vector<4x1024xf32> -> vector<4x1024xf32>
    %271 = arith.addf %260, %270 : vector<4x1024xf32>
    %272 = vector.extract_strided_slice %206 {offsets = [0, 32], sizes = [12, 992], strides = [1, 1]} : vector<12x1024xf32> to vector<12x992xf32>
    %cst_159 = arith.constant 0.000000e+00 : f32
    %273 = vector.broadcast %cst_159 : f32 to vector<12x32xf32>
    %274 = tpu.concatenate %272, %273 in 1 : vector<12x992xf32>, vector<12x32xf32> -> vector<12x1024xf32>
    %c7_160 = arith.constant 7 : index
    %c0_161 = arith.constant 0 : index
    %c0_162 = arith.constant 0 : index
    %275 = vector.load %arg10[%c7_160, %c0_161, %c0_162] : memref<9x4x12xf32, #tpu.memory_space<vmem>>, vector<1x4x12xf32>
    %276 = vector.shape_cast %275 : vector<1x4x12xf32> to vector<4x12xf32>
    %cst_163 = arith.constant dense<0.000000e+00> : vector<4x1024xf32>
    %277 = tpu.matmul %276, %274, %cst_163 {dimension_numbers = #tpu.dot_dimension_numbers<[1], [0], [0], [1], [0, 0, 1, 1], [], []>} : vector<4x12xf32>, vector<12x1024xf32>, vector<4x1024xf32> -> vector<4x1024xf32>
    %278 = arith.addf %271, %277 : vector<4x1024xf32>
    %279 = vector.extract_strided_slice %206 {offsets = [0, 33], sizes = [12, 991], strides = [1, 1]} : vector<12x1024xf32> to vector<12x991xf32>
    %cst_164 = arith.constant 0.000000e+00 : f32
    %280 = vector.broadcast %cst_164 : f32 to vector<12x33xf32>
    %281 = tpu.concatenate %279, %280 in 1 : vector<12x991xf32>, vector<12x33xf32> -> vector<12x1024xf32>
    %cst_165 = arith.constant 0.000000e+00 : f32
    %282 = vector.shape_cast %6 : vector<1x1024xi1> to vector<1x1024xi1>
    %283 = vector.broadcast %282 : vector<1x1024xi1> to vector<12x1024xi1>
    %284 = vector.broadcast %cst_165 : f32 to vector<12x1024xf32>
    %285 = arith.select %283, %281, %284 : vector<12x1024xi1>, vector<12x1024xf32>
    %c8_166 = arith.constant 8 : index
    %c0_167 = arith.constant 0 : index
    %c0_168 = arith.constant 0 : index
    %286 = vector.load %arg10[%c8_166, %c0_167, %c0_168] : memref<9x4x12xf32, #tpu.memory_space<vmem>>, vector<1x4x12xf32>
    %287 = vector.shape_cast %286 : vector<1x4x12xf32> to vector<4x12xf32>
    %cst_169 = arith.constant dense<0.000000e+00> : vector<4x1024xf32>
    %288 = tpu.matmul %287, %285, %cst_169 {dimension_numbers = #tpu.dot_dimension_numbers<[1], [0], [0], [1], [0, 0, 1, 1], [], []>} : vector<4x12xf32>, vector<12x1024xf32>, vector<4x1024xf32> -> vector<4x1024xf32>
    %289 = arith.addf %278, %288 : vector<4x1024xf32>
    %c0_170 = arith.constant 0 : index
    %c0_171 = arith.constant 0 : index
    %290 = vector.load %arg11[%c0_170, %c0_171] : memref<4x1xf32, #tpu.memory_space<vmem>>, vector<4x1xf32>
    %291 = vector.broadcast %290 : vector<4x1xf32> to vector<4x1024xf32>
    %292 = arith.addf %289, %291 : vector<4x1024xf32>
    %c0_172 = arith.constant 0 : index
    %c12 = arith.constant 12 : index
    %c0_173 = arith.constant 0 : index
    %293 = vector.load %arg17[%c0_172, %c12, %c0_173] : memref<1x16x1024xf32, #tpu.memory_space<vmem>>, vector<1x4x1024xf32>
    %294 = vector.shape_cast %293 : vector<1x4x1024xf32> to vector<4x1024xf32>
    %295 = vector.shape_cast %292 : vector<4x1024xf32> to vector<1x4x1024xf32>
    tpu.vector_store %arg17[%c0_172, %c12, %c0_173], %295 {strides = array<i32>} : memref<1x16x1024xf32, #tpu.memory_space<vmem>>, vector<1x4x1024xf32>,
    %c0_174 = arith.constant 0 : index
    %c0_175 = arith.constant 0 : index
    %c0_176 = arith.constant 0 : index
    %296 = vector.load %arg17[%c0_174, %c0_175, %c0_176] : memref<1x16x1024xf32, #tpu.memory_space<vmem>>, vector<1x16x1024xf32>
    %297 = vector.shape_cast %296 : vector<1x16x1024xf32> to vector<16x1024xf32>
    %c0_177 = arith.constant 0 : index
    %c0_178 = arith.constant 0 : index
    %298 = vector.load %arg12[%c0_177, %c0_178] : memref<16x1xf32, #tpu.memory_space<vmem>>, vector<16x1xf32>
    %299 = vector.broadcast %298 : vector<16x1xf32> to vector<16x1024xf32>
    %300 = arith.mulf %297, %299 : vector<16x1024xf32>
    %c0_179 = arith.constant 0 : index
    %c0_180 = arith.constant 0 : index
    %301 = vector.load %arg13[%c0_179, %c0_180] : memref<16x1xf32, #tpu.memory_space<vmem>>, vector<16x1xf32>
    %302 = vector.broadcast %301 : vector<16x1xf32> to vector<16x1024xf32>
    %303 = arith.addf %300, %302 : vector<16x1024xf32>
    %cst_181 = arith.constant 0.000000e+00 : f32
    %304 = vector.broadcast %cst_181 : f32 to vector<16x1024xf32>
    %305 = arith.maximumf %303, %304 : vector<16x1024xf32>
    %c0_182 = arith.constant 0 : index
    %c0_183 = arith.constant 0 : index
    %306 = vector.load %arg14[%c0_182, %c0_183] : memref<16x16xf32, #tpu.memory_space<vmem>>, vector<16x16xf32>
    %cst_184 = arith.constant dense<0.000000e+00> : vector<16x1024xf32>
    %307 = tpu.matmul %306, %305, %cst_184 {dimension_numbers = #tpu.dot_dimension_numbers<[1], [0], [0], [1], [0, 0, 1, 1], [], []>} : vector<16x16xf32>, vector<16x1024xf32>, vector<16x1024xf32> -> vector<16x1024xf32>
    %c0_185 = arith.constant 0 : index
    %c0_186 = arith.constant 0 : index
    %308 = vector.load %arg15[%c0_185, %c0_186] : memref<16x1xf32, #tpu.memory_space<vmem>>, vector<16x1xf32>
    %309 = vector.broadcast %308 : vector<16x1xf32> to vector<16x1024xf32>
    %310 = arith.addf %307, %309 : vector<16x1024xf32>
    %311 = vector.extract_strided_slice %310 {offsets = [0, 1], sizes = [16, 1023], strides = [1, 1]} : vector<16x1024xf32> to vector<16x1023xf32>
    %cst_187 = arith.constant 0.000000e+00 : f32
    %312 = vector.broadcast %cst_187 : f32 to vector<16x1xf32>
    %313 = tpu.concatenate %311, %312 in 1 : vector<16x1023xf32>, vector<16x1xf32> -> vector<16x1024xf32>
    %cst_188 = arith.constant 0.000000e+00 : f32
    %314 = vector.shape_cast %6 : vector<1x1024xi1> to vector<1x1024xi1>
    %315 = vector.broadcast %314 : vector<1x1024xi1> to vector<16x1024xi1>
    %316 = vector.broadcast %cst_188 : f32 to vector<16x1024xf32>
    %317 = arith.select %315, %313, %316 : vector<16x1024xi1>, vector<16x1024xf32>
    %318 = arith.maximumf %310, %317 : vector<16x1024xf32>
    %319 = vector.extract_strided_slice %310 {offsets = [0, 32], sizes = [16, 992], strides = [1, 1]} : vector<16x1024xf32> to vector<16x992xf32>
    %cst_189 = arith.constant 0.000000e+00 : f32
    %320 = vector.broadcast %cst_189 : f32 to vector<16x32xf32>
    %321 = tpu.concatenate %319, %320 in 1 : vector<16x992xf32>, vector<16x32xf32> -> vector<16x1024xf32>
    %322 = vector.extract_strided_slice %310 {offsets = [0, 33], sizes = [16, 991], strides = [1, 1]} : vector<16x1024xf32> to vector<16x991xf32>
    %cst_190 = arith.constant 0.000000e+00 : f32
    %323 = vector.broadcast %cst_190 : f32 to vector<16x33xf32>
    %324 = tpu.concatenate %322, %323 in 1 : vector<16x991xf32>, vector<16x33xf32> -> vector<16x1024xf32>
    %cst_191 = arith.constant 0.000000e+00 : f32
    %325 = vector.shape_cast %6 : vector<1x1024xi1> to vector<1x1024xi1>
    %326 = vector.broadcast %325 : vector<1x1024xi1> to vector<16x1024xi1>
    %327 = vector.broadcast %cst_191 : f32 to vector<16x1024xf32>
    %328 = arith.select %326, %324, %327 : vector<16x1024xi1>, vector<16x1024xf32>
    %329 = arith.maximumf %321, %328 : vector<16x1024xf32>
    %330 = arith.maximumf %318, %329 : vector<16x1024xf32>
    %c0_192 = arith.constant 0 : index
    %c0_193 = arith.constant 0 : index
    %331 = vector.load %arg16[%c0_192, %c0_193] : memref<1024x256xf32, #tpu.memory_space<vmem>>, vector<1024x256xf32>
    %cst_194 = arith.constant dense<0.000000e+00> : vector<16x256xf32>
    %332 = tpu.matmul %330, %331, %cst_194 {dimension_numbers = #tpu.dot_dimension_numbers<[1], [0], [0], [1], [0, 0, 1, 1], [], []>} : vector<16x1024xf32>, vector<1024x256xf32>, vector<16x256xf32> -> vector<16x256xf32>
    %c0_195 = arith.constant 0 : index
    %c0_196 = arith.constant 0 : index
    %c0_197 = arith.constant 0 : index
    %333 = vector.load %arg18[%c0_195, %c0_196, %c0_197] : memref<1x16x256xf32, #tpu.memory_space<vmem>>, vector<1x16x256xf32>
    %334 = vector.shape_cast %333 : vector<1x16x256xf32> to vector<16x256xf32>
    %335 = vector.shape_cast %332 : vector<16x256xf32> to vector<1x16x256xf32>
    tpu.vector_store %arg18[%c0_195, %c0_196, %c0_197], %335 {strides = array<i32>} : memref<1x16x256xf32, #tpu.memory_space<vmem>>, vector<1x16x256xf32>,
    return
  }
  func.func @transform_0(%arg0: i32) -> (i32, i32, i32) {
    %c0_i32 = arith.constant 0 : i32
    %c0_i32_0 = arith.constant 0 : i32
    %c0_i32_1 = arith.constant 0 : i32
    return %arg0, %c0_i32, %c0_i32_0 : i32, i32, i32
  }
  func.func @transform_1(%arg0: i32) -> (i32, i32, i32) {
    %c0_i32 = arith.constant 0 : i32
    %c0_i32_0 = arith.constant 0 : i32
    %c0_i32_1 = arith.constant 0 : i32
    %c0_i32_2 = arith.constant 0 : i32
    return %c0_i32, %c0_i32_0, %c0_i32_1 : i32, i32, i32
  }
  func.func @transform_2(%arg0: i32) -> (i32, i32) {
    %c0_i32 = arith.constant 0 : i32
    %c0_i32_0 = arith.constant 0 : i32
    %c0_i32_1 = arith.constant 0 : i32
    return %c0_i32, %c0_i32_0 : i32, i32
  }
  func.func @transform_3(%arg0: i32) -> (i32, i32) {
    %c0_i32 = arith.constant 0 : i32
    %c0_i32_0 = arith.constant 0 : i32
    %c0_i32_1 = arith.constant 0 : i32
    return %c0_i32, %c0_i32_0 : i32, i32
  }
  func.func @transform_4(%arg0: i32) -> (i32, i32) {
    %c0_i32 = arith.constant 0 : i32
    %c0_i32_0 = arith.constant 0 : i32
    %c0_i32_1 = arith.constant 0 : i32
    return %c0_i32, %c0_i32_0 : i32, i32
  }
  func.func @transform_5(%arg0: i32) -> (i32, i32, i32) {
    %c0_i32 = arith.constant 0 : i32
    %c0_i32_0 = arith.constant 0 : i32
    %c0_i32_1 = arith.constant 0 : i32
    %c0_i32_2 = arith.constant 0 : i32
    return %c0_i32, %c0_i32_0, %c0_i32_1 : i32, i32, i32
  }
  func.func @transform_6(%arg0: i32) -> (i32, i32) {
    %c0_i32 = arith.constant 0 : i32
    %c0_i32_0 = arith.constant 0 : i32
    %c0_i32_1 = arith.constant 0 : i32
    return %c0_i32, %c0_i32_0 : i32, i32
  }
  func.func @transform_7(%arg0: i32) -> (i32, i32) {
    %c0_i32 = arith.constant 0 : i32
    %c0_i32_0 = arith.constant 0 : i32
    %c0_i32_1 = arith.constant 0 : i32
    return %c0_i32, %c0_i32_0 : i32, i32
  }
  func.func @transform_8(%arg0: i32) -> (i32, i32) {
    %c0_i32 = arith.constant 0 : i32
    %c0_i32_0 = arith.constant 0 : i32
    %c0_i32_1 = arith.constant 0 : i32
    return %c0_i32, %c0_i32_0 : i32, i32
  }
  func.func @transform_9(%arg0: i32) -> (i32, i32, i32) {
    %c0_i32 = arith.constant 0 : i32
    %c0_i32_0 = arith.constant 0 : i32
    %c0_i32_1 = arith.constant 0 : i32
    %c0_i32_2 = arith.constant 0 : i32
    return %c0_i32, %c0_i32_0, %c0_i32_1 : i32, i32, i32
  }
  func.func @transform_10(%arg0: i32) -> (i32, i32) {
    %c0_i32 = arith.constant 0 : i32
    %c0_i32_0 = arith.constant 0 : i32
    %c0_i32_1 = arith.constant 0 : i32
    return %c0_i32, %c0_i32_0 : i32, i32
  }
  func.func @transform_11(%arg0: i32) -> (i32, i32) {
    %c0_i32 = arith.constant 0 : i32
    %c0_i32_0 = arith.constant 0 : i32
    %c0_i32_1 = arith.constant 0 : i32
    return %c0_i32, %c0_i32_0 : i32, i32
  }
  func.func @transform_12(%arg0: i32) -> (i32, i32) {
    %c0_i32 = arith.constant 0 : i32
    %c0_i32_0 = arith.constant 0 : i32
    %c0_i32_1 = arith.constant 0 : i32
    return %c0_i32, %c0_i32_0 : i32, i32
  }
  func.func @transform_13(%arg0: i32) -> (i32, i32) {
    %c0_i32 = arith.constant 0 : i32
    %c0_i32_0 = arith.constant 0 : i32
    %c0_i32_1 = arith.constant 0 : i32
    return %c0_i32, %c0_i32_0 : i32, i32
  }
  func.func @transform_14(%arg0: i32) -> (i32, i32) {
    %c0_i32 = arith.constant 0 : i32
    %c0_i32_0 = arith.constant 0 : i32
    %c0_i32_1 = arith.constant 0 : i32
    return %c0_i32, %c0_i32_0 : i32, i32
  }
  func.func @transform_15(%arg0: i32) -> (i32, i32) {
    %c0_i32 = arith.constant 0 : i32
    %c0_i32_0 = arith.constant 0 : i32
    %c0_i32_1 = arith.constant 0 : i32
    return %c0_i32, %c0_i32_0 : i32, i32
  }
  func.func @transform_16(%arg0: i32) -> (i32, i32, i32) {
    %c0_i32 = arith.constant 0 : i32
    %c0_i32_0 = arith.constant 0 : i32
    %c0_i32_1 = arith.constant 0 : i32
    return %arg0, %c0_i32, %c0_i32_0 : i32, i32, i32
  }
  func.func @transform_17(%arg0: i32) -> (i32, i32, i32) {
    %c0_i32 = arith.constant 0 : i32
    %c0_i32_0 = arith.constant 0 : i32
    %c0_i32_1 = arith.constant 0 : i32
    return %arg0, %c0_i32, %c0_i32_0 : i32, i32, i32
  }
}

</mosaic_0001>

<bundles_post_ra>
// kernel: tpu_custom_call.1
= control target key start
LH: loop header
LB: loop body
LE: loop exit
PB: predicated region body
PF: predicated region fallthrough
CT: control target
= control target key end

     0   :  { %s17127_s0 = inlined_call_operand.vmem [shape: f32[2,3,1024], index: 0, kind: input, shape index: {}]   ;;  %s17128_s1 = inlined_call_operand.vmem [shape: f32[9,8,3], index: 1, kind: input, shape index: {}]   ;;  %s17129_s2 = inlined_call_operand.vmem [shape: f32[8,1], index: 2, kind: input, shape index: {}]   ;;  %s17130_s3 = inlined_call_operand.vmem [shape: f32[8,1], index: 3, kind: input, shape index: {}]   ;;  %s17131_s4 = inlined_call_operand.vmem [shape: f32[8,1], index: 4, kind: input, shape index: {}]   ;;  %s17132_s5 = inlined_call_operand.vmem [shape: f32[9,4,8], index: 5, kind: input, shape index: {}]   ;;  %s17133_s6 = inlined_call_operand.vmem [shape: f32[4,1], index: 6, kind: input, shape index: {}]   ;;  %s17134_s7 = inlined_call_operand.vmem [shape: f32[12,1], index: 7, kind: input, shape index: {}]   ;;  %s17135_s8 = inlined_call_operand.vmem [shape: f32[12,1], index: 8, kind: input, shape index: {}]   ;;  %s17136_s9 = inlined_call_operand.vmem [shape: f32[9,4,12], index: 9, kind: input, shape index: {}]   ;;  %s17137_s10 = inlined_call_operand.vmem [shape: f32[4,1], index: 10, kind: input, shape index: {}]   ;;  %s17138_s11 = inlined_call_operand.vmem [shape: f32[16,1], index: 11, kind: input, shape index: {}]   ;;  %s17139_s12 = inlined_call_operand.vmem [shape: f32[16,1], index: 12, kind: input, shape index: {}]   ;;  %s17140_s13 = inlined_call_operand.vmem [shape: f32[16,16], index: 13, kind: input, shape index: {}]   ;;  %s17141_s14 = inlined_call_operand.vmem [shape: f32[16,1], index: 14, kind: input, shape index: {}]   ;;  %s17142_s15 = inlined_call_operand.hbm [shape: f32[1024,256], index: 15, kind: input, shape index: {}]   ;;  %s17143_s16 = inlined_call_operand.hbm [shape: f32[2,16,1024], index: 16, kind: output, shape index: {0}]   ;;  %s17144_s17 = inlined_call_operand.hbm [shape: f32[2,16,256], index: 17, kind: output, shape index: {1}]  }
   0x1   :  { %17378 = sst [smem:[#allocation60_spill]] %s17127_s0 }
   0x2   :  { %17379 = sst [smem:[#allocation61_spill]] %s17128_s1 }
   0x3   :  { %17380 = sst [smem:[#allocation62_spill]] %s17129_s2 }
   0x4   :  { %23 = vsyncpa [#allocation3], 0 }
   0x5   :  { %24 = vsyncpa [#allocation4], 0 }
   0x6   :  { %26 = vsyncpa [#allocation4 + $0x1], 0 }
   0x7   :  { %27 = vsyncpa [#allocation7], 0 }
   0x8   :  { %29 = vsyncpa [#allocation7 + $0x1], 0  ;;  %s13722_s24 = smov 0   ;;  %s13724_s25 = smov 0  }
   0x9   :  { %s13726_s26 = smov 0   ;;  %s13728_s27 = smov 0  }
   0xa LB: > { %17381 = sst [smem:[#allocation11_spill]] %s13598_s24  ;;  %s13743_s28 = sadd.s32 4294967295, %s13610_s27   ;;  %s13610_s27 = sphi %s13728_s27, %s18148_s27   ;;  %s13606_s26 = sphi %s13726_s26, %s18150_s26   ;;  %s13602_s25 = sphi %s13724_s25, %s18152_s25   ;;  %s13598_s24 = sphi %s13722_s24, %s18151_s24  }
   0xb   : > { %17382 = sst [smem:[#allocation12_spill]] %s13606_s26  ;;  %s11867_s29 = sadd.s32 4294967294, %s13610_s27  }
   0xc   : > { %17383 = sst [smem:[#allocation13_spill]] %s13610_s27  ;;  %s13747_s0 = sadd.s32 1, %s13610_s27  }
   0xd   : > { %17384 = sst [smem:[#allocation14_spill]] %s13747_s0  ;;  %s383_s30 = sadd.s32 1, %s13606_s26 }
   0xe   : > { %s380_s18 = ssub.s32 %s13610_s27, %s13747_s0  ;;  %p393_p0 = scmp.ne.s32.totalorder %s13606_s26, %s13602_s25 }
   0xf   : > { %p381_p1 = scmp.eq.s32.totalorder %s380_s18, 0  ;;  %p394_p2 = scmp.eq.s32.totalorder %s13743_s28, 1 }
  0x10   : > { %p399_p3 = scmp.ne.s32.totalorder %s13602_s25, %s13598_s24  ;;  %p400_p4 = scmp.eq.s32.totalorder %s11867_s29, 1 }
  0x11   : > { %s13758_s19 = scalar_select %p381_p1, %s13606_s26, %s383_s30  }
  0x12   : > { %p13760_p5 = por %p394_p2, %p393_p0  ;;  %p13764_p6 = por %p400_p4, %p399_p3 }
  0x13   : > { %17385 = sst [smem:[#allocation15_spill]] %s13758_s19  ;;  %p11868_p7 = scmp.ge.s32.totalorder %s13610_s27, 1 }
  0x14   : > { %s17386_s1 = scalar_select %p13760_p5, 1, 0 }
  0x15   : > { %s17387_s20 = scalar_select %p13764_p6, 1, 0 }
  0x16   : > { %p433_p8 = scmp.lt.s32.totalorder %s13610_s27, 3  ;;  %p17151_p9 = scmp.eq.s32.totalorder %s13743_s28, 0 }
  0x17   : > { %17388 = sst [smem:[#allocation16_spill]] %s17387_s20  ;;  %s13612_s22 = smov [#allocation2]  }
  0x18   : > { %p13771_p10 = pnand %p11868_p7, %p433_p8  ;;  %s487_s23 = sshll.u32 %s13612_s22, 4  ;;  %s488_s23 = int_to_ptr.vmem [resolvable:$true] %s487_s23 }
  0x19   : > { %s13484_s19 = scalar_lea.hbm %s17142_s15, 32768 }
  0x1a   : > { %s17389_s21 = scalar_select %p13771_p10, 1, 0 }
  0x1b   : > { %p12974_p11 = pneg %p13771_p10  ;;  %p13485_p13 = scmp.ne.s32.totalorder %s17142_s15, %s13484_s19 }
  0x1c   : > { %p13491_p3 = scmp.lt.u32.totalorder %s13484_s19, %s17142_s15 }
  0x1d   : > { %p13779_p12 = pnand %p17151_p9, %p12974_p11 }
  0x1f   : > { %p13486_p0 = pneg %p13779_p12 }
  0x21   : > { %p13487_p1 = pnand %p13486_p0, %p13485_p13 }
  0x23   : > { %p13488_p2 = pneg %p13487_p1 }
  0x25   : > { %p13493_p4 = pnand %p13491_p3, %p13488_p2 }
  0x27   : > { %13496 = shalt.err (!%p13493_p4)
}
  0x28   : > { %s13497_s24 = scalar_lea.vmem %s488_s23, 32768  ;;  %p13505_p9 = scmp.lt.s32.totalorder %s488_s23, %s488_s23 }
  0x29   : > { %p13498_p7 = scmp.ne.s32.totalorder %s488_s23, %s13497_s24  ;;  %p13506_p6 = scmp.lt.s32.totalorder %s13497_s24, %s13497_s24 }
  0x2b   : > { %p13500_p8 = pnand %p13498_p7, %p13486_p0  ;;  %p13507_p5 = por %p13506_p6, %p13505_p9 }
  0x2d   : > { %p13501_p11 = pneg %p13500_p8 }
  0x2f   : > { %p13508_p10 = pnand %p13507_p5, %p13501_p11 }
  0x31   : > { %13511 = shalt.err (!%p13508_p10)
}
  0x32   : > { %s13613_s26 = smov 256   ;;  %s13614_s0 = smov 16  }
  0x33   : > { %12977 = dma.hbm_to_vmem [thread:$0]  (!%p13779_p12), %s17142_s15, 32768, %s488_s23, [#allocation3], %s13613_s26, %s13613_s26, %s13614_s0  }
  0x34   : > { %p17391_p13 = scmp.ne.s32.totalorder %s17389_s21, 0 }
  0x36   : > { %511 = sbr.rel (%p17391_p13) target bundleno = 2158 (0x86e), region = 84 }
  0x3d   : > { %p17392_p1 = scmp.eq.s32.totalorder %s13743_s28, 0 }
  0x3f   : > { %13585 = dma.done.wait (%p17392_p1), [#allocation3], 32768   ;;  %p17393_p0 = pmov %p17392_p1 }
  0x40   : > { %p568_p5 = scmp.lt.s32.totalorder %s13743_s28, 1  ;;  %s17394_s22 = sld [smem:[#allocation60_spill]]  ;;  %v17200_v2 = vmov 0.0   ;;  %v573_v9 = vlaneseq  ;;  %vm17157_vm0 = vcmask 1042432   ;;  %v13624_v13 = vmov 0   ;;  %v3830_v43 = vld [vmem:[%s17130_s3] sm:$0xff] }
  0x41   : > { %13587 = vsyncadd (%p17393_p0), [#allocation3], 4294934528  ;;  %790 = vmatprep.mubr.f32.mxu0 %v17200_v2  ;;  %861 = vmatprep.mubr.f32.mxu1 %v17200_v2  ;;  %s13616_s21 = smov 32   ;;  %s13617_s23 = smov 33   ;;  %vm17156_vm1 = vcmask 261120   ;;  %vm17158_vm2 = vcmask 23552  }
  0x42   : > { %s569_s24 = scalar_select %p568_p5, %s13743_s28, 1  ;;  %v13956_v12 = vand.u32 127, %v573_v9  ;;  %13038 = vset.pattern.permute.xlu0 %v13624_v13  ;;  %13039 = vset.pattern.permute.xlu1 %v13624_v13  ;;  %vm17155_vm3 = vcmask 269312   ;;  %v17397_v37 = vmov 0  ;;  %v17400_v38 = vmov 0  ;;  %v3844_v57 = vld [vmem:[%s17131_s4] sm:$0xff] }
  0x43   : > { %s17196_s26 = smov 1   ;;  %s17194_s0 = smov 127   ;;  %v17402_v48 = vmov 0  ;;  %v17405_v49 = vmov 0  ;;  %v17408_v62 = vmov 0  ;;  %v17410_v63 = vmov 0 }
  0x44   : > { %s12271_s19 = sshll.u32 %s569_s24, 5  ;;  %s17190_s30 = smov 97   ;;  %v13965_v17 = vadd.s32 128, %v13956_v12  ;;  %v13976_v23 = vadd.s32 256, %v13956_v12  ;;  %v13979_v24 = vadd.s32 384, %v13956_v12  ;;  %v582_v26 = vand.u32 31, %v13956_v12 }
  0x45   : > { %s17192_s18 = smov 96   ;;  %s13623_s24 = smov 95   ;;  %v14017_v39 = vadd.s32 512, %v13956_v12  ;;  %v14020_v40 = vadd.s32 640, %v13956_v12  ;;  %v14055_v53 = vadd.s32 768, %v13956_v12  ;;  %v14058_v54 = vadd.s32 896, %v13956_v12 }
  0x46   : > { %s572_s27 = scalar_lea.vmem %s17394_s22, %s12271_s19  ;;  %s17395_s29 = sld [smem:[#allocation61_spill]]  ;;  %v583_v27 = vand.u32 31, %v13965_v17  ;;  %v584_v35 = vand.u32 31, %v13976_v23  ;;  %v585_v36 = vand.u32 31, %v13979_v24  ;;  %vm14005_vm4 = vcmp.gt.s32.totalorder %v582_v26, 0 }
  0x47   : > { %v13810_v0 = vld [vmem:[%s572_s27 + $0x8] sm:$0x77]  ;;  %v13812_v1 = vld [vmem:[%s572_s27] sm:$0x77]  ;;  %v13824_v4 = vld [vmem:[%s572_s27 + $0x10] sm:$0x77] }
  0x48   : > { %680 = vrot.lane.b32.xlu1 %v13810_v0, %s13616_s21  ;;  %676 = vrot.lane.b32.xlu0 %v13812_v1, %s13616_s21  ;;  %v13822_v3 = vcombine.high %v13810_v0, %v13810_v0  ;;  %v13832_v5 = vcombine.high %v13824_v4, %v13824_v4  ;;  %v13836_v6 = vcombine.high %v13812_v1, %v13812_v1  ;;  %v13838_v7 = vld [vmem:[%s572_s27 + $0x18] sm:$0x77]  ;;  %s17198_s27 = smov 31   ;;  %s17396_s2 = sld [smem:[#allocation62_spill]]  ;;  %v17398_v37 = vsel %vm14005_vm4, 4294967295, %v17397_v37 }
  0x49   : > { %v13846_v8 = vcombine.high %v13838_v7, %v13838_v7  ;;  %17399 = vst [vmem:[#allocation17_spill] sm:$0xff] %v17398_v37  ;;  %vm14012_vm5 = vcmp.gt.s32.totalorder %v583_v27, 0  ;;  %vm14036_vm6 = vcmp.gt.s32.totalorder %v584_v35, 0  ;;  %vm14042_vm7 = vcmp.gt.s32.totalorder %v585_v36, 0  ;;  %s14432_s19 = sand.u32 1, %s13602_s25   ;;  %p18143_p9 = scmp.ne.s32.totalorder %s17386_s1, 0 }
  0x4a   : > { %v17401_v38 = vsel %vm14012_vm5, 4294967295, %v17400_v38  ;;  %v17403_v48 = vsel %vm14036_vm6, 4294967295, %v17402_v48  ;;  %v17406_v49 = vsel %vm14042_vm7, 4294967295, %v17405_v49  ;;  %v586_v51 = vand.u32 31, %v14017_v39  ;;  %s11873_s20 = sshll.u32 %s14432_s19, 7 }
  0x4b   : > { %17404 = vst [vmem:[#allocation18_spill] sm:$0xff] %v17403_v48  ;;  %17407 = vst [vmem:[#allocation19_spill] sm:$0xff] %v17406_v49  ;;  %v587_v52 = vand.u32 31, %v14020_v40  ;;  %v588_v9 = vand.u32 31, %v14055_v53  ;;  %vm17159_vm12 = vcmask 252928   ;;  %vm14116_vm13 = vcmp.lt.s32.totalorder %v582_v26, 31 }
  0x4c   : > { %682 = vrot.lane.b32.xlu1 %v13822_v3, %s13616_s21  ;;  %684 = vrot.lane.b32.xlu0 %v13824_v4, %s13616_s21  ;;  %v11877_v22 = vld [vmem:[%s17395_s29 + $0x8] sm:$0xff]  ;;  %v675_v50 = vld [vmem:[%s17395_s29] sm:$0xff]  ;;  %vm14075_vm8 = vcmp.gt.s32.totalorder %v586_v51, 0  ;;  %vm14122_vm14 = vcmp.lt.s32.totalorder %v583_v27, 31  ;;  %vm14141_vm15 = vcmp.lt.s32.totalorder %v584_v35, 31  ;;  %s14443_s22 = scalar_lea.vmem [#allocation5], %s11873_s20 }
  0x4d   : > { %v17409_v62 = vsel %vm14075_vm8, 4294967295, %v17408_v62  ;;  %vm14081_vm9 = vcmp.gt.s32.totalorder %v587_v52, 0  ;;  %vm14097_vm10 = vcmp.gt.s32.totalorder %v588_v9, 0  ;;  %v11902_v27 = vld [vmem:[%s17395_s29 + $0x10] sm:$0xff]  ;;  %s17652_s20 = smov 96  }
  0x4e   : > { %v3800_v34 = vld [vmem:[%s17396_s2] sm:$0xff]  ;;  %v17411_v63 = vsel %vm14081_vm9, 4294967295, %v17410_v63 }
  0x4f   : > { %17412 = vst [vmem:[#allocation20_spill] sm:$0xff] %v17411_v63 }
  0x50   : > { %686 = vrot.lane.b32.xlu1 %v13832_v5, %s13616_s21  ;;  %678 = vrot.lane.b32.xlu0 %v13836_v6, %s13616_s21 }
  0x54   : > { %690 = vrot.lane.b32.xlu1 %v13846_v8, %s13616_s21  ;;  %688 = vrot.lane.b32.xlu0 %v13838_v7, %s13616_s21 }
  0x58   : > { %620 = vrot.lane.b32.xlu1 %v13836_v6, %s13617_s23  ;;  %618 = vrot.lane.b32.xlu0 %v13812_v1, %s13617_s23 }
  0x5c   : > { %624 = vrot.lane.b32.xlu1 %v13822_v3, %s13617_s23  ;;  %622 = vrot.lane.b32.xlu0 %v13810_v0, %s13617_s23 }
  0x60   : > { %628 = vrot.lane.b32.xlu1 %v13832_v5, %s13617_s23  ;;  %626 = vrot.lane.b32.xlu0 %v13824_v4, %s13617_s23 }
  0x64   : > { %632 = vrot.lane.b32.xlu1 %v13846_v8, %s13617_s23  ;;  %630 = vrot.lane.b32.xlu0 %v13838_v7, %s13617_s23 }
  0x68   : > { %1323 = vrot.lane.b32.xlu1 %v13836_v6, %s17198_s27  ;;  %1321 = vrot.lane.b32.xlu0 %v13812_v1, %s17198_s27 }
  0x6c   : > { %1327 = vrot.lane.b32.xlu1 %v13822_v3, %s17198_s27  ;;  %1325 = vrot.lane.b32.xlu0 %v13810_v0, %s17198_s27 }
  0x70   : > { %1331 = vrot.lane.b32.xlu1 %v13832_v5, %s17198_s27  ;;  %1329 = vrot.lane.b32.xlu0 %v13824_v4, %s17198_s27 }
  0x74   : > { %1335 = vrot.lane.b32.xlu1 %v13846_v8, %s17198_s27  ;;  %1333 = vrot.lane.b32.xlu0 %v13838_v7, %s17198_s27 }
  0x78   : > { %1701 = vrot.lane.b32.xlu1 %v13836_v6, %s17196_s26  ;;  %1699 = vrot.lane.b32.xlu0 %v13812_v1, %s17196_s26 }
  0x7c   : > { %1705 = vrot.lane.b32.xlu1 %v13822_v3, %s17196_s26  ;;  %1703 = vrot.lane.b32.xlu0 %v13810_v0, %s17196_s26 }
  0x80   : > { %1709 = vrot.lane.b32.xlu1 %v13832_v5, %s17196_s26  ;;  %1707 = vrot.lane.b32.xlu0 %v13824_v4, %s17196_s26 }
  0x84   : > { %1713 = vrot.lane.b32.xlu1 %v13846_v8, %s17196_s26  ;;  %1711 = vrot.lane.b32.xlu0 %v13838_v7, %s17196_s26 }
  0x88   : > { %2378 = vrot.lane.b32.xlu1 %v13810_v0, %s17194_s0  ;;  %2376 = vrot.lane.b32.xlu0 %v13836_v6, %s17194_s0 }
  0x8c   : > { %2380 = vrot.lane.b32.xlu1 %v13822_v3, %s17194_s0  ;;  %2374 = vrot.lane.b32.xlu0 %v13812_v1, %s17194_s0 }
  0x90   : > { %2384 = vrot.lane.b32.xlu1 %v13832_v5, %s17194_s0  ;;  %2382 = vrot.lane.b32.xlu0 %v13824_v4, %s17194_s0 }
  0x94   : > { %2388 = vrot.lane.b32.xlu1 %v13846_v8, %s17194_s0  ;;  %2386 = vrot.lane.b32.xlu0 %v13838_v7, %s17194_s0 }
  0x98   : > { %2740 = vrot.lane.b32.xlu1 %v13810_v0, %s17190_s30  ;;  %2738 = vrot.lane.b32.xlu0 %v13836_v6, %s17190_s30 }
  0x9c   : > { %2742 = vrot.lane.b32.xlu1 %v13822_v3, %s17190_s30  ;;  %2736 = vrot.lane.b32.xlu0 %v13812_v1, %s17190_s30 }
  0xa0   : > { %2746 = vrot.lane.b32.xlu1 %v13832_v5, %s17190_s30  ;;  %2744 = vrot.lane.b32.xlu0 %v13824_v4, %s17190_s30 }
  0xa4   : > { %2750 = vrot.lane.b32.xlu1 %v13846_v8, %s17190_s30  ;;  %2748 = vrot.lane.b32.xlu0 %v13838_v7, %s17190_s30 }
  0xa8   : > { %3102 = vrot.lane.b32.xlu1 %v13810_v0, %s17192_s18  ;;  %3100 = vrot.lane.b32.xlu0 %v13836_v6, %s17192_s18 }
  0xac   : > { %3104 = vrot.lane.b32.xlu1 %v13822_v3, %s17192_s18  ;;  %3098 = vrot.lane.b32.xlu0 %v13812_v1, %s17192_s18 }
  0xb0   : > { %3108 = vrot.lane.b32.xlu1 %v13832_v5, %s17192_s18  ;;  %3106 = vrot.lane.b32.xlu0 %v13824_v4, %s17192_s18 }
  0xb4   : > { %3112 = vrot.lane.b32.xlu1 %v13846_v8, %s17192_s18  ;;  %3110 = vrot.lane.b32.xlu0 %v13838_v7, %s17192_s18 }
  0xb8   : > { %3442 = vrot.lane.b32.xlu1 %v13810_v0, %s13623_s24  ;;  %3440 = vrot.lane.b32.xlu0 %v13836_v6, %s13623_s24 }
  0xba   : > { %v681_v10 = vpop.permute.xlu1 %680  ;;  %v677_v11 = vpop.permute.xlu0 %676 }
  0xbb   : > { %v701_v25 = vsel %vm17156_vm1, 0.0, %v677_v11 }
  0xbc   : > { %3444 = vrot.lane.b32.xlu1 %v13822_v3, %s13623_s24  ;;  %3438 = vrot.lane.b32.xlu0 %v13812_v1, %s13623_s24 }
  0xbe   : > { %v683_v14 = vpop.permute.xlu1 %682  ;;  %v685_v15 = vpop.permute.xlu0 %684 }
  0xbf   : > { %v695_v16 = vsel %vm17156_vm1, %v681_v10, %v683_v14  ;;  %v696_v31 = vsel %vm17156_vm1, %v683_v14, %v685_v15 }
  0xc0   : > { %11881 = vmatprep.subr.msk.mxu1 %vm17157_vm0, %v695_v16  ;;  %3448 = vrot.lane.b32.xlu1 %v13832_v5, %s13623_s24 }
  0xc1   : > { %3446 = vrot.lane.b32.xlu0 %v13824_v4, %s13623_s24 }
  0xc2   : > { %v687_v18 = vpop.permute.xlu1 %686  ;;  %v679_v19 = vpop.permute.xlu0 %678 }
  0xc3   : > { %v693_v20 = vsel %vm17156_vm1, %v677_v11, %v679_v19  ;;  %v694_v21 = vsel %vm17156_vm1, %v679_v19, %v681_v10  ;;  %v697_v29 = vsel %vm17156_vm1, %v685_v15, %v687_v18  ;;  %v589_v10 = vand.u32 31, %v14058_v54 }
  0xc4   : > { %3452 = vrot.lane.b32.xlu1 %v13846_v8, %s13623_s24  ;;  %11878 = vmatprep.subr.msk.mxu0 %vm17157_vm0, %v693_v20  ;;  %v17413_v19 = vmov 0  ;;  %v17416_v20 = vmov 0 }
  0xc5   : > { %3450 = vrot.lane.b32.xlu0 %v13838_v7, %s13623_s24  ;;  %11882 = vmatpush1.msk.msra.mxu1 %vm17157_vm0, %v694_v21  ;;  %v17414_v19 = vsel %vm14097_vm10, 4294967295, %v17413_v19  ;;  %vm14101_vm11 = vcmp.gt.s32.totalorder %v589_v10, 0 }
  0xc6   : > { %11879 = vmatpush1.msk.msra.mxu0 %vm17157_vm0, %v701_v25  ;;  %v691_v28 = vpop.permute.xlu1 %690  ;;  %v689_v30 = vpop.permute.xlu0 %688  ;;  %11883 = vmatmul.mubr.msk.f32.vlgmr.msra.gmra.mrb[0].mxu1 %vm17158_vm2, %v11877_v22  ;;  %17415 = vst [vmem:[#allocation21_spill] sm:$0xff] %v17414_v19  ;;  %v17417_v20 = vsel %vm14101_vm11, 4294967295, %v17416_v20 }
  0xc7   : > { %11884 = vmatprep.subr.msk.mxu0 %vm17157_vm0, %v697_v29  ;;  %v698_v32 = vsel %vm17156_vm1, %v687_v18, %v689_v30  ;;  %11880 = vmatmul.mubr.msk.f32.vlgmr.msra.gmra.mrb[0].mxu0 %vm17158_vm2, %v11877_v22  ;;  %v699_v33 = vsel %vm17156_vm1, %v689_v30, %v691_v28  ;;  %17418 = vst [vmem:[#allocation22_spill] sm:$0xff] %v17417_v20  ;;  %vm14163_vm1 = vcmp.lt.s32.totalorder %v586_v51, 31 }
  0xc8   : > { %11885 = vmatpush1.msk.msra.mxu0 %vm17157_vm0, %v696_v31  ;;  %11887 = vmatprep.subr.msk.mxu1 %vm17157_vm0, %v699_v33  ;;  %v17419_v31 = vmov 0 }
  0xc9   : > { %11888 = vmatpush1.msk.msra.mxu1 %vm17157_vm0, %v698_v32  ;;  %932 = vmatprep.mubr.f32.mxu0 %v17200_v2  ;;  %v17420_v31 = vsel %vm14116_vm13, 4294967295, %v17419_v31  ;;  %v17422_v32 = vmov 0 }
  0xca   : > { %v621_v41 = vpop.permute.xlu1 %620  ;;  %v619_v42 = vpop.permute.xlu0 %618  ;;  %1003 = vmatprep.mubr.f32.mxu1 %v17200_v2  ;;  %3803 = vperm.xlu0 %13038, %v3800_v34   ;;  %17421 = vst [vmem:[#allocation23_spill] sm:$0xff] %v17420_v31  ;;  %v17423_v32 = vsel %vm14122_vm14, 4294967295, %v17422_v32 }
  0xcb   : > { %v635_v44 = vsel %vm17155_vm3, %v619_v42, %v621_v41  ;;  %v650_v45 = vsel %vm17155_vm3, 0.0, %v619_v42  ;;  %11886 = vmatmul.mubr.msk.f32.vlgmr.msra.gmra.mrb[2].mxu0 %vm17158_vm2, %v11877_v22  ;;  %11889 = vmatmul.mubr.msk.f32.vlgmr.msra.gmra.mrb[2].mxu1 %vm17158_vm2, %v11877_v22  ;;  %17424 = vst [vmem:[#allocation24_spill] sm:$0xff] %v17423_v32  ;;  %v17425_v42 = vmov 0 }
  0xcc   : > { %v667_v46 = vsel %vm14005_vm4, %v650_v45, 0.0  ;;  %v668_v47 = vsel %vm14012_vm5, %v635_v44, 0.0  ;;  %1101 = vmatprep.mubr.f32.mxu0 %v17200_v2  ;;  %1172 = vmatprep.mubr.f32.mxu1 %v17200_v2  ;;  %v17426_v42 = vsel %vm14141_vm15, 4294967295, %v17425_v42 }
  0xcd   : > { %11890 = vmatprep.subr.msk.mxu0 %vm17157_vm0, %v668_v47  ;;  %3833 = vperm.xlu1 %13039, %v3830_v43   ;;  %17427 = vst [vmem:[#allocation25_spill] sm:$0xff] %v17426_v42  ;;  %v17428_v43 = vmov 0  ;;  %v17434_v47 = vmov 0 }
  0xce   : > { %v625_v55 = vpop.permute.xlu1 %624  ;;  %11891 = vmatpush1.msk.msra.mxu0 %vm17157_vm0, %v667_v46  ;;  %v623_v56 = vpop.permute.xlu0 %622 }
  0xcf   : > { %v636_v58 = vsel %vm17155_vm3, %v621_v41, %v623_v56  ;;  %v637_v59 = vsel %vm17155_vm3, %v623_v56, %v625_v55  ;;  %11892 = vmatmul.mubr.msk.f32.vlgmr.msra.gmra.mrb[0].mxu0 %vm17158_vm2, %v675_v50 }
  0xd0   : > { %v669_v60 = vsel %vm14036_vm6, %v636_v58, 0.0  ;;  %v670_v61 = vsel %vm14042_vm7, %v637_v59, 0.0  ;;  %1243 = vmatprep.mubr.f32.mxu0 %v17200_v2 }
  0xd1   : > { %11893 = vmatprep.subr.msk.mxu1 %vm17157_vm0, %v670_v61  ;;  %3847 = vperm.xlu1 %13039, %v3844_v57  }
  0xd2   : > { %v629_v11 = vpop.permute.xlu1 %628  ;;  %11894 = vmatpush1.msk.msra.mxu1 %vm17157_vm0, %v669_v60  ;;  %v627_v13 = vpop.permute.xlu0 %626 }
  0xd3   : > { %v638_v14 = vsel %vm17155_vm3, %v625_v55, %v627_v13  ;;  %v639_v15 = vsel %vm17155_vm3, %v627_v13, %v629_v11  ;;  %11895 = vmatmul.mubr.msk.f32.vlgmr.msra.gmra.mrb[0].mxu1 %vm17158_vm2, %v675_v50  ;;  %v17445_v55 = vmov 0 }
  0xd4   : > { %v671_v16 = vsel %vm14075_vm8, %v638_v14, 0.0  ;;  %v672_v18 = vsel %vm14081_vm9, %v639_v15, 0.0  ;;  %1314 = vmatprep.mubr.f32.mxu1 %v17200_v2 }
  0xd5   : > { %11896 = vmatprep.subr.msk.mxu0 %vm17157_vm0, %v672_v18 }
  0xd6   : > { %v633_v21 = vpop.permute.xlu1 %632  ;;  %11897 = vmatpush1.msk.msra.mxu0 %vm17157_vm0, %v671_v16  ;;  %v631_v22 = vpop.permute.xlu0 %630  ;;  %v11915_v16 = vld [vmem:[%s17395_s29 + $0x18] sm:$0xff] }
  0xd7   : > { %v640_v25 = vsel %vm17155_vm3, %v629_v11, %v631_v22  ;;  %v641_v28 = vsel %vm17155_vm3, %v631_v22, %v633_v21  ;;  %11898 = vmatmul.mubr.msk.f32.vlgmr.msra.gmra.mrb[2].mxu0 %vm17158_vm2, %v675_v50  ;;  %vm14147_vm3 = vcmp.lt.s32.totalorder %v585_v36, 31  ;;  %v17431_v36 = vmov 0 }
  0xd8   : > { %v673_v29 = vsel %vm14097_vm10, %v640_v25, 0.0  ;;  %v674_v30 = vsel %vm14101_vm11, %v641_v28, 0.0  ;;  %1471 = vmatprep.mubr.f32.mxu0 %v17200_v2  ;;  %v17429_v43 = vsel %vm14147_vm3, 4294967295, %v17428_v43  ;;  %v17432_v36 = vsel %vm14163_vm1, 4294967295, %v17431_v36 }
  0xd9   : > { %11899 = vmatprep.subr.msk.mxu1 %vm17157_vm0, %v674_v30  ;;  %17430 = vst [vmem:[#allocation26_spill] sm:$0xff] %v17429_v43  ;;  %17433 = vst [vmem:[#allocation27_spill] sm:$0xff] %v17432_v36 }
  0xda   : > { %v1324_v33 = vpop.permute.xlu1 %1323  ;;  %11900 = vmatpush1.msk.msra.mxu1 %vm17157_vm0, %v673_v29  ;;  %v1322_v34 = vpop.permute.xlu0 %1321 }
  0xdb   : > { %v1338_v41 = vsel %vm17159_vm12, %v1322_v34, %v1324_v33  ;;  %v1353_v12 = vsel %vm17159_vm12, 0.0, %v1322_v34  ;;  %11901 = vmatmul.mubr.msk.f32.vlgmr.msra.gmra.mrb[2].mxu1 %vm17158_vm2, %v675_v50 }
  0xdc   : > { %v1370_v26 = vsel %vm14116_vm13, %v1353_v12, 0.0  ;;  %v1371_v17 = vsel %vm14122_vm14, %v1338_v41, 0.0  ;;  %1542 = vmatprep.mubr.f32.mxu1 %v17200_v2  ;;  %vm17441_vm13 = vcmask 23552   ;;  %vm14183_vm14 = vcmp.lt.s32.totalorder %v588_v9, 31 }
  0xdd   : > { %11903 = vmatprep.subr.msk.mxu0 %vm17157_vm0, %v1371_v17 }
  0xde   : > { %v1328_v44 = vpop.permute.xlu1 %1327  ;;  %11904 = vmatpush1.msk.msra.mxu0 %vm17157_vm0, %v1370_v26  ;;  %v1326_v45 = vpop.permute.xlu0 %1325  ;;  %vm14169_vm0 = vcmp.lt.s32.totalorder %v587_v52, 31  ;;  %v17442_v52 = vmov 0 }
  0xdf   : > { %v1339_v46 = vsel %vm17159_vm12, %v1324_v33, %v1326_v45  ;;  %v1340_v23 = vsel %vm17159_vm12, %v1326_v45, %v1328_v44  ;;  %11905 = vmatmul.mubr.msk.f32.vlgmr.msra.gmra.mrb[0].mxu0 %vm17158_vm2, %v11902_v27  ;;  %v17435_v47 = vsel %vm14169_vm0, 4294967295, %v17434_v47  ;;  %vm17437_vm2 = vcmask 1042432  }
  0xe0   : > { %v1372_v35 = vsel %vm14141_vm15, %v1339_v46, 0.0  ;;  %v1373_v24 = vsel %vm14147_vm3, %v1340_v23, 0.0  ;;  %1613 = vmatprep.mubr.f32.mxu0 %v17200_v2  ;;  %17436 = vst [vmem:[#allocation28_spill] sm:$0xff] %v17435_v47  ;;  %vm17438_vm12 = vmmov %vm17437_vm2  ;;  %vm17439_vm15 = vcmask 252928   ;;  %v17443_v52 = vsel %vm14183_vm14, 4294967295, %v17442_v52 }
  0xe1   : > { %11906 = vmatprep.subr.msk.mxu1 %vm17437_vm2, %v1373_v24  ;;  %vm17440_vm3 = vmmov %vm17439_vm15  ;;  %17444 = vst [vmem:[#allocation29_spill] sm:$0xff] %v17443_v52  ;;  %vm14187_vm2 = vcmp.lt.s32.totalorder %v589_v10, 31 }
  0xe2   : > { %v1332_v50 = vpop.permute.xlu1 %1331  ;;  %11907 = vmatpush1.msk.msra.mxu1 %vm17438_vm12, %v1372_v35  ;;  %v1330_v53 = vpop.permute.xlu0 %1329  ;;  %v17446_v55 = vsel %vm14187_vm2, 4294967295, %v17445_v55  ;;  %v11928_v35 = vld [vmem:[%s17395_s29 + $0x20] sm:$0xff] }
  0xe3   : > { %v1341_v54 = vsel %vm17439_vm15, %v1328_v44, %v1330_v53  ;;  %v1342_v39 = vsel %vm17440_vm3, %v1330_v53, %v1332_v50  ;;  %11908 = vmatmul.mubr.msk.f32.vlgmr.msra.gmra.mrb[0].mxu1 %vm17441_vm13, %v11902_v27  ;;  %17447 = vst [vmem:[#allocation30_spill] sm:$0xff] %v17446_v55  ;;  %vm17448_vm3 = vmmov %vm17438_vm12 }
  0xe4   : > { %v1374_v51 = vsel %vm14163_vm1, %v1341_v54, 0.0  ;;  %v1375_v40 = vsel %vm14169_vm0, %v1342_v39, 0.0  ;;  %1684 = vmatprep.mubr.f32.mxu1 %v17200_v2  ;;  %vm17449_vm13 = vmmov %vm17439_vm15  ;;  %vm17451_vm1 = vcmask 23552   ;;  %vm17172_vm0 = vcmask 7168  }
  0xe5   : > { %11909 = vmatprep.subr.msk.mxu0 %vm17438_vm12, %v1375_v40  ;;  %vm17450_vm15 = vmmov %vm17449_vm13 }
  0xe6   : > { %v1336_v56 = vpop.permute.xlu1 %1335  ;;  %11910 = vmatpush1.msk.msra.mxu0 %vm17448_vm3, %v1374_v51  ;;  %v1334_v57 = vpop.permute.xlu0 %1333  ;;  %vm17452_vm12 = vmmov %vm17448_vm3 }
  0xe7   : > { %v1343_v58 = vsel %vm17449_vm13, %v1332_v50, %v1334_v57  ;;  %v1344_v59 = vsel %vm17450_vm15, %v1334_v57, %v1336_v56  ;;  %11911 = vmatmul.mubr.msk.f32.vlgmr.msra.gmra.mrb[2].mxu0 %vm17451_vm1, %v11902_v27  ;;  %vm17453_vm13 = vmmov %vm17448_vm3 }
  0xe8   : > { %v1376_v60 = vsel %vm14183_vm14, %v1343_v58, 0.0  ;;  %v1377_v61 = vsel %vm14187_vm2, %v1344_v59, 0.0  ;;  %1833 = vmatprep.mubr.f32.mxu0 %v17200_v2  ;;  %vm17454_vm15 = vmmov %vm17448_vm3 }
  0xe9   : > { %11912 = vmatprep.subr.msk.mxu1 %vm17452_vm12, %v1377_v61  ;;  %vm17455_vm12 = vmmov %vm17451_vm1 }
  0xea   : > { %v1702_v9 = vpop.permute.xlu1 %1701  ;;  %11913 = vmatpush1.msk.msra.mxu1 %vm17448_vm3, %v1376_v60  ;;  %v1700_v10 = vpop.permute.xlu0 %1699 }
  0xeb   : > { %v1716_v11 = vsel %vm17172_vm0, %v1700_v10, %v1702_v9  ;;  %v1731_v13 = vsel %vm17172_vm0, 0.0, %v1700_v10  ;;  %11914 = vmatmul.mubr.msk.f32.vlgmr.msra.gmra.mrb[2].mxu1 %vm17451_vm1, %v11902_v27  ;;  %vm17456_vm1 = vmmov %vm17448_vm3 }
  0xec   : > { %v1732_v14 = vsel %vm14005_vm4, %v1731_v13, 0.0  ;;  %v1733_v15 = vsel %vm14012_vm5, %v1716_v11, 0.0  ;;  %1904 = vmatprep.mubr.f32.mxu1 %v17200_v2 }
  0xed   : > { %11916 = vmatprep.subr.msk.mxu0 %vm17453_vm13, %v1733_v15  ;;  %vm17457_vm13 = vmmov %vm17455_vm12 }
  0xee   : > { %v1706_v18 = vpop.permute.xlu1 %1705  ;;  %11917 = vmatpush1.msk.msra.mxu0 %vm17454_vm15, %v1732_v14  ;;  %v1704_v21 = vpop.permute.xlu0 %1703  ;;  %vm17458_vm15 = vmmov %vm17456_vm1 }
  0xef   : > { %v1717_v22 = vsel %vm17172_vm0, %v1702_v9, %v1704_v21  ;;  %v1718_v25 = vsel %vm17172_vm0, %v1704_v21, %v1706_v18  ;;  %11918 = vmatmul.mubr.msk.f32.vlgmr.msra.gmra.mrb[0].mxu0 %vm17455_vm12, %v11915_v16  ;;  %vm17459_vm12 = vmmov %vm17456_vm1 }
  0xf0   : > { %v1734_v28 = vsel %vm14036_vm6, %v1717_v22, 0.0  ;;  %v1735_v29 = vsel %vm14042_vm7, %v1718_v25, 0.0  ;;  %1975 = vmatprep.mubr.f32.mxu0 %v17200_v2 }
  0xf1   : > { %11919 = vmatprep.subr.msk.mxu1 %vm17448_vm3, %v1735_v29  ;;  %vm17460_vm3 = vmmov %vm17457_vm13 }
  0xf2   : > { %v1710_v30 = vpop.permute.xlu1 %1709  ;;  %11920 = vmatpush1.msk.msra.mxu1 %vm17456_vm1, %v1734_v28  ;;  %v1708_v33 = vpop.permute.xlu0 %1707  ;;  %v11954_v28 = vld [vmem:[%s17395_s29 + $0x30] sm:$0xff] }
  0xf3   : > { %v1719_v34 = vsel %vm17172_vm0, %v1706_v18, %v1708_v33  ;;  %v1720_v41 = vsel %vm17172_vm0, %v1708_v33, %v1710_v30  ;;  %11921 = vmatmul.mubr.msk.f32.vlgmr.msra.gmra.mrb[0].mxu1 %vm17457_vm13, %v11915_v16  ;;  %vm17461_vm13 = vmmov %vm17456_vm1 }
  0xf4   : > { %v1736_v12 = vsel %vm14075_vm8, %v1719_v34, 0.0  ;;  %v1737_v26 = vsel %vm14081_vm9, %v1720_v41, 0.0  ;;  %2046 = vmatprep.mubr.f32.mxu1 %v17200_v2  ;;  %vm17466_vm8 = vmmov %vm17456_vm1 }
  0xf5   : > { %11922 = vmatprep.subr.msk.mxu0 %vm17458_vm15, %v1737_v26  ;;  %vm17177_vm15 = vcmask 1039360  }
  0xf6   : > { %v1714_v17 = vpop.permute.xlu1 %1713  ;;  %11923 = vmatpush1.msk.msra.mxu0 %vm17459_vm12, %v1736_v12  ;;  %v1712_v27 = vpop.permute.xlu0 %1711  ;;  %vm17462_vm12 = vmmov %vm17456_vm1 }
  0xf7   : > { %v1721_v44 = vsel %vm17172_vm0, %v1710_v30, %v1712_v27  ;;  %v1722_v45 = vsel %vm17172_vm0, %v1712_v27, %v1714_v17  ;;  %11924 = vmatmul.mubr.msk.f32.vlgmr.msra.gmra.mrb[2].mxu0 %vm17460_vm3, %v11915_v16  ;;  %11929 = vmatprep.subr.msk.mxu0 %vm17456_vm1, %v13836_v6  ;;  %vm17463_vm3 = vmmov %vm17456_vm1  ;;  %vm17464_vm0 = vcmask 23552  }
  0xf8   : > { %v1738_v46 = vsel %vm14097_vm10, %v1721_v44, 0.0  ;;  %v1739_v23 = vsel %vm14101_vm11, %v1722_v45, 0.0  ;;  %11930 = vmatpush1.msk.msra.mxu0 %vm17461_vm13, %v13812_v1  ;;  %2146 = vmatprep.mubr.f32.mxu0 %v17200_v2  ;;  %vm17465_vm13 = vmmov %vm17464_vm0  ;;  %vm17467_vm11 = vnez %v17423_v32 }
  0xf9   : > { %11925 = vmatprep.subr.msk.mxu1 %vm17462_vm12, %v1739_v23  ;;  %11935 = vmatprep.subr.msk.mxu0 %vm17463_vm3, %v13832_v5  ;;  %vm17468_vm12 = vmmov %vm17456_vm1 }
  0xfa   : > { %v2379_v6 = vpop.permute.xlu1 %2378  ;;  %11926 = vmatpush1.msk.msra.mxu1 %vm17456_vm1, %v1738_v46  ;;  %v2377_v24 = vpop.permute.xlu0 %2376  ;;  %vm17469_vm3 = vmmov %vm17456_vm1 }
  0xfb   : > { %v2392_v50 = vsel %vm17177_vm15, %v2377_v24, %v2379_v6  ;;  %11931 = vmatmul.mubr.msk.f32.vlgmr.msra.gmra.mrb[0].mxu0 %vm17464_vm0, %v11928_v35  ;;  %11927 = vmatmul.mubr.msk.f32.vlgmr.msra.gmra.mrb[2].mxu1 %vm17465_vm13, %v11915_v16  ;;  %vm17471_vm13 = vnez %v17420_v31 }
  0xfc   : > { %11936 = vmatpush1.msk.msra.mxu0 %vm17466_vm8, %v13824_v4  ;;  %v2408_v1 = vsel %vm17467_vm11, %v2392_v50, 0.0  ;;  %11932 = vmatprep.subr.msk.mxu1 %vm17468_vm12, %v13822_v3  ;;  %vm17470_vm8 = vmmov %vm17464_vm0 }
  0xfd   : > { %11942 = vmatprep.subr.msk.mxu0 %vm17469_vm3, %v2408_v1  ;;  %2288 = vmatprep.mubr.f32.mxu0 %v17200_v2  ;;  %vm17472_vm12 = vmmov %vm17456_vm1 }
  0xfe   : > { %v2381_v5 = vpop.permute.xlu1 %2380  ;;  %v2375_v53 = vpop.permute.xlu0 %2374  ;;  %11933 = vmatpush1.msk.msra.mxu1 %vm17456_vm1, %v13810_v0  ;;  %2217 = vmatprep.mubr.f32.mxu1 %v17200_v2  ;;  %v11941_v0 = vld [vmem:[%s17395_s29 + $0x28] sm:$0xff]  ;;  %vm17473_vm3 = vmmov %vm17456_vm1 }
  0xff   : > { %v2391_v54 = vsel %vm17177_vm15, %v2375_v53, %v2377_v24  ;;  %11937 = vmatmul.mubr.msk.f32.vlgmr.msra.gmra.mrb[2].mxu0 %vm17464_vm0, %v11928_v35  ;;  %11934 = vmatmul.mubr.msk.f32.vlgmr.msra.gmra.mrb[0].mxu1 %vm17470_vm8, %v11928_v35  ;;  %v2393_v4 = vsel %vm17177_vm15, %v2379_v6, %v2381_v5  ;;  %vm17474_vm8 = vmmov %vm17464_vm0 }
 0x100   : > { %v2407_v3 = vsel %vm17471_vm13, %v2391_v54, 0.0  ;;  %11938 = vmatprep.subr.msk.mxu1 %vm17472_vm12, %v13846_v8  ;;  %2359 = vmatprep.mubr.f32.mxu1 %v17200_v2  ;;  %vm17475_vm12 = vnez %v17429_v43  ;;  %vm17477_vm13 = vmmov %vm17456_vm1 }
 0x101   : > { %11943 = vmatpush1.msk.msra.mxu0 %vm17473_vm3, %v2407_v3  ;;  %11939 = vmatpush1.msk.msra.mxu1 %vm17456_vm1, %v13838_v7  ;;  %vm17476_vm3 = vnez %v17426_v42 }
 0x102   : > { %v2385_v39 = vpop.permute.xlu1 %2384  ;;  %v2383_v51 = vpop.permute.xlu0 %2382  ;;  %2508 = vmatprep.mubr.f32.mxu0 %v17200_v2  ;;  %v2409_v7 = vsel %vm17476_vm3, %v2393_v4, 0.0  ;;  %vm17480_vm3 = vcmask 1042432  }
 0x103   : > { %v2394_v40 = vsel %vm17177_vm15, %v2381_v5, %v2383_v51  ;;  %11940 = vmatmul.mubr.msk.f32.vlgmr.msra.gmra.mrb[2].mxu1 %vm17464_vm0, %v11928_v35  ;;  %11944 = vmatmul.mubr.msk.f32.vlgmr.msra.gmra.mrb[0].mxu0 %vm17474_vm8, %v11941_v0  ;;  %v2395_v56 = vsel %vm17177_vm15, %v2383_v51, %v2385_v39  ;;  %vm17478_vm8 = vnez %v17435_v47 }
 0x104   : > { %v2410_v8 = vsel %vm17475_vm12, %v2394_v40, 0.0  ;;  %2579 = vmatprep.mubr.f32.mxu1 %v17200_v2  ;;  %2650 = vmatprep.mubr.f32.mxu0 %v17200_v2 }
 0x105   : > { %11945 = vmatprep.subr.msk.mxu1 %vm17456_vm1, %v2410_v8  ;;  %vm17182_vm1 = vcmask 793600  }
 0x106   : > { %v2389_v57 = vpop.permute.xlu1 %2388  ;;  %11946 = vmatpush1.msk.msra.mxu1 %vm17477_vm13, %v2409_v7  ;;  %v2387_v58 = vpop.permute.xlu0 %2386  ;;  %vm17479_vm13 = vnez %v17432_v36 }
 0x107   : > { %v2406_v59 = vsel %vm17177_vm15, %v2389_v57, 0.0  ;;  %v2396_v60 = vsel %vm17177_vm15, %v2385_v39, %v2387_v58  ;;  %v2397_v61 = vsel %vm17177_vm15, %v2387_v58, %v2389_v57  ;;  %11947 = vmatmul.mubr.msk.f32.vlgmr.msra.gmra.mrb[0].mxu1 %vm17464_vm0, %v11941_v0  ;;  %v2411_v13 = vsel %vm17479_vm13, %v2395_v56, 0.0  ;;  %vm17481_vm15 = vmmov %vm17480_vm3 }
 0x108   : > { %v2413_v9 = vsel %vm14183_vm14, %v2397_v61, 0.0  ;;  %v2412_v10 = vsel %vm17478_vm8, %v2396_v60, 0.0  ;;  %v2414_v11 = vsel %vm14187_vm2, %v2406_v59, 0.0  ;;  %2721 = vmatprep.mubr.f32.mxu1 %v17200_v2  ;;  %vm17482_vm0 = vmmov %vm17480_vm3  ;;  %vm17484_vm8 = vcmask 23552  }
 0x109   : > { %11948 = vmatprep.subr.msk.mxu0 %vm17480_vm3, %v2412_v10  ;;  %11951 = vmatprep.subr.msk.mxu1 %vm17481_vm15, %v2414_v11  ;;  %vm17483_vm14 = vmmov %vm17482_vm0 }
 0x10a   : > { %v2741_v14 = vpop.permute.xlu1 %2740  ;;  %11949 = vmatpush1.msk.msra.mxu0 %vm17482_vm0, %v2411_v13  ;;  %11952 = vmatpush1.msk.msra.mxu1 %vm17483_vm14, %v2413_v9  ;;  %v2739_v15 = vpop.permute.xlu0 %2738  ;;  %vm17485_vm2 = vmmov %vm17484_vm8 }
 0x10b   : > { %v2754_v16 = vsel %vm17182_vm1, %v2739_v15, %v2741_v14  ;;  %11950 = vmatmul.mubr.msk.f32.vlgmr.msra.gmra.mrb[2].mxu0 %vm17484_vm8, %v11941_v0  ;;  %11953 = vmatmul.mubr.msk.f32.vlgmr.msra.gmra.mrb[2].mxu1 %vm17485_vm2, %v11941_v0  ;;  %vm17486_vm15 = vmmov %vm17482_vm0  ;;  %v11967_v0 = vld [vmem:[%s17395_s29 + $0x38] sm:$0xff] }
 0x10c   : > { %v2770_v18 = vsel %vm14012_vm5, %v2754_v16, 0.0  ;;  %2870 = vmatprep.mubr.f32.mxu0 %v17200_v2  ;;  %2941 = vmatprep.mubr.f32.mxu1 %v17200_v2  ;;  %vm17487_vm14 = vmmov %vm17482_vm0  ;;  %v11980_v16 = vld [vmem:[%s17395_s29 + $0x40] sm:$0xff] }
 0x10d   : > { %11955 = vmatprep.subr.msk.mxu0 %vm17486_vm15, %v2770_v18  ;;  %vm17488_vm3 = vmmov %vm17482_vm0  ;;  %vm17491_vm15 = vnez %v17417_v20 }
 0x10e   : > { %v2743_v21 = vpop.permute.xlu1 %2742  ;;  %v2737_v22 = vpop.permute.xlu0 %2736  ;;  %vm17489_vm8 = vmmov %vm17482_vm0 }
 0x10f   : > { %v2753_v25 = vsel %vm17182_vm1, %v2737_v22, %v2739_v15  ;;  %v2755_v30 = vsel %vm17182_vm1, %v2741_v14, %v2743_v21  ;;  %vm17490_vm0 = vmmov %vm17485_vm2 }
 0x110   : > { %v2769_v29 = vsel %vm14005_vm4, %v2753_v25, 0.0  ;;  %v2771_v26 = vsel %vm14036_vm6, %v2755_v30, 0.0 }
 0x111   : > { %11956 = vmatpush1.msk.msra.mxu0 %vm17487_vm14, %v2769_v29  ;;  %vm17187_vm14 = vcmask 785408  }
 0x112   : > { %v2747_v33 = vpop.permute.xlu1 %2746  ;;  %v2745_v34 = vpop.permute.xlu0 %2744  ;;  %11957 = vmatmul.mubr.msk.f32.vlgmr.msra.gmra.mrb[0].mxu0 %vm17485_vm2, %v11954_v28  ;;  %vm17492_vm2 = vnez %v17409_v62 }
 0x113   : > { %v2756_v41 = vsel %vm17182_vm1, %v2743_v21, %v2745_v34  ;;  %3012 = vmatprep.mubr.f32.mxu0 %v17200_v2  ;;  %v2757_v17 = vsel %vm17182_vm1, %v2745_v34, %v2747_v33 }
 0x114   : > { %v2772_v12 = vsel %vm14042_vm7, %v2756_v41, 0.0  ;;  %v2773_v50 = vsel %vm17492_vm2, %v2757_v17, 0.0 }
 0x115   : > { %11958 = vmatprep.subr.msk.mxu1 %vm17488_vm3, %v2772_v12 }
 0x116   : > { %v2751_v27 = vpop.permute.xlu1 %2750  ;;  %11959 = vmatpush1.msk.msra.mxu1 %vm17489_vm8, %v2771_v26  ;;  %v2749_v44 = vpop.permute.xlu0 %2748  ;;  %vm17493_vm8 = vmmov %vm17488_vm3 }
 0x117   : > { %v2768_v45 = vsel %vm17182_vm1, %v2751_v27, 0.0  ;;  %v2758_v46 = vsel %vm17182_vm1, %v2747_v33, %v2749_v44  ;;  %v2759_v23 = vsel %vm17182_vm1, %v2749_v44, %v2751_v27  ;;  %11960 = vmatmul.mubr.msk.f32.vlgmr.msra.gmra.mrb[0].mxu1 %vm17490_vm0, %v11954_v28  ;;  %vm17494_vm0 = vmmov %vm17488_vm3 }
 0x118   : > { %v2775_v35 = vsel %vm14097_vm10, %v2759_v23, 0.0  ;;  %v2774_v6 = vsel %vm14081_vm9, %v2758_v46, 0.0  ;;  %v2776_v24 = vsel %vm17491_vm15, %v2768_v45, 0.0  ;;  %3083 = vmatprep.mubr.f32.mxu1 %v17200_v2  ;;  %vm17495_vm1 = vmmov %vm17494_vm0  ;;  %vm17496_vm10 = vcmask 23552  }
 0x119   : > { %11961 = vmatprep.subr.msk.mxu0 %vm17488_vm3, %v2774_v6  ;;  %11964 = vmatprep.subr.msk.mxu1 %vm17493_vm8, %v2776_v24  ;;  %vm17497_vm15 = vmmov %vm17496_vm10 }
 0x11a   : > { %v3103_v1 = vpop.permute.xlu1 %3102  ;;  %11962 = vmatpush1.msk.msra.mxu0 %vm17494_vm0, %v2773_v50  ;;  %11965 = vmatpush1.msk.msra.mxu1 %vm17495_vm1, %v2775_v35  ;;  %v3101_v5 = vpop.permute.xlu0 %3100  ;;  %vm17498_vm9 = vmmov %vm17494_vm0 }
 0x11b   : > { %v3116_v53 = vsel %vm17187_vm14, %v3101_v5, %v3103_v1  ;;  %11963 = vmatmul.mubr.msk.f32.vlgmr.msra.gmra.mrb[2].mxu0 %vm17496_vm10, %v11954_v28  ;;  %11966 = vmatmul.mubr.msk.f32.vlgmr.msra.gmra.mrb[2].mxu1 %vm17497_vm15, %v11954_v28  ;;  %vm17499_vm1 = vmmov %vm17494_vm0 }
 0x11c   : > { %11968 = vmatprep.subr.msk.mxu0 %vm17498_vm9, %v3116_v53  ;;  %3210 = vmatprep.mubr.f32.mxu0 %v17200_v2  ;;  %vm17500_vm3 = vmmov %vm17496_vm10 }
 0x11d   : > { %3281 = vmatprep.mubr.f32.mxu1 %v17200_v2  ;;  %vm17501_vm9 = vmmov %vm17494_vm0 }
 0x11e   : > { %v3105_v54 = vpop.permute.xlu1 %3104  ;;  %v3099_v3 = vpop.permute.xlu0 %3098  ;;  %vm17502_vm10 = vmmov %vm17494_vm0 }
 0x11f   : > { %v3115_v4 = vsel %vm17187_vm14, %v3099_v3, %v3101_v5  ;;  %v3117_v8 = vsel %vm17187_vm14, %v3103_v1, %v3105_v54  ;;  %vm17503_vm15 = vmmov %vm17500_vm3 }
 0x120   : > { %11969 = vmatpush1.msk.msra.mxu0 %vm17499_vm1, %v3115_v4  ;;  %vm17504_vm8 = vmmov %vm17494_vm0  ;;  %vm17188_vm1 = vcmask 777216  }
 0x121   : > { %11970 = vmatmul.mubr.msk.f32.vlgmr.msra.gmra.mrb[0].mxu0 %vm17500_vm3, %v11967_v0  ;;  %vm17505_vm3 = vmmov %vm17494_vm0 }
 0x122   : > { %v3109_v39 = vpop.permute.xlu1 %3108  ;;  %v3107_v51 = vpop.permute.xlu0 %3106  ;;  %3352 = vmatprep.mubr.f32.mxu0 %v17200_v2 }
 0x123   : > { %v3118_v40 = vsel %vm17187_vm14, %v3105_v54, %v3107_v51  ;;  %v3119_v60 = vsel %vm17187_vm14, %v3107_v51, %v3109_v39 }
 0x124   : > { %11971 = vmatprep.subr.msk.mxu1 %vm17501_vm9, %v3118_v40  ;;  %vm17506_vm9 = vmmov %vm17494_vm0 }
 0x125   : > { %11972 = vmatpush1.msk.msra.mxu1 %vm17502_vm10, %v3117_v8  ;;  %vm17507_vm10 = vmmov %vm17503_vm15 }
 0x126   : > { %v3113_v7 = vpop.permute.xlu1 %3112  ;;  %v3111_v56 = vpop.permute.xlu0 %3110  ;;  %11973 = vmatmul.mubr.msk.f32.vlgmr.msra.gmra.mrb[0].mxu1 %vm17503_vm15, %v11967_v0  ;;  %vm17508_vm15 = vmmov %vm17507_vm10 }
 0x127   : > { %v3121_v57 = vsel %vm17187_vm14, %v3111_v56, %v3113_v7  ;;  %v3120_v58 = vsel %vm17187_vm14, %v3109_v39, %v3111_v56  ;;  %v3123_v59 = vsel %vm17187_vm14, %v3113_v7, 0.0  ;;  %3423 = vmatprep.mubr.f32.mxu1 %v17200_v2  ;;  %vm17518_vm14 = vnez %v17435_v47 }
 0x128   : > { %11974 = vmatprep.subr.msk.mxu0 %vm17504_vm8, %v3120_v58  ;;  %11977 = vmatprep.subr.msk.mxu1 %vm17494_vm0, %v3123_v59  ;;  %vm17509_vm8 = vmmov %vm17494_vm0  ;;  %vm17510_vm0 = vnez %v17420_v31 }
 0x129   : > { %11975 = vmatpush1.msk.msra.mxu0 %vm17505_vm3, %v3119_v60  ;;  %11978 = vmatpush1.msk.msra.mxu1 %vm17506_vm9, %v3121_v57  ;;  %vm17511_vm9 = vmmov %vm17507_vm10 }
 0x12a   : > { %v3443_v61 = vpop.permute.xlu1 %3442  ;;  %v3441_v9 = vpop.permute.xlu0 %3440  ;;  %11976 = vmatmul.mubr.msk.f32.vlgmr.msra.gmra.mrb[2].mxu0 %vm17507_vm10, %v11967_v0  ;;  %11979 = vmatmul.mubr.msk.f32.vlgmr.msra.gmra.mrb[2].mxu1 %vm17508_vm15, %v11967_v0  ;;  %vm17512_vm10 = vnez %v17426_v42  ;;  %vm17513_vm15 = vmmov %vm17505_vm3 }
 0x12b   : > { %v3456_v10 = vsel %vm17188_vm1, %v3441_v9, %v3443_v61  ;;  %3572 = vmatprep.mubr.f32.mxu0 %v17200_v2  ;;  %3643 = vmatprep.mubr.f32.mxu1 %v17200_v2 }
 0x12c   : > { %v3472_v11 = vsel %vm17467_vm11, %v3456_v10, 0.0 }
 0x12d   : > { %11981 = vmatprep.subr.msk.mxu0 %vm17509_vm8, %v3472_v11  ;;  %vm17514_vm8 = vmmov %vm17505_vm3 }
 0x12e   : > { %v3445_v13 = vpop.permute.xlu1 %3444  ;;  %v3439_v14 = vpop.permute.xlu0 %3438 }
 0x12f   : > { %v3455_v15 = vsel %vm17188_vm1, %v3439_v14, %v3441_v9  ;;  %v3457_v22 = vsel %vm17188_vm1, %v3443_v61, %v3445_v13 }
 0x130   : > { %v3471_v18 = vsel %vm17510_vm0, %v3455_v15, 0.0  ;;  %v3473_v30 = vsel %vm17512_vm10, %v3457_v22, 0.0  ;;  %vm17519_vm10 = vmmov %vm17514_vm8 }
 0x131   : > { %11982 = vmatpush1.msk.msra.mxu0 %vm17505_vm3, %v3471_v18  ;;  %vm17515_vm3 = vmmov %vm17511_vm9 }
 0x132   : > { %v3449_v21 = vpop.permute.xlu1 %3448  ;;  %11983 = vmatmul.mubr.msk.f32.vlgmr.msra.gmra.mrb[0].mxu0 %vm17511_vm9, %v11980_v16  ;;  %vm17516_vm9 = vnez %v17446_v55 }
 0x133   : > { %v3447_v25 = vpop.permute.xlu0 %3446  ;;  %3714 = vmatprep.mubr.f32.mxu0 %v17200_v2 }
 0x134   : > { %v3458_v28 = vsel %vm17188_vm1, %v3445_v13, %v3447_v25  ;;  %v3459_v34 = vsel %vm17188_vm1, %v3447_v25, %v3449_v21 }
 0x135   : > { %v3474_v29 = vsel %vm17475_vm12, %v3458_v28, 0.0  ;;  %v3475_v46 = vsel %vm17479_vm13, %v3459_v34, 0.0 }
 0x136   : > { %11984 = vmatprep.subr.msk.mxu1 %vm17513_vm15, %v3474_v29  ;;  %v3453_v33 = vpop.permute.xlu1 %3452  ;;  %vm17517_vm15 = vnez %v17443_v52 }
 0x137   : > { %v3470_v41 = vsel %vm17188_vm1, %v3453_v33, 0.0  ;;  %11985 = vmatpush1.msk.msra.mxu1 %vm17514_vm8, %v3473_v30  ;;  %v3451_v12 = vpop.permute.xlu0 %3450 }
 0x138   : > { %v3460_v26 = vsel %vm17188_vm1, %v3449_v21, %v3451_v12  ;;  %v3461_v17 = vsel %vm17188_vm1, %v3451_v12, %v3453_v33  ;;  %11986 = vmatmul.mubr.msk.f32.vlgmr.msra.gmra.mrb[0].mxu1 %vm17515_vm3, %v11980_v16  ;;  %v3478_v27 = vsel %vm17516_vm9, %v3470_v41, 0.0  ;;  %vm17520_vm1 = vmmov %vm17514_vm8  ;;  %vm17522_vm9 = vcmask 23552  }
 0x139   : > { %v3477_v44 = vsel %vm17517_vm15, %v3461_v17, 0.0  ;;  %v3476_v45 = vsel %vm17518_vm14, %v3460_v26, 0.0  ;;  %11990 = vmatprep.subr.msk.mxu1 %vm17519_vm10, %v3478_v27  ;;  %3785 = vmatprep.mubr.f32.mxu1 %v17200_v2  ;;  %vm17521_vm3 = vmmov %vm17520_vm1 }
 0x13a   : > { %11987 = vmatprep.subr.msk.mxu0 %vm17514_vm8, %v3476_v45  ;;  %11991 = vmatpush1.msk.msra.mxu1 %vm17520_vm1, %v3477_v44  ;;  %vm17523_vm12 = vmmov %vm17522_vm9 }
 0x13b   : > { %11988 = vmatpush1.msk.msra.mxu0 %vm17521_vm3, %v3475_v46 }
 0x13c   : > { %11989 = vmatmul.mubr.msk.f32.vlgmr.msra.gmra.mrb[2].mxu0 %vm17522_vm9, %v11980_v16  ;;  %11992 = vmatmul.mubr.msk.f32.vlgmr.msra.gmra.mrb[2].mxu1 %vm17523_vm12, %v11980_v16  ;;  %vm17528_vm12 = vcmask 261120   ;;  %vm17210_vm9 = vcmask 64512  }
 0x13d   : > { %4017 = vmatprep.mubr.f32.mxu0 %v17200_v2  ;;  %4088 = vmatprep.mubr.f32.mxu1 %v17200_v2  ;;  %vm17529_vm1 = vmmov %vm17528_vm12 }
 0x13e   : > { %vm14662_vm10 = vmneg %vm17529_vm1 }
 0x13f   : > { %vm17533_vm8 = vmmov %vm17529_vm1 }
 0x140   : > { %vm17534_vm3 = vmmov %vm17529_vm1 }
 0x149   : > { %v3804_v35 = vpop.permute.xlu0 %3803 }
 0x14c   : > { %v14434_v23 = vpop.permute.xlu1 %3833 }
 0x150   : > { %v14441_v5 = vpop.permute.xlu1 %3847 }
 0x205   : > { %v3574_v6 = vpop.f32.mrb[0].mxu0 }
 0x206   : > { %v14437_v24 = vadd.f32 %v3804_v35, %v3574_v6  ;;  %v3576_v50 = vpop.f32.mrb[1].mxu0 }
 0x207   : > { %v14439_v1 = vadd.f32 %v3804_v35, %v3576_v50 }
 0x208   : > { %3814 = vst [vmem:[%s14443_s22] sm:$0xff] %v14437_v24  ;;  %v3836_v53 = vmul.f32 %v14434_v23, %v14437_v24 }
 0x209   : > { %3815 = vst [vmem:[%s14443_s22 + $0x8] sm:$0xff] %v14439_v1  ;;  %v3837_v11 = vmul.f32 %v14434_v23, %v14439_v1 }
 0x20a   : > { %v3850_v54 = vadd.f32 %v14441_v5, %v3836_v53  ;;  %v6874_v53 = vld [vmem:[%s17134_s7 + $0x8] sm:$0xf] }
 0x20b   : > { %v3645_v3 = vpop.f32.mrb[0].mxu1  ;;  %v3851_v14 = vadd.f32 %v14441_v5, %v3837_v11 }
 0x20c   : > { %v14452_v0 = vadd.f32 %v3804_v35, %v3645_v3  ;;  %v3647_v4 = vpop.f32.mrb[1].mxu1  ;;  %v14454_v39 = vmax.f32 %v3850_v54, 0.0 }
 0x20d   : > { %v14456_v51 = vadd.f32 %v3804_v35, %v3647_v4  ;;  %v14503_v16 = vmax.f32 %v3851_v14, 0.0 }
 0x20e   : > { %3816 = vst [vmem:[%s14443_s22 + $0x10] sm:$0xff] %v14452_v0  ;;  %v3838_v40 = vmul.f32 %v14434_v23, %v14452_v0  ;;  %3915 = vrot.lane.b32.xlu0 %v14454_v39, %s13616_s21 }
 0x20f   : > { %3817 = vst [vmem:[%s14443_s22 + $0x18] sm:$0xff] %v14456_v51  ;;  %v3716_v8 = vpop.f32.mrb[2].mxu0  ;;  %v3787_v7 = vpop.f32.mrb[2].mxu1  ;;  %v3839_v13 = vmul.f32 %v14434_v23, %v14456_v51 }
 0x210   : > { %v14466_v56 = vadd.f32 %v3804_v35, %v3716_v8  ;;  %v14468_v57 = vadd.f32 %v3804_v35, %v3787_v7  ;;  %v3718_v58 = vpop.f32.mrb[3].mxu0  ;;  %v3789_v59 = vpop.f32.mrb[3].mxu1  ;;  %v3852_v60 = vadd.f32 %v14441_v5, %v3838_v40  ;;  %v17530_v40 = vmov 0  ;;  %v11993_v8 = vld [vmem:[%s17132_s5 + $0x4] sm:$0xf] }
 0x211   : > { %v14471_v61 = vadd.f32 %v3804_v35, %v3718_v58  ;;  %v14473_v9 = vadd.f32 %v3804_v35, %v3789_v59  ;;  %v3853_v15 = vadd.f32 %v14441_v5, %v3839_v13  ;;  %v6835_v35 = vld [vmem:[%s17133_s6] sm:$0xf]  ;;  %v17531_v40 = vsel %vm14662_vm10, 4294967295, %v17530_v40  ;;  %v6902_v58 = vld [vmem:[%s17135_s8 + $0x8] sm:$0xf] }
 0x212   : > { %17524 = vst [vmem:[#allocation31_spill] sm:$0xff] %v14466_v56  ;;  %17525 = vst [vmem:[#allocation32_spill] sm:$0xff] %v14468_v57  ;;  %v14479_v10 = vmax.f32 %v3852_v60, 0.0  ;;  %v3840_v21 = vmul.f32 %v14434_v23, %v14466_v56  ;;  %v3842_v25 = vmul.f32 %v14434_v23, %v14468_v57  ;;  %v6901_v7 = vld [vmem:[%s17135_s8] sm:$0xff] }
 0x213   : > { %17526 = vst [vmem:[#allocation33_spill] sm:$0xff] %v14471_v61  ;;  %17527 = vst [vmem:[#allocation34_spill] sm:$0xff] %v14473_v9  ;;  %v14509_v18 = vmax.f32 %v3853_v15, 0.0  ;;  %v3841_v22 = vmul.f32 %v14434_v23, %v14471_v61  ;;  %v3843_v29 = vmul.f32 %v14434_v23, %v14473_v9 }
 0x214   : > { %3818 = vst [vmem:[%s14443_s22 + $0x20] sm:$0xff] %v14466_v56  ;;  %3820 = vst [vmem:[%s14443_s22 + $0x30] sm:$0xff] %v14468_v57  ;;  %5499 = vrot.lane.b32.xlu1 %v14479_v10, %s17194_s0  ;;  %3919 = vrot.lane.b32.xlu0 %v14479_v10, %s13616_s21  ;;  %v3854_v28 = vadd.f32 %v14441_v5, %v3840_v21  ;;  %v3856_v33 = vadd.f32 %v14441_v5, %v3842_v25 }
 0x215   : > { %3819 = vst [vmem:[%s14443_s22 + $0x28] sm:$0xff] %v14471_v61  ;;  %3821 = vst [vmem:[%s14443_s22 + $0x38] sm:$0xff] %v14473_v9  ;;  %v3855_v30 = vadd.f32 %v14441_v5, %v3841_v22  ;;  %v3857_v41 = vadd.f32 %v14441_v5, %v3843_v29  ;;  %v6873_v5 = vld [vmem:[%s17134_s7] sm:$0xff] }
 0x216   : > { %v14558_v34 = vmax.f32 %v3854_v28, 0.0  ;;  %v14567_v26 = vmax.f32 %v3856_v33, 0.0  ;;  %17532 = vst [vmem:[#allocation35_spill] sm:$0xff] %v17531_v40 }
 0x217   : > { %v14565_v12 = vmax.f32 %v3855_v30, 0.0  ;;  %v14573_v17 = vmax.f32 %v3857_v41, 0.0 }
 0x218   : > { %5836 = vrot.lane.b32.xlu1 %v14479_v10, %s17190_s30  ;;  %3874 = vrot.lane.b32.xlu0 %v14454_v39, %s13617_s23 }
 0x21c   : > { %6173 = vrot.lane.b32.xlu1 %v14479_v10, %s17192_s18  ;;  %3878 = vrot.lane.b32.xlu0 %v14479_v10, %s13617_s23 }
 0x220   : > { %3917 = vrot.lane.b32.xlu1 %v14503_v16, %s13616_s21  ;;  %4524 = vrot.lane.b32.xlu0 %v14454_v39, %s17198_s27 }
 0x224   : > { %3921 = vrot.lane.b32.xlu1 %v14509_v18, %s13616_s21  ;;  %4528 = vrot.lane.b32.xlu0 %v14479_v10, %s17198_s27 }
 0x228   : > { %3876 = vrot.lane.b32.xlu1 %v14503_v16, %s13617_s23  ;;  %4861 = vrot.lane.b32.xlu0 %v14454_v39, %s17196_s26 }
 0x22c   : > { %3880 = vrot.lane.b32.xlu1 %v14509_v18, %s13617_s23  ;;  %4865 = vrot.lane.b32.xlu0 %v14479_v10, %s17196_s26 }
 0x230   : > { %4526 = vrot.lane.b32.xlu1 %v14503_v16, %s17198_s27  ;;  %5495 = vrot.lane.b32.xlu0 %v14454_v39, %s17194_s0 }
 0x234   : > { %4530 = vrot.lane.b32.xlu1 %v14509_v18, %s17198_s27  ;;  %5832 = vrot.lane.b32.xlu0 %v14454_v39, %s17190_s30 }
 0x238   : > { %4863 = vrot.lane.b32.xlu1 %v14503_v16, %s17196_s26  ;;  %6169 = vrot.lane.b32.xlu0 %v14454_v39, %s17192_s18 }
 0x23c   : > { %4867 = vrot.lane.b32.xlu1 %v14509_v18, %s17196_s26  ;;  %5497 = vrot.lane.b32.xlu0 %v14503_v16, %s17194_s0 }
 0x240   : > { %5501 = vrot.lane.b32.xlu1 %v14509_v18, %s17194_s0  ;;  %5834 = vrot.lane.b32.xlu0 %v14503_v16, %s17190_s30 }
 0x244   : > { %5838 = vrot.lane.b32.xlu1 %v14509_v18, %s17190_s30  ;;  %6171 = vrot.lane.b32.xlu0 %v14503_v16, %s17192_s18 }
 0x248   : > { %6175 = vrot.lane.b32.xlu1 %v14509_v18, %s17192_s18  ;;  %3923 = vrot.lane.b32.xlu0 %v14558_v34, %s13616_s21 }
 0x24c   : > { %3925 = vrot.lane.b32.xlu1 %v14565_v12, %s13616_s21  ;;  %3927 = vrot.lane.b32.xlu0 %v14567_v26, %s13616_s21 }
 0x250   : > { %3929 = vrot.lane.b32.xlu1 %v14573_v17, %s13616_s21  ;;  %3882 = vrot.lane.b32.xlu0 %v14558_v34, %s13617_s23 }
 0x254   : > { %3884 = vrot.lane.b32.xlu1 %v14565_v12, %s13617_s23  ;;  %3886 = vrot.lane.b32.xlu0 %v14567_v26, %s13617_s23 }
 0x258   : > { %3888 = vrot.lane.b32.xlu1 %v14573_v17, %s13617_s23  ;;  %4532 = vrot.lane.b32.xlu0 %v14558_v34, %s17198_s27 }
 0x25c   : > { %4534 = vrot.lane.b32.xlu1 %v14565_v12, %s17198_s27  ;;  %4536 = vrot.lane.b32.xlu0 %v14567_v26, %s17198_s27 }
 0x260   : > { %4538 = vrot.lane.b32.xlu1 %v14573_v17, %s17198_s27  ;;  %4869 = vrot.lane.b32.xlu0 %v14558_v34, %s17196_s26  ;;  %s11745_s27 = sshll.u32 %s14443_s22, 4  ;;  %s17051_s27 = int_to_ptr.vmem [resolvable:$true] %s11745_s27 }
 0x264   : > { %4871 = vrot.lane.b32.xlu1 %v14565_v12, %s17196_s26  ;;  %4873 = vrot.lane.b32.xlu0 %v14567_v26, %s17196_s26 }
 0x268   : > { %4875 = vrot.lane.b32.xlu1 %v14573_v17, %s17196_s26  ;;  %6500 = vrot.lane.b32.xlu0 %v14503_v16, %s13623_s24  ;;  %s11727_s26 = scalar_lea.sflag [#allocation4], %s14432_s19 }
 0x26c   : > { %6502 = vrot.lane.b32.xlu1 %v14479_v10, %s13623_s24  ;;  %5503 = vrot.lane.b32.xlu0 %v14558_v34, %s17194_s0 }
 0x270   : > { %6504 = vrot.lane.b32.xlu1 %v14509_v18, %s13623_s24  ;;  %5507 = vrot.lane.b32.xlu0 %v14567_v26, %s17194_s0 }
 0x274   : > { %5505 = vrot.lane.b32.xlu1 %v14565_v12, %s17194_s0  ;;  %5840 = vrot.lane.b32.xlu0 %v14558_v34, %s17190_s30 }
 0x278   : > { %5509 = vrot.lane.b32.xlu1 %v14573_v17, %s17194_s0  ;;  %5844 = vrot.lane.b32.xlu0 %v14567_v26, %s17190_s30  ;;  %s17633_s0 = smov 31  }
 0x27c   : > { %5842 = vrot.lane.b32.xlu1 %v14565_v12, %s17190_s30  ;;  %6177 = vrot.lane.b32.xlu0 %v14558_v34, %s17192_s18 }
 0x280   : > { %5846 = vrot.lane.b32.xlu1 %v14573_v17, %s17190_s30  ;;  %6181 = vrot.lane.b32.xlu0 %v14567_v26, %s17192_s18  ;;  %v3916_v27 = vpop.permute.xlu0 %3915  ;;  %s17650_s30 = smov 127  }
 0x284   : > { %6179 = vrot.lane.b32.xlu1 %v14565_v12, %s17192_s18  ;;  %6498 = vrot.lane.b32.xlu0 %v14454_v39, %s13623_s24 }
 0x286   : > { %v14631_v44 = vpop.permute.xlu1 %5499  ;;  %v3920_v45 = vpop.permute.xlu0 %3919 }
 0x288   : > { %6183 = vrot.lane.b32.xlu1 %v14573_v17, %s17192_s18  ;;  %6506 = vrot.lane.b32.xlu0 %v14558_v34, %s13623_s24  ;;  %s17634_s18 = smov 1  }
 0x28a   : > { %v14637_v46 = vpop.permute.xlu1 %5836  ;;  %v3875_v23 = vpop.permute.xlu0 %3874 }
 0x28c   : > { %6508 = vrot.lane.b32.xlu1 %v14565_v12, %s13623_s24  ;;  %6510 = vrot.lane.b32.xlu0 %v14567_v26, %s13623_s24 }
 0x28e   : > { %v14646_v6 = vpop.permute.xlu1 %6173  ;;  %v14648_v50 = vpop.permute.xlu0 %3878 }
 0x290   : > { %6512 = vrot.lane.b32.xlu1 %v14573_v17, %s13623_s24  ;;  %6838 = vperm.xlu0 %13038, %v6835_v35  }
 0x292   : > { %v3918_v54 = vpop.permute.xlu1 %3917  ;;  %v14658_v3 = vpop.permute.xlu0 %4524 }
 0x293   : > { %v3931_v4 = vsel %vm17528_vm12, %v3916_v27, %v3918_v54  ;;  %v3932_v13 = vsel %vm17534_vm3, %v3918_v54, %v3920_v45  ;;  %vm17535_vm12 = vmmov %vm17529_vm1 }
 0x294   : > { %6877 = vperm.xlu1 %13039, %v6873_v5   ;;  %6882 = vperm.xlu0 %13038, %v6874_v53  }
 0x295   : > { %3953 = vmatprep.subr.mxu0 %v3931_v4 }
 0x296   : > { %11995 = vmatpush1.msk.msra.mxu0 %vm14662_vm10, %v3916_v27  ;;  %v3922_v59 = vpop.permute.xlu1 %3921  ;;  %v14677_v60 = vpop.permute.xlu0 %4528  ;;  %vm17538_vm10 = vmmov %vm17529_vm1 }
 0x297   : > { %v3933_v11 = vsel %vm17533_vm8, %v3920_v45, %v3922_v59  ;;  %11996 = vmatmul.mubr.msk.f32.vlgmr.msra.gmra.mrb[4].mxu0 %vm17210_vm9, %v11993_v8  ;;  %vm17536_vm8 = vcmask 269312  }
 0x298   : > { %6905 = vperm.xlu1 %13039, %v6901_v7   ;;  %6910 = vperm.xlu0 %13038, %v6902_v58   ;;  %vm17537_vm3 = vmmov %vm17536_vm8 }
 0x299   : > { %4024 = vmatprep.subr.mxu1 %v3933_v11  ;;  %4159 = vmatprep.mubr.f32.mxu0 %v17200_v2  ;;  %v3905_v9 = vsel %vm17537_vm3, 0.0, %v3875_v23 }
 0x29a   : > { %4025 = vmatpush1.msra.mxu1 %v3932_v13  ;;  %v3877_v14 = vpop.permute.xlu1 %3876  ;;  %v14683_v15 = vpop.permute.xlu0 %4861 }
 0x29b   : > { %11997 = vmatmul.mubr.msk.f32.vlgmr.msra.gmra.mrb[4].mxu1 %vm17210_vm9, %v11993_v8  ;;  %v3890_v40 = vsel %vm17536_vm8, %v3875_v23, %v3877_v14 }
 0x29c   : > { %4230 = vmatprep.mubr.f32.mxu1 %v17200_v2 }
 0x29e   : > { %v3881_v21 = vpop.permute.xlu1 %3880  ;;  %v14687_v22 = vpop.permute.xlu0 %4865 }
 0x2a2   : > { %v14689_v25 = vpop.permute.xlu1 %4526  ;;  %v14691_v28 = vpop.permute.xlu0 %5495 }
 0x2a6   : > { %v14693_v29 = vpop.permute.xlu1 %4530  ;;  %v14695_v30 = vpop.permute.xlu0 %5832 }
 0x2aa   : > { %v14697_v33 = vpop.permute.xlu1 %4863  ;;  %v14699_v41 = vpop.permute.xlu0 %6169 }
 0x2ae   : > { %v14701_v27 = vpop.permute.xlu1 %4867  ;;  %v14703_v45 = vpop.permute.xlu0 %5497 }
 0x2b2   : > { %v14705_v35 = vpop.permute.xlu1 %5501  ;;  %v14707_v5 = vpop.permute.xlu0 %5834 }
 0x2b6   : > { %v14709_v53 = vpop.permute.xlu1 %5838  ;;  %v14711_v54 = vpop.permute.xlu0 %6171 }
 0x2ba   : > { %v14713_v4 = vpop.permute.xlu1 %6175  ;;  %v3924_v7 = vpop.permute.xlu0 %3923 }
 0x2bb   : > { %v3934_v2 = vsel %vm17529_vm1, %v3922_v59, %v3924_v7 }
 0x2be   : > { %v3926_v58 = vpop.permute.xlu1 %3925  ;;  %v3928_v11 = vpop.permute.xlu0 %3927 }
 0x2bf   : > { %v3935_v13 = vsel %vm17535_vm12, %v3924_v7, %v3926_v58  ;;  %vm17540_vm12 = vmmov %vm17529_vm1 }
 0x2c0   : > { %4095 = vmatprep.subr.mxu0 %v3935_v13  ;;  %v17539_v13 = vmov 0.0   ;;  %v3936_v23 = vsel %vm17540_vm12, %v3926_v58, %v3928_v11  ;;  %vm17541_vm1 = vmmov %vm17537_vm3  ;;  %vm17545_vm12 = vnez %v17411_v63  ;;  %v12012_v58 = vld [vmem:[%s17132_s5 + $0x8] sm:$0xf] }
 0x2c1   : > { %4096 = vmatpush1.msra.mxu0 %v3934_v2  ;;  %v3914_v2 = vld [vmem:[%s17132_s5] sm:$0xf]  ;;  %vm17543_vm8 = vmmov %vm17541_vm1 }
 0x2c2   : > { %v3930_v57 = vpop.permute.xlu1 %3929  ;;  %11998 = vmatmul.mubr.msk.f32.vlgmr.msra.gmra.mrb[6].mxu0 %vm17210_vm9, %v11993_v8  ;;  %12000 = vmatprep.subr.msk.mxu0 %vm14012_vm5, %v3890_v40  ;;  %v3883_v61 = vpop.permute.xlu0 %3882  ;;  %vm17544_vm3 = vmmov %vm17541_vm1 }
 0x2c3   : > { %12001 = vmatpush1.msk.msra.mxu0 %vm14005_vm4, %v3905_v9  ;;  %v3937_v56 = vsel %vm17538_vm10, %v3928_v11, %v3930_v57  ;;  %4304 = vmatprep.mubr.f32.mxu0 %v17539_v13  ;;  %v3892_v9 = vsel %vm17541_vm1, %v14648_v50, %v3881_v21  ;;  %vm17542_vm10 = vmmov %vm17541_vm1  ;;  %v3893_v7 = vsel %vm17544_vm3, %v3881_v21, %v3883_v61  ;;  %vm17546_vm1 = vcmask 252928  }
 0x2c4   : > { %4166 = vmatprep.subr.mxu1 %v3937_v56  ;;  %v3891_v57 = vsel %vm17542_vm10, %v3877_v14, %v14648_v50  ;;  %vm17547_vm10 = vmmov %vm17546_vm1 }
 0x2c5   : > { %4167 = vmatpush1.msra.mxu1 %v3936_v23  ;;  %v4555_v14 = vsel %vm17547_vm10, 0.0, %v14658_v3  ;;  %vm17550_vm10 = vnez %v17414_v19 }
 0x2c6   : > { %v3885_v59 = vpop.permute.xlu1 %3884  ;;  %11999 = vmatmul.mubr.msk.f32.vlgmr.msra.gmra.mrb[6].mxu1 %vm17210_vm9, %v11993_v8  ;;  %12002 = vmatmul.mubr.msk.f32.vlgmr.msra.gmra.mrb[4].mxu0 %vm17210_vm9, %v3914_v2  ;;  %v3887_v40 = vpop.permute.xlu0 %3886 }
 0x2c7   : > { %12003 = vmatprep.subr.msk.mxu1 %vm14042_vm7, %v3892_v9  ;;  %v3894_v56 = vsel %vm17543_vm8, %v3883_v61, %v3885_v59  ;;  %4375 = vmatprep.mubr.f32.mxu1 %v17539_v13  ;;  %v4540_v61 = vsel %vm17546_vm1, %v14658_v3, %v14689_v25  ;;  %vm17548_vm8 = vmmov %vm17544_vm3  ;;  %v3895_v11 = vsel %vm17544_vm3, %v3885_v59, %v3887_v40 }
 0x2c8   : > { %12004 = vmatpush1.msk.msra.mxu1 %vm14036_vm6, %v3891_v57  ;;  %12006 = vmatprep.subr.msk.mxu0 %vm17545_vm12, %v3894_v56  ;;  %vm17549_vm1 = vnez %v17417_v20 }
 0x2c9   : > { %12007 = vmatpush1.msk.msra.mxu0 %vm17492_vm2, %v3893_v7  ;;  %4446 = vmatprep.mubr.f32.mxu0 %v17539_v13  ;;  %v12025_v7 = vld [vmem:[%s17132_s5 + $0xc] sm:$0xf] }
 0x2ca   : > { %v3889_v50 = vpop.permute.xlu1 %3888  ;;  %12005 = vmatmul.mubr.msk.f32.vlgmr.msra.gmra.mrb[4].mxu1 %vm17210_vm9, %v3914_v2  ;;  %12008 = vmatmul.mubr.msk.f32.vlgmr.msra.gmra.mrb[6].mxu0 %vm17210_vm9, %v3914_v2  ;;  %v4533_v8 = vpop.permute.xlu0 %4532 }
 0x2cb   : > { %v3896_v21 = vsel %vm17548_vm8, %v3887_v40, %v3889_v50  ;;  %12013 = vmatprep.subr.msk.mxu0 %vm17467_vm11, %v4540_v61  ;;  %4517 = vmatprep.mubr.f32.mxu1 %v17539_v13  ;;  %vm17551_vm8 = vcmask 252928  }
 0x2cc   : > { %12014 = vmatpush1.msk.msra.mxu0 %vm17510_vm0, %v4555_v14  ;;  %12009 = vmatprep.subr.msk.mxu1 %vm17549_vm1, %v3896_v21  ;;  %v4542_v23 = vsel %vm17551_vm8, %v14677_v60, %v14693_v29  ;;  %vm17552_vm3 = vmmov %vm17551_vm8  ;;  %vm17553_vm0 = vnez %v17429_v43  ;;  %vm17557_vm8 = vcmask 64512  }
 0x2cd   : > { %12010 = vmatpush1.msk.msra.mxu1 %vm17550_vm10, %v3895_v11  ;;  %4633 = vmatprep.mubr.f32.mxu0 %v17539_v13  ;;  %v4541_v9 = vsel %vm17552_vm3, %v14689_v25, %v14677_v60  ;;  %vm17554_vm11 = vmmov %vm17552_vm3 }
 0x2ce   : > { %v4535_v3 = vpop.permute.xlu1 %4534  ;;  %12011 = vmatmul.mubr.msk.f32.vlgmr.msra.gmra.mrb[6].mxu1 %vm17210_vm9, %v3914_v2  ;;  %12015 = vmatmul.mubr.msk.f32.vlgmr.msra.gmra.mrb[4].mxu0 %vm17210_vm9, %v12012_v58  ;;  %v4537_v59 = vpop.permute.xlu0 %4536  ;;  %vm17555_vm10 = vmmov %vm17552_vm3  ;;  %vm17556_vm9 = vnez %v17426_v42  ;;  %vm17559_vm3 = vcmask 7168  }
 0x2cf   : > { %12016 = vmatprep.subr.msk.mxu1 %vm17553_vm0, %v4542_v23  ;;  %v4544_v40 = vsel %vm17554_vm11, %v4533_v8, %v4535_v3  ;;  %4704 = vmatprep.mubr.f32.mxu1 %v17539_v13  ;;  %v4543_v2 = vsel %vm17555_vm10, %v14693_v29, %v4533_v8  ;;  %vm17558_vm11 = vmmov %vm17557_vm8  ;;  %v4877_v25 = vsel %vm17559_vm3, %v14683_v15, %v14697_v33 }
 0x2d0   : > { %12017 = vmatpush1.msk.msra.mxu1 %vm17556_vm9, %v4541_v9  ;;  %12019 = vmatprep.subr.msk.mxu0 %vm17518_vm14, %v4544_v40  ;;  %vm17560_vm10 = vmmov %vm17559_vm3  ;;  %vm17561_vm9 = vcmask 252928  }
 0x2d1   : > { %12020 = vmatpush1.msk.msra.mxu0 %vm17479_vm13, %v4543_v2  ;;  %4775 = vmatprep.mubr.f32.mxu0 %v17539_v13  ;;  %v4892_v57 = vsel %vm17560_vm10, 0.0, %v14683_v15  ;;  %v4879_v61 = vsel %vm17560_vm10, %v14687_v22, %v14701_v27 }
 0x2d2   : > { %v4539_v60 = vpop.permute.xlu1 %4538  ;;  %12018 = vmatmul.mubr.msk.f32.vlgmr.msra.gmra.mrb[4].mxu1 %vm17557_vm8, %v12012_v58  ;;  %12021 = vmatmul.mubr.msk.f32.vlgmr.msra.gmra.mrb[6].mxu0 %vm17558_vm11, %v12012_v58  ;;  %v4870_v29 = vpop.permute.xlu0 %4869  ;;  %vm17562_vm8 = vmmov %vm17561_vm9  ;;  %vm17563_vm11 = vnez %v17446_v55 }
 0x2d3   : > { %v4546_v56 = vsel %vm17561_vm9, %v4537_v59, %v4539_v60  ;;  %12026 = vmatprep.subr.msk.mxu0 %vm14012_vm5, %v4877_v25  ;;  %4846 = vmatprep.mubr.f32.mxu1 %v17539_v13  ;;  %v4545_v50 = vsel %vm17562_vm8, %v4535_v3, %v4537_v59  ;;  %vm17564_vm9 = vcmask 64512   ;;  %vm17566_vm8 = vmmov %vm17560_vm10  ;;  %v12038_v3 = vld [vmem:[%s17132_s5 + $0x10] sm:$0xf] }
 0x2d4   : > { %12027 = vmatpush1.msk.msra.mxu0 %vm14005_vm4, %v4892_v57  ;;  %12022 = vmatprep.subr.msk.mxu1 %vm17563_vm11, %v4546_v56  ;;  %vm17565_vm3 = vmmov %vm17564_vm9  ;;  %v4878_v14 = vsel %vm17566_vm8, %v14697_v33, %v14687_v22 }
 0x2d5   : > { %12023 = vmatpush1.msk.msra.mxu1 %vm17517_vm15, %v4545_v50  ;;  %4970 = vmatprep.mubr.f32.mxu0 %v17539_v13  ;;  %vm17567_vm15 = vmmov %vm17566_vm8 }
 0x2d6   : > { %v4872_v15 = vpop.permute.xlu1 %4871  ;;  %12024 = vmatmul.mubr.msk.f32.vlgmr.msra.gmra.mrb[6].mxu1 %vm17564_vm9, %v12012_v58  ;;  %12028 = vmatmul.mubr.msk.f32.vlgmr.msra.gmra.mrb[4].mxu0 %vm17565_vm3, %v12025_v7  ;;  %v4874_v8 = vpop.permute.xlu0 %4873  ;;  %vm17568_vm9 = vmmov %vm17566_vm8 }
 0x2d7   : > { %12029 = vmatprep.subr.msk.mxu1 %vm14042_vm7, %v4879_v61  ;;  %v4881_v21 = vsel %vm17567_vm15, %v4870_v29, %v4872_v15  ;;  %5041 = vmatprep.mubr.f32.mxu1 %v17539_v13  ;;  %v4880_v58 = vsel %vm17568_vm9, %v14701_v27, %v4870_v29  ;;  %vm17569_vm15 = vmmov %vm17565_vm3  ;;  %v4882_v11 = vsel %vm17566_vm8, %v4872_v15, %v4874_v8  ;;  %v12056_v29 = vld [vmem:[%s17132_s5 + $0x18] sm:$0xf] }
 0x2d8   : > { %12030 = vmatpush1.msk.msra.mxu1 %vm14036_vm6, %v4878_v14  ;;  %12032 = vmatprep.subr.msk.mxu0 %vm17545_vm12, %v4881_v21  ;;  %vm17570_vm10 = vmmov %vm17566_vm8  ;;  %vm17571_vm9 = vnez %v17414_v19  ;;  %vm17574_vm8 = vnez %v17423_v32  ;;  %v12069_v21 = vld [vmem:[%s17132_s5 + $0x1c] sm:$0xf] }
 0x2d9   : > { %12033 = vmatpush1.msk.msra.mxu0 %vm17492_vm2, %v4880_v58  ;;  %5112 = vmatprep.mubr.f32.mxu0 %v17539_v13 }
 0x2da   : > { %v4876_v22 = vpop.permute.xlu1 %4875  ;;  %12031 = vmatmul.mubr.msk.f32.vlgmr.msra.gmra.mrb[4].mxu1 %vm17565_vm3, %v12025_v7  ;;  %12034 = vmatmul.mubr.msk.f32.vlgmr.msra.gmra.mrb[6].mxu0 %vm17569_vm15, %v12025_v7  ;;  %v14836_v33 = vpop.permute.xlu0 %6500  ;;  %vm17572_vm15 = vmmov %vm17565_vm3 }
 0x2db   : > { %v4883_v27 = vsel %vm17570_vm10, %v4874_v8, %v4876_v22  ;;  %5203 = vmatprep.subr.mxu0 %v14503_v16  ;;  %5183 = vmatprep.mubr.f32.mxu1 %v17539_v13  ;;  %vm17573_vm10 = vcmask 1039360  }
 0x2dc   : > { %5204 = vmatpush1.msra.mxu0 %v14454_v39  ;;  %12035 = vmatprep.subr.msk.mxu1 %vm17549_vm1, %v4883_v27  ;;  %v5512_v39 = vsel %vm17573_vm10, %v14703_v45, %v14631_v44 }
 0x2dd   : > { %5345 = vmatprep.subr.mxu0 %v14565_v12  ;;  %12036 = vmatpush1.msk.msra.mxu1 %vm17571_vm9, %v4882_v11  ;;  %vm17576_vm9 = vmmov %vm17572_vm15 }
 0x2de   : > { %5267 = vmatprep.mubr.f32.mxu0 %v17539_v13  ;;  %v14852_v16 = vpop.permute.xlu1 %6502  ;;  %12037 = vmatmul.mubr.msk.f32.vlgmr.msra.gmra.mrb[6].mxu1 %vm17565_vm3, %v12025_v7  ;;  %v5504_v23 = vpop.permute.xlu0 %5503  ;;  %vm17575_vm3 = vmmov %vm17573_vm10  ;;  %vm17577_vm10 = vnez %v17420_v31 }
 0x2df   : > { %12039 = vmatmul.mubr.msk.f32.vlgmr.msra.gmra.mrb[4].mxu0 %vm17572_vm15, %v12038_v3  ;;  %5274 = vmatprep.subr.mxu1 %v14509_v18 }
 0x2e0   : > { %5346 = vmatpush1.msra.mxu0 %v14558_v34  ;;  %5275 = vmatpush1.msra.mxu1 %v14479_v10  ;;  %v5511_v10 = vsel %vm17575_vm3, %v14691_v28, %v14703_v45 }
 0x2e1   : > { %12044 = vmatprep.subr.msk.mxu0 %vm17574_vm8, %v5512_v39  ;;  %5416 = vmatprep.subr.mxu1 %v14573_v17  ;;  %vm17578_vm8 = vmmov %vm17575_vm3  ;;  %v12043_v17 = vld [vmem:[%s17132_s5 + $0x14] sm:$0xf] }
 0x2e2   : > { %5338 = vmatprep.mubr.f32.mxu1 %v17539_v13  ;;  %5409 = vmatprep.mubr.f32.mxu0 %v17539_v13  ;;  %v14867_v12 = vpop.permute.xlu1 %6504  ;;  %v5508_v18 = vpop.permute.xlu0 %5507  ;;  %v5514_v34 = vsel %vm17578_vm8, %v14705_v35, %v5504_v23  ;;  %vm17580_vm8 = vmmov %vm17572_vm15 }
 0x2e3   : > { %12040 = vmatmul.mubr.msk.f32.vlgmr.msra.gmra.mrb[4].mxu1 %vm17572_vm15, %v12038_v3  ;;  %12041 = vmatmul.mubr.msk.f32.vlgmr.msra.gmra.mrb[6].mxu0 %vm17576_vm9, %v12038_v3  ;;  %vm17579_vm9 = vmmov %vm17575_vm3 }
 0x2e4   : > { %5417 = vmatpush1.msra.mxu1 %v14567_v26  ;;  %12045 = vmatpush1.msk.msra.mxu0 %vm17577_vm10, %v5511_v10  ;;  %v5513_v26 = vsel %vm17579_vm9, %v14631_v44, %v14705_v35  ;;  %vm17581_vm15 = vmmov %vm17580_vm8  ;;  %vm17584_vm9 = vcmask 793600   ;;  %v12075_v10 = vld [vmem:[%s17132_s5 + $0x20] sm:$0xf] }
 0x2e5   : > { %12047 = vmatprep.subr.msk.mxu1 %vm17553_vm0, %v5514_v34  ;;  %5480 = vmatprep.mubr.f32.mxu1 %v17539_v13  ;;  %vm17582_vm10 = vmmov %vm17575_vm3  ;;  %vm17583_vm0 = vnez %v17426_v42  ;;  %v5849_v44 = vsel %vm17584_vm9, %v14707_v5, %v14637_v46 }
 0x2e6   : > { %5604 = vmatprep.mubr.f32.mxu0 %v17539_v13  ;;  %v5506_v28 = vpop.permute.xlu1 %5505  ;;  %v5841_v45 = vpop.permute.xlu0 %5840 }
 0x2e7   : > { %v5515_v59 = vsel %vm17575_vm3, %v5504_v23, %v5506_v28  ;;  %12042 = vmatmul.mubr.msk.f32.vlgmr.msra.gmra.mrb[6].mxu1 %vm17580_vm8, %v12038_v3  ;;  %12046 = vmatmul.mubr.msk.f32.vlgmr.msra.gmra.mrb[4].mxu0 %vm17581_vm15, %v12043_v17  ;;  %v5516_v9 = vsel %vm17582_vm10, %v5506_v28, %v5508_v18  ;;  %vm17585_vm10 = vmmov %vm17584_vm9  ;;  %vm17588_vm9 = vnez %v17443_v52 }
 0x2e8   : > { %12048 = vmatpush1.msk.msra.mxu1 %vm17583_vm0, %v5513_v26  ;;  %12050 = vmatprep.subr.msk.mxu0 %vm17518_vm14, %v5516_v9  ;;  %v5848_v2 = vsel %vm17585_vm10, %v14695_v30, %v14707_v5  ;;  %vm17586_vm15 = vmmov %vm17580_vm8  ;;  %v5851_v30 = vsel %vm17585_vm10, %v14709_v53, %v5841_v45 }
 0x2e9   : > { %5675 = vmatprep.mubr.f32.mxu1 %v17539_v13  ;;  %12051 = vmatpush1.msk.msra.mxu0 %vm17479_vm13, %v5515_v59  ;;  %vm17587_vm13 = vmmov %vm17575_vm3 }
 0x2ea   : > { %5746 = vmatprep.mubr.f32.mxu0 %v17539_v13  ;;  %v5510_v35 = vpop.permute.xlu1 %5509  ;;  %12057 = vmatprep.subr.msk.mxu0 %vm14012_vm5, %v5849_v44  ;;  %v5845_v40 = vpop.permute.xlu0 %5844 }
 0x2eb   : > { %v5517_v60 = vsel %vm17575_vm3, %v5508_v18, %v5510_v35  ;;  %12049 = vmatmul.mubr.msk.f32.vlgmr.msra.gmra.mrb[4].mxu1 %vm17580_vm8, %v12043_v17  ;;  %12052 = vmatmul.mubr.msk.f32.vlgmr.msra.gmra.mrb[6].mxu0 %vm17586_vm15, %v12043_v17  ;;  %v5526_v25 = vsel %vm17587_vm13, %v5510_v35, 0.0  ;;  %vm17589_vm13 = vmmov %vm17585_vm10 }
 0x2ec   : > { %12058 = vmatpush1.msk.msra.mxu0 %vm14005_vm4, %v5848_v2  ;;  %12053 = vmatprep.subr.msk.mxu1 %vm17563_vm11, %v5526_v25  ;;  %v5850_v56 = vsel %vm17589_vm13, %v14637_v46, %v14709_v53  ;;  %vm17590_vm3 = vmmov %vm17585_vm10  ;;  %vm17593_vm10 = vcmask 785408  }
 0x2ed   : > { %12054 = vmatpush1.msk.msra.mxu1 %vm17588_vm9, %v5517_v60  ;;  %5817 = vmatprep.mubr.f32.mxu1 %v17539_v13  ;;  %vm17591_vm15 = vmmov %vm17580_vm8  ;;  %v6186_v46 = vsel %vm17593_vm10, %v14711_v54, %v14646_v6 }
 0x2ee   : > { %5941 = vmatprep.mubr.f32.mxu0 %v17539_v13  ;;  %v5843_v5 = vpop.permute.xlu1 %5842  ;;  %12060 = vmatprep.subr.msk.mxu1 %vm14042_vm7, %v5851_v30  ;;  %v6178_v57 = vpop.permute.xlu0 %6177  ;;  %vm17592_vm4 = vmmov %vm17590_vm3 }
 0x2ef   : > { %v5852_v7 = vsel %vm17590_vm3, %v5841_v45, %v5843_v5  ;;  %12055 = vmatmul.mubr.msk.f32.vlgmr.msra.gmra.mrb[6].mxu1 %vm17580_vm8, %v12043_v17  ;;  %12059 = vmatmul.mubr.msk.f32.vlgmr.msra.gmra.mrb[4].mxu0 %vm17591_vm15, %v12056_v29  ;;  %v5853_v50 = vsel %vm17592_vm4, %v5843_v5, %v5845_v40  ;;  %vm17594_vm4 = vmmov %vm17590_vm3  ;;  %v17623_v5 = vld [vmem:[#allocation31_spill] sm:$0xff] }
 0x2f0   : > { %12061 = vmatpush1.msk.msra.mxu1 %vm14036_vm6, %v5850_v56  ;;  %12063 = vmatprep.subr.msk.mxu0 %vm17545_vm12, %v5853_v50  ;;  %vm17595_vm13 = vmmov %vm17580_vm8  ;;  %vm17612_vm12 = vnez %v17420_v31  ;;  %v17624_v56 = vld [vmem:[#allocation33_spill] sm:$0xff] }
 0x2f1   : > { %6012 = vmatprep.mubr.f32.mxu1 %v17539_v13  ;;  %12064 = vmatpush1.msk.msra.mxu0 %vm17492_vm2, %v5852_v7  ;;  %vm17596_vm3 = vmmov %vm17580_vm8 }
 0x2f2   : > { %6083 = vmatprep.mubr.f32.mxu0 %v17539_v13  ;;  %v5847_v53 = vpop.permute.xlu1 %5846  ;;  %6206 = vmatprep.subr.mxu0 %v6186_v46  ;;  %v6182_v15 = vpop.permute.xlu0 %6181  ;;  %vm17597_vm8 = vmmov %vm17593_vm10  ;;  %vm17599_vm10 = vnez %v17414_v19 }
 0x2f3   : > { %v5854_v61 = vsel %vm17594_vm4, %v5845_v40, %v5847_v53  ;;  %12062 = vmatmul.mubr.msk.f32.vlgmr.msra.gmra.mrb[4].mxu1 %vm17595_vm13, %v12056_v29  ;;  %12065 = vmatmul.mubr.msk.f32.vlgmr.msra.gmra.mrb[6].mxu0 %vm17596_vm3, %v12056_v29  ;;  %v6185_v8 = vsel %vm17597_vm8, %v14699_v41, %v14711_v54  ;;  %vm17598_vm15 = vmmov %vm17594_vm4 }
 0x2f4   : > { %v5863_v14 = vsel %vm17598_vm15, %v5847_v53, 0.0  ;;  %6207 = vmatpush1.msra.mxu0 %v6185_v8  ;;  %6154 = vmatprep.mubr.f32.mxu1 %v17539_v13  ;;  %vm17600_vm4 = vmmov %vm17597_vm8  ;;  %v17628_v8 = vld [vmem:[#allocation34_spill] sm:$0xff] }
 0x2f5   : > { %12066 = vmatprep.subr.msk.mxu1 %vm17549_vm1, %v5863_v14  ;;  %v6188_v58 = vsel %vm17600_vm4, %v14713_v4, %v6178_v57  ;;  %6270 = vmatprep.mubr.f32.mxu0 %v17539_v13  ;;  %vm17601_vm13 = vmmov %vm17596_vm3 }
 0x2f6   : > { %12067 = vmatpush1.msk.msra.mxu1 %vm17599_vm10, %v5854_v61  ;;  %v6180_v41 = vpop.permute.xlu1 %6179  ;;  %v6499_v54 = vpop.permute.xlu0 %6498  ;;  %vm17602_vm8 = vmmov %vm17600_vm4 }
 0x2f7   : > { %6277 = vmatprep.subr.mxu1 %v6188_v58  ;;  %12068 = vmatmul.mubr.msk.f32.vlgmr.msra.gmra.mrb[6].mxu1 %vm17601_vm13, %v12056_v29  ;;  %v6187_v22 = vsel %vm17602_vm8, %v14646_v6, %v14713_v4  ;;  %vm17603_vm15 = vmmov %vm17600_vm4  ;;  %vm17606_vm13 = vnez %v17423_v32 }
 0x2f8   : > { %12070 = vmatmul.mubr.msk.f32.vlgmr.msra.gmra.mrb[4].mxu0 %vm17596_vm3, %v12069_v21  ;;  %v6190_v27 = vsel %vm17603_vm15, %v6180_v41, %v6182_v15  ;;  %vm17604_vm1 = vmmov %vm17600_vm4  ;;  %6278 = vmatpush1.msra.mxu1 %v6187_v22  ;;  %vm17605_vm4 = vcmask 777216  }
 0x2f9   : > { %v6189_v11 = vsel %vm17604_vm1, %v6178_v57, %v6180_v41  ;;  %6348 = vmatprep.subr.mxu0 %v6190_v27  ;;  %6341 = vmatprep.mubr.f32.mxu1 %v17539_v13  ;;  %v6515_v3 = vsel %vm17605_vm4, %v14836_v33, %v14852_v16  ;;  %vm17607_vm3 = vmmov %vm17605_vm4  ;;  %vm17608_vm1 = vcmask 64512  }
 0x2fa   : > { %6349 = vmatpush1.msra.mxu0 %v6189_v11  ;;  %6412 = vmatprep.mubr.f32.mxu0 %v17539_v13  ;;  %v6184_v23 = vpop.permute.xlu1 %6183  ;;  %v6507_v6 = vpop.permute.xlu0 %6506  ;;  %v6514_v4 = vsel %vm17607_vm3, %v6499_v54, %v14836_v33  ;;  %vm17609_vm8 = vmmov %vm17608_vm1 }
 0x2fb   : > { %12076 = vmatprep.subr.msk.mxu0 %vm17606_vm13, %v6515_v3  ;;  %12071 = vmatmul.mubr.msk.f32.vlgmr.msra.gmra.mrb[4].mxu1 %vm17608_vm1, %v12069_v21  ;;  %v6191_v39 = vsel %vm17603_vm15, %v6182_v15, %v6184_v23  ;;  %vm17610_vm10 = vmmov %vm17607_vm3  ;;  %vm17613_vm3 = vnez %v17429_v43  ;;  %v17627_v15 = vld [vmem:[#allocation32_spill] sm:$0xff] }
 0x2fc   : > { %12072 = vmatmul.mubr.msk.f32.vlgmr.msra.gmra.mrb[6].mxu0 %vm17609_vm8, %v12069_v21  ;;  %v6517_v18 = vsel %vm17610_vm10, %v14867_v12, %v6507_v6  ;;  %vm17611_vm4 = vmmov %vm17603_vm15  ;;  %6483 = vmatprep.mubr.f32.mxu1 %v17539_v13  ;;  %v6516_v17 = vsel %vm17610_vm10, %v14852_v16, %v14867_v12 }
 0x2fd   : > { %12073 = vmatprep.subr.msk.mxu1 %vm17611_vm4, %v6184_v23  ;;  %12077 = vmatpush1.msk.msra.mxu0 %vm17612_vm12, %v6514_v4  ;;  %vm17614_vm1 = vmmov %vm17610_vm10 }
 0x2fe   : > { %6420 = vmatpush1.msra.mxu1 %v6191_v39  ;;  %6607 = vmatprep.mubr.f32.mxu0 %v17539_v13  ;;  %v6509_v33 = vpop.permute.xlu1 %6508  ;;  %v6511_v34 = vpop.permute.xlu0 %6510  ;;  %vm17615_vm15 = vmmov %vm17609_vm8 }
 0x2ff   : > { %12079 = vmatprep.subr.msk.mxu1 %vm17613_vm3, %v6517_v18  ;;  %v6518_v28 = vsel %vm17614_vm1, %v6507_v6, %v6509_v33  ;;  %12074 = vmatmul.mubr.msk.f32.vlgmr.msra.gmra.mrb[6].mxu1 %vm17609_vm8, %v12069_v21  ;;  %vm17616_vm4 = vmmov %vm17614_vm1  ;;  %vm17617_vm3 = vnez %v17432_v36 }
 0x300   : > { %12078 = vmatmul.mubr.msk.f32.vlgmr.msra.gmra.mrb[4].mxu0 %vm17615_vm15, %v12075_v10  ;;  %v6519_v45 = vsel %vm17616_vm4, %v6509_v33, %v6511_v34  ;;  %12080 = vmatpush1.msk.msra.mxu1 %vm17583_vm0, %v6516_v17  ;;  %vm17618_vm10 = vmmov %vm17614_vm1 }
 0x301   : > { %12082 = vmatprep.subr.msk.mxu0 %vm17518_vm14, %v6519_v45  ;;  %6678 = vmatprep.mubr.f32.mxu1 %v17539_v13  ;;  %vm17619_vm1 = vmmov %vm17609_vm8 }
 0x302   : > { %12083 = vmatpush1.msk.msra.mxu0 %vm17617_vm3, %v6518_v28  ;;  %6749 = vmatprep.mubr.f32.mxu0 %v17539_v13  ;;  %v6513_v16 = vpop.permute.xlu1 %6512  ;;  %vm17620_vm8 = vmmov %vm17619_vm1 }
 0x303   : > { %v6520_v12 = vsel %vm17618_vm10, %v6511_v34, %v6513_v16  ;;  %12081 = vmatmul.mubr.msk.f32.vlgmr.msra.gmra.mrb[4].mxu1 %vm17619_vm1, %v12075_v10  ;;  %vm17621_vm15 = vmmov %vm17616_vm4  ;;  %vm17635_vm10 = vcmask 252928  }
 0x304   : > { %12084 = vmatmul.mubr.msk.f32.vlgmr.msra.gmra.mrb[6].mxu0 %vm17620_vm8, %v12075_v10  ;;  %v6529_v26 = vsel %vm17621_vm15, %v6513_v16, 0.0  ;;  %6820 = vmatprep.mubr.f32.mxu1 %v17539_v13  ;;  %vm17622_vm4 = vmmov %vm17619_vm1  ;;  %vm17637_vm1 = vcmask 7168   ;;  %vm17639_vm8 = vcmask 269312  }
 0x305   : > { %12085 = vmatprep.subr.msk.mxu1 %vm17563_vm11, %v6529_v26  ;;  %7187 = vmatprep.mubr.f32.mxu0 %v17539_v13  ;;  %vm17641_vm15 = vmmov %vm17635_vm10 }
 0x306   : > { %12086 = vmatpush1.msk.msra.mxu1 %vm17588_vm9, %v6520_v12 }
 0x307   : > { %12087 = vmatmul.mubr.msk.f32.vlgmr.msra.gmra.mrb[6].mxu1 %vm17622_vm4, %v12075_v10  ;;  %vm17643_vm4 = vmmov %vm17635_vm10 }
 0x308   : > { %7258 = vmatprep.mubr.f32.mxu1 %v17539_v13 }
 0x30f   : > { %v6839_v6 = vpop.permute.xlu0 %6838 }
 0x313   : > { %v6878_v59 = vpop.permute.xlu1 %6877  ;;  %v15074_v4 = vpop.permute.xlu0 %6882 }
 0x314   : > { %v6886_v9 = vmul.f32 %v6878_v59, %v14439_v1  ;;  %v6887_v44 = vmul.f32 %v6878_v59, %v14452_v0  ;;  %v6888_v35 = vmul.f32 %v6878_v59, %v14456_v51  ;;  %v6885_v40 = vmul.f32 %v6878_v59, %v14437_v24 }
 0x315   : > { %v6889_v57 = vmul.f32 %v6878_v59, %v17623_v5  ;;  %v6890_v7 = vmul.f32 %v6878_v59, %v17624_v56  ;;  %v6891_v61 = vmul.f32 %v6878_v59, %v17627_v15  ;;  %v6892_v14 = vmul.f32 %v6878_v59, %v17628_v8 }
 0x317   : > { %v6906_v2 = vpop.permute.xlu1 %6905  ;;  %v15076_v39 = vpop.permute.xlu0 %6910 }
 0x318   : > { %v6913_v60 = vadd.f32 %v6906_v2, %v6885_v40  ;;  %v6914_v25 = vadd.f32 %v6906_v2, %v6886_v9  ;;  %v6915_v29 = vadd.f32 %v6906_v2, %v6887_v44  ;;  %v6916_v30 = vadd.f32 %v6906_v2, %v6888_v35 }
 0x319   : > { %v6917_v1 = vadd.f32 %v6906_v2, %v6889_v57  ;;  %v6918_v53 = vadd.f32 %v6906_v2, %v6890_v7  ;;  %v6919_v21 = vadd.f32 %v6906_v2, %v6891_v61  ;;  %v6920_v58 = vadd.f32 %v6906_v2, %v6892_v14 }
 0x31a   : > { %v15028_v50 = vmax.f32 %v6913_v60, 0.0  ;;  %v15030_v46 = vmax.f32 %v6914_v25, 0.0  ;;  %v15032_v0 = vmax.f32 %v6915_v29, 0.0  ;;  %v15034_v51 = vmax.f32 %v6916_v30, 0.0 }
 0x31b   : > { %v15042_v41 = vmax.f32 %v6917_v1, 0.0  ;;  %v15044_v54 = vmax.f32 %v6918_v53, 0.0  ;;  %v15050_v27 = vmax.f32 %v6919_v21, 0.0  ;;  %v15052_v11 = vmax.f32 %v6920_v58, 0.0 }
 0x31c   : > { %17625 = vst [vmem:[#allocation31_spill] sm:$0xff] %v15032_v0  ;;  %17626 = vst [vmem:[#allocation33_spill] sm:$0xff] %v15034_v51  ;;  %v13040_v24 = vpack.i.bf16 %v15030_v46, %v15028_v50  ;;  %v13045_v22 = vpack.i.bf16 %v15034_v51, %v15032_v0 }
 0x31d   : > { %17629 = vst [vmem:[#allocation32_spill] sm:$0xff] %v15042_v41  ;;  %17630 = vst [vmem:[#allocation34_spill] sm:$0xff] %v15044_v54  ;;  %v13080_v3 = vpack.i.bf16 %v15044_v54, %v15042_v41  ;;  %v15060_v23 = vpack.i.bf16 %v15052_v11, %v15050_v27 }
 0x31e   : > { %13041 = vrot.lane.b32.xlu1 %v13040_v24, %s13616_s21  ;;  %13051 = vrot.lane.b32.xlu0 %v13040_v24, %s13617_s23  ;;  %17631 = vst [vmem:[#allocation36_spill] sm:$0xff] %v15050_v27  ;;  %17632 = vst [vmem:[#allocation37_spill] sm:$0xff] %v15052_v11 }
 0x322   : > { %13046 = vrot.lane.b32.xlu1 %v13045_v22, %s13616_s21  ;;  %13056 = vrot.lane.b32.xlu0 %v13045_v22, %s13617_s23 }
 0x326   : > { %13081 = vrot.lane.b32.xlu1 %v13080_v3, %s13616_s21  ;;  %13061 = vrot.lane.b32.xlu0 %v13040_v24, %s17633_s0 }
 0x32a   : > { %13086 = vrot.lane.b32.xlu1 %v15060_v23, %s13616_s21  ;;  %13066 = vrot.lane.b32.xlu0 %v13045_v22, %s17633_s0 }
 0x32e   : > { %13071 = vrot.lane.b32.xlu0 %v13040_v24, %s17634_s18 }
 0x332   : > { %13076 = vrot.lane.b32.xlu0 %v13045_v22, %s17634_s18 }
 0x336   : > { %13091 = vrot.lane.b32.xlu0 %v13080_v3, %s13617_s23 }
 0x33a   : > { %13096 = vrot.lane.b32.xlu0 %v15060_v23, %s13617_s23 }
 0x33e   : > { %13101 = vrot.lane.b32.xlu0 %v13080_v3, %s17633_s0 }
 0x342   : > { %13106 = vrot.lane.b32.xlu0 %v15060_v23, %s17633_s0 }
 0x346   : > { %13111 = vrot.lane.b32.xlu0 %v13080_v3, %s17634_s18 }
 0x390   : > { %v15078_v18 = vpop.permute.xlu0 %13051 }
 0x394   : > { %v15080_v10 = vpop.permute.xlu0 %13056 }
 0x398   : > { %v15082_v33 = vpop.permute.xlu0 %13061 }
 0x399   : > { %v17227_v17 = vunpack.i.h.bf16 %v15082_v33 }
 0x39c   : > { %v15084_v34 = vpop.permute.xlu0 %13066 }
 0x39d   : > { %v17225_v28 = vunpack.i.l.bf16 %v15084_v34  ;;  %v17226_v29 = vunpack.i.h.bf16 %v15084_v34 }
 0x39f   : > { %v15093_v45 = vsel %vm17635_vm10, %v17227_v17, %v17225_v28  ;;  %vm17237_vm10 = vcmask 1043456  }
 0x3a0   : > { %17636 = vst [vmem:[#allocation38_spill] sm:$0xff] %v15093_v45  ;;  %v15095_v16 = vpop.permute.xlu0 %13071 }
 0x3a1   : > { %v17224_v26 = vunpack.i.h.bf16 %v15095_v16 }
 0x3a4   : > { %v15097_v12 = vpop.permute.xlu0 %13076 }
 0x3a5   : > { %v17223_v59 = vunpack.i.l.bf16 %v15097_v12 }
 0x3a7   : > { %v15106_v9 = vsel %vm17637_vm1, %v17224_v26, %v17223_v59  ;;  %vm17653_vm1 = vcmask 261120  }
 0x3a8   : > { %17638 = vst [vmem:[#allocation39_spill] sm:$0xff] %v15106_v9  ;;  %v15108_v44 = vpop.permute.xlu0 %13091 }
 0x3a9   : > { %v17222_v40 = vunpack.i.h.bf16 %v15108_v44 }
 0x3ac   : > { %v15110_v35 = vpop.permute.xlu0 %13096 }
 0x3ad   : > { %v17221_v2 = vunpack.i.l.bf16 %v15110_v35 }
 0x3af   : > { %v15119_v60 = vsel %vm17639_vm8, %v17222_v40, %v17221_v2  ;;  %vm17654_vm8 = vmmov %vm17653_vm1 }
 0x3b0   : > { %17640 = vst [vmem:[#allocation40_spill] sm:$0xff] %v15119_v60  ;;  %v15121_v25 = vpop.permute.xlu0 %13101 }
 0x3b1   : > { %v17219_v30 = vunpack.i.l.bf16 %v15121_v25  ;;  %v17220_v56 = vunpack.i.h.bf16 %v15121_v25 }
 0x3b3   : > { %v15130_v5 = vsel %vm17641_vm15, %v17226_v29, %v17219_v30  ;;  %vm17655_vm15 = vmmov %vm17653_vm1 }
 0x3b4   : > { %17642 = vst [vmem:[#allocation41_spill] sm:$0xff] %v15130_v5  ;;  %v15132_v57 = vpop.permute.xlu0 %13106  ;;  %v17659_v5 = vld [vmem:[#allocation35_spill] sm:$0xff] }
 0x3b5   : > { %v17218_v7 = vunpack.i.l.bf16 %v15132_v57 }
 0x3b7   : > { %v15141_v1 = vsel %vm17643_vm4, %v17220_v56, %v17218_v7  ;;  %vm13625_vm4 = vmmov 1  }
 0x3b8   : > { %17644 = vst [vmem:[#allocation42_spill] sm:$0xff] %v15141_v1  ;;  %vm15306_vm11 = vmpackc.low %vm17237_vm10, %vm13625_vm4  ;;  %vm17661_vm4 = vcmask 261120  }
 0x3d3   : > { %v6609_v53 = vpop.f32.mrb[4].mxu0 }
 0x3d4   : > { %v6841_v24 = vadd.f32 %v6839_v6, %v6609_v53  ;;  %v6611_v15 = vpop.f32.mrb[5].mxu0 }
 0x3d5   : > { %v6842_v61 = vadd.f32 %v6839_v6, %v6611_v15 }
 0x3d6   : > { %6849 = vst [vmem:[%s14443_s22 + $0x40] sm:$0xf] %v6841_v24  ;;  %v6680_v8 = vpop.f32.mrb[4].mxu1 }
 0x3d7   : > { %6850 = vst [vmem:[%s14443_s22 + $0x48] sm:$0xf] %v6842_v61  ;;  %v6751_v14 = vpop.f32.mrb[6].mxu0  ;;  %v6843_v21 = vadd.f32 %v6839_v6, %v6680_v8  ;;  %v6682_v22 = vpop.f32.mrb[5].mxu1 }
 0x3d8   : > { %v6845_v58 = vadd.f32 %v6839_v6, %v6751_v14  ;;  %v6753_v3 = vpop.f32.mrb[7].mxu0  ;;  %v6844_v7 = vadd.f32 %v6839_v6, %v6682_v22 }
 0x3d9   : > { %v6846_v30 = vadd.f32 %v6839_v6, %v6753_v3  ;;  %6851 = vst [vmem:[%s14443_s22 + $0x50] sm:$0xf] %v6843_v21 }
 0x3da   : > { %6853 = vst [vmem:[%s14443_s22 + $0x60] sm:$0xf] %v6845_v58  ;;  %6852 = vst [vmem:[%s14443_s22 + $0x58] sm:$0xf] %v6844_v7  ;;  %v6822_v53 = vpop.f32.mrb[6].mxu1 }
 0x3db   : > { %6854 = vst [vmem:[%s14443_s22 + $0x68] sm:$0xf] %v6846_v30  ;;  %v6847_v24 = vadd.f32 %v6839_v6, %v6822_v53  ;;  %v6824_v15 = vpop.f32.mrb[7].mxu1 }
 0x3dc   : > { %v6848_v8 = vadd.f32 %v6839_v6, %v6824_v15 }
 0x3dd   : > { %v6865_v61 = vld [vmem:[%s14443_s22 + $0x40] sm:$0xf]  ;;  %6855 = vst [vmem:[%s14443_s22 + $0x70] sm:$0xf] %v6847_v24 }
 0x3de   : > { %v6893_v14 = vmul.f32 %v15074_v4, %v6865_v61  ;;  %v6866_v56 = vld [vmem:[%s14443_s22 + $0x48] sm:$0xf]  ;;  %6856 = vst [vmem:[%s14443_s22 + $0x78] sm:$0xf] %v6848_v8 }
 0x3df   : > { %v6894_v22 = vmul.f32 %v15074_v4, %v6866_v56 }
 0x3e0   : > { %v6921_v21 = vadd.f32 %v15076_v39, %v6893_v14  ;;  %v6867_v30 = vld [vmem:[%s14443_s22 + $0x50] sm:$0xf] }
 0x3e1   : > { %v6922_v7 = vadd.f32 %v15076_v39, %v6894_v22  ;;  %v6869_v58 = vld [vmem:[%s14443_s22 + $0x60] sm:$0xf]  ;;  %v6895_v53 = vmul.f32 %v15074_v4, %v6867_v30  ;;  %v6868_v15 = vld [vmem:[%s14443_s22 + $0x58] sm:$0xf] }
 0x3e2   : > { %v15159_v3 = vmax.f32 %v6921_v21, 0.0  ;;  %v6897_v6 = vmul.f32 %v15074_v4, %v6869_v58  ;;  %v6870_v61 = vld [vmem:[%s14443_s22 + $0x68] sm:$0xf]  ;;  %v6896_v56 = vmul.f32 %v15074_v4, %v6868_v15 }
 0x3e3   : > { %v15165_v24 = vmax.f32 %v6922_v7, 0.0  ;;  %v6898_v8 = vmul.f32 %v15074_v4, %v6870_v61  ;;  %v6923_v14 = vadd.f32 %v15076_v39, %v6895_v53 }
 0x3e4   : > { %v6925_v22 = vadd.f32 %v15076_v39, %v6897_v6  ;;  %v6924_v21 = vadd.f32 %v15076_v39, %v6896_v56  ;;  %v6871_v40 = vld [vmem:[%s14443_s22 + $0x70] sm:$0xf] }
 0x3e5   : > { %v6926_v2 = vadd.f32 %v15076_v39, %v6898_v8  ;;  %v13125_v30 = vpack.i.bf16 %v15165_v24, %v15159_v3  ;;  %v15176_v58 = vmax.f32 %v6923_v14, 0.0  ;;  %v6899_v7 = vmul.f32 %v15074_v4, %v6871_v40  ;;  %v6872_v59 = vld [vmem:[%s14443_s22 + $0x78] sm:$0xf] }
 0x3e6   : > { %v15180_v15 = vmax.f32 %v6924_v21, 0.0  ;;  %v6900_v61 = vmul.f32 %v15074_v4, %v6872_v59  ;;  %v15185_v53 = vmax.f32 %v6925_v22, 0.0 }
 0x3e7   : > { %17645 = vst [vmem:[#allocation43_spill] sm:$0xff] %v15176_v58  ;;  %13126 = vrot.lane.b32.xlu1 %v13125_v30, %s13617_s23  ;;  %13116 = vrot.lane.b32.xlu0 %v13125_v30, %s13616_s21  ;;  %v6927_v6 = vadd.f32 %v15076_v39, %v6899_v7  ;;  %v15188_v56 = vmax.f32 %v6926_v2, 0.0  ;;  %v13290_v21 = vpack.i.bf16 %v15176_v58, %v15165_v24 }
 0x3e8   : > { %17646 = vst [vmem:[#allocation44_spill] sm:$0xff] %v15185_v53  ;;  %v6928_v8 = vadd.f32 %v15076_v39, %v6900_v61  ;;  %v13130_v40 = vpack.i.bf16 %v15180_v15, %v15176_v58  ;;  %v15199_v4 = vpack.i.bf16 %v15180_v15, %v15159_v3  ;;  %v13280_v22 = vpack.i.bf16 %v15185_v53, %v15180_v15 }
 0x3e9   : > { %17647 = vst [vmem:[#allocation45_spill] sm:$0xff] %v15188_v56  ;;  %v15193_v14 = vmax.f32 %v6927_v6, 0.0  ;;  %v13155_v2 = vpack.i.bf16 %v15188_v56, %v15185_v53  ;;  %v13175_v61 = vpack.i.bf16 %v15032_v0, %v15030_v46  ;;  %v13185_v6 = vpack.i.bf16 %v15028_v50, %v15185_v53  ;;  %v17762_v53 = vld [vmem:[#allocation22_spill] sm:$0xff] }
 0x3ea   : > { %v15201_v59 = vmax.f32 %v6928_v8, 0.0  ;;  %v13275_v8 = vpack.i.bf16 %v15159_v3, %v15042_v41 }
 0x3eb   : > { %17648 = vst [vmem:[#allocation46_spill] sm:$0xff] %v15193_v14  ;;  %13131 = vrot.lane.b32.xlu1 %v13130_v40, %s13617_s23  ;;  %13121 = vrot.lane.b32.xlu0 %v13130_v40, %s13616_s21  ;;  %v13350_v39 = vpack.i.bf16 %v15193_v14, %v15188_v56 }
 0x3ec   : > { %17649 = vst [vmem:[#allocation47_spill] sm:$0xff] %v15201_v59  ;;  %v13160_v7 = vpack.i.bf16 %v15201_v59, %v15193_v14 }
 0x3ef   : > { %13136 = vrot.lane.b32.xlu1 %v13125_v30, %s17633_s0  ;;  %13156 = vrot.lane.b32.xlu0 %v13155_v2, %s13616_s21 }
 0x3f3   : > { %13141 = vrot.lane.b32.xlu1 %v13130_v40, %s17633_s0  ;;  %13161 = vrot.lane.b32.xlu0 %v13160_v7, %s13616_s21  ;;  %s17651_s21 = smov 97  }
 0x3f7   : > { %13146 = vrot.lane.b32.xlu1 %v13125_v30, %s17634_s18  ;;  %13166 = vrot.lane.b32.xlu0 %v15060_v23, %s17634_s18  ;;  %v13190_v23 = vpack.i.bf16 %v15042_v41, %v15034_v51  ;;  %v13195_v30 = vpack.i.bf16 %v15050_v27, %v15044_v54  ;;  %v17741_v27 = vld [vmem:[#allocation20_spill] sm:$0xff] }
 0x3fb   : > { %13151 = vrot.lane.b32.xlu1 %v13130_v40, %s17634_s18  ;;  %13176 = vrot.lane.b32.xlu0 %v13175_v61, %s17650_s30  ;;  %v13300_v40 = vpack.i.bf16 %v15052_v11, %v15201_v59  ;;  %v17748_v59 = vld [vmem:[#allocation26_spill] sm:$0xff] }
 0x3ff   : > { %13171 = vrot.lane.b32.xlu1 %v13290_v21, %s17650_s30  ;;  %13186 = vrot.lane.b32.xlu0 %v13185_v6, %s17650_s30 }
 0x403   : > { %13181 = vrot.lane.b32.xlu1 %v15199_v4, %s17650_s30  ;;  %13206 = vrot.lane.b32.xlu0 %v13175_v61, %s17651_s21 }
 0x407   : > { %13191 = vrot.lane.b32.xlu1 %v13190_v23, %s17650_s30  ;;  %13246 = vrot.lane.b32.xlu0 %v13185_v6, %s17651_s21 }
 0x40b   : > { %13196 = vrot.lane.b32.xlu1 %v13195_v30, %s17650_s30  ;;  %13266 = vrot.lane.b32.xlu0 %v13290_v21, %s17652_s20 }
 0x40f   : > { %13201 = vrot.lane.b32.xlu1 %v13290_v21, %s17651_s21  ;;  %13276 = vrot.lane.b32.xlu0 %v13275_v8, %s17652_s20  ;;  %v13042_v8 = vpop.permute.xlu1 %13041 }
 0x413   : > { %13211 = vrot.lane.b32.xlu1 %v13155_v2, %s13617_s23  ;;  %13286 = vrot.lane.b32.xlu0 %v13195_v30, %s17652_s20 }
 0x417   : > { %13216 = vrot.lane.b32.xlu1 %v13160_v7, %s13617_s23  ;;  %13296 = vrot.lane.b32.xlu0 %v13350_v39, %s17650_s30 }
 0x41b   : > { %13221 = vrot.lane.b32.xlu1 %v13155_v2, %s17633_s0  ;;  %13301 = vrot.lane.b32.xlu0 %v13300_v40, %s17650_s30 }
 0x41f   : > { %13226 = vrot.lane.b32.xlu1 %v13160_v7, %s17633_s0  ;;  %13306 = vrot.lane.b32.xlu0 %v13350_v39, %s17651_s21  ;;  %s13512_s0 = scalar_lea.vmem %s17051_s27, 2048 }
 0x420   : > { %p13513_p6 = scmp.ne.s32.totalorder %s17051_s27, %s13512_s0 }
 0x422   : > { %p13514_p10 = pnand %p13513_p6, %p18143_p9 }
 0x423   : > { %13231 = vrot.lane.b32.xlu1 %v13155_v2, %s17634_s18  ;;  %13311 = vrot.lane.b32.xlu0 %v13300_v40, %s17651_s21  ;;  %v10469_v2 = vld [vmem:[%s17138_s11] sm:$0xff] }
 0x424   : > { %p13515_p12 = pneg %p13514_p10 }
 0x427   : > { %13236 = vrot.lane.b32.xlu1 %v13160_v7, %s17634_s18  ;;  %13316 = vrot.lane.b32.xlu0 %v13175_v61, %s13623_s24  ;;  %v13270_v7 = vpack.i.bf16 %v15034_v51, %v15028_v50  ;;  %s13626_s18 = smov [#allocation5]  }
 0x42b   : > { %13241 = vrot.lane.b32.xlu1 %v15199_v4, %s17651_s21  ;;  %13331 = vrot.lane.b32.xlu0 %v13300_v40, %s17652_s20 }
 0x42f   : > { %13251 = vrot.lane.b32.xlu1 %v13190_v23, %s17651_s21  ;;  %13336 = vrot.lane.b32.xlu0 %v13185_v6, %s13623_s24  ;;  %v10497_v6 = vld [vmem:[%s17139_s12] sm:$0xff] }
 0x433   : > { %13256 = vrot.lane.b32.xlu1 %v13195_v30, %s17651_s21  ;;  %13351 = vrot.lane.b32.xlu0 %v13350_v39, %s13623_s24  ;;  %s13516_s21 = sshll.u32 %s13626_s18, 4  ;;  %s13517_s21 = int_to_ptr.vmem [resolvable:$false] %s13516_s21 }
 0x434   : > { %s13518_s2 = scalar_lea.vmem %s13517_s21, 4096  ;;  %p13519_p2 = scmp.lt.s32.totalorder %s17051_s27, %s13517_s21 }
 0x435   : > { %p13520_p3 = scmp.lt.s32.totalorder %s13518_s2, %s13512_s0 }
 0x437   : > { %13261 = vrot.lane.b32.xlu1 %v13175_v61, %s17652_s20  ;;  %13356 = vrot.lane.b32.xlu0 %v13300_v40, %s13623_s24  ;;  %v10543_v61 = vld [vmem:[%s17141_s14] sm:$0xff]  ;;  %v13047_v40 = vpop.permute.xlu1 %13046  ;;  %p13521_p4 = por %p13520_p3, %p13519_p2 }
 0x438   : > { %v13049_v1 = vunpack.i.h.bf16 %v13047_v40  ;;  %v13048_v9 = vunpack.i.l.bf16 %v13047_v40  ;;  %v15328_v40 = vld [vmem:[%s17136_s9 + $0x4] sm:$0xf] }
 0x439   : > { %p13522_p7 = pnand %p13521_p4, %p13515_p12 }
 0x43b   : > { %13271 = vrot.lane.b32.xlu1 %v13270_v7, %s17652_s20  ;;  %10473 = vperm.xlu0 %13038, %v10469_v2   ;;  %v15283_v2 = vpop.permute.xlu1 %13081 }
 0x43f   : > { %13281 = vrot.lane.b32.xlu1 %v13280_v22, %s17652_s20  ;;  %10501 = vperm.xlu0 %13038, %v10497_v6   ;;  %v10407_v22 = vld [vmem:[%s17137_s10] sm:$0xf]  ;;  %v15290_v7 = vpop.permute.xlu1 %13086  ;;  %v13043_v6 = vunpack.i.l.bf16 %v13042_v8 }
 0x440   : > { %v13089_v63 = vunpack.i.h.bf16 %v15290_v7 }
 0x443   : > { %13291 = vrot.lane.b32.xlu1 %v13290_v21, %s13623_s24  ;;  %10547 = vperm.xlu0 %13038, %v10543_v61   ;;  %v15292_v21 = vpop.permute.xlu0 %13111 }
 0x447   : > { %13321 = vrot.lane.b32.xlu1 %v13350_v39, %s17652_s20  ;;  %v13044_v39 = vunpack.i.h.bf16 %v13042_v8  ;;  %v10498_v8 = vld [vmem:[%s17139_s12 + $0x8] sm:$0xff] }
 0x449   : > { %v7074_v28 = vsel %vm17653_vm1, %v13043_v6, %v13044_v39  ;;  %vm17660_vm1 = vnez %v17659_v5  ;;  %v10544_v5 = vld [vmem:[%s17141_s14 + $0x8] sm:$0xff] }
 0x44b   : > { %13326 = vrot.lane.b32.xlu1 %v15199_v4, %s13623_s24  ;;  %v10470_v4 = vld [vmem:[%s17138_s11 + $0x8] sm:$0xff] }
 0x44f   : > { %13341 = vrot.lane.b32.xlu1 %v13190_v23, %s13623_s24 }
 0x453   : > { %13346 = vrot.lane.b32.xlu1 %v13195_v30, %s13623_s24 }
 0x457   : > { %10410 = vperm.xlu1 %13039, %v10407_v22   ;;  %v17656_v22 = vmov 0 }
 0x458   : > { %v17657_v22 = vsel %vm15306_vm11, 4294967295, %v17656_v22 }
 0x459   : > { %v15297_v61 = vpop.permute.xlu1 %13126  ;;  %v13117_v23 = vpop.permute.xlu0 %13116  ;;  %17658 = vst [vmem:[#allocation48_spill] sm:$0xff] %v17657_v22 }
 0x45a   : > { %v13119_v30 = vunpack.i.h.bf16 %v13117_v23  ;;  %v13118_v26 = vunpack.i.l.bf16 %v13117_v23  ;;  %v13128_v47 = vunpack.i.l.bf16 %v15297_v61 }
 0x45b   : > { %10478 = vperm.xlu1 %13039, %v10470_v4  }
 0x45c   : > { %v7081_v29 = vsel %vm17654_vm8, %v13118_v26, %v13119_v30  ;;  %v7098_v17 = vsel %vm17655_vm15, 0.0, %v13118_v26  ;;  %vm12278_vm8 = vmpackc.low %vm17237_vm10, %vm17660_vm1  ;;  %v17249_v26 = vunpack.i.h.bf16 %v15297_v61  ;;  %vm17252_vm15 = vcmask 97280  }
 0x45d   : > { %v12274_v23 = vpack.c.bf16 %v7081_v29, %v7074_v28  ;;  %v12277_v4 = vpack.c.bf16 %v7098_v17, %v13043_v6  ;;  %v15310_v55 = vpop.permute.xlu1 %13131  ;;  %v13122_v52 = vpop.permute.xlu0 %13121  ;;  %v13084_v17 = vunpack.i.h.bf16 %v15283_v2  ;;  %v13083_v29 = vunpack.i.l.bf16 %v15283_v2  ;;  %vm17662_vm1 = vmmov %vm17661_vm4 }
 0x45e   : > { %v13124_v36 = vunpack.i.h.bf16 %v13122_v52  ;;  %v13123_v60 = vunpack.i.l.bf16 %v13122_v52  ;;  %v7075_v52 = vsel %vm17661_vm4, %v13044_v39, %v13048_v9  ;;  %v7076_v6 = vsel %vm17662_vm1, %v13048_v9, %v13049_v1  ;;  %vm17663_vm10 = vmmov %vm17662_vm1 }
 0x45f   : > { %10506 = vperm.xlu1 %13039, %v10498_v8   ;;  %12276 = vmatprep.subr.msk.bf16.mxu0 %vm15306_vm11, %v12274_v23  ;;  %vm17664_vm9 = vmmov %vm17662_vm1  ;;  %v13053_v28 = vunpack.i.l.bf16 %v15078_v18  ;;  %v17250_v43 = vunpack.i.h.bf16 %v15310_v55  ;;  %v13133_v39 = vunpack.i.l.bf16 %v15310_v55 }
 0x460   : > { %12279 = vmatpush1.bf16.msk.msra.mxu0 %vm12278_vm8, %v12277_v4  ;;  %v7082_v8 = vsel %vm17663_vm10, %v13119_v30, %v13123_v60  ;;  %v7083_v23 = vsel %vm17664_vm9, %v13123_v60, %v13124_v36  ;;  %vm17665_vm8 = vcmask 269312   ;;  %vm17666_vm9 = vmmov %vm17662_vm1 }
 0x461   : > { %v15334_v2 = vpop.permute.xlu1 %13136  ;;  %v13157_v4 = vpop.permute.xlu0 %13156  ;;  %v7000_v45 = vsel %vm17665_vm8, %v13128_v47, %v17249_v26  ;;  %v12280_v20 = vpack.c.bf16 %v7083_v23, %v7076_v6  ;;  %v12283_v19 = vpack.c.bf16 %v7082_v8, %v7075_v52  ;;  %v7077_v60 = vsel %vm17666_vm9, %v13049_v1, %v13083_v29  ;;  %vm17667_vm10 = vmmov %vm17662_vm1 }
 0x462   : > { %v13159_v9 = vunpack.i.h.bf16 %v13157_v4  ;;  %v13158_v42 = vunpack.i.l.bf16 %v13157_v4  ;;  %v7078_v30 = vsel %vm17667_vm10, %v13083_v29, %v13084_v17  ;;  %v13088_v26 = vunpack.i.l.bf16 %v15290_v7  ;;  %vm17668_vm4 = vmmov %vm17665_vm8 }
 0x463   : > { %10552 = vperm.xlu1 %13039, %v10544_v5   ;;  %12093 = vmatmul.mubr.msk.f32.vlgmr.msra.gmra.mrb[8].mxu0 %vm17252_vm15, %v15328_v40  ;;  %v7024_v52 = vsel %vm17668_vm4, 0.0, %v13128_v47  ;;  %v7034_v5 = vsel %vm14012_vm5, %v7000_v45, 0.0  ;;  %vm17669_vm8 = vmmov %vm17662_vm1 }
 0x464   : > { %12282 = vmatprep.subr.msk.bf16.mxu1 %vm15306_vm11, %v12280_v20  ;;  %7329 = vmatprep.mubr.f32.mxu0 %v17539_v13  ;;  %v7084_v6 = vsel %vm17662_vm1, %v13124_v36, %v13158_v42  ;;  %v7085_v1 = vsel %vm17669_vm8, %v13158_v42, %v13159_v9  ;;  %v17670_v20 = vunpack.i.h.bf16 %v15078_v18  ;;  %vm17671_vm9 = vmmov %vm17668_vm4  ;;  %v13058_v42 = vunpack.i.l.bf16 %v15080_v10 }
 0x465   : > { %12285 = vmatpush1.bf16.msk.msra.mxu1 %vm15306_vm11, %v12283_v19  ;;  %v15358_v29 = vpop.permute.xlu1 %13141  ;;  %v13162_v7 = vpop.permute.xlu0 %13161  ;;  %v12286_v8 = vpack.c.bf16 %v7085_v1, %v7078_v30  ;;  %v12289_v23 = vpack.c.bf16 %v7084_v6, %v7077_v60  ;;  %vm17672_vm10 = vmmov %vm17668_vm4  ;;  %vm17673_vm4 = vcmask 1043456   ;;  %v17674_v19 = vmov 0 }
 0x466   : > { %v6993_v4 = vsel %vm17671_vm9, %v13053_v28, %v17670_v20  ;;  %v7002_v36 = vsel %vm17672_vm10, %v13133_v39, %v17250_v43  ;;  %v13164_v45 = vunpack.i.h.bf16 %v13162_v7  ;;  %vm15370_vm1 = vmpackc.low %vm17673_vm4, %vm14012_vm5  ;;  %vm17676_vm8 = vnez %v17398_v37  ;;  %v17796_v37 = vld [vmem:[#allocation41_spill] sm:$0xff] }
 0x467   : > { %v17675_v19 = vsel %vm15370_vm1, 4294967295, %v17674_v19  ;;  %v7033_v60 = vsel %vm17676_vm8, %v7024_v52, 0.0  ;;  %v13163_v30 = vunpack.i.l.bf16 %v13162_v7  ;;  %12288 = vmatprep.subr.msk.bf16.mxu0 %vm15306_vm11, %v12286_v8  ;;  %v12298_v6 = vpack.c.bf16 %v7034_v5, %v6993_v4  ;;  %vm17680_vm14 = vmmov %vm17671_vm9 }
 0x468   : > { %12096 = vmatmul.mubr.msk.f32.vlgmr.msra.gmra.mrb[8].mxu1 %vm17252_vm15, %v15328_v40  ;;  %v7023_v1 = vsel %vm17671_vm9, 0.0, %v13053_v28  ;;  %vm17677_vm10 = vcmask 261120   ;;  %12291 = vmatpush1.bf16.msk.msra.mxu0 %vm15306_vm11, %v12289_v23  ;;  %v17679_v5 = vunpack.i.h.bf16 %v15297_v61  ;;  %v7036_v28 = vsel %vm14042_vm7, %v7002_v36, 0.0 }
 0x469   : > { %v7079_v20 = vsel %vm17677_vm10, %v13084_v17, %v13088_v26  ;;  %vm17678_vm4 = vmmov %vm17677_vm10  ;;  %v15386_v47 = vpop.permute.xlu1 %13146  ;;  %v15388_v52 = vpop.permute.xlu0 %13166  ;;  %7400 = vmatprep.mubr.f32.mxu1 %v17539_v13  ;;  %12300 = vmatprep.subr.msk.bf16.mxu0 %vm15370_vm1, %v12298_v6  ;;  %v12301_v61 = vpack.c.bf16 %v7033_v60, %v7023_v1  ;;  %v17687_v23 = vunpack.i.h.bf16 %v15080_v10  ;;  %v17693_v6 = vunpack.i.h.bf16 %v15078_v18 }
 0x46a   : > { %v7080_v43 = vsel %vm17678_vm4, %v13088_v26, %v13089_v63  ;;  %v7001_v7 = vsel %vm17680_vm14, %v17679_v5, %v13133_v39  ;;  %vm17681_vm9 = vmmov %vm17678_vm4  ;;  %v17684_v26 = vmov 0 }
 0x46b   : > { %v7086_v17 = vsel %vm17681_vm9, %v13159_v9, %v13163_v30  ;;  %vm17682_vm10 = vmmov %vm17678_vm4  ;;  %vm17683_vm4 = vcmask 1043456   ;;  %v6995_v4 = vsel %vm17680_vm14, %v13058_v42, %v17687_v23  ;;  %vm17688_vm9 = vcmask 97280  }
 0x46c   : > { %v7087_v63 = vsel %vm17682_vm10, %v13163_v30, %v13164_v45  ;;  %vm15403_vm15 = vmpackc.low %vm17683_vm4, %vm17676_vm8  ;;  %v12295_v39 = vpack.c.bf16 %v7086_v17, %v7079_v20  ;;  %12099 = vmatmul.mubr.msk.f32.vlgmr.msra.gmra.mrb[10].mxu0 %vm17688_vm9, %v15328_v40  ;;  %v17690_v9 = vmov 0  ;;  %v7035_v36 = vsel %vm14036_vm6, %v7001_v7, 0.0  ;;  %v15432_v30 = vld [vmem:[%s17136_s9] sm:$0xf] }
 0x46d   : > { %v17685_v26 = vsel %vm15403_vm15, 4294967295, %v17684_v26  ;;  %v12292_v8 = vpack.c.bf16 %v7087_v63, %v7080_v43  ;;  %vm17689_vm10 = vmmov %vm17683_vm4  ;;  %12303 = vmatpush1.bf16.msk.msra.mxu0 %vm15403_vm15, %v12301_v61  ;;  %v15425_v43 = vpop.permute.xlu1 %13151  ;;  %v15427_v45 = vpop.permute.xlu0 %13176  ;;  %v12304_v60 = vpack.c.bf16 %v7036_v28, %v6995_v4  ;;  %7498 = vmatprep.mubr.f32.mxu0 %v17539_v13  ;;  %v17696_v20 = vmov 0 }
 0x46e   : > { %17686 = vst [vmem:[#allocation35_spill] sm:$0xff] %v17685_v26  ;;  %vm15415_vm1 = vmpackc.low %vm17689_vm10, %vm14042_vm7  ;;  %v13063_v63 = vunpack.i.l.bf16 %v15082_v33  ;;  %v13073_v61 = vunpack.i.l.bf16 %v15095_v16  ;;  %v13079_v23 = vunpack.i.h.bf16 %v15097_v12  ;;  %v13093_v4 = vunpack.i.l.bf16 %v15108_v44 }
 0x46f   : > { %v17691_v9 = vsel %vm15415_vm1, 4294967295, %v17690_v9  ;;  %12294 = vmatprep.subr.msk.bf16.mxu1 %vm15306_vm11, %v12292_v8  ;;  %vm17694_vm4 = vmmov %vm17680_vm14  ;;  %v17713_v26 = vunpack.i.h.bf16 %v15095_v16  ;;  %v17722_v16 = vunpack.i.h.bf16 %v15108_v44  ;;  %v13153_v54 = vunpack.i.l.bf16 %v15425_v43 }
 0x470   : > { %17692 = vst [vmem:[#allocation49_spill] sm:$0xff] %v17691_v9  ;;  %12297 = vmatpush1.bf16.msk.msra.mxu1 %vm15306_vm11, %v12295_v39  ;;  %v6994_v1 = vsel %vm17694_vm4, %v17693_v6, %v13058_v42  ;;  %vm17695_vm14 = vmmov %vm17689_vm10  ;;  %vm17699_vm10 = vcmask 97280   ;;  %v13113_v6 = vunpack.i.l.bf16 %v15292_v21 }
 0x471   : > { %12306 = vmatprep.subr.msk.bf16.mxu1 %vm15415_vm1, %v12304_v60  ;;  %vm15445_vm9 = vmpackc.low %vm17695_vm14, %vm14036_vm6  ;;  %v12307_v5 = vpack.c.bf16 %v7035_v36, %v6994_v1  ;;  %12107 = vmatmul.mubr.msk.f32.vlgmr.msra.gmra.mrb[8].mxu0 %vm17699_vm10, %v15432_v30  ;;  %v15453_v18 = vpop.permute.xlu1 %13171  ;;  %v15455_v42 = vpop.permute.xlu0 %13186  ;;  %v13099_v36 = vunpack.i.h.bf16 %v15110_v35  ;;  %v13109_v60 = vunpack.i.h.bf16 %v15132_v57  ;;  %v17707_v1 = vunpack.i.h.bf16 %v15082_v33 }
 0x472   : > { %v17697_v20 = vsel %vm15445_vm9, 4294967295, %v17696_v20  ;;  %vm17700_vm11 = vmmov %vm17699_vm10  ;;  %7640 = vmatprep.mubr.f32.mxu0 %v17539_v13  ;;  %vm17763_vm6 = vnez %v17762_v53 }
 0x473   : > { %17698 = vst [vmem:[#allocation50_spill] sm:$0xff] %v17697_v20  ;;  %12102 = vmatmul.mubr.msk.f32.vlgmr.msra.gmra.mrb[10].mxu1 %vm17700_vm11, %v15328_v40  ;;  %vm17702_vm4 = vmmov %vm17699_vm10  ;;  %vm17708_vm11 = vcmask 252928   ;;  %v13138_v20 = vunpack.i.l.bf16 %v15334_v2 }
 0x474   : > { %12309 = vmatpush1.bf16.msk.msra.mxu1 %vm15445_vm9, %v12307_v5  ;;  %7569 = vmatprep.mubr.f32.mxu1 %v17539_v13  ;;  %v15486_v5 = vsel %vm17708_vm11, %v13063_v63, %v17707_v1  ;;  %vm17709_vm14 = vmmov %vm17708_vm11 }
 0x475   : > { %v15461_v7 = vpop.permute.xlu1 %13181  ;;  %v15463_v28 = vpop.permute.xlu0 %13206  ;;  %vm17712_vm10 = vmmov %vm17708_vm11 }
 0x476   : > { %17701 = vst [vmem:[#allocation51_spill] sm:$0xff] %v15463_v28 }
 0x477   : > { %12112 = vmatmul.mubr.msk.f32.vlgmr.msra.gmra.mrb[8].mxu1 %vm17702_vm4, %v15432_v30  ;;  %vm17714_vm4 = vcmask 7168  }
 0x478   : > { %7711 = vmatprep.mubr.f32.mxu1 %v17539_v13  ;;  %v15501_v33 = vsel %vm17714_vm4, %v13073_v61, %v17713_v26  ;;  %vm17715_vm11 = vmmov %vm17714_vm4 }
 0x479   : > { %v15468_v40 = vpop.permute.xlu1 %13191  ;;  %v15470_v17 = vpop.permute.xlu0 %13246  ;;  %v15504_v1 = vsel %vm17715_vm11, 0.0, %v13073_v61  ;;  %v13139_v61 = vunpack.i.h.bf16 %v15334_v2 }
 0x47a   : > { %17703 = vst [vmem:[#allocation52_spill] sm:$0xff] %v15468_v40  ;;  %17704 = vst [vmem:[#allocation53_spill] sm:$0xff] %v15470_v17  ;;  %v17711_v17 = vunpack.i.l.bf16 %v15084_v34 }
 0x47d   : > { %v15474_v8 = vpop.permute.xlu1 %13196  ;;  %v15476_v39 = vpop.permute.xlu0 %13266 }
 0x47e   : > { %17705 = vst [vmem:[#allocation54_spill] sm:$0xff] %v15474_v8  ;;  %17706 = vst [vmem:[#allocation55_spill] sm:$0xff] %v15476_v39  ;;  %v7780_v39 = vsel %vm17709_vm14, 0.0, %v13063_v63  ;;  %v17710_v8 = vunpack.i.h.bf16 %v15084_v34  ;;  %v17718_v63 = vunpack.i.l.bf16 %v15097_v12  ;;  %v17720_v34 = vunpack.i.h.bf16 %v15080_v10 }
 0x47f   : > { %vm17719_vm14 = vmmov %vm17714_vm4  ;;  %v17726_v12 = vunpack.i.h.bf16 %v15121_v25  ;;  %v17729_v10 = vunpack.i.l.bf16 %v15132_v57 }
 0x480   : > { %v15496_v9 = vsel %vm17712_vm10, %v17711_v17, %v17710_v8  ;;  %v15513_v28 = vsel %vm17719_vm14, %v17718_v63, %v13079_v23  ;;  %vm17721_vm10 = vcmask 269312   ;;  %v17724_v8 = vunpack.i.l.bf16 %v15110_v35 }
 0x481   : > { %v15506_v22 = vpop.permute.xlu1 %13201  ;;  %v15508_v40 = vpop.permute.xlu0 %13276  ;;  %v6996_v17 = vsel %vm17721_vm10, %v17720_v34, %v13093_v4  ;;  %vm17723_vm4 = vmmov %vm17721_vm10  ;;  %v17727_v63 = vunpack.i.l.bf16 %v15121_v25  ;;  %vm17728_vm14 = vcmask 252928   ;;  %v17732_v35 = vunpack.i.h.bf16 %v15292_v21 }
 0x482   : > { %17716 = vst [vmem:[#allocation56_spill] sm:$0xff] %v15506_v22  ;;  %17717 = vst [vmem:[#allocation57_spill] sm:$0xff] %v15508_v40  ;;  %v6997_v26 = vsel %vm17723_vm4, %v13093_v4, %v17722_v16  ;;  %v17277_v25 = vunpack.i.h.bf16 %v15358_v29  ;;  %v13143_v34 = vunpack.i.l.bf16 %v15358_v29 }
 0x483   : > { %vm17725_vm11 = vmmov %vm17723_vm4  ;;  %v15532_v40 = vsel %vm17728_vm14, %v17727_v63, %v17726_v12  ;;  %vm17731_vm4 = vcmask 7168  }
 0x484   : > { %v15525_v22 = vsel %vm17725_vm11, %v17724_v8, %v13099_v36  ;;  %vm17730_vm10 = vmmov %vm17728_vm14  ;;  %v15540_v4 = vsel %vm17731_vm4, %v13079_v23, %v13113_v6  ;;  %v13148_v23 = vunpack.i.l.bf16 %v15386_v47 }
 0x485   : > { %v15537_v44 = vsel %vm17730_vm10, %v17729_v10, %v13109_v60  ;;  %vm17733_vm9 = vmmov %vm17731_vm4  ;;  %v13212_v16 = vpop.permute.xlu1 %13211  ;;  %v15559_v10 = vpop.permute.xlu0 %13286  ;;  %vm17739_vm4 = vcmask 269312  }
 0x486   : > { %v15545_v2 = vsel %vm17733_vm9, %v13113_v6, %v17732_v35  ;;  %vm17734_vm11 = vmmov %vm17730_vm10  ;;  %v13214_v12 = vunpack.i.h.bf16 %v13212_v16  ;;  %v13213_v63 = vunpack.i.l.bf16 %v13212_v16  ;;  %v17738_v35 = vunpack.i.h.bf16 %v15310_v55 }
 0x487   : > { %v7781_v36 = vsel %vm17734_vm11, 0.0, %v13138_v20  ;;  %vm17735_vm9 = vmmov %vm17730_vm10 }
 0x488   : > { %v7757_v8 = vsel %vm17735_vm9, %v13138_v20, %v13139_v61  ;;  %v7790_v57 = vsel %vm17612_vm12, %v7781_v36, 0.0  ;;  %vm17736_vm14 = vmmov %vm17735_vm9  ;;  %v7003_v0 = vsel %vm17739_vm4, %v17738_v35, %v13213_v63 }
 0x489   : > { %v7758_v20 = vsel %vm17736_vm14, %v13139_v61, %v13143_v34  ;;  %vm17737_vm10 = vmmov %vm17735_vm9  ;;  %v7791_v60 = vsel %vm17606_vm13, %v7757_v8, 0.0  ;;  %v7037_v6 = vsel %vm17492_vm2, %v7003_v0, 0.0  ;;  %vm17742_vm9 = vnez %v17741_v27  ;;  %v13217_v14 = vpop.permute.xlu1 %13216 }
 0x48a   : > { %v7759_v16 = vsel %vm17737_vm10, %v13143_v34, %v17277_v25  ;;  %vm17740_vm11 = vmmov %vm17739_vm4  ;;  %v13149_v34 = vunpack.i.h.bf16 %v15386_v47  ;;  %v12313_v25 = vpack.c.bf16 %v7037_v6, %v6996_v17  ;;  %v13219_v55 = vunpack.i.h.bf16 %v13217_v14  ;;  %v15609_v6 = vpop.permute.xlu0 %13296 }
 0x48b   : > { %v7004_v36 = vsel %vm17740_vm11, %v13213_v63, %v13214_v12  ;;  %v13218_v11 = vunpack.i.l.bf16 %v13217_v14  ;;  %vm17743_vm14 = vcmask 1043456   ;;  %v17744_v63 = vmov 0 }
 0x48c   : > { %v7038_v61 = vsel %vm17742_vm9, %v7004_v36, 0.0  ;;  %vm15590_vm10 = vmpackc.low %vm17743_vm14, %vm17742_vm9  ;;  %v12325_v8 = vpack.c.bf16 %v7790_v57, %v7780_v39  ;;  %v7792_v0 = vsel %vm17583_vm0, %v7758_v20, 0.0  ;;  %vm17749_vm4 = vnez %v17748_v59 }
 0x48d   : > { %v17745_v63 = vsel %vm15590_vm10, 4294967295, %v17744_v63  ;;  %v7793_v36 = vsel %vm17749_vm4, %v7759_v16, 0.0  ;;  %v12310_v41 = vpack.c.bf16 %v7038_v61, %v6997_v26  ;;  %vm17750_vm11 = vmmov %vm17743_vm14  ;;  %v17751_v14 = vmov 0  ;;  %v17760_v16 = vld [vmem:[#allocation21_spill] sm:$0xff] }
 0x48e   : > { %17746 = vst [vmem:[#allocation20_spill] sm:$0xff] %v17745_v63  ;;  %vm15601_vm1 = vmpackc.low %vm17750_vm11, %vm17492_vm2  ;;  %v13169_v47 = vunpack.i.h.bf16 %v15388_v52  ;;  %v13168_v17 = vunpack.i.l.bf16 %v15388_v52  ;;  %vm17753_vm14 = vcmask 269312   ;;  %v17756_v26 = vmov 0 }
 0x48f   : > { %v17752_v14 = vsel %vm15601_vm1, 4294967295, %v17751_v14  ;;  %v7005_v39 = vsel %vm17753_vm14, %v13214_v12, %v13218_v11  ;;  %vm17754_vm15 = vmmov %vm17753_vm14  ;;  %vm17761_vm2 = vnez %v17760_v16  ;;  %12312 = vmatprep.subr.msk.bf16.mxu0 %vm15590_vm10, %v12310_v41  ;;  %v12322_v12 = vpack.c.bf16 %v7791_v60, %v15486_v5  ;;  %v17768_v41 = vld [vmem:[#allocation38_spill] sm:$0xff]  ;;  %v17769_v5 = vld [vmem:[#allocation40_spill] sm:$0xff] }
 0x490   : > { %v7006_v57 = vsel %vm17754_vm15, %v13218_v11, %v13219_v55  ;;  %vm17755_vm9 = vmmov %vm17750_vm11  ;;  %vm17759_vm11 = vcmask 7168   ;;  %v7039_v61 = vsel %vm17761_vm2, %v7005_v39, 0.0  ;;  %v13222_v11 = vpop.permute.xlu1 %13221  ;;  %12315 = vmatpush1.bf16.msk.msra.mxu0 %vm15601_vm1, %v12313_v25  ;;  %v17765_v39 = vmov 0 }
 0x491   : > { %vm15614_vm7 = vmpackc.low %vm17755_vm9, %vm17606_vm13  ;;  %v8182_v20 = vsel %vm17759_vm11, 0.0, %v13148_v23  ;;  %v7040_v52 = vsel %vm17763_vm6, %v7006_v57, 0.0  ;;  %v13224_v56 = vunpack.i.h.bf16 %v13222_v11  ;;  %v12331_v57 = vpack.c.bf16 %v7792_v0, %v17768_v41 }
 0x492   : > { %v17757_v26 = vsel %vm15614_vm7, 4294967295, %v17756_v26  ;;  %vm17764_vm15 = vmmov %vm17759_vm11  ;;  %v12319_v60 = vpack.c.bf16 %v7039_v61, %v17769_v5  ;;  %12324 = vmatprep.subr.msk.bf16.mxu0 %vm15614_vm7, %v12322_v12  ;;  %v17771_v25 = vmov 0  ;;  %v12328_v58 = vpack.c.bf16 %v7793_v36, %v15496_v9 }
 0x493   : > { %17758 = vst [vmem:[#allocation58_spill] sm:$0xff] %v17757_v26  ;;  %v8158_v55 = vsel %vm17764_vm15, %v13148_v23, %v13149_v34  ;;  %vm15634_vm14 = vmpackc.low %vm17755_vm9, %vm17763_vm6  ;;  %v13223_v23 = vunpack.i.l.bf16 %v13222_v11  ;;  %v8191_v51 = vsel %vm17676_vm8, %v8182_v20, 0.0  ;;  %v17774_v0 = vunpack.i.h.bf16 %v15292_v21  ;;  %v15692_v21 = vpop.permute.xlu0 %13301 }
 0x494   : > { %v17766_v39 = vsel %vm15634_vm14, 4294967295, %v17765_v39  ;;  %vm17770_vm11 = vmmov %vm17755_vm9  ;;  %vm17775_vm9 = vcmask 7168   ;;  %v12316_v12 = vpack.c.bf16 %v7040_v52, %v15525_v22  ;;  %v17777_v41 = vmov 0 }
 0x495   : > { %17767 = vst [vmem:[#allocation22_spill] sm:$0xff] %v17766_v39  ;;  %vm15645_vm15 = vmpackc.low %vm17770_vm11, %vm17612_vm12  ;;  %v15655_v61 = vsel %vm17775_vm9, %v17774_v0, %v13168_v17  ;;  %v8192_v9 = vsel %vm14012_vm5, %v8158_v55, 0.0  ;;  %v17780_v36 = vunpack.i.h.bf16 %v15358_v29  ;;  %vm17783_vm8 = vcmask 97280   ;;  %v17791_v0 = vld [vmem:[#allocation28_spill] sm:$0xff]  ;;  %v17902_v39 = vld [vmem:[#allocation37_spill] sm:$0xff] }
 0x496   : > { %v17772_v25 = vsel %vm15645_vm15, 4294967295, %v17771_v25  ;;  %vm17776_vm1 = vmmov %vm17775_vm9  ;;  %vm17781_vm9 = vcmask 252928   ;;  %12117 = vmatmul.mubr.msk.f32.vlgmr.msra.gmra.mrb[10].mxu0 %vm17783_vm8, %v15432_v30  ;;  %v17784_v22 = vmov 0  ;;  %vm17787_vm5 = vcmask 7168   ;;  %12318 = vmatprep.subr.msk.bf16.mxu1 %vm15634_vm14, %v12316_v12 }
 0x497   : > { %17773 = vst [vmem:[#allocation38_spill] sm:$0xff] %v17772_v25  ;;  %v15658_v11 = vsel %vm17776_vm1, %v13168_v17, %v13169_v47  ;;  %vm15664_vm7 = vmpackc.low %vm17770_vm11, %vm17761_vm2  ;;  %v7760_v20 = vsel %vm17781_vm9, %v17780_v36, %v13223_v23  ;;  %v13227_v17 = vpop.permute.xlu1 %13226  ;;  %v8159_v52 = vsel %vm17787_vm5, %v13149_v34, %v13153_v54  ;;  %v17788_v55 = vunpack.i.h.bf16 %v15425_v43  ;;  %12327 = vmatpush1.bf16.msk.msra.mxu0 %vm15645_vm15, %v12325_v8  ;;  %v15701_v34 = vld [vmem:[%s17136_s9 + $0x8] sm:$0xf] }
 0x498   : > { %v17778_v41 = vsel %vm15664_vm7, 4294967295, %v17777_v41  ;;  %vm17782_vm1 = vmmov %vm17781_vm9  ;;  %vm17792_vm9 = vnez %v17791_v0  ;;  %12321 = vmatpush1.bf16.msk.msra.mxu1 %vm15664_vm7, %v12319_v60  ;;  %7891 = vmatprep.mubr.f32.mxu0 %v17539_v13  ;;  %v17794_v8 = vmov 0  ;;  %v12349_v12 = vpack.c.bf16 %v8191_v51, %v15504_v1 }
 0x499   : > { %17779 = vst [vmem:[#allocation40_spill] sm:$0xff] %v17778_v41  ;;  %v7761_v47 = vsel %vm17782_vm1, %v13223_v23, %v13224_v56  ;;  %vm15680_vm10 = vmpackc.low %vm17770_vm11, %vm17749_vm4  ;;  %v7794_v23 = vsel %vm17617_vm3, %v7760_v20, 0.0  ;;  %v13174_v20 = vunpack.i.h.bf16 %v15453_v18  ;;  %v13228_v26 = vunpack.i.l.bf16 %v13227_v17 }
 0x49a   : > { %v17785_v22 = vsel %vm15680_vm10, 4294967295, %v17784_v22  ;;  %vm17789_vm12 = vmmov %vm17787_vm5  ;;  %v7795_v36 = vsel %vm17792_vm9, %v7761_v47, 0.0  ;;  %v13229_v47 = vunpack.i.h.bf16 %v13227_v17  ;;  %v12337_v25 = vpack.c.bf16 %v7794_v23, %v17796_v37  ;;  %12330 = vmatprep.subr.msk.bf16.mxu1 %vm15680_vm10, %v12328_v58 }
 0x49b   : > { %17786 = vst [vmem:[#allocation59_spill] sm:$0xff] %v17785_v22  ;;  %v8160_v29 = vsel %vm17789_vm12, %v13153_v54, %v17788_v55  ;;  %v13178_v54 = vunpack.i.l.bf16 %v15427_v45  ;;  %v13173_v55 = vunpack.i.l.bf16 %v15453_v18  ;;  %vm17793_vm5 = vmmov %vm17770_vm11  ;;  %v17798_v18 = vmov 0  ;;  %v13232_v58 = vpop.permute.xlu1 %13231  ;;  %v17813_v22 = vld [vmem:[#allocation30_spill] sm:$0xff] }
 0x49c   : > { %vm15712_vm12 = vmpackc.low %vm17793_vm5, %vm17792_vm9  ;;  %v12346_v60 = vpack.c.bf16 %v8192_v9, %v15501_v33  ;;  %vm17800_vm11 = vnez %v17403_v48  ;;  %v13189_v37 = vunpack.i.h.bf16 %v15455_v42  ;;  %v12334_v1 = vpack.c.bf16 %v7795_v36, %v15532_v40  ;;  %v17811_v48 = vld [vmem:[#allocation29_spill] sm:$0xff] }
 0x49d   : > { %v17795_v8 = vsel %vm15712_vm12, 4294967295, %v17794_v8  ;;  %vm17797_vm8 = vmmov %vm17793_vm5  ;;  %v8193_v0 = vsel %vm17800_vm11, %v8159_v52, 0.0  ;;  %vm17801_vm5 = vnez %v17406_v49  ;;  %vm17802_vm10 = vcmask 97280  }
 0x49e   : > { %vm15723_vm1 = vmpackc.low %vm17797_vm8, %vm17583_vm0  ;;  %v8194_v51 = vsel %vm17801_vm5, %v8160_v29, 0.0  ;;  %12128 = vmatmul.mubr.msk.f32.vlgmr.msra.gmra.mrb[8].mxu0 %vm17802_vm10, %v15701_v34  ;;  %v17803_v17 = vmov 0  ;;  %vm17805_vm9 = vcmask 252928   ;;  %v13234_v52 = vunpack.i.h.bf16 %v13232_v58  ;;  %12336 = vmatprep.subr.msk.bf16.mxu0 %vm15712_vm12, %v12334_v1 }
 0x49f   : > { %v17799_v18 = vsel %vm15723_vm1, 4294967295, %v17798_v18  ;;  %vm15739_vm15 = vmpackc.low %vm17797_vm8, %vm17617_vm3  ;;  %v7762_v33 = vsel %vm17805_vm9, %v13224_v56, %v13228_v26  ;;  %v13233_v29 = vunpack.i.l.bf16 %v13232_v58  ;;  %8033 = vmatprep.mubr.f32.mxu0 %v17539_v13  ;;  %v17808_v40 = vunpack.i.h.bf16 %v15427_v45 }
 0x4a0   : > { %v17804_v17 = vsel %vm15739_vm15, 4294967295, %v17803_v17  ;;  %vm17806_vm11 = vmmov %vm17805_vm9  ;;  %vm17812_vm8 = vnez %v17811_v48  ;;  %vm17814_vm9 = vnez %v17813_v22  ;;  %v13183_v58 = vunpack.i.l.bf16 %v15461_v7  ;;  %12339 = vmatpush1.bf16.msk.msra.mxu0 %vm15739_vm15, %v12337_v25  ;;  %v16739_v22 = vld [vmem:[#allocation2 + $0x6c8] sm:$0xff] }
 0x4a1   : > { %v7763_v9 = vsel %vm17806_vm11, %v13228_v26, %v13229_v47  ;;  %vm17807_vm5 = vmmov %vm17802_vm10  ;;  %vm17809_vm10 = vcmask 1039360   ;;  %v7796_v49 = vsel %vm17812_vm8, %v7762_v33, 0.0  ;;  %v13184_v47 = vunpack.i.h.bf16 %v15461_v7  ;;  %v13237_v7 = vpop.permute.xlu1 %13236 }
 0x4a2   : > { %12122 = vmatmul.mubr.msk.f32.vlgmr.msra.gmra.mrb[10].mxu1 %vm17807_vm5, %v15432_v30  ;;  %v8866_v23 = vsel %vm17809_vm10, %v13178_v54, %v17808_v40  ;;  %vm17810_vm7 = vmmov %vm17809_vm10  ;;  %v7797_v56 = vsel %vm17814_vm9, %v7763_v9, 0.0  ;;  %v17815_v30 = vld [vmem:[#allocation39_spill] sm:$0xff]  ;;  %v15763_v40 = vpop.permute.xlu0 %13306  ;;  %v17816_v5 = vunpack.i.h.bf16 %v15425_v43  ;;  %vm17820_vm5 = vnez %v17675_v19 }
 0x4a3   : > { %v8873_v36 = vsel %vm17810_vm7, %v13173_v55, %v13174_v20  ;;  %12333 = vmatpush1.bf16.msk.msra.mxu1 %vm15723_vm1, %v12331_v57  ;;  %v12355_v26 = vpack.c.bf16 %v8193_v0, %v17815_v30  ;;  %vm17817_vm7 = vcmask 7168   ;;  %7962 = vmatprep.mubr.f32.mxu1 %v17539_v13  ;;  %v17818_v57 = vld [vmem:[#allocation42_spill] sm:$0xff]  ;;  %vm17821_vm10 = vcmask 1043456  }
 0x4a4   : > { %v8161_v33 = vsel %vm17817_vm7, %v17816_v5, %v13233_v29  ;;  %v12343_v9 = vpack.c.bf16 %v7796_v49, %v17818_v57  ;;  %vm17819_vm11 = vmmov %vm17817_vm7  ;;  %12348 = vmatprep.subr.msk.bf16.mxu0 %vm17820_vm5, %v12346_v60  ;;  %v12352_v25 = vpack.c.bf16 %v8194_v51, %v15513_v28  ;;  %v8906_v5 = vsel %vm17606_vm13, %v8873_v36, 0.0  ;;  %v17828_v57 = vld [vmem:[#allocation51_spill] sm:$0xff] }
 0x4a5   : > { %v8162_v0 = vsel %vm17819_vm11, %v13233_v29, %v13234_v52  ;;  %vm15779_vm1 = vmpackc.low %vm17821_vm10, %vm17814_vm9  ;;  %vm17824_vm7 = vcmask 1039360   ;;  %v12340_v29 = vpack.c.bf16 %v7797_v56, %v15537_v44  ;;  %v13239_v30 = vunpack.i.h.bf16 %v13237_v7  ;;  %v17834_v56 = vld [vmem:[#allocation52_spill] sm:$0xff] }
 0x4a6   : > { %v8865_v49 = vsel %vm17824_vm7, %v13189_v37, %v13178_v54  ;;  %vm17825_vm11 = vcmask 97280   ;;  %vm15793_vm5 = vmpackc.low %vm17821_vm10, %vm17812_vm8  ;;  %v17826_v60 = vmov 0  ;;  %vm17829_vm15 = vnez %v17409_v62 }
 0x4a7   : > { %12133 = vmatmul.mubr.msk.f32.vlgmr.msra.gmra.mrb[8].mxu1 %vm17825_vm11, %v15701_v34  ;;  %v17827_v60 = vsel %vm15793_vm5, 4294967295, %v17826_v60  ;;  %v8195_v51 = vsel %vm17829_vm15, %v8161_v33, 0.0  ;;  %vm17830_vm7 = vnez %v17741_v27  ;;  %v13238_v44 = vunpack.i.l.bf16 %v13237_v7  ;;  %vm17831_vm13 = vmmov %vm17825_vm11  ;;  %12342 = vmatprep.subr.msk.bf16.mxu1 %vm15779_vm1, %v12340_v29  ;;  %v17835_v33 = vld [vmem:[#allocation35_spill] sm:$0xff] }
 0x4a8   : > { %v8196_v54 = vsel %vm17830_vm7, %v8162_v0, 0.0  ;;  %12138 = vmatmul.mubr.msk.f32.vlgmr.msra.gmra.mrb[10].mxu0 %vm17831_vm13, %v15701_v34  ;;  %8104 = vmatprep.mubr.f32.mxu1 %v17539_v13  ;;  %vm17832_vm11 = vcmask 1039360   ;;  %v13194_v1 = vunpack.i.h.bf16 %v17834_v56  ;;  %v13193_v28 = vunpack.i.l.bf16 %v17834_v56  ;;  %v15816_v0 = vld [vmem:[%s17136_s9 + $0xc] sm:$0xf]  ;;  %v15829_v56 = vpop.permute.xlu0 %13311 }
 0x4a9   : > { %v8872_v37 = vsel %vm17832_vm11, %v13183_v58, %v13173_v55  ;;  %vm17833_vm10 = vmmov %vm17832_vm11  ;;  %vm17836_vm15 = vnez %v17835_v33  ;;  %v13208_v7 = vunpack.i.l.bf16 %v17828_v57  ;;  %vm17837_vm13 = vcmask 7168   ;;  %12345 = vmatpush1.bf16.msk.msra.mxu1 %vm15793_vm5, %v12343_v9  ;;  %8292 = vmatprep.mubr.f32.mxu0 %v17539_v13  ;;  %v15824_v58 = vpop.permute.xlu1 %13241 }
 0x4aa   : > { %v8874_v36 = vsel %vm17833_vm10, %v13174_v20, %v13184_v47  ;;  %12351 = vmatpush1.bf16.msk.msra.mxu0 %vm17836_vm15, %v12349_v12  ;;  %v8163_v55 = vsel %vm17837_vm13, %v13234_v52, %v13238_v44  ;;  %vm17838_vm11 = vmmov %vm17837_vm13  ;;  %v15826_v29 = vpack.c.bf16 %v8906_v5, %v8866_v23  ;;  %v12361_v12 = vpack.c.bf16 %v8195_v51, %v15540_v4  ;;  %v17844_v51 = vld [vmem:[#allocation53_spill] sm:$0xff] }
 0x4ab   : > { %v8164_v20 = vsel %vm17838_vm11, %v13238_v44, %v13239_v30  ;;  %v8197_v32 = vsel %vm17761_vm2, %v8163_v55, 0.0  ;;  %v17839_v30 = vld [vmem:[#allocation49_spill] sm:$0xff]  ;;  %v12358_v9 = vpack.c.bf16 %v8196_v54, %v15545_v2  ;;  %v17841_v44 = vunpack.i.l.bf16 %v15455_v42  ;;  %v17850_v54 = vld [vmem:[#allocation54_spill] sm:$0xff] }
 0x4ac   : > { %v8198_v52 = vsel %vm17763_vm6, %v8164_v20, 0.0  ;;  %vm17840_vm10 = vnez %v17839_v30  ;;  %vm17842_vm13 = vcmask 1039360   ;;  %vm17843_vm11 = vnez %v17420_v31  ;;  %v17851_v31 = vld [vmem:[#allocation50_spill] sm:$0xff]  ;;  %v15898_v59 = vpop.permute.xlu0 %13316 }
 0x4ad   : > { %12354 = vmatprep.subr.msk.bf16.mxu1 %vm17840_vm10, %v12352_v25  ;;  %v8875_v23 = vsel %vm17842_vm13, %v13184_v47, %v17841_v44  ;;  %v8905_v4 = vsel %vm17843_vm11, %v8872_v37, 0.0  ;;  %v8907_v5 = vsel %vm17583_vm0, %v8874_v36, 0.0  ;;  %v13249_v55 = vunpack.i.h.bf16 %v17844_v51  ;;  %vm17846_vm15 = vmmov %vm17842_vm13  ;;  %v17847_v25 = vld [vmem:[#allocation56_spill] sm:$0xff]  ;;  %v15862_v2 = vpop.permute.xlu1 %13251 }
 0x4ae   : > { %vm17845_vm2 = vcmask 97280   ;;  %v8868_v20 = vsel %vm17846_vm15, %v13193_v28, %v13194_v1  ;;  %vm17848_vm10 = vnez %v17745_v63  ;;  %v12364_v47 = vpack.c.bf16 %v8198_v52, %v15658_v11  ;;  %v17854_v11 = vld [vmem:[#allocation55_spill] sm:$0xff] }
 0x4af   : > { %12149 = vmatmul.mubr.msk.f32.vlgmr.msra.gmra.mrb[8].mxu0 %vm17845_vm2, %v15816_v0  ;;  %12360 = vmatprep.subr.msk.bf16.mxu0 %vm17848_vm10, %v12358_v9  ;;  %vm17849_vm13 = vmmov %vm17845_vm2  ;;  %v13198_v37 = vunpack.i.l.bf16 %v17850_v54  ;;  %v13299_v36 = vunpack.i.h.bf16 %v15609_v6  ;;  %v13298_v44 = vunpack.i.l.bf16 %v15609_v6  ;;  %v12367_v35 = vpack.c.bf16 %v8197_v32, %v15655_v61 }
 0x4b0   : > { %12143 = vmatmul.mubr.msk.f32.vlgmr.msra.gmra.mrb[10].mxu1 %vm17849_vm13, %v15701_v34  ;;  %vm17852_vm2 = vnez %v17851_v31  ;;  %v17853_v9 = vunpack.i.h.bf16 %v15427_v45  ;;  %v13199_v34 = vunpack.i.h.bf16 %v17850_v54  ;;  %v13268_v63 = vunpack.i.l.bf16 %v17854_v11  ;;  %8434 = vmatprep.mubr.f32.mxu0 %v17539_v13 }
 0x4b1   : > { %12357 = vmatpush1.bf16.msk.msra.mxu1 %vm17852_vm2, %v12355_v26  ;;  %vm17855_vm13 = vnez %v17752_v14  ;;  %8363 = vmatprep.mubr.f32.mxu1 %v17539_v13  ;;  %v8908_v32 = vsel %vm17749_vm4, %v8875_v23, 0.0  ;;  %v15875_v6 = vpack.c.bf16 %v8905_v4, %v8865_v49  ;;  %v17856_v45 = vunpack.i.h.bf16 %v17828_v57  ;;  %v17858_v26 = vld [vmem:[#allocation57_spill] sm:$0xff] }
 0x4b2   : > { %v8867_v16 = vsel %vm17846_vm15, %v17853_v9, %v13193_v28  ;;  %12363 = vmatpush1.bf16.msk.msra.mxu0 %vm17855_vm13, %v12361_v12  ;;  %vm17857_vm0 = vcmask 793600   ;;  %v13279_v28 = vunpack.i.h.bf16 %v17858_v26  ;;  %v17859_v54 = vpack.c.bf16 %v15165_v24, %v15030_v46  ;;  %v17860_v9 = vld [vmem:[#allocation48_spill] sm:$0xff]  ;;  %12366 = vmatprep.subr.msk.bf16.mxu1 %vm15634_vm14, %v12364_v47 }
 0x4b3   : > { %v9267_v61 = vsel %vm17857_vm0, %v13208_v7, %v17856_v45  ;;  %vm17861_vm15 = vnez %v17860_v9  ;;  %v15887_v12 = vpack.c.bf16 %v8908_v32, %v8868_v20  ;;  %vm17862_vm11 = vmmov %vm17857_vm0  ;;  %v17863_v49 = vunpack.i.h.bf16 %v17847_v25 }
 0x4b4   : > { %12372 = vmatprep.subr.msk.bf16.mxu0 %vm17861_vm15, %v17859_v54  ;;  %v15890_v23 = vsel %vm17862_vm11, %v13249_v55, %v13208_v7  ;;  %v17864_v4 = vunpack.i.l.bf16 %v17847_v25  ;;  %v13303_v52 = vunpack.i.l.bf16 %v15692_v21  ;;  %vm17865_vm4 = vcmask 97280   ;;  %v15914_v55 = vpop.permute.xlu1 %13256 }
 0x4b5   : > { %12154 = vmatmul.mubr.msk.f32.vlgmr.msra.gmra.mrb[8].mxu1 %vm17865_vm4, %v15816_v0  ;;  %v15904_v46 = vpack.c.bf16 %v8907_v5, %v8867_v16  ;;  %vm17866_vm11 = vcmask 1039360   ;;  %vm17868_vm2 = vmmov %vm17865_vm4  ;;  %v17871_v47 = vunpack.i.h.bf16 %v17854_v11  ;;  %vm17872_vm4 = vcmask 785408  }
 0x4b6   : > { %v9274_v45 = vsel %vm17857_vm0, %v17864_v4, %v17863_v49  ;;  %v15907_v24 = vsel %vm17866_vm11, %v13194_v1, %v13198_v37  ;;  %vm17867_vm13 = vmmov %vm17866_vm11  ;;  %12159 = vmatmul.mubr.msk.f32.vlgmr.msra.gmra.mrb[10].mxu0 %vm17868_vm2, %v15816_v0  ;;  %vm17869_vm0 = vnez %v17778_v41  ;;  %v17342_v1 = vunpack.i.h.bf16 %v15559_v10  ;;  %8505 = vmatprep.mubr.f32.mxu1 %v17539_v13 }
 0x4b7   : > { %v8877_v7 = vsel %vm17867_vm13, %v13298_v44, %v13299_v36  ;;  %12369 = vmatpush1.bf16.msk.msra.mxu1 %vm17869_vm0, %v12367_v35  ;;  %vm17870_vm10 = vmmov %vm17866_vm11  ;;  %v15920_v16 = vsel %vm17872_vm4, %v13268_v63, %v17871_v47  ;;  %v13288_v5 = vunpack.i.l.bf16 %v15559_v10  ;;  %v17873_v32 = vpack.c.bf16 %v15159_v3, %v15028_v50  ;;  %v17874_v35 = vld [vmem:[#allocation33_spill] sm:$0xff]  ;;  %8605 = vmatprep.mubr.f32.mxu0 %v17539_v13 }
 0x4b8   : > { %v8870_v20 = vsel %vm17870_vm10, %v13198_v37, %v13199_v34  ;;  %v17875_v54 = vpack.c.bf16 %v15180_v15, %v17874_v35  ;;  %v15937_v37 = vld [vmem:[%s17136_s9 + $0x10] sm:$0xf]  ;;  %vm17876_vm10 = vnez %v17401_v38  ;;  %v17340_v4 = vunpack.i.l.bf16 %v17858_v26  ;;  %vm17877_vm2 = vmmov %vm17872_vm4  ;;  %v17878_v47 = vld [vmem:[#allocation45_spill] sm:$0xff] }
 0x4b9   : > { %12375 = vmatpush1.bf16.msk.msra.mxu0 %vm17861_vm15, %v17873_v32  ;;  %v9307_v49 = vsel %vm17876_vm10, %v9274_v45, 0.0  ;;  %v15943_v50 = vsel %vm17877_vm2, %v13279_v28, %v13268_v63  ;;  %v13304_v3 = vunpack.i.h.bf16 %v15692_v21  ;;  %v17879_v15 = vld [vmem:[#allocation34_spill] sm:$0xff]  ;;  %v17881_v35 = vunpack.i.l.bf16 %v15455_v42  ;;  %vm17882_vm13 = vmmov %vm17866_vm11  ;;  %v17883_v45 = vld [vmem:[#allocation28_spill] sm:$0xff] }
 0x4ba   : > { %12378 = vmatprep.subr.msk.bf16.mxu1 %vm17861_vm15, %v17875_v54  ;;  %v17880_v32 = vpack.c.bf16 %v17878_v47, %v17879_v15  ;;  %vm17884_vm11 = vnez %v17883_v45  ;;  %vm17885_vm4 = vmmov %vm17882_vm13  ;;  %v13308_v28 = vunpack.i.l.bf16 %v15763_v40  ;;  %vm17886_vm10 = vcmask 97280   ;;  %v17896_v45 = vld [vmem:[#allocation44_spill] sm:$0xff] }
 0x4bb   : > { %v8876_v38 = vsel %vm17882_vm13, %v17881_v35, %v13298_v44  ;;  %v8910_v54 = vsel %vm17884_vm11, %v8877_v7, 0.0  ;;  %v8878_v63 = vsel %vm17885_vm4, %v13299_v36, %v13303_v52  ;;  %12164 = vmatmul.mubr.msk.f32.vlgmr.msra.gmra.mrb[10].mxu1 %vm17886_vm10, %v15816_v0  ;;  %vm17887_vm2 = vmmov %vm17885_vm4  ;;  %v13309_v47 = vunpack.i.h.bf16 %v15763_v40  ;;  %v15968_v7 = vpop.permute.xlu1 %13261  ;;  %v15981_v0 = vpop.permute.xlu0 %13331 }
 0x4bc   : > { %12384 = vmatprep.subr.msk.bf16.mxu0 %vm17861_vm15, %v17880_v32  ;;  %v8896_v21 = vsel %vm17887_vm2, %v13303_v52, 0.0  ;;  %v13313_v42 = vunpack.i.l.bf16 %v15829_v56  ;;  %v13243_v44 = vunpack.i.l.bf16 %v15824_v58  ;;  %vm17888_vm13 = vmmov %vm17886_vm10  ;;  %v13248_v36 = vunpack.i.l.bf16 %v17844_v51  ;;  %v17893_v52 = vld [vmem:[#allocation43_spill] sm:$0xff]  ;;  %v17897_v51 = vld [vmem:[#allocation32_spill] sm:$0xff]  ;;  %8676 = vmatprep.mubr.f32.mxu1 %v17539_v13 }
 0x4bd   : > { %12168 = vmatmul.mubr.msk.f32.vlgmr.msra.gmra.mrb[8].mxu0 %vm17888_vm13, %v15937_v37  ;;  %vm17889_vm4 = vcmask 785408   ;;  %v17894_v32 = vld [vmem:[#allocation31_spill] sm:$0xff]  ;;  %v17898_v41 = vpack.c.bf16 %v17896_v45, %v17897_v51  ;;  %v8909_v11 = vsel %vm17617_vm3, %v8876_v38, 0.0  ;;  %vm17900_vm13 = vmmov %vm17887_vm2  ;;  %v12406_v45 = vpack.c.bf16 %v8910_v54, %v8870_v20 }
 0x4be   : > { %v15974_v15 = vsel %vm17889_vm4, %v17340_v4, %v13288_v5  ;;  %vm17891_vm10 = vmmov %vm17889_vm4  ;;  %v17895_v35 = vpack.c.bf16 %v17893_v52, %v17894_v32  ;;  %v12418_v4 = vpack.c.bf16 %v9307_v49, %v9267_v61  ;;  %v17904_v32 = vld [vmem:[#allocation58_spill] sm:$0xff]  ;;  %v8912_v61 = vsel %vm17814_vm9, %v8896_v21, 0.0  ;;  %8747 = vmatprep.mubr.f32.mxu0 %v17539_v13  ;;  %18051 = vst [vmem:[#allocation31_spill] sm:$0xff] %v16739_v22 }
 0x4bf   : > { %17890 = vst [vmem:[#allocation41_spill] sm:$0xff] %v15974_v15  ;;  %v15979_v40 = vsel %vm17891_vm10, %v13288_v5, %v17342_v1  ;;  %12387 = vmatpush1.bf16.msk.msra.mxu0 %vm17861_vm15, %v17898_v41  ;;  %v8871_v5 = vsel %vm17887_vm2, %v13199_v34, %v13304_v3  ;;  %v8895_v1 = vsel %vm17900_vm13, %v13304_v3, 0.0  ;;  %vm17905_vm4 = vnez %v17904_v32  ;;  %v16025_v54 = vpop.permute.xlu1 %13271 }
 0x4c0   : > { %17892 = vst [vmem:[#allocation29_spill] sm:$0xff] %v15979_v40  ;;  %12381 = vmatpush1.bf16.msk.msra.mxu1 %vm17861_vm15, %v17895_v35  ;;  %v17901_v40 = vld [vmem:[#allocation47_spill] sm:$0xff]  ;;  %12396 = vmatprep.subr.msk.bf16.mxu0 %vm17905_vm4, %v15826_v29  ;;  %v8911_v41 = vsel %vm17812_vm8, %v8878_v63, 0.0  ;;  %vm17906_vm10 = vcmask 793600   ;;  %v13244_v20 = vunpack.i.h.bf16 %v15824_v58  ;;  %v17909_v3 = vunpack.i.l.bf16 %v17847_v25  ;;  %v17914_v35 = vld [vmem:[#allocation36_spill] sm:$0xff] }
 0x4c1   : > { %v17903_v52 = vpack.c.bf16 %v17901_v40, %v17902_v39  ;;  %v16010_v34 = vsel %vm17906_vm10, %v13248_v36, %v13308_v28  ;;  %vm17907_vm2 = vmmov %vm17906_vm10  ;;  %vm17911_vm11 = vcmask 97280   ;;  %v13254_v63 = vunpack.i.h.bf16 %v15862_v2  ;;  %v17913_v40 = vld [vmem:[#allocation46_spill] sm:$0xff] }
 0x4c2   : > { %v9278_v39 = vsel %vm17907_vm2, %v13308_v28, %v13309_v47  ;;  %vm17908_vm13 = vmmov %vm17907_vm2  ;;  %v13253_v28 = vunpack.i.l.bf16 %v15862_v2  ;;  %v13259_v21 = vunpack.i.h.bf16 %v15914_v55  ;;  %v13258_v58 = vunpack.i.l.bf16 %v15914_v55  ;;  %v17918_v55 = vld [vmem:[#allocation59_spill] sm:$0xff] }
 0x4c3   : > { %12390 = vmatprep.subr.msk.bf16.mxu1 %vm17861_vm15, %v17903_v52  ;;  %v9297_v29 = vsel %vm17908_vm13, %v13313_v42, 0.0  ;;  %vm17910_vm8 = vmmov %vm17907_vm2  ;;  %12171 = vmatmul.mubr.msk.f32.vlgmr.msra.gmra.mrb[8].mxu1 %vm17911_vm11, %v15937_v37  ;;  %v17915_v51 = vpack.c.bf16 %v17913_v40, %v17914_v35  ;;  %v16042_v52 = vld [vmem:[%s17136_s9 + $0x14] sm:$0xf]  ;;  %v12409_v2 = vpack.c.bf16 %v8909_v11, %v15907_v24  ;;  %v12415_v49 = vpack.c.bf16 %v8911_v41, %v8871_v5  ;;  %v17924_v5 = vld [vmem:[#allocation17_spill] sm:$0xff]  ;;  %v16075_v53 = vpop.permute.xlu1 %13281 }
 0x4c4   : > { %v9273_v38 = vsel %vm17910_vm8, %v13243_v44, %v17909_v3  ;;  %vm17912_vm10 = vmmov %vm17911_vm11  ;;  %v17916_v44 = vld [vmem:[#allocation38_spill] sm:$0xff]  ;;  %v12412_v3 = vpack.c.bf16 %v8912_v61, %v8895_v1  ;;  %vm17919_vm11 = vnez %v17918_v55  ;;  %vm17920_vm2 = vnez %v17409_v62  ;;  %v16060_v1 = vpop.permute.xlu0 %13336  ;;  %8818 = vmatprep.mubr.f32.mxu1 %v17539_v13 }
 0x4c5   : > { %12174 = vmatmul.mubr.msk.f32.vlgmr.msra.gmra.mrb[10].mxu0 %vm17912_vm10, %v15937_v37  ;;  %12393 = vmatpush1.bf16.msk.msra.mxu1 %vm17861_vm15, %v17915_v51  ;;  %vm17917_vm8 = vnez %v17916_v44  ;;  %v9311_v40 = vsel %vm17830_vm7, %v9278_v39, 0.0  ;;  %v17921_v35 = vunpack.i.h.bf16 %v15829_v56  ;;  %v9313_v24 = vsel %vm17763_vm6, %v9297_v29, 0.0  ;;  %vm17922_vm10 = vmmov %vm17908_vm13 }
 0x4c6   : > { %12399 = vmatpush1.bf16.msk.msra.mxu0 %vm17917_vm8, %v15875_v6  ;;  %12402 = vmatprep.subr.msk.bf16.mxu1 %vm17919_vm11, %v15887_v12  ;;  %v9310_v6 = vsel %vm17920_vm2, %v16010_v34, 0.0  ;;  %v16065_v12 = vsel %vm17922_vm10, %v13309_v47, %v13313_v42  ;;  %v13319_v62 = vunpack.i.h.bf16 %v15898_v59  ;;  %vm17923_vm2 = vmmov %vm17922_vm10  ;;  %vm17925_vm7 = vnez %v17924_v5 }
 0x4c7   : > { %12408 = vmatprep.subr.msk.bf16.mxu0 %vm15712_vm12, %v12406_v45  ;;  %v9296_v11 = vsel %vm17908_vm13, %v17921_v35, 0.0  ;;  %9006 = vmatprep.mubr.f32.mxu0 %v17539_v13  ;;  %v9276_v27 = vsel %vm17923_vm2, %v13244_v20, %v13248_v36  ;;  %v9306_v45 = vsel %vm17925_vm7, %v9273_v38, 0.0  ;;  %vm17926_vm13 = vcmask 97280   ;;  %vm17928_vm12 = vmmov %vm17923_vm2  ;;  %v17935_v38 = vld [vmem:[#allocation19_spill] sm:$0xff] }
 0x4c8   : > { %12177 = vmatmul.mubr.msk.f32.vlgmr.msra.gmra.mrb[10].mxu1 %vm17926_vm13, %v15937_v37  ;;  %vm17927_vm6 = vmmov %vm17926_vm13  ;;  %v9269_v41 = vsel %vm17928_vm12, %v13253_v28, %v13254_v63  ;;  %v13264_v42 = vunpack.i.h.bf16 %v15968_v7  ;;  %v13263_v61 = vunpack.i.l.bf16 %v15968_v7  ;;  %vm17930_vm10 = vnez %v17799_v18 }
 0x4c9   : > { %12183 = vmatmul.mubr.msk.f32.vlgmr.msra.gmra.mrb[8].mxu0 %vm17927_vm6, %v16042_v52  ;;  %vm17929_vm11 = vmmov %vm17923_vm2  ;;  %12405 = vmatpush1.bf16.msk.msra.mxu1 %vm17930_vm10, %v15904_v46  ;;  %vm17931_vm2 = vnez %v17804_v17  ;;  %v12436_v37 = vpack.c.bf16 %v9313_v24, %v9296_v11  ;;  %v13318_v36 = vunpack.i.l.bf16 %v15898_v59  ;;  %v17932_v34 = vunpack.i.h.bf16 %v17847_v25  ;;  %v16114_v11 = vpop.permute.xlu0 %13351 }
 0x4ca   : > { %v9271_v47 = vsel %vm17929_vm11, %v13258_v58, %v13259_v21  ;;  %12411 = vmatpush1.bf16.msk.msra.mxu0 %vm17931_vm2, %v12409_v2  ;;  %vm17933_vm7 = vmmov %vm17929_vm11  ;;  %v13333_v29 = vunpack.i.l.bf16 %v15981_v0  ;;  %12414 = vmatprep.subr.msk.bf16.mxu1 %vm15779_vm1, %v12412_v3  ;;  %vm17934_vm12 = vnez %v17675_v19  ;;  %vm17936_vm11 = vnez %v17935_v38 }
 0x4cb   : > { %v9275_v39 = vsel %vm17933_vm7, %v17932_v34, %v13244_v20  ;;  %12420 = vmatprep.subr.msk.bf16.mxu0 %vm17934_vm12, %v12418_v4  ;;  %v9309_v46 = vsel %vm17936_vm11, %v9276_v27, 0.0  ;;  %v12421_v51 = vpack.c.bf16 %v9306_v45, %v15890_v23  ;;  %v17937_v2 = vunpack.i.h.bf16 %v17828_v57  ;;  %vm17938_vm13 = vmmov %vm17933_vm7  ;;  %9077 = vmatprep.mubr.f32.mxu1 %v17539_v13  ;;  %v16110_v57 = vpop.permute.xlu1 %13291  ;;  %v17942_v23 = vld [vmem:[#allocation18_spill] sm:$0xff] }
 0x4cc   : > { %v13273_v25 = vunpack.i.l.bf16 %v16025_v54  ;;  %9148 = vmatprep.mubr.f32.mxu0 %v17539_v13  ;;  %v13334_v20 = vunpack.i.h.bf16 %v15981_v0  ;;  %v12424_v3 = vpack.c.bf16 %v9309_v46, %v9269_v41  ;;  %vm17939_vm6 = vmmov %vm17933_vm7  ;;  %v12430_v4 = vpack.c.bf16 %v9311_v40, %v9271_v47  ;;  %v16128_v40 = vld [vmem:[%s17136_s9 + $0x18] sm:$0xf] }
 0x4cd   : > { %v9268_v35 = vsel %vm17938_vm13, %v17937_v2, %v13253_v28  ;;  %v9270_v19 = vsel %vm17939_vm6, %v13254_v63, %v13258_v58  ;;  %vm17940_vm7 = vcmask 97280   ;;  %vm17943_vm11 = vnez %v17942_v23  ;;  %v17972_v23 = vld [vmem:[#allocation29_spill] sm:$0xff] }
 0x4ce   : > { %12188 = vmatmul.mubr.msk.f32.vlgmr.msra.gmra.mrb[8].mxu1 %vm17940_vm7, %v16042_v52  ;;  %vm17941_vm12 = vmmov %vm17940_vm7  ;;  %v9308_v28 = vsel %vm17943_vm11, %v9275_v39, 0.0  ;;  %vm17944_vm13 = vcmask 785408   ;;  %v13284_v63 = vunpack.i.h.bf16 %v16075_v53  ;;  %v13283_v58 = vunpack.i.l.bf16 %v16075_v53 }
 0x4cf   : > { %12193 = vmatmul.mubr.msk.f32.vlgmr.msra.gmra.mrb[10].mxu0 %vm17941_vm12, %v16042_v52  ;;  %v9668_v24 = vsel %vm17944_vm13, %v13263_v61, %v13264_v42  ;;  %12417 = vmatpush1.bf16.msk.msra.mxu1 %vm15793_vm5, %v12415_v49  ;;  %vm17945_vm6 = vnez %v17835_v33  ;;  %vm17946_vm7 = vmmov %vm17944_vm13  ;;  %v12427_v5 = vpack.c.bf16 %v9308_v28, %v9268_v35  ;;  %v17947_v45 = vunpack.i.h.bf16 %v15829_v56  ;;  %v17950_v33 = vld [vmem:[#allocation20_spill] sm:$0xff] }
 0x4d0   : > { %12423 = vmatpush1.bf16.msk.msra.mxu0 %vm17945_vm6, %v12421_v51  ;;  %v9691_v27 = vsel %vm17946_vm7, %v13333_v29, 0.0  ;;  %vm17948_vm12 = vcmask 793600   ;;  %v13274_v41 = vunpack.i.h.bf16 %v16025_v54  ;;  %vm17949_vm11 = vnez %v17839_v30  ;;  %vm17952_vm6 = vmmov %vm17946_vm7  ;;  %9219 = vmatprep.mubr.f32.mxu1 %v17539_v13 }
 0x4d1   : > { %v9272_v53 = vsel %vm17948_vm12, %v13259_v21, %v17947_v45  ;;  %12426 = vmatprep.subr.msk.bf16.mxu1 %vm17949_vm11, %v12424_v3  ;;  %vm17951_vm13 = vnez %v17950_v33  ;;  %v12433_v49 = vpack.c.bf16 %v9310_v6, %v9270_v19  ;;  %v9667_v47 = vsel %vm17952_vm6, %v13273_v25, %v13263_v61  ;;  %9407 = vmatprep.mubr.f32.mxu0 %v17539_v13  ;;  %v17953_v21 = vld [vmem:[#allocation21_spill] sm:$0xff]  ;;  %vm17957_vm11 = vmmov %vm17952_vm6  ;;  %v16203_v45 = vld [vmem:[%s17136_s9 + $0x1c] sm:$0xf] }
 0x4d2   : > { %12432 = vmatprep.subr.msk.bf16.mxu0 %vm17951_vm13, %v12430_v4  ;;  %v13294_v34 = vunpack.i.h.bf16 %v16110_v57  ;;  %v13293_v56 = vunpack.i.l.bf16 %v16110_v57  ;;  %vm17954_vm7 = vnez %v17953_v21  ;;  %vm17955_vm12 = vcmask 777216  }
 0x4d3   : > { %v9312_v54 = vsel %vm17954_vm7, %v16065_v12, 0.0  ;;  %v10039_v30 = vsel %vm17955_vm12, %v13318_v36, %v13319_v62  ;;  %v17956_v6 = vunpack.i.h.bf16 %v15559_v10  ;;  %v12442_v39 = vpack.c.bf16 %v15920_v16, %v9668_v24  ;;  %v13322_v12 = vpop.permute.xlu1 %13321  ;;  %vm17960_vm7 = vmmov %vm17957_vm11 }
 0x4d4   : > { %vm17958_vm13 = vcmask 97280   ;;  %v12460_v38 = vpack.c.bf16 %v9691_v27, %v13334_v20  ;;  %v9677_v46 = vsel %vm17960_vm7, %v13283_v58, %v13284_v63  ;;  %vm17961_vm5 = vnez %v17851_v31 }
 0x4d5   : > { %v16157_v61 = vsel %vm17957_vm11, %v17956_v6, %v13334_v20  ;;  %12198 = vmatmul.mubr.msk.f32.vlgmr.msra.gmra.mrb[10].mxu1 %vm17958_vm13, %v16042_v52  ;;  %vm17959_vm6 = vmmov %vm17958_vm13  ;;  %vm17962_vm12 = vnez %v17752_v14  ;;  %v13324_v10 = vunpack.i.h.bf16 %v13322_v12  ;;  %v13323_v51 = vunpack.i.l.bf16 %v13322_v12  ;;  %v16178_v20 = vpop.permute.xlu0 %13356 }
 0x4d6   : > { %12204 = vmatmul.mubr.msk.f32.vlgmr.msra.gmra.mrb[8].mxu0 %vm17959_vm6, %v16128_v40  ;;  %12429 = vmatpush1.bf16.msk.msra.mxu1 %vm17961_vm5, %v12427_v5  ;;  %v12439_v2 = vpack.c.bf16 %v9312_v54, %v9272_v53  ;;  %v17963_v16 = vunpack.i.l.bf16 %v17858_v26  ;;  %vm17964_vm11 = vmmov %vm17960_vm7  ;;  %v12445_v35 = vpack.c.bf16 %v15943_v50, %v9667_v47  ;;  %v13339_v31 = vunpack.i.h.bf16 %v16060_v1  ;;  %v17979_v47 = vld [vmem:[#allocation41_spill] sm:$0xff] }
 0x4d7   : > { %12435 = vmatpush1.bf16.msk.msra.mxu0 %vm17962_vm12, %v12433_v49  ;;  %12438 = vmatprep.subr.msk.bf16.mxu1 %vm15634_vm14, %v12436_v37  ;;  %vm17966_vm5 = vcmask 777216   ;;  %vm17967_vm13 = vmmov %vm17960_vm7  ;;  %v13338_v3 = vunpack.i.l.bf16 %v16060_v1  ;;  %v17969_v37 = vld [vmem:[#allocation55_spill] sm:$0xff]  ;;  %v13327_v24 = vpop.permute.xlu1 %13326  ;;  %v13353_v27 = vunpack.i.l.bf16 %v16114_v11  ;;  %v13358_v53 = vunpack.i.l.bf16 %v16178_v20 }
 0x4d8   : > { %v9670_v52 = vsel %vm17964_vm11, %v13274_v41, %v17963_v16  ;;  %12444 = vmatprep.subr.msk.bf16.mxu0 %vm17861_vm15, %v12442_v39  ;;  %v10046_v14 = vsel %vm17966_vm5, %v13293_v56, %v13294_v34  ;;  %9478 = vmatprep.mubr.f32.mxu1 %v17539_v13  ;;  %v9678_v26 = vsel %vm17967_vm13, %v13284_v63, %v13323_v51  ;;  %vm17968_vm6 = vmmov %vm17960_vm7  ;;  %v17970_v19 = vunpack.i.h.bf16 %v17969_v37 }
 0x4d9   : > { %9549 = vmatprep.mubr.f32.mxu0 %v17539_v13  ;;  %v9679_v50 = vsel %vm17968_vm6, %v13323_v51, %v13324_v10  ;;  %vm17971_vm14 = vmmov %vm17968_vm6  ;;  %v12448_v57 = vpack.c.bf16 %v9677_v46, %v9670_v52  ;;  %vm17973_vm7 = vcmask 97280   ;;  %v13354_v63 = vunpack.i.h.bf16 %v16114_v11  ;;  %v17977_v11 = vld [vmem:[#allocation24_spill] sm:$0xff] }
 0x4da   : > { %v9676_v4 = vsel %vm17971_vm14, %v17970_v19, %v13283_v58  ;;  %v12454_v28 = vpack.c.bf16 %v9679_v50, %v17972_v23  ;;  %12209 = vmatmul.mubr.msk.f32.vlgmr.msra.gmra.mrb[8].mxu1 %vm17973_vm7, %v16128_v40  ;;  %vm17974_vm12 = vmmov %vm17973_vm7  ;;  %v13329_v1 = vunpack.i.h.bf16 %v13327_v24  ;;  %v13328_v58 = vunpack.i.l.bf16 %v13327_v24  ;;  %v12234_v19 = vld [vmem:[%s17136_s9 + $0x20] sm:$0xf] }
 0x4db   : > { %12214 = vmatmul.mubr.msk.f32.vlgmr.msra.gmra.mrb[10].mxu0 %vm17974_vm12, %v16128_v40  ;;  %12441 = vmatpush1.bf16.msk.msra.mxu1 %vm17869_vm0, %v12439_v2  ;;  %vm17976_vm11 = vmmov %vm17968_vm6  ;;  %vm17978_vm5 = vnez %v17977_v11  ;;  %v12457_v21 = vpack.c.bf16 %v9678_v26, %v17979_v47  ;;  %vm17980_vm0 = vcmask 777216   ;;  %vm17982_vm14 = vcmask 1043456   ;;  %v13342_v46 = vpop.permute.xlu1 %13341 }
 0x4dc   : > { %12447 = vmatpush1.bf16.msk.msra.mxu0 %vm17861_vm15, %v12445_v35  ;;  %v9669_v33 = vsel %vm17976_vm11, %v13264_v42, %v13274_v41  ;;  %v10079_v49 = vsel %vm17978_vm5, %v10046_v14, 0.0  ;;  %12450 = vmatprep.subr.msk.bf16.mxu1 %vm17861_vm15, %v12448_v57  ;;  %v10038_v54 = vsel %vm17980_vm0, %v13339_v31, %v13318_v36  ;;  %vm17981_vm13 = vmmov %vm17980_vm0  ;;  %v13359_v42 = vunpack.i.h.bf16 %v16178_v20  ;;  %v17994_v35 = vld [vmem:[#allocation26_spill] sm:$0xff]  ;;  %v17999_v14 = vld [vmem:[#allocation25_spill] sm:$0xff] }
 0x4dd   : > { %9620 = vmatprep.mubr.f32.mxu1 %v17539_v13  ;;  %v12451_v6 = vpack.c.bf16 %v9676_v4, %v9669_v33  ;;  %v10045_v39 = vsel %vm17981_vm13, %v13328_v58, %v13293_v56  ;;  %9778 = vmatprep.mubr.f32.mxu0 %v17539_v13  ;;  %vm16222_vm7 = vmpackc.low %vm17982_vm14, %vm17968_vm6  ;;  %v17987_v56 = vld [vmem:[#allocation23_spill] sm:$0xff]  ;;  %vm17989_vm13 = vcmask 97280   ;;  %v13344_v0 = vunpack.i.h.bf16 %v13342_v46  ;;  %v18003_v4 = vld [vmem:[#allocation28_spill] sm:$0xff] }
 0x4de   : > { %12456 = vmatprep.subr.msk.bf16.mxu0 %vm17861_vm15, %v12454_v28  ;;  %vm17985_vm12 = vmmov %vm17968_vm6  ;;  %12219 = vmatmul.mubr.msk.f32.vlgmr.msra.gmra.mrb[10].mxu1 %vm17989_vm13, %v16128_v40 }
 0x4df   : > { %v9680_v36 = vsel %vm17985_vm12, %v13324_v10, %v13333_v29  ;;  %vm17986_vm11 = vmmov %vm17980_vm0  ;;  %vm17988_vm0 = vnez %v17987_v56  ;;  %12453 = vmatpush1.bf16.msk.msra.mxu1 %vm17861_vm15, %v12451_v6  ;;  %9849 = vmatprep.mubr.f32.mxu1 %v17539_v13  ;;  %v13343_v29 = vunpack.i.l.bf16 %v13342_v46  ;;  %v12466_v10 = vpack.c.bf16 %v10079_v49, %v10039_v30  ;;  %v13347_v59 = vpop.permute.xlu1 %13346 }
 0x4e0   : > { %v10048_v41 = vsel %vm17986_vm11, %v13329_v1, %v13338_v3  ;;  %v10078_v12 = vsel %vm17988_vm0, %v10045_v39, 0.0  ;;  %vm17990_vm6 = vmmov %vm17989_vm13  ;;  %v10050_v16 = vsel %vm17986_vm11, %v13353_v27, %v13354_v63  ;;  %12462 = vmatprep.subr.msk.bf16.mxu1 %vm16222_vm7, %v12460_v38  ;;  %vm17995_vm13 = vnez %v17994_v35  ;;  %v16759_v35 = vld [vmem:[#allocation2 + $0x2d0] sm:$0xff] }
 0x4e1   : > { %12223 = vmatmul.mubr.msk.f32.vlgmr.msra.gmra.mrb[8].mxu0 %vm17990_vm6, %v16203_v45  ;;  %vm17991_vm14 = vmmov %vm17986_vm11  ;;  %v12469_v52 = vpack.c.bf16 %v10078_v12, %v10038_v54  ;;  %v10081_v25 = vsel %vm17995_vm13, %v10048_v41, 0.0  ;;  %v13349_v32 = vunpack.i.h.bf16 %v13347_v59 }
 0x4e2   : > { %v10047_v51 = vsel %vm17991_vm14, %v13294_v34, %v13329_v1  ;;  %vm17992_vm12 = vmmov %vm17986_vm11  ;;  %12459 = vmatpush1.bf16.msk.msra.mxu0 %vm17861_vm15, %v12457_v21  ;;  %v12463_v34 = vpack.c.bf16 %v9680_v36, %v16157_v61  ;;  %9920 = vmatprep.mubr.f32.mxu0 %v17539_v13 }
 0x4e3   : > { %v10049_v2 = vsel %vm17992_vm12, %v13338_v3, %v13353_v27  ;;  %vm17993_vm0 = vmmov %vm17986_vm11  ;;  %12468 = vmatprep.subr.msk.bf16.mxu0 %vm17905_vm4, %v12466_v10  ;;  %vm18000_vm12 = vnez %v17999_v14  ;;  %vm18001_vm11 = vcmask 97280   ;;  %v13348_v3 = vunpack.i.l.bf16 %v13347_v59  ;;  %v10411_v18 = vpop.permute.xlu1 %10410 }
 0x4e4   : > { %v10069_v40 = vsel %vm17993_vm0, %v13358_v53, 0.0  ;;  %vm17996_vm6 = vmmov %vm17993_vm0  ;;  %v10051_v20 = vsel %vm17993_vm0, %v13354_v63, %v13358_v53  ;;  %v10080_v61 = vsel %vm18000_vm12, %v10047_v51, 0.0  ;;  %12226 = vmatmul.mubr.msk.f32.vlgmr.msra.gmra.mrb[8].mxu1 %vm18001_vm11, %v16203_v45  ;;  %v10082_v37 = vsel %vm17617_vm3, %v10049_v2, 0.0  ;;  %v10454_v51 = vld [vmem:[%s14443_s22 + $0x8] sm:$0xff]  ;;  %v10453_v2 = vld [vmem:[%s14443_s22] sm:$0xff] }
 0x4e5   : > { %v10040_v30 = vsel %vm17996_vm6, %v13319_v62, %v13343_v29  ;;  %vm17997_vm14 = vmmov %vm17993_vm0  ;;  %v10085_v62 = vsel %vm17814_vm9, %v10069_v40, 0.0  ;;  %12465 = vmatpush1.bf16.msk.msra.mxu1 %vm17861_vm15, %v12463_v34  ;;  %9991 = vmatprep.mubr.f32.mxu1 %v17539_v13  ;;  %vm18004_vm6 = vnez %v18003_v4 }
 0x4e6   : > { %v10041_v31 = vsel %vm17997_vm14, %v13343_v29, %v13344_v0  ;;  %vm17998_vm7 = vmmov %vm17993_vm0  ;;  %v12475_v50 = vpack.c.bf16 %v10080_v61, %v10040_v30  ;;  %v10083_v9 = vsel %vm18004_vm6, %v10050_v16, 0.0  ;;  %v10456_v16 = vld [vmem:[%s14443_s22 + $0x18] sm:$0xff] }
 0x4e7   : > { %v10068_v38 = vsel %vm17998_vm7, %v13359_v42, 0.0  ;;  %v12472_v26 = vpack.c.bf16 %v10081_v25, %v10041_v31  ;;  %vm18002_vm4 = vmmov %vm18001_vm11  ;;  %v16317_v36 = vpop.permute.xlu1 %10478 }
 0x4e8   : > { %12229 = vmatmul.mubr.msk.f32.vlgmr.msra.gmra.mrb[10].mxu0 %vm18002_vm4, %v16203_v45  ;;  %vm18005_vm15 = vmmov %vm17993_vm0  ;;  %v12484_v24 = vpack.c.bf16 %v10085_v62, %v10068_v38 }
 0x4e9   : > { %12471 = vmatpush1.bf16.msk.msra.mxu0 %vm17917_vm8, %v12469_v52  ;;  %v10042_v57 = vsel %vm18005_vm15, %v13344_v0, %v13348_v3  ;;  %vm18006_vm14 = vmmov %vm17993_vm0  ;;  %10179 = vmatprep.mubr.f32.mxu0 %v17539_v13  ;;  %vm18009_vm8 = vnez %v17811_v48  ;;  %vm18011_vm15 = vnez %v17795_v8  ;;  %v16311_v8 = vpop.permute.xlu0 %10473 }
 0x4ea   : > { %v10043_v23 = vsel %vm18006_vm14, %v13348_v3, %v13349_v32  ;;  %vm18007_vm7 = vmmov %vm17993_vm0  ;;  %vm18008_vm0 = vnez %v17918_v55  ;;  %v10084_v44 = vsel %vm18009_vm8, %v10051_v20, 0.0  ;;  %v12481_v27 = vpack.c.bf16 %v10082_v37, %v10042_v57  ;;  %v10458_v3 = vld [vmem:[%s14443_s22 + $0x28] sm:$0xff] }
 0x4eb   : > { %v10044_v28 = vsel %vm18007_vm7, %v13349_v32, %v13359_v42  ;;  %12474 = vmatprep.subr.msk.bf16.mxu1 %vm18008_vm0, %v12472_v26  ;;  %v12478_v63 = vpack.c.bf16 %v10083_v9, %v10043_v23  ;;  %vm18010_vm11 = vmmov %vm18002_vm4  ;;  %vm18013_vm7 = vnez %v17827_v60  ;;  %v10482_v10 = vmul.f32 %v16311_v8, %v10454_v51  ;;  %v10507_v62 = vpop.permute.xlu1 %10506  ;;  %v10455_v32 = vld [vmem:[%s14443_s22 + $0x10] sm:$0xff] }
 0x4ec   : > { %12233 = vmatmul.mubr.msk.f32.vlgmr.msra.gmra.mrb[10].mxu1 %vm18010_vm11, %v16203_v45  ;;  %v12487_v5 = vpack.c.bf16 %v10084_v44, %v10044_v28  ;;  %12239 = vmatmul.mubr.msk.f32.vlgmr.msra.gmra.mrb[8].mxu0 %vm18002_vm4, %v12234_v19  ;;  %vm18012_vm14 = vmmov %vm18002_vm4  ;;  %v10481_v34 = vmul.f32 %v16311_v8, %v10453_v2  ;;  %v10484_v25 = vmul.f32 %v16311_v8, %v10456_v16  ;;  %vm18025_vm0 = vcmask 1039360  }
 0x4ed   : > { %12477 = vmatpush1.bf16.msk.msra.mxu1 %vm17930_vm10, %v12475_v50  ;;  %10250 = vmatprep.mubr.f32.mxu1 %v17539_v13  ;;  %vm18014_vm10 = vmmov %vm18002_vm4  ;;  %v16314_v47 = vpop.permute.xlu0 %10501  ;;  %v10483_v57 = vmul.f32 %v16311_v8, %v10455_v32  ;;  %v10486_v23 = vmul.f32 %v16311_v8, %v10458_v3  ;;  %vm18026_vm11 = vcmask 777216  }
 0x4ee   : > { %12486 = vmatprep.subr.msk.bf16.mxu1 %vm15779_vm1, %v12484_v24  ;;  %12480 = vmatprep.subr.msk.bf16.mxu0 %vm18011_vm15, %v12478_v63  ;;  %vm18015_vm1 = vmmov %vm18002_vm4  ;;  %v10510_v31 = vadd.f32 %v16314_v47, %v10482_v10  ;;  %v10509_v20 = vadd.f32 %v16314_v47, %v10481_v34  ;;  %v10512_v61 = vadd.f32 %v16314_v47, %v10484_v25  ;;  %vm18027_vm4 = vcmask 785408  }
 0x4ef   : > { %10321 = vmatprep.mubr.f32.mxu0 %v17539_v13  ;;  %12483 = vmatpush1.bf16.msk.msra.mxu0 %vm17931_vm2, %v12481_v27  ;;  %vm10555_vm2 = vcmask 130048   ;;  %vm18028_vm15 = vmmov %vm18025_vm0 }
 0x4f0   : > { %12244 = vmatmul.mubr.msk.f32.vlgmr.msra.gmra.mrb[8].mxu1 %vm18012_vm14, %v12234_v19  ;;  %v10526_v37 = vmax.f32 %v10510_v31, 0.0  ;;  %v10525_v44 = vmax.f32 %v10509_v20, 0.0  ;;  %v10528_v63 = vmax.f32 %v10512_v61, 0.0  ;;  %vm18030_vm14 = vmmov %vm18025_vm0 }
 0x4f1   : > { %12489 = vmatpush1.bf16.msk.msra.mxu1 %vm18013_vm7, %v12487_v5  ;;  %10392 = vmatprep.mubr.f32.mxu1 %v17539_v13  ;;  %v10460_v5 = vld [vmem:[%s14443_s22 + $0x38] sm:$0xff]  ;;  %vm18031_vm7 = vmmov %vm18025_vm0 }
 0x4f2   : > { %12249 = vmatmul.mubr.msk.f32.vlgmr.msra.gmra.mrb[10].mxu0 %vm18014_vm10, %v12234_v19  ;;  %vm18032_vm10 = vmmov %vm18026_vm11 }
 0x4f3   : > { %10626 = vmatprep.mubr.f32.mxu0 %v17539_v13 }
 0x4f4   : > { %12254 = vmatmul.mubr.msk.f32.vlgmr.msra.gmra.mrb[10].mxu1 %vm18015_vm1, %v12234_v19  ;;  %vm18033_vm1 = vmmov %vm18027_vm4 }
 0x4f5   : > { %10703 = vmatprep.mubr.f32.mxu1 %v17539_v13 }
 0x5bf   : > { %v10181_v17 = vpop.f32.mrb[8].mxu0 }
 0x5c0   : > { %v10413_v43 = vadd.f32 %v10411_v18, %v10181_v17  ;;  %v10183_v55 = vpop.f32.mrb[9].mxu0 }
 0x5c1   : > { %v10414_v60 = vadd.f32 %v10411_v18, %v10183_v55  ;;  %v10488_v55 = vmul.f32 %v16311_v8, %v10460_v5  ;;  %v11160_v5 = vld [vmem:[#allocation2 + $0x10] sm:$0xff] }
 0x5c2   : > { %v10429_v1 = vrot.slane %v10413_v43, 4  ;;  %v10511_v43 = vadd.f32 %v16314_v47, %v10483_v57 }
 0x5c3   : > { %v10252_v58 = vpop.f32.mrb[8].mxu1  ;;  %v10430_v45 = vrot.slane %v10414_v60, 4  ;;  %v10457_v60 = vld [vmem:[%s14443_s22 + $0x20] sm:$0xff] }
 0x5c4   : > { %v10415_v53 = vadd.f32 %v10411_v18, %v10252_v58  ;;  %v10254_v33 = vpop.f32.mrb[9].mxu1  ;;  %10445 = vst [vmem:[%s14443_s22 + $0x40] sm:$0xf0] %v10429_v1 }
 0x5c5   : > { %v10416_v49 = vadd.f32 %v10411_v18, %v10254_v33  ;;  %10446 = vst [vmem:[%s14443_s22 + $0x48] sm:$0xf0] %v10430_v45  ;;  %v10323_v54 = vpop.f32.mrb[10].mxu0  ;;  %v10514_v45 = vadd.f32 %v16314_v47, %v10486_v23  ;;  %v10485_v33 = vmul.f32 %v16311_v8, %v10457_v60  ;;  %v11159_v23 = vld [vmem:[#allocation2 + $0x8] sm:$0xff] }
 0x5c6   : > { %v10431_v21 = vrot.slane %v10415_v53, 4  ;;  %v10417_v39 = vadd.f32 %v10411_v18, %v10323_v54  ;;  %v10325_v42 = vpop.f32.mrb[11].mxu0  ;;  %v11163_v60 = vld [vmem:[#allocation2 + $0x28] sm:$0xff] }
 0x5c7   : > { %v10432_v6 = vrot.slane %v10416_v49, 4  ;;  %v10394_v7 = vpop.f32.mrb[10].mxu1  ;;  %v10418_v12 = vadd.f32 %v10411_v18, %v10325_v42  ;;  %v10459_v49 = vld [vmem:[%s14443_s22 + $0x30] sm:$0xff]  ;;  %v10530_v61 = vmax.f32 %v10514_v45, 0.0  ;;  %v11291_v45 = vld [vmem:[#allocation2 + $0x428] sm:$0xff] }
 0x5c8   : > { %10447 = vst [vmem:[%s14443_s22 + $0x50] sm:$0xf0] %v10431_v21  ;;  %v10419_v41 = vadd.f32 %v10411_v18, %v10394_v7  ;;  %v10396_v46 = vpop.f32.mrb[11].mxu1  ;;  %v10433_v0 = vrot.slane %v10417_v39, 4  ;;  %v10487_v42 = vmul.f32 %v16311_v8, %v10459_v49  ;;  %v10541_v8 = vld [vmem:[%s17140_s13] sm:$0xff] }
 0x5c9   : > { %10448 = vst [vmem:[%s14443_s22 + $0x58] sm:$0xf0] %v10432_v6  ;;  %v10420_v29 = vadd.f32 %v10411_v18, %v10396_v46  ;;  %v10434_v52 = vrot.slane %v10418_v12, 4  ;;  %v10516_v6 = vadd.f32 %v16314_v47, %v10488_v55  ;;  %v11288_v55 = vld [vmem:[#allocation2 + $0x410] sm:$0xff]  ;;  %v11162_v49 = vld [vmem:[#allocation2 + $0x20] sm:$0xff] }
 0x5ca   : > { %v10435_v40 = vrot.slane %v10419_v41, 4  ;;  %10449 = vst [vmem:[%s14443_s22 + $0x60] sm:$0xf0] %v10433_v0  ;;  %v10515_v34 = vadd.f32 %v16314_v47, %v10487_v42  ;;  %v11169_v42 = vld [vmem:[#allocation2 + $0x58] sm:$0xff] }
 0x5cb   : > { %v10436_v30 = vrot.slane %v10420_v29, 4  ;;  %10450 = vst [vmem:[%s14443_s22 + $0x68] sm:$0xf0] %v10434_v52  ;;  %v10461_v38 = vld [vmem:[%s14443_s22 + $0x40] sm:$0xff] }
 0x5cc   : > { %10451 = vst [vmem:[%s14443_s22 + $0x70] sm:$0xf0] %v10435_v40  ;;  %v10462_v26 = vld [vmem:[%s14443_s22 + $0x48] sm:$0xff]  ;;  %v10489_v59 = vmul.f32 %v16317_v36, %v10461_v38  ;;  %v10527_v40 = vmax.f32 %v10511_v43, 0.0  ;;  %v10513_v38 = vadd.f32 %v16314_v47, %v10485_v33  ;;  %v11286_v43 = vld [vmem:[#allocation2 + $0x400] sm:$0xff] }
 0x5cd   : > { %10452 = vst [vmem:[%s14443_s22 + $0x78] sm:$0xf0] %v10436_v30  ;;  %v10490_v50 = vmul.f32 %v16317_v36, %v10462_v26 }
 0x5ce   : > { %v10517_v19 = vadd.f32 %v10507_v62, %v10489_v59  ;;  %v10532_v59 = vmax.f32 %v10516_v6, 0.0 }
 0x5cf   : > { %v10463_v9 = vld [vmem:[%s14443_s22 + $0x50] sm:$0xff]  ;;  %v10518_v28 = vadd.f32 %v10507_v62, %v10490_v50 }
 0x5d0   : > { %v10464_v24 = vld [vmem:[%s14443_s22 + $0x58] sm:$0xff]  ;;  %v10491_v27 = vmul.f32 %v16317_v36, %v10463_v9  ;;  %v10533_v18 = vmax.f32 %v10517_v19, 0.0  ;;  %v10529_v19 = vmax.f32 %v10513_v38, 0.0  ;;  %v11170_v38 = vld [vmem:[#allocation2 + $0x60] sm:$0xff] }
 0x5d1   : > { %v10492_v17 = vmul.f32 %v16317_v36, %v10464_v24  ;;  %v10534_v1 = vmax.f32 %v10518_v28, 0.0  ;;  %v10465_v53 = vld [vmem:[%s14443_s22 + $0x60] sm:$0xff]  ;;  %v11161_v28 = vld [vmem:[#allocation2 + $0x18] sm:$0xff] }
 0x5d2   : > { %v10519_v58 = vadd.f32 %v10507_v62, %v10491_v27  ;;  %v10466_v54 = vld [vmem:[%s14443_s22 + $0x68] sm:$0xff]  ;;  %v10493_v39 = vmul.f32 %v16317_v36, %v10465_v53  ;;  %v12492_v29 = vpack.c.bf16 %v10533_v18, %v10525_v44  ;;  %v12506_v24 = vpack.c.bf16 %v11161_v28, %v11159_v23  ;;  %v11158_v27 = vld [vmem:[#allocation2] sm:$0xff]  ;;  %v11293_v53 = vld [vmem:[#allocation2 + $0x438] sm:$0xff] }
 0x5d3   : > { %v10520_v21 = vadd.f32 %v10507_v62, %v10492_v17  ;;  %v10467_v7 = vld [vmem:[%s14443_s22 + $0x70] sm:$0xff]  ;;  %v12490_v41 = vpack.c.bf16 %v10534_v1, %v10526_v37  ;;  %v10494_v46 = vmul.f32 %v16317_v36, %v10466_v54  ;;  %v10531_v37 = vmax.f32 %v10515_v34, 0.0  ;;  %v11287_v44 = vld [vmem:[#allocation2 + $0x408] sm:$0xff]  ;;  %v11290_v54 = vld [vmem:[#allocation2 + $0x420] sm:$0xff] }
 0x5d4   : > { %v10535_v12 = vmax.f32 %v10519_v58, 0.0  ;;  %v10468_v51 = vld [vmem:[%s14443_s22 + $0x78] sm:$0xff]  ;;  %v10495_v0 = vmul.f32 %v16317_v36, %v10467_v7  ;;  %v10521_v16 = vadd.f32 %v10507_v62, %v10493_v39  ;;  %v12508_v17 = vpack.c.bf16 %v11160_v5, %v11158_v27  ;;  %v11292_v39 = vld [vmem:[#allocation2 + $0x430] sm:$0xff]  ;;  %v11167_v7 = vld [vmem:[#allocation2 + $0x48] sm:$0xff] }
 0x5d5   : > { %v10536_v10 = vmax.f32 %v10520_v21, 0.0  ;;  %v10496_v2 = vmul.f32 %v16317_v36, %v10468_v51  ;;  %12491 = vmatprep.subr.bf16.mxu0 %v12490_v41  ;;  %v10522_v52 = vadd.f32 %v10507_v62, %v10494_v46  ;;  %v12636_v1 = vpack.c.bf16 %v11288_v55, %v11286_v43  ;;  %v11165_v58 = vld [vmem:[#allocation2 + $0x38] sm:$0xff]  ;;  %v11164_v21 = vld [vmem:[#allocation2 + $0x30] sm:$0xff]  ;;  %v11295_v46 = vld [vmem:[#allocation2 + $0x448] sm:$0xff] }
 0x5d6   : > { %v10523_v25 = vadd.f32 %v10507_v62, %v10495_v0  ;;  %12493 = vmatpush1.bf16.msra.mxu0 %v12492_v29  ;;  %v12496_v20 = vpack.c.bf16 %v10535_v12, %v10527_v40  ;;  %v10537_v32 = vmax.f32 %v10521_v16, 0.0  ;;  %v12638_v33 = vpack.c.bf16 %v11293_v53, %v11291_v45  ;;  %v11297_v51 = vld [vmem:[#allocation2 + $0x458] sm:$0xff]  ;;  %v11166_v0 = vld [vmem:[#allocation2 + $0x40] sm:$0xff]  ;;  %v11296_v16 = vld [vmem:[#allocation2 + $0x450] sm:$0xff] }
 0x5d7   : > { %v12494_v30 = vpack.c.bf16 %v10536_v10, %v10528_v63  ;;  %v10524_v31 = vadd.f32 %v10507_v62, %v10496_v2  ;;  %v10538_v36 = vmax.f32 %v10522_v52, 0.0  ;;  %v10542_v62 = vld [vmem:[%s17140_s13 + $0x8] sm:$0xff]  ;;  %v11289_v63 = vld [vmem:[#allocation2 + $0x418] sm:$0xff]  ;;  %v12512_v6 = vpack.c.bf16 %v11164_v21, %v11162_v49  ;;  %v11168_v10 = vld [vmem:[#allocation2 + $0x50] sm:$0xff] }
 0x5d8   : > { %v10539_v26 = vmax.f32 %v10523_v25, 0.0  ;;  %v12500_v57 = vpack.c.bf16 %v10537_v32, %v10529_v19  ;;  %v12634_v18 = vpack.c.bf16 %v11289_v63, %v11287_v44  ;;  %v12640_v41 = vpack.c.bf16 %v11292_v39, %v11290_v54  ;;  %v11294_v2 = vld [vmem:[#allocation2 + $0x440] sm:$0xff]  ;;  %v11171_v52 = vld [vmem:[#allocation2 + $0x68] sm:$0xff]  ;;  %v11173_v34 = vld [vmem:[#allocation2 + $0x78] sm:$0xff] }
 0x5d9   : > { %12495 = vmatprep.subr.bf16.mxu1 %v12494_v30  ;;  %v10540_v50 = vmax.f32 %v10524_v31, 0.0  ;;  %12255 = vmatmul.mubr.msk.f32.vlgmr.msra.gmra.mrb[12].mxu0 %vm10555_vm2, %v10541_v8  ;;  %v12498_v3 = vpack.c.bf16 %v10538_v36, %v10530_v61  ;;  %v12514_v12 = vpack.c.bf16 %v11169_v42, %v11167_v7  ;;  %v12642_v29 = vpack.c.bf16 %v11297_v51, %v11295_v46  ;;  %v11299_v25 = vld [vmem:[#allocation2 + $0x468] sm:$0xff]  ;;  %v11301_v31 = vld [vmem:[#allocation2 + $0x478] sm:$0xff]  ;;  %v11298_v36 = vld [vmem:[#allocation2 + $0x460] sm:$0xff] }
 0x5da   : > { %12497 = vmatpush1.bf16.msra.mxu1 %v12496_v20  ;;  %10632 = vmatprep.mubr.f32.mxu0 %v17539_v13  ;;  %v12504_v9 = vpack.c.bf16 %v10539_v26, %v10531_v37  ;;  %v12516_v40 = vpack.c.bf16 %v11168_v10, %v11166_v0  ;;  %v12518_v30 = vpack.c.bf16 %v11173_v34, %v11171_v52  ;;  %v11172_v20 = vld [vmem:[#allocation2 + $0x70] sm:$0xff]  ;;  %v11303_v32 = vld [vmem:[#allocation2 + $0x488] sm:$0xff]  ;;  %v11174_v19 = vld [vmem:[#allocation2 + $0x80] sm:$0xff] }
 0x5db   : > { %v12502_v47 = vpack.c.bf16 %v10540_v50, %v10532_v59  ;;  %12499 = vmatprep.subr.bf16.mxu0 %v12498_v3  ;;  %v12646_v61 = vpack.c.bf16 %v11301_v31, %v11299_v25  ;;  %v11300_v26 = vld [vmem:[#allocation2 + $0x470] sm:$0xff]  ;;  %v11175_v59 = vld [vmem:[#allocation2 + $0x88] sm:$0xff]  ;;  %v11177_v50 = vld [vmem:[#allocation2 + $0x98] sm:$0xff]  ;;  %v12520_v37 = vpack.c.bf16 %v11172_v20, %v11170_v38 }
 0x5dc   : > { %12501 = vmatpush1.bf16.msra.mxu0 %v12500_v57  ;;  %v11305_v3 = vld [vmem:[#allocation2 + $0x498] sm:$0xff]  ;;  %v11302_v57 = vld [vmem:[#allocation2 + $0x480] sm:$0xff]  ;;  %v11304_v28 = vld [vmem:[#allocation2 + $0x490] sm:$0xff] }
 0x5dd   : > { %12257 = vmatmul.mubr.msk.f32.vlgmr.msra.gmra.mrb[12].mxu1 %vm10555_vm2, %v10541_v8  ;;  %12503 = vmatprep.subr.bf16.mxu1 %v12502_v47  ;;  %v12522_v47 = vpack.c.bf16 %v11177_v50, %v11175_v59  ;;  %v12650_v23 = vpack.c.bf16 %v11305_v3, %v11303_v32  ;;  %v11179_v44 = vld [vmem:[#allocation2 + $0xa8] sm:$0xff]  ;;  %v11309_v27 = vld [vmem:[#allocation2 + $0x4b8] sm:$0xff]  ;;  %v11178_v43 = vld [vmem:[#allocation2 + $0xa0] sm:$0xff] }
 0x5de   : > { %12256 = vmatmul.mubr.msk.f32.gmra.mrb[14].mxu0 %vm10555_vm2, %v10542_v62  ;;  %12505 = vmatpush1.bf16.msra.mxu1 %v12504_v9  ;;  %v11176_v9 = vld [vmem:[#allocation2 + $0x90] sm:$0xff]  ;;  %v11307_v63 = vld [vmem:[#allocation2 + $0x4a8] sm:$0xff]  ;;  %v11185_v53 = vld [vmem:[#allocation2 + $0xd8] sm:$0xff] }
 0x5df   : > { %10709 = vmatprep.mubr.f32.mxu1 %v17539_v13  ;;  %10780 = vmatprep.mubr.f32.mxu0 %v17539_v13  ;;  %v12524_v5 = vpack.c.bf16 %v11176_v9, %v11174_v19  ;;  %v11180_v55 = vld [vmem:[#allocation2 + $0xb0] sm:$0xff]  ;;  %v11183_v45 = vld [vmem:[#allocation2 + $0xc8] sm:$0xff]  ;;  %v11310_v7 = vld [vmem:[#allocation2 + $0x4c0] sm:$0xff] }
 0x5e0   : > { %12507 = vmatprep.subr.bf16.mxu1 %v12506_v24  ;;  %12635 = vmatprep.subr.bf16.mxu0 %v12634_v18  ;;  %v11181_v24 = vld [vmem:[#allocation2 + $0xb8] sm:$0xff]  ;;  %v12652_v18 = vpack.c.bf16 %v11304_v28, %v11302_v57  ;;  %v12528_v49 = vpack.c.bf16 %v11180_v55, %v11178_v43  ;;  %v12530_v54 = vpack.c.bf16 %v11185_v53, %v11183_v45  ;;  %v11184_v39 = vld [vmem:[#allocation2 + $0xd0] sm:$0xff]  ;;  %v11315_v51 = vld [vmem:[#allocation2 + $0x4e8] sm:$0xff] }
 0x5e1   : > { %12258 = vmatmul.mubr.msk.f32.gmra.mrb[14].mxu1 %vm10555_vm2, %v10542_v62  ;;  %v11189_v46 = vld [vmem:[#allocation2 + $0xf8] sm:$0xff]  ;;  %v11314_v52 = vld [vmem:[#allocation2 + $0x4e0] sm:$0xff]  ;;  %v11316_v25 = vld [vmem:[#allocation2 + $0x4f0] sm:$0xff] }
 0x5e2   : > { %12259 = vmatmul.mubr.msk.f32.vlgmr.msra.gmra.mrb[16].mxu0 %vm10555_vm2, %v10541_v8  ;;  %10857 = vmatprep.mubr.f32.mxu1 %v17539_v13  ;;  %v11317_v0 = vld [vmem:[#allocation2 + $0x4f8] sm:$0xff]  ;;  %v11319_v31 = vld [vmem:[#allocation2 + $0x508] sm:$0xff]  ;;  %v11192_v59 = vld [vmem:[#allocation2 + $0x110] sm:$0xff] }
 0x5e3   : > { %10786 = vmatprep.mubr.f32.mxu0 %v17539_v13  ;;  %12637 = vmatpush1.bf16.msra.mxu0 %v12636_v1  ;;  %v12654_v1 = vpack.c.bf16 %v11309_v27, %v11307_v63  ;;  %v12662_v34 = vpack.c.bf16 %v11317_v0, %v11315_v51  ;;  %v11321_v38 = vld [vmem:[#allocation2 + $0x518] sm:$0xff]  ;;  %v11318_v50 = vld [vmem:[#allocation2 + $0x500] sm:$0xff]  ;;  %v11320_v3 = vld [vmem:[#allocation2 + $0x510] sm:$0xff] }
 0x5e4   : > { %12639 = vmatprep.subr.bf16.mxu0 %v12638_v33  ;;  %v11313_v33 = vld [vmem:[#allocation2 + $0x4d8] sm:$0xff]  ;;  %v12666_v32 = vpack.c.bf16 %v11321_v38, %v11319_v31  ;;  %v12668_v57 = vpack.c.bf16 %v11320_v3, %v11318_v50  ;;  %v11194_v28 = vld [vmem:[#allocation2 + $0x120] sm:$0xff]  ;;  %v11324_v27 = vld [vmem:[#allocation2 + $0x530] sm:$0xff] }
 0x5e5   : > { %12261 = vmatmul.mubr.msk.f32.vlgmr.msra.gmra.mrb[16].mxu1 %vm10555_vm2, %v10541_v8  ;;  %v12644_v8 = vpack.c.bf16 %v11296_v16, %v11294_v2  ;;  %v11186_v16 = vld [vmem:[#allocation2 + $0xe0] sm:$0xff]  ;;  %v11325_v19 = vld [vmem:[#allocation2 + $0x538] sm:$0xff]  ;;  %v11200_v53 = vld [vmem:[#allocation2 + $0x150] sm:$0xff] }
 0x5e6   : > { %12260 = vmatmul.mubr.msk.f32.gmra.mrb[18].mxu0 %vm10555_vm2, %v10542_v62  ;;  %10863 = vmatprep.mubr.f32.mxu1 %v17539_v13  ;;  %v12510_v13 = vpack.c.bf16 %v11165_v58, %v11163_v60  ;;  %v11306_v60 = vld [vmem:[#allocation2 + $0x4a0] sm:$0xff]  ;;  %v11308_v58 = vld [vmem:[#allocation2 + $0x4b0] sm:$0xff] }
 0x5e7   : > { %12509 = vmatpush1.bf16.msra.mxu1 %v12508_v17  ;;  %12641 = vmatpush1.bf16.msra.mxu0 %v12640_v41  ;;  %v12526_v17 = vpack.c.bf16 %v11181_v24, %v11179_v44  ;;  %v12656_v21 = vpack.c.bf16 %v11308_v58, %v11306_v60  ;;  %v11312_v41 = vld [vmem:[#allocation2 + $0x4d0] sm:$0xff]  ;;  %v11322_v24 = vld [vmem:[#allocation2 + $0x520] sm:$0xff]  ;;  %v11327_v60 = vld [vmem:[#allocation2 + $0x548] sm:$0xff] }
 0x5e8   : > { %12511 = vmatprep.subr.bf16.mxu1 %v12510_v13  ;;  %12643 = vmatprep.subr.bf16.mxu0 %v12642_v29  ;;  %v11311_v13 = vld [vmem:[#allocation2 + $0x4c8] sm:$0xff]  ;;  %v12660_v10 = vpack.c.bf16 %v11312_v41, %v11310_v7  ;;  %v11196_v44 = vld [vmem:[#allocation2 + $0x130] sm:$0xff]  ;;  %v12672_v43 = vpack.c.bf16 %v11324_v27, %v11322_v24  ;;  %v11198_v58 = vld [vmem:[#allocation2 + $0x140] sm:$0xff] }
 0x5e9   : > { %12262 = vmatmul.mubr.msk.f32.gmra.mrb[18].mxu1 %vm10555_vm2, %v10542_v62  ;;  %v12648_v62 = vpack.c.bf16 %v11300_v26, %v11298_v36  ;;  %v12658_v42 = vpack.c.bf16 %v11313_v33, %v11311_v13  ;;  %v11190_v26 = vld [vmem:[#allocation2 + $0x100] sm:$0xff]  ;;  %v11328_v33 = vld [vmem:[#allocation2 + $0x550] sm:$0xff]  ;;  %v11331_v41 = vld [vmem:[#allocation2 + $0x568] sm:$0xff]  ;;  %vm18035_vm2 = vnez %v17987_v56 }
 0x5ea   : > { %v12540_v9 = vpack.c.bf16 %v11192_v59, %v11190_v26  ;;  %v11326_v13 = vld [vmem:[#allocation2 + $0x540] sm:$0xff]  ;;  %v11204_v0 = vld [vmem:[#allocation2 + $0x170] sm:$0xff]  ;;  %v11339_v27 = vld [vmem:[#allocation2 + $0x5a8] sm:$0xff] }
 0x5eb   : > { %12513 = vmatpush1.bf16.msra.mxu1 %v12512_v6  ;;  %12645 = vmatpush1.bf16.msra.mxu0 %v12644_v8  ;;  %v11182_v6 = vld [vmem:[#allocation2 + $0xc0] sm:$0xff]  ;;  %v11191_v8 = vld [vmem:[#allocation2 + $0x108] sm:$0xff] }
 0x5ec   : > { %12515 = vmatprep.subr.bf16.mxu1 %v12514_v12  ;;  %12647 = vmatprep.subr.bf16.mxu0 %v12646_v61  ;;  %v11187_v12 = vld [vmem:[#allocation2 + $0xe8] sm:$0xff]  ;;  %v12532_v29 = vpack.c.bf16 %v11184_v39, %v11182_v6  ;;  %v12664_v61 = vpack.c.bf16 %v11316_v25, %v11314_v52  ;;  %v11205_v6 = vld [vmem:[#allocation2 + $0x178] sm:$0xff]  ;;  %v11206_v3 = vld [vmem:[#allocation2 + $0x180] sm:$0xff] }
 0x5ed   : > { %v12534_v2 = vpack.c.bf16 %v11189_v46, %v11187_v12  ;;  %v11333_v12 = vld [vmem:[#allocation2 + $0x578] sm:$0xff]  ;;  %v11202_v46 = vld [vmem:[#allocation2 + $0x160] sm:$0xff] }
 0x5ee   : > { %v12678_v51 = vpack.c.bf16 %v11333_v12, %v11331_v41  ;;  %v11209_v25 = vld [vmem:[#allocation2 + $0x198] sm:$0xff] }
 0x5ef   : > { %12517 = vmatpush1.bf16.msra.mxu1 %v12516_v40  ;;  %12649 = vmatpush1.bf16.msra.mxu0 %v12648_v62  ;;  %v11188_v40 = vld [vmem:[#allocation2 + $0xf0] sm:$0xff]  ;;  %v11197_v62 = vld [vmem:[#allocation2 + $0x138] sm:$0xff] }
 0x5f0   : > { %12519 = vmatprep.subr.bf16.mxu1 %v12518_v30  ;;  %12651 = vmatprep.subr.bf16.mxu0 %v12650_v23  ;;  %v11193_v30 = vld [vmem:[#allocation2 + $0x118] sm:$0xff]  ;;  %v12536_v20 = vpack.c.bf16 %v11188_v40, %v11186_v16  ;;  %v12552_v40 = vpack.c.bf16 %v11204_v0, %v11202_v46 }
 0x5f1   : > { %v12538_v36 = vpack.c.bf16 %v11193_v30, %v11191_v8  ;;  %v11335_v8 = vld [vmem:[#allocation2 + $0x588] sm:$0xff] }
 0x5f3   : > { %12521 = vmatpush1.bf16.msra.mxu1 %v12520_v37  ;;  %12653 = vmatpush1.bf16.msra.mxu0 %v12652_v18  ;;  %v11195_v37 = vld [vmem:[#allocation2 + $0x128] sm:$0xff]  ;;  %v11201_v18 = vld [vmem:[#allocation2 + $0x158] sm:$0xff] }
 0x5f4   : > { %12523 = vmatprep.subr.bf16.mxu1 %v12522_v47  ;;  %12655 = vmatprep.subr.bf16.mxu0 %v12654_v1  ;;  %v11323_v47 = vld [vmem:[#allocation2 + $0x528] sm:$0xff]  ;;  %v12542_v23 = vpack.c.bf16 %v11197_v62, %v11195_v37  ;;  %v11329_v1 = vld [vmem:[#allocation2 + $0x558] sm:$0xff]  ;;  %v11208_v37 = vld [vmem:[#allocation2 + $0x190] sm:$0xff] }
 0x5f5   : > { %v12670_v63 = vpack.c.bf16 %v11325_v19, %v11323_v47  ;;  %v12674_v45 = vpack.c.bf16 %v11329_v1, %v11327_v60  ;;  %v11334_v62 = vld [vmem:[#allocation2 + $0x580] sm:$0xff] }
 0x5f7   : > { %12525 = vmatpush1.bf16.msra.mxu1 %v12524_v5  ;;  %12657 = vmatpush1.bf16.msra.mxu0 %v12656_v21  ;;  %v11199_v5 = vld [vmem:[#allocation2 + $0x148] sm:$0xff]  ;;  %v12676_v21 = vpack.c.bf16 %v11328_v33, %v11326_v13 }
 0x5f8   : > { %12527 = vmatprep.subr.bf16.mxu1 %v12526_v17  ;;  %12659 = vmatprep.subr.bf16.mxu0 %v12658_v42  ;;  %v12544_v17 = vpack.c.bf16 %v11196_v44, %v11194_v28  ;;  %v12546_v55 = vpack.c.bf16 %v11201_v18, %v11199_v5  ;;  %v11213_v28 = vld [vmem:[#allocation2 + $0x1b8] sm:$0xff] }
 0x5f9   : > { %v11341_v5 = vld [vmem:[#allocation2 + $0x5b8] sm:$0xff] }
 0x5fb   : > { %12529 = vmatpush1.bf16.msra.mxu1 %v12528_v49  ;;  %12661 = vmatpush1.bf16.msra.mxu0 %v12660_v10  ;;  %v12548_v49 = vpack.c.bf16 %v11200_v53, %v11198_v58  ;;  %v11332_v10 = vld [vmem:[#allocation2 + $0x570] sm:$0xff]  ;;  %v11217_v53 = vld [vmem:[#allocation2 + $0x1d8] sm:$0xff] }
 0x5fc   : > { %12531 = vmatprep.subr.bf16.mxu1 %v12530_v54  ;;  %12663 = vmatprep.subr.bf16.mxu0 %v12662_v34  ;;  %v11203_v54 = vld [vmem:[#allocation2 + $0x168] sm:$0xff]  ;;  %v11340_v58 = vld [vmem:[#allocation2 + $0x5b0] sm:$0xff] }
 0x5fd   : > { %v12550_v7 = vpack.c.bf16 %v11205_v6, %v11203_v54  ;;  %v11207_v34 = vld [vmem:[#allocation2 + $0x188] sm:$0xff]  ;;  %v12686_v54 = vpack.c.bf16 %v11341_v5, %v11339_v27  ;;  %v11225_v27 = vld [vmem:[#allocation2 + $0x218] sm:$0xff] }
 0x5fe   : > { %v11351_v5 = vld [vmem:[#allocation2 + $0x608] sm:$0xff] }
 0x5ff   : > { %12533 = vmatpush1.bf16.msra.mxu1 %v12532_v29  ;;  %12665 = vmatpush1.bf16.msra.mxu0 %v12664_v61  ;;  %v11330_v29 = vld [vmem:[#allocation2 + $0x560] sm:$0xff]  ;;  %v12554_v61 = vpack.c.bf16 %v11209_v25, %v11207_v34  ;;  %v11344_v25 = vld [vmem:[#allocation2 + $0x5d0] sm:$0xff] }
 0x600   : > { %12535 = vmatprep.subr.bf16.mxu1 %v12534_v2  ;;  %12667 = vmatprep.subr.bf16.mxu0 %v12666_v32  ;;  %v16385_v2 = vpop.permute.xlu0 %10547  ;;  %v12680_v52 = vpack.c.bf16 %v11332_v10, %v11330_v29 }
 0x603   : > { %12537 = vmatpush1.bf16.msra.mxu1 %v12536_v20  ;;  %12669 = vmatpush1.bf16.msra.mxu0 %v12668_v57  ;;  %v11336_v57 = vld [vmem:[#allocation2 + $0x590] sm:$0xff] }
 0x604   : > { %12539 = vmatprep.subr.bf16.mxu1 %v12538_v36  ;;  %12671 = vmatprep.subr.bf16.mxu0 %v12670_v63  ;;  %v11337_v36 = vld [vmem:[#allocation2 + $0x598] sm:$0xff]  ;;  %v12684_v24 = vpack.c.bf16 %v11336_v57, %v11334_v62  ;;  %v11346_v57 = vld [vmem:[#allocation2 + $0x5e0] sm:$0xff] }
 0x605   : > { %v12682_v59 = vpack.c.bf16 %v11337_v36, %v11335_v8  ;;  %v11219_v8 = vld [vmem:[#allocation2 + $0x1e8] sm:$0xff] }
 0x607   : > { %12541 = vmatpush1.bf16.msra.mxu1 %v12540_v9  ;;  %12673 = vmatpush1.bf16.msra.mxu0 %v12672_v43  ;;  %v12556_v9 = vpack.c.bf16 %v11208_v37, %v11206_v3  ;;  %v11212_v43 = vld [vmem:[#allocation2 + $0x1b0] sm:$0xff]  ;;  %v11218_v3 = vld [vmem:[#allocation2 + $0x1e0] sm:$0xff]  ;;  %v10553_v37 = vpop.permute.xlu1 %10552 }
 0x608   : > { %12543 = vmatprep.subr.bf16.mxu1 %v12542_v23  ;;  %12675 = vmatprep.subr.bf16.mxu0 %v12674_v45  ;;  %v11211_v23 = vld [vmem:[#allocation2 + $0x1a8] sm:$0xff] }
 0x609   : > { %v12558_v63 = vpack.c.bf16 %v11213_v28, %v11211_v23  ;;  %v11215_v45 = vld [vmem:[#allocation2 + $0x1c8] sm:$0xff]  ;;  %v11348_v23 = vld [vmem:[#allocation2 + $0x5f0] sm:$0xff] }
 0x60a   : > { %v12562_v12 = vpack.c.bf16 %v11217_v53, %v11215_v45 }
 0x60b   : > { %12545 = vmatpush1.bf16.msra.mxu1 %v12544_v17  ;;  %12677 = vmatpush1.bf16.msra.mxu0 %v12676_v21  ;;  %v11210_v17 = vld [vmem:[#allocation2 + $0x1a0] sm:$0xff] }
 0x60c   : > { %12547 = vmatprep.subr.bf16.mxu1 %v12546_v55  ;;  %12679 = vmatprep.subr.bf16.mxu0 %v12678_v51  ;;  %v11338_v55 = vld [vmem:[#allocation2 + $0x5a0] sm:$0xff]  ;;  %v12560_v6 = vpack.c.bf16 %v11212_v43, %v11210_v17  ;;  %v11353_v43 = vld [vmem:[#allocation2 + $0x618] sm:$0xff] }
 0x60d   : > { %v12688_v41 = vpack.c.bf16 %v11340_v58, %v11338_v55  ;;  %v12698_v55 = vpack.c.bf16 %v11353_v43, %v11351_v5 }
 0x60f   : > { %12549 = vmatpush1.bf16.msra.mxu1 %v12548_v49  ;;  %12681 = vmatpush1.bf16.msra.mxu0 %v12680_v52  ;;  %v11342_v52 = vld [vmem:[#allocation2 + $0x5c0] sm:$0xff] }
 0x610   : > { %12551 = vmatprep.subr.bf16.mxu1 %v12550_v7  ;;  %12683 = vmatprep.subr.bf16.mxu0 %v12682_v59  ;;  %v11345_v7 = vld [vmem:[#allocation2 + $0x5d8] sm:$0xff]  ;;  %v12692_v36 = vpack.c.bf16 %v11344_v25, %v11342_v52  ;;  %v11347_v59 = vld [vmem:[#allocation2 + $0x5e8] sm:$0xff] }
 0x613   : > { %12553 = vmatpush1.bf16.msra.mxu1 %v12552_v40  ;;  %12685 = vmatpush1.bf16.msra.mxu0 %v12684_v24  ;;  %v11216_v40 = vld [vmem:[#allocation2 + $0x1d0] sm:$0xff]  ;;  %v12696_v24 = vpack.c.bf16 %v11348_v23, %v11346_v57 }
 0x614   : > { %12555 = vmatprep.subr.bf16.mxu1 %v12554_v61  ;;  %12687 = vmatprep.subr.bf16.mxu0 %v12686_v54  ;;  %v11221_v61 = vld [vmem:[#allocation2 + $0x1f8] sm:$0xff] }
 0x615   : > { %v12566_v62 = vpack.c.bf16 %v11221_v61, %v11219_v8 }
 0x617   : > { %12557 = vmatpush1.bf16.msra.mxu1 %v12556_v9  ;;  %12689 = vmatpush1.bf16.msra.mxu0 %v12688_v41  ;;  %v11220_v9 = vld [vmem:[#allocation2 + $0x1f0] sm:$0xff] }
 0x618   : > { %12559 = vmatprep.subr.bf16.mxu1 %v12558_v63  ;;  %v11223_v63 = vld [vmem:[#allocation2 + $0x208] sm:$0xff] }
 0x619   : > { %v12570_v17 = vpack.c.bf16 %v11225_v27, %v11223_v63 }
 0x61b   : > { %12561 = vmatpush1.bf16.msra.mxu1 %v12560_v6 }
 0x61c   : > { %12563 = vmatprep.subr.bf16.mxu1 %v12562_v12 }
 0x6ac   : > { %v10628_v39 = vpop.f32.mrb[12].mxu0 }
 0x6ad   : > { %v10630_v42 = vpop.f32.mrb[13].mxu0  ;;  %v16411_v60 = vadd.f32 %v10628_v39, %v16385_v2  ;;  %v11343_v39 = vld [vmem:[#allocation2 + $0x5c8] sm:$0xff] }
 0x6ae   : > { %v16388_v30 = vadd.f32 %v10630_v42, %v16385_v2  ;;  %v12690_v0 = vpack.c.bf16 %v11345_v7, %v11343_v39 }
 0x6b0   : > { %v10705_v16 = vpop.f32.mrb[12].mxu1  ;;  %12691 = vmatprep.subr.bf16.mxu0 %v12690_v0 }
 0x6b1   : > { %v16390_v31 = vpop.f32.mrb[14].mxu0  ;;  %v16393_v38 = vadd.f32 %v10705_v16, %v16385_v2  ;;  %v16395_v20 = vpop.f32.mrb[13].mxu1  ;;  %v11214_v16 = vld [vmem:[#allocation2 + $0x1c0] sm:$0xff]  ;;  %12693 = vmatpush1.bf16.msra.mxu0 %v12692_v36 }
 0x6b2   : > { %v16397_v26 = vpop.f32.mrb[15].mxu0  ;;  %v12564_v34 = vpack.c.bf16 %v11216_v40, %v11214_v16  ;;  %v16449_v45 = vadd.f32 %v16395_v20, %v16385_v2 }
 0x6b3   : > { %v13370_v50 = vpack.i.bf16 %v16393_v38, %v16388_v30 }
 0x6b4   : > { %v16401_v32 = vpop.f32.mrb[14].mxu1  ;;  %12565 = vmatpush1.bf16.msra.mxu1 %v12564_v34  ;;  %18018 = vst [vmem:[#allocation51_spill] sm:$0xff] %v16449_v45 }
 0x6b5   : > { %v10782_v47 = vpop.f32.mrb[16].mxu0  ;;  %v16403_v19 = vpop.f32.mrb[15].mxu1  ;;  %13371 = vrot.lane.b32.xlu1 %v13370_v50, %s17652_s20  ;;  %13361 = vrot.lane.b32.xlu0 %v13370_v50, %s17650_s30  ;;  %v16435_v28 = vadd.f32 %v16401_v32, %v10553_v37 }
 0x6b6   : > { %v10784_v44 = vpop.f32.mrb[17].mxu0  ;;  %v16408_v18 = vadd.f32 %v10782_v47, %v16385_v2  ;;  %12567 = vmatprep.subr.bf16.mxu1 %v12566_v62  ;;  %v16482_v6 = vadd.f32 %v16403_v19, %v10553_v37 }
 0x6b7   : > { %v16414_v13 = vadd.f32 %v10784_v44, %v16385_v2  ;;  %18016 = vst [vmem:[#allocation39_spill] sm:$0xff] %v16435_v28  ;;  %v12568_v44 = vpack.c.bf16 %v11220_v9, %v11218_v3 }
 0x6b8   : > { %v10859_v1 = vpop.f32.mrb[16].mxu1  ;;  %v13375_v51 = vpack.i.bf16 %v16408_v18, %v16411_v60  ;;  %18023 = vst [vmem:[#allocation56_spill] sm:$0xff] %v16482_v6 }
 0x6b9   : > { %v16416_v33 = vpop.f32.mrb[18].mxu0  ;;  %v16419_v49 = vadd.f32 %v10859_v1, %v16385_v2  ;;  %v10861_v21 = vpop.f32.mrb[17].mxu1  ;;  %13366 = vrot.lane.b32.xlu0 %v13370_v50, %s13623_s24  ;;  %v11349_v50 = vld [vmem:[#allocation2 + $0x5f8] sm:$0xff]  ;;  %v16438_v1 = vadd.f32 %v16397_v26, %v10553_v37  ;;  %12569 = vmatpush1.bf16.msra.mxu1 %v12568_v44 }
 0x6ba   : > { %v16422_v42 = vpop.f32.mrb[19].mxu0  ;;  %v12694_v47 = vpack.c.bf16 %v11349_v50, %v11347_v59  ;;  %v16443_v32 = vadd.f32 %v10861_v21, %v16385_v2  ;;  %12571 = vmatprep.subr.bf16.mxu1 %v12570_v17  ;;  %v16454_v26 = vadd.f32 %v16416_v33, %v10553_v37  ;;  %v16459_v21 = vadd.f32 %v16390_v31, %v10553_v37 }
 0x6bb   : > { %v13380_v46 = vpack.i.bf16 %v16419_v49, %v16414_v13  ;;  %v13405_v58 = vpack.i.bf16 %v16435_v28, %v16438_v1  ;;  %v16468_v20 = vadd.f32 %v16422_v42, %v10553_v37  ;;  %v16619_v28 = vld [vmem:[#allocation2 + $0x650] sm:$0xff] }
 0x6bc   : > { %v10865_v29 = vpop.f32.mrb[18].mxu1  ;;  %12695 = vmatprep.subr.bf16.mxu0 %v12694_v47  ;;  %18017 = vst [vmem:[#allocation42_spill] sm:$0xff] %v16443_v32  ;;  %18019 = vst [vmem:[#allocation52_spill] sm:$0xff] %v16454_v26  ;;  %v13420_v53 = vpack.i.bf16 %v16443_v32, %v16449_v45  ;;  %v13435_v2 = vpack.i.bf16 %v16454_v26, %v16459_v21  ;;  %v16689_v32 = vld [vmem:[#allocation2 + $0x2a8] sm:$0xff] }
 0x6bd   : > { %v16428_v10 = vpop.f32.mrb[19].mxu1  ;;  %13381 = vrot.lane.b32.xlu1 %v13380_v46, %s17650_s30  ;;  %13376 = vrot.lane.b32.xlu0 %v13375_v51, %s17650_s30  ;;  %v16463_v54 = vadd.f32 %v10865_v29, %v10553_v37  ;;  %18021 = vst [vmem:[#allocation49_spill] sm:$0xff] %v16468_v20  ;;  %18043 = vst [vmem:[#allocation48_spill] sm:$0xff] %v16689_v32 }
 0x6be   : > { %12697 = vmatpush1.bf16.msra.mxu0 %v12696_v24  ;;  %v16479_v33 = vadd.f32 %v16428_v10, %v10553_v37  ;;  %v18141_v14 = vld [vmem:[#allocation39_spill] sm:$0xff] }
 0x6bf   : > { %12699 = vmatprep.subr.bf16.mxu0 %v12698_v55  ;;  %18020 = vst [vmem:[#allocation35_spill] sm:$0xff] %v16463_v54  ;;  %v13445_v31 = vpack.i.bf16 %v16463_v54, %v16468_v20  ;;  %v16615_v54 = vld [vmem:[#allocation2 + $0x250] sm:$0xff] }
 0x6c0   : > { %18022 = vst [vmem:[#allocation53_spill] sm:$0xff] %v16479_v33  ;;  %v13465_v39 = vpack.i.bf16 %v16479_v33, %v16482_v6  ;;  %v16691_v33 = vld [vmem:[#allocation2 + $0x2b8] sm:$0xff] }
 0x6c1   : > { %13386 = vrot.lane.b32.xlu1 %v13380_v46, %s13623_s24  ;;  %13396 = vrot.lane.b32.xlu0 %v13380_v46, %s17652_s20  ;;  %18044 = vst [vmem:[#allocation33_spill] sm:$0xff] %v16691_v33  ;;  %v16755_v33 = vld [vmem:[#allocation2 + $0x6d8] sm:$0xff] }
 0x6c5   : > { %13391 = vrot.lane.b32.xlu1 %v13375_v51, %s13623_s24  ;;  %13401 = vrot.lane.b32.xlu0 %v13375_v51, %s17652_s20 }
 0x6c6   : > { %v18142_v48 = vld [vmem:[#allocation35_spill] sm:$0xff] }
 0x6c9   : > { %13406 = vrot.lane.b32.xlu1 %v13405_v58, %s17650_s30  ;;  %13416 = vrot.lane.b32.xlu0 %v13405_v58, %s17652_s20 }
 0x6cd   : > { %13411 = vrot.lane.b32.xlu1 %v13405_v58, %s13623_s24  ;;  %13421 = vrot.lane.b32.xlu0 %v13420_v53, %s17650_s30 }
 0x6d1   : > { %13426 = vrot.lane.b32.xlu1 %v13420_v53, %s13623_s24  ;;  %13436 = vrot.lane.b32.xlu0 %v13435_v2, %s13623_s24 }
 0x6d5   : > { %13431 = vrot.lane.b32.xlu1 %v13435_v2, %s17650_s30  ;;  %13446 = vrot.lane.b32.xlu0 %v13445_v31, %s17650_s30 }
 0x6d9   : > { %13441 = vrot.lane.b32.xlu1 %v13435_v2, %s17652_s20  ;;  %13451 = vrot.lane.b32.xlu0 %v13445_v31, %s13623_s24 }
 0x6dd   : > { %13461 = vrot.lane.b32.xlu1 %v13445_v31, %s17652_s20  ;;  %13456 = vrot.lane.b32.xlu0 %v13420_v53, %s17652_s20 }
 0x6e1   : > { %13466 = vrot.lane.b32.xlu1 %v13465_v39, %s17650_s30  ;;  %13471 = vrot.lane.b32.xlu0 %v13465_v39, %s13623_s24  ;;  %s12272_s24 = sshll.u32 %s13743_s28, 11 }
 0x6e2   : > { %s17048_s23 = scalar_lea.hbm %s17143_s16, %s12272_s24 }
 0x6e5   : > { %13476 = vrot.lane.b32.xlu1 %v13465_v39, %s17652_s20 }
 0x727   : > { %v16491_v7 = vpop.permute.xlu0 %13361  ;;  %v16495_v41 = vpop.permute.xlu1 %13371 }
 0x728   : > { %v17354_v42 = vunpack.i.h.bf16 %v16491_v7  ;;  %v13363_v19 = vunpack.i.l.bf16 %v16491_v7  ;;  %18024 = vst [vmem:[#allocation54_spill] sm:$0xff] %v16495_v41  ;;  %v17348_v51 = vunpack.i.h.bf16 %v16495_v41  ;;  %v13373_v0 = vunpack.i.l.bf16 %v16495_v41  ;;  %v16757_v41 = vld [vmem:[#allocation2 + $0x2c0] sm:$0xff] }
 0x72a   : > { %v10919_v12 = vsel %vm18025_vm0, %v13363_v19, %v17354_v42  ;;  %v11015_v8 = vsel %vm18027_vm4, %v13373_v0, %v17348_v51  ;;  %vm18036_vm0 = vmmov %vm18032_vm10 }
 0x72b   : > { %v16500_v46 = vpop.permute.xlu0 %13366  ;;  %v10951_v40 = vsel %vm17978_vm5, %v10919_v12, 0.0  ;;  %v16558_v12 = vld [vmem:[#allocation2 + $0x200] sm:$0xff]  ;;  %vm18038_vm4 = vmmov %vm18033_vm1 }
 0x72c   : > { %v17349_v29 = vunpack.i.h.bf16 %v16500_v46  ;;  %v13368_v10 = vunpack.i.l.bf16 %v16500_v46  ;;  %v10967_v59 = vmax.f32 %v16388_v30, %v10951_v40  ;;  %v16562_v40 = vld [vmem:[#allocation2 + $0x600] sm:$0xff] }
 0x72e   : > { %v11079_v16 = vsel %vm18026_vm11, %v13368_v10, %v17349_v29  ;;  %vm18037_vm11 = vmmov %vm18036_vm0  ;;  %v16595_v29 = vld [vmem:[#allocation2 + $0x248] sm:$0xff] }
 0x72f   : > { %v16511_v52 = vpop.permute.xlu1 %13381  ;;  %v16513_v34 = vpop.permute.xlu0 %13376  ;;  %v11111_v25 = vsel %vm17978_vm5, %v11079_v16, 0.0  ;;  %v16560_v16 = vld [vmem:[#allocation2 + $0x210] sm:$0xff] }
 0x730   : > { %v17355_v61 = vunpack.i.h.bf16 %v16511_v52  ;;  %v13383_v36 = vunpack.i.l.bf16 %v16511_v52  ;;  %v11127_v50 = vmax.f32 %v11015_v8, %v11111_v25  ;;  %v17353_v3 = vunpack.i.h.bf16 %v16513_v34  ;;  %v16564_v25 = vld [vmem:[#allocation2 + $0x610] sm:$0xff] }
 0x731   : > { %v13378_v37 = vunpack.i.l.bf16 %v16513_v34  ;;  %v12572_v6 = vpack.c.bf16 %v16560_v16, %v16558_v12  ;;  %v16639_v12 = vld [vmem:[#allocation2 + $0x260] sm:$0xff]  ;;  %v16641_v16 = vld [vmem:[#allocation2 + $0x270] sm:$0xff] }
 0x732   : > { %v10923_v62 = vsel %vm18028_vm15, %v13383_v36, %v17355_v61  ;;  %v11143_v57 = vmax.f32 %v10967_v59, %v11127_v50  ;;  %v10922_v63 = vsel %vm18030_vm14, %v17353_v3, %v13383_v36  ;;  %vm18039_vm15 = vmmov %vm18033_vm1 }
 0x733   : > { %v16528_v47 = vpop.permute.xlu1 %13386  ;;  %v16530_v9 = vpop.permute.xlu0 %13396  ;;  %v10918_v27 = vsel %vm18031_vm7, %v13378_v37, %v13363_v19  ;;  %v10955_v17 = vsel %vm18004_vm6, %v10923_v62, 0.0  ;;  %v10954_v8 = vsel %vm17617_vm3, %v10922_v63, 0.0  ;;  %v16571_v37 = vld [vmem:[#allocation2 + $0x228] sm:$0xff]  ;;  %v16573_v62 = vld [vmem:[#allocation2 + $0x238] sm:$0xff]  ;;  %vm18042_vm14 = vmmov %vm18031_vm7 }
 0x734   : > { %18029 = vst [vmem:[#allocation50_spill] sm:$0xff] %v16530_v9  ;;  %v17350_v23 = vunpack.i.h.bf16 %v16528_v47  ;;  %v13388_v44 = vunpack.i.l.bf16 %v16528_v47  ;;  %v17347_v30 = vunpack.i.h.bf16 %v16530_v9  ;;  %v13398_v24 = vunpack.i.l.bf16 %v16530_v9  ;;  %11478 = vmatprep.mubr.f32.mxu1 %v11143_v57  ;;  %v16575_v57 = vld [vmem:[#allocation2 + $0x628] sm:$0xff]  ;;  %vm18047_vm7 = vmmov %vm18036_vm0 }
 0x735   : > { %v10950_v36 = vsel %vm18035_vm2, %v10918_v27, 0.0  ;;  %v10971_v59 = vmax.f32 %v16414_v13, %v10955_v17  ;;  %v16587_v27 = vld [vmem:[#allocation2 + $0x220] sm:$0xff]  ;;  %v16589_v17 = vld [vmem:[#allocation2 + $0x230] sm:$0xff]  ;;  %v10970_v3 = vmax.f32 %v16408_v18, %v10954_v8  ;;  %v12700_v18 = vpack.c.bf16 %v16564_v25, %v16562_v40  ;;  %v16631_v8 = vld [vmem:[#allocation2 + $0x668] sm:$0xff] }
 0x736   : > { %v11083_v5 = vsel %vm18032_vm10, %v13388_v44, %v17350_v23  ;;  %v11019_v43 = vsel %vm18033_vm1, %v13398_v24, %v17347_v30  ;;  %v16597_v23 = vld [vmem:[#allocation2 + $0x258] sm:$0xff]  ;;  %v10966_v42 = vmax.f32 %v16411_v60, %v10950_v36  ;;  %v16627_v60 = vld [vmem:[#allocation2 + $0x268] sm:$0xff]  ;;  %v16643_v40 = vld [vmem:[#allocation2 + $0x660] sm:$0xff] }
 0x737   : > { %v16548_v55 = vpop.permute.xlu1 %13391  ;;  %v16550_v58 = vpop.permute.xlu0 %13401  ;;  %v11115_v53 = vsel %vm18004_vm6, %v11083_v5, 0.0  ;;  %v16577_v5 = vld [vmem:[#allocation2 + $0x638] sm:$0xff]  ;;  %v16645_v25 = vld [vmem:[#allocation2 + $0x670] sm:$0xff]  ;;  %vm18054_vm10 = vmmov %vm18033_vm1 }
 0x738   : > { %18034 = vst [vmem:[#allocation57_spill] sm:$0xff] %v16550_v58  ;;  %v17352_v2 = vunpack.i.h.bf16 %v16548_v55  ;;  %v13393_v31 = vunpack.i.l.bf16 %v16548_v55  ;;  %v17351_v39 = vunpack.i.h.bf16 %v16550_v58  ;;  %v13403_v19 = vunpack.i.l.bf16 %v16550_v58  ;;  %v16633_v36 = vld [vmem:[#allocation2 + $0x678] sm:$0xff]  ;;  %vm18057_vm1 = vmmov %vm18042_vm14 }
 0x739   : > { %v11131_v50 = vmax.f32 %v11019_v43, %v11115_v53  ;;  %v16591_v43 = vld [vmem:[#allocation2 + $0x620] sm:$0xff]  ;;  %v16593_v53 = vld [vmem:[#allocation2 + $0x630] sm:$0xff]  ;;  %v18056_v58 = vunpack.i.h.bf16 %v16511_v52  ;;  %v18059_v52 = vunpack.i.h.bf16 %v16491_v7 }
 0x73a   : > { %v11082_v30 = vsel %vm18036_vm0, %v17352_v2, %v13388_v44  ;;  %v11078_v63 = vsel %vm18037_vm11, %v13393_v31, %v13368_v10  ;;  %v11014_v51 = vsel %vm18038_vm4, %v13403_v19, %v13373_v0  ;;  %v11018_v13 = vsel %vm18039_vm15, %v17351_v39, %v13398_v24  ;;  %v16607_v19 = vld [vmem:[#allocation2 + $0x648] sm:$0xff]  ;;  %v16609_v39 = vld [vmem:[#allocation2 + $0x658] sm:$0xff]  ;;  %v16611_v2 = vld [vmem:[#allocation2 + $0x240] sm:$0xff] }
 0x73b   : > { %v11114_v10 = vsel %vm17617_vm3, %v11082_v30, 0.0  ;;  %v11110_v0 = vsel %vm18035_vm2, %v11078_v63, 0.0  ;;  %v16603_v44 = vpop.permute.xlu1 %13406  ;;  %v16605_v24 = vpop.permute.xlu0 %13416  ;;  %v11147_v31 = vmax.f32 %v10971_v59, %v11131_v50  ;;  %v16617_v63 = vld [vmem:[#allocation2 + $0x640] sm:$0xff]  ;;  %v16647_v50 = vld [vmem:[#allocation2 + $0x288] sm:$0xff]  ;;  %vm18060_vm0 = vmmov %vm18057_vm1 }
 0x73c   : > { %v11126_v61 = vmax.f32 %v11014_v51, %v11110_v0  ;;  %v11130_v30 = vmax.f32 %v11018_v13, %v11114_v10  ;;  %v16629_v51 = vld [vmem:[#allocation2 + $0x278] sm:$0xff]  ;;  %v12574_v0 = vpack.c.bf16 %v16573_v62, %v16571_v37  ;;  %v12578_v37 = vpack.c.bf16 %v16597_v23, %v16595_v29  ;;  %v16673_v23 = vld [vmem:[#allocation2 + $0x280] sm:$0xff]  ;;  %v16687_v29 = vld [vmem:[#allocation2 + $0x690] sm:$0xff] }
 0x73d   : > { %11632 = vmatprep.mubr.f32.mxu0 %v11147_v31  ;;  %v12702_v31 = vpack.c.bf16 %v16577_v5, %v16575_v57  ;;  %v12706_v62 = vpack.c.bf16 %v16609_v39, %v16607_v19  ;;  %v16661_v57 = vld [vmem:[#allocation2 + $0x298] sm:$0xff]  ;;  %v16663_v5 = vld [vmem:[#allocation2 + $0x688] sm:$0xff]  ;;  %v16675_v39 = vld [vmem:[#allocation2 + $0x290] sm:$0xff]  ;;  %v18052_v4 = vunpack.i.h.bf16 %v16605_v24  ;;  %v18053_v9 = vunpack.i.l.bf16 %v16605_v24 }
 0x73e   : > { %v11142_v13 = vmax.f32 %v10966_v42, %v11126_v61  ;;  %v11146_v10 = vmax.f32 %v10970_v3, %v11130_v30  ;;  %v12576_v61 = vpack.c.bf16 %v16589_v17, %v16587_v27  ;;  %v12704_v3 = vpack.c.bf16 %v16593_v53, %v16591_v43  ;;  %v16665_v30 = vld [vmem:[#allocation2 + $0x698] sm:$0xff]  ;;  %v16677_v17 = vld [vmem:[#allocation2 + $0x680] sm:$0xff]  ;;  %v16703_v27 = vld [vmem:[#allocation2 + $0x6a8] sm:$0xff] }
 0x73f   : > { %v16649_v59 = vpop.permute.xlu1 %13411  ;;  %v16651_v42 = vpop.permute.xlu0 %13421  ;;  %v18040_v43 = vunpack.i.h.bf16 %v16603_v44  ;;  %v18041_v53 = vunpack.i.l.bf16 %v16603_v44  ;;  %18048 = vst [vmem:[#allocation45_spill] sm:$0xff] %v16703_v27  ;;  %vm18066_vm11 = vmmov %vm18060_vm0 }
 0x740   : > { %11479 = vmatmul.mubr.f32.vlgmr.msra.gmra.mrb[20].mxu1 %v11142_v13  ;;  %11633 = vmatmul.mubr.f32.vlgmr.msra.gmra.mrb[20].mxu0 %v11146_v10  ;;  %v18045_v26 = vunpack.i.h.bf16 %v16649_v59  ;;  %v18046_v15 = vunpack.i.l.bf16 %v16649_v59  ;;  %v16705_v10 = vld [vmem:[#allocation2 + $0x6b8] sm:$0xff]  ;;  %v16707_v13 = vld [vmem:[#allocation2 + $0x2a0] sm:$0xff]  ;;  %v18063_v22 = vunpack.i.h.bf16 %v16651_v42  ;;  %vm18069_vm4 = vmmov %vm18060_vm0 }
 0x741   : > { %v10926_v19 = vsel %vm18042_vm14, %v18041_v53, %v18040_v43  ;;  %12573 = vmatpush1.bf16.msra.mxu1 %v12572_v6  ;;  %12701 = vmatpush1.bf16.msra.mxu0 %v12700_v18  ;;  %v12582_v6 = vpack.c.bf16 %v16629_v51, %v16627_v60  ;;  %v12710_v18 = vpack.c.bf16 %v16633_v36, %v16631_v8  ;;  %v16721_v8 = vld [vmem:[#allocation2 + $0x2b0] sm:$0xff]  ;;  %v16723_v36 = vld [vmem:[#allocation2 + $0x6a0] sm:$0xff]  ;;  %v16735_v53 = vld [vmem:[#allocation2 + $0x2c8] sm:$0xff] }
 0x742   : > { %v11086_v43 = vsel %vm18047_vm7, %v18046_v15, %v18045_v26  ;;  %12575 = vmatprep.subr.bf16.mxu1 %v12574_v0  ;;  %12703 = vmatprep.subr.bf16.mxu0 %v12702_v31  ;;  %v16725_v0 = vld [vmem:[#allocation2 + $0x6b0] sm:$0xff]  ;;  %v10959_v31 = vsel %vm17978_vm5, %v10926_v19, 0.0  ;;  %18049 = vst [vmem:[#allocation34_spill] sm:$0xff] %v16735_v53  ;;  %v16737_v51 = vld [vmem:[#allocation2 + $0x2d8] sm:$0xff]  ;;  %v11022_v19 = vsel %vm18054_vm10, %v18053_v9, %v18052_v4  ;;  %v18055_v15 = vunpack.i.h.bf16 %v16651_v42  ;;  %vm18071_vm15 = vmmov %vm18047_vm7 }
 0x743   : > { %v16709_v20 = vpop.permute.xlu1 %13426  ;;  %v16711_v45 = vpop.permute.xlu0 %13436  ;;  %18050 = vst [vmem:[#allocation43_spill] sm:$0xff] %v16737_v51  ;;  %v11119_v60 = vsel %vm17978_vm5, %v11086_v43, 0.0  ;;  %v18058_v4 = vunpack.i.l.bf16 %v16651_v42  ;;  %v16772_v43 = vld [vmem:[#allocation2 + $0x2e8] sm:$0xff]  ;;  %v10975_v7 = vmax.f32 %v16438_v1, %v10959_v31  ;;  %v18061_v51 = vpack.c.bf16 %v16615_v54, %v16611_v2  ;;  %vm18064_vm5 = vmmov %vm18060_vm0 }
 0x744   : > { %v10924_v26 = vsel %vm18057_vm1, %v18056_v58, %v18055_v15  ;;  %v11135_v58 = vmax.f32 %v11022_v19, %v11119_v60  ;;  %v13438_v15 = vunpack.i.l.bf16 %v16711_v45  ;;  %v16784_v60 = vld [vmem:[#allocation2 + $0x2f8] sm:$0xff]  ;;  %v16786_v19 = vld [vmem:[#allocation2 + $0x6e8] sm:$0xff]  ;;  %v16811_v31 = vsel %vm18064_vm5, %v18063_v22, 0.0  ;;  %vm18073_vm14 = vmmov %vm18047_vm7 }
 0x745   : > { %12577 = vmatpush1.bf16.msra.mxu1 %v12576_v61  ;;  %12705 = vmatpush1.bf16.msra.mxu0 %v12704_v3  ;;  %v10920_v9 = vsel %vm18060_vm0, %v18059_v52, %v18058_v4  ;;  %v16768_v61 = vld [vmem:[#allocation2 + $0x6c0] sm:$0xff]  ;;  %v16770_v3 = vld [vmem:[#allocation2 + $0x6d0] sm:$0xff]  ;;  %v16788_v4 = vld [vmem:[#allocation2 + $0x6f8] sm:$0xff]  ;;  %v10956_v52 = vsel %vm18009_vm8, %v10924_v26, 0.0  ;;  %v18062_v26 = vpack.c.bf16 %v16619_v28, %v16617_v63  ;;  %v12598_v54 = vpack.c.bf16 %v16784_v60, %v16772_v43 }
 0x746   : > { %12579 = vmatprep.subr.bf16.mxu1 %v12578_v37  ;;  %12707 = vmatprep.subr.bf16.mxu0 %v12706_v62  ;;  %v10952_v62 = vsel %vm18000_vm12, %v10920_v9, 0.0  ;;  %v13429_v37 = vunpack.i.h.bf16 %v16709_v20  ;;  %v11151_v53 = vmax.f32 %v10975_v7, %v11135_v58  ;;  %v12724_v1 = vpack.c.bf16 %v16770_v3, %v16768_v61  ;;  %vm18080_vm1 = vmmov %vm18047_vm7  ;;  %v11261_v3 = vld [vmem:[#allocation2 + $0x338] sm:$0xff] }
 0x747   : > { %v16775_v32 = vpop.permute.xlu1 %13431  ;;  %v16777_v27 = vpop.permute.xlu0 %13446  ;;  %v18065_v9 = vunpack.i.l.bf16 %v16603_v44  ;;  %v12726_v28 = vpack.c.bf16 %v16788_v4, %v16786_v19  ;;  %v16821_v2 = vmax.f32 %v16419_v49, %v10956_v52  ;;  %v18067_v63 = vunpack.i.h.bf16 %v16513_v34  ;;  %vm18086_vm5 = vmmov %vm18080_vm1  ;;  %v11260_v19 = vld [vmem:[#allocation2 + $0x330] sm:$0xff] }
 0x748   : > { %v13433_v11 = vunpack.i.l.bf16 %v16775_v32  ;;  %v18068_v22 = vunpack.i.l.bf16 %v16651_v42  ;;  %11484 = vmatprep.mubr.f32.mxu1 %v11151_v53  ;;  %v16839_v49 = vmax.f32 %v16393_v38, %v10952_v62  ;;  %v13439_v34 = vunpack.i.h.bf16 %v16711_v45 }
 0x749   : > { %12581 = vmatpush1.bf16.msra.mxu1 %v18061_v51  ;;  %12709 = vmatpush1.bf16.msra.mxu0 %v18062_v26  ;;  %v16849_v53 = vsel %vm18047_vm7, %v13429_v37, 0.0  ;;  %v18074_v38 = vpack.c.bf16 %v16641_v16, %v16639_v12  ;;  %v18075_v62 = vpack.c.bf16 %v16645_v25, %v16643_v40  ;;  %v18078_v12 = vpack.c.bf16 %v16665_v30, %v16663_v5  ;;  %vm18102_vm7 = vmmov %vm18060_vm0 }
 0x74a   : > { %v10925_v58 = vsel %vm18066_vm11, %v13433_v11, %v18065_v9  ;;  %12583 = vmatprep.subr.bf16.mxu1 %v12582_v6  ;;  %12711 = vmatprep.subr.bf16.mxu0 %v12710_v18  ;;  %v16828_v51 = vsel %vm18069_vm4, %v18068_v22, %v18067_v63  ;;  %v13428_v11 = vunpack.i.l.bf16 %v16709_v20  ;;  %v18070_v6 = vunpack.i.l.bf16 %v16649_v59  ;;  %vm18089_vm11 = vmmov %vm18054_vm10 }
 0x74b   : > { %v16834_v7 = vpop.permute.xlu1 %13441  ;;  %v16836_v26 = vpop.permute.xlu0 %13451  ;;  %v10958_v52 = vsel %vm18035_vm2, %v10925_v58, 0.0  ;;  %v18072_v20 = vunpack.i.h.bf16 %v16528_v47  ;;  %v13448_v63 = vunpack.i.l.bf16 %v16777_v27  ;;  %v18076_v58 = vunpack.i.l.bf16 %v16605_v24  ;;  %vm18095_vm4 = vmmov %vm18054_vm10 }
 0x74c   : > { %v11085_v18 = vsel %vm18071_vm15, %v13438_v15, %v18070_v6  ;;  %v13443_v42 = vunpack.i.l.bf16 %v16834_v7  ;;  %v13449_v15 = vunpack.i.h.bf16 %v16777_v27  ;;  %v17377_v22 = vunpack.i.h.bf16 %v16836_v26  ;;  %vm18098_vm15 = vmmov %vm18095_vm4 }
 0x74d   : > { %v11084_v9 = vsel %vm18073_vm14, %v18072_v20, %v13429_v37  ;;  %12585 = vmatpush1.bf16.msra.mxu1 %v18074_v38  ;;  %12713 = vmatpush1.bf16.msra.mxu0 %v18075_v62  ;;  %v13453_v37 = vunpack.i.l.bf16 %v16836_v26  ;;  %v18077_v6 = vpack.c.bf16 %v16661_v57, %v16647_v50  ;;  %v11118_v16 = vsel %vm18035_vm2, %v11085_v18, 0.0  ;;  %vm18082_vm2 = vmmov %vm18080_vm1 }
 0x74e   : > { %v11021_v47 = vsel %vm18054_vm10, %v13443_v42, %v18076_v58  ;;  %12715 = vmatprep.subr.bf16.mxu0 %v18078_v12  ;;  %v18079_v40 = vunpack.i.h.bf16 %v16500_v46  ;;  %v13434_v42 = vunpack.i.h.bf16 %v16775_v32  ;;  %v10974_v62 = vmax.f32 %v16459_v21, %v10958_v52  ;;  %vm18101_vm14 = vmmov %vm18095_vm4 }
 0x74f   : > { %12587 = vmatprep.subr.bf16.mxu1 %v18077_v6  ;;  %v16876_v20 = vpop.permute.xlu1 %13461  ;;  %v13457_v38 = vpop.permute.xlu0 %13456  ;;  %v11134_v50 = vmax.f32 %v11021_v47, %v11118_v16  ;;  %v11116_v56 = vsel %vm18009_vm8, %v11084_v9, 0.0  ;;  %v18081_v46 = vunpack.i.h.bf16 %v16548_v55  ;;  %v18083_v6 = vpack.c.bf16 %v16675_v39, %v16673_v23  ;;  %v18087_v39 = vld [vmem:[#allocation54_spill] sm:$0xff]  ;;  %v18091_v16 = vld [vmem:[#allocation48_spill] sm:$0xff]  ;;  %vm18103_vm10 = vmmov %vm18080_vm1 }
 0x750   : > { %v11080_v25 = vsel %vm18080_vm1, %v18079_v40, %v13428_v11  ;;  %v17376_v57 = vunpack.i.h.bf16 %v16876_v20  ;;  %v13463_v5 = vunpack.i.l.bf16 %v16876_v20  ;;  %v13459_v30 = vunpack.i.h.bf16 %v13457_v38  ;;  %vm18107_vm1 = vmmov %vm18095_vm4  ;;  %v18138_v47 = vld [vmem:[#allocation56_spill] sm:$0xff] }
 0x751   : > { %v13458_v58 = vunpack.i.l.bf16 %v13457_v38  ;;  %v11081_v18 = vsel %vm18082_vm2, %v13428_v11, %v18081_v46  ;;  %12589 = vmatpush1.bf16.msra.mxu1 %v18083_v6  ;;  %v18084_v21 = vpack.c.bf16 %v16687_v29, %v16677_v17  ;;  %v11150_v52 = vmax.f32 %v10974_v62, %v11134_v50  ;;  %v18090_v17 = vld [vmem:[#allocation33_spill] sm:$0xff]  ;;  %v18099_v6 = vld [vmem:[#allocation50_spill] sm:$0xff]  ;;  %vm18122_vm2 = vmmov %vm18060_vm0 }
 0x752   : > { %v10953_v12 = vsel %vm17995_vm13, %v16828_v51, 0.0  ;;  %v11112_v9 = vsel %vm18000_vm12, %v11080_v25, 0.0  ;;  %v10930_v55 = vsel %vm18060_vm0, %v13448_v63, %v13449_v15  ;;  %v11090_v23 = vsel %vm18086_vm5, %v13453_v37, %v17377_v22  ;;  %v18093_v51 = vld [vmem:[#allocation45_spill] sm:$0xff] }
 0x753   : > { %12717 = vmatpush1.bf16.msra.mxu0 %v18084_v21  ;;  %v18088_v11 = vunpack.i.h.bf16 %v18087_v39  ;;  %v18092_v40 = vpack.c.bf16 %v18090_v17, %v18091_v16  ;;  %v18094_v38 = vpack.c.bf16 %v16705_v10, %v18093_v51  ;;  %v11026_v25 = vsel %vm18095_vm4, %v13463_v5, %v17376_v57  ;;  %v18096_v62 = vld [vmem:[#allocation57_spill] sm:$0xff]  ;;  %11485 = vmatmul.mubr.f32.gmra.mrb[22].mxu1 %v11150_v52  ;;  %v11252_v16 = vld [vmem:[#allocation2 + $0x2f0] sm:$0xff]  ;;  %v18109_v57 = vld [vmem:[#allocation34_spill] sm:$0xff] }
 0x754   : > { %v18097_v50 = vunpack.i.h.bf16 %v18096_v62  ;;  %v18100_v21 = vunpack.i.h.bf16 %v18099_v6  ;;  %v11250_v17 = vld [vmem:[#allocation2 + $0x2e0] sm:$0xff]  ;;  %v10929_v10 = vsel %vm18102_vm7, %v13434_v42, %v13448_v63  ;;  %v13444_v51 = vunpack.i.h.bf16 %v16834_v7  ;;  %v11380_v62 = vld [vmem:[#allocation2 + $0x6f0] sm:$0xff]  ;;  %v11257_v6 = vld [vmem:[#allocation2 + $0x318] sm:$0xff] }
 0x755   : > { %v11016_v29 = vsel %vm18089_vm11, %v18088_v11, %v13458_v58  ;;  %12591 = vmatprep.subr.bf16.mxu1 %v18092_v40  ;;  %12719 = vmatprep.subr.bf16.mxu0 %v18094_v38  ;;  %v11378_v40 = vld [vmem:[#allocation2 + $0x6e0] sm:$0xff]  ;;  %v11089_v52 = vsel %vm18103_vm10, %v13439_v34, %v13453_v37  ;;  %v18104_v63 = vpack.c.bf16 %v16721_v8, %v16707_v13  ;;  %vm18125_vm11 = vmmov %vm18107_vm1  ;;  %v18127_v32 = vunpack.i.h.bf16 %v16603_v44 }
 0x756   : > { %v11017_v46 = vsel %vm18098_vm15, %v13458_v58, %v18097_v50  ;;  %v11020_v39 = vsel %vm18101_vm14, %v18100_v21, %v13459_v30  ;;  %v16921_v11 = vmax.f32 %v11016_v29, %v11112_v9  ;;  %v11113_v58 = vsel %vm17995_vm13, %v11081_v18, 0.0  ;;  %v11255_v50 = vld [vmem:[#allocation2 + $0x308] sm:$0xff]  ;;  %v18108_v9 = vld [vmem:[#allocation43_spill] sm:$0xff]  ;;  %vm18126_vm4 = vmmov %vm18107_vm1 }
 0x757   : > { %v16927_v38 = vmax.f32 %v11020_v39, %v11116_v56  ;;  %12593 = vmatpush1.bf16.msra.mxu1 %v18104_v63  ;;  %v18105_v56 = vpack.c.bf16 %v16725_v0, %v16723_v36  ;;  %v10963_v18 = vsel %vm18004_vm6, %v10930_v55, 0.0  ;;  %v11123_v21 = vsel %vm18004_vm6, %v11090_v23, 0.0  ;;  %v18111_v36 = vld [vmem:[#allocation31_spill] sm:$0xff]  ;;  %v11383_v63 = vld [vmem:[#allocation2 + $0x708] sm:$0xff]  ;;  %v11385_v55 = vld [vmem:[#allocation2 + $0x718] sm:$0xff] }
 0x758   : > { %v11044_v39 = vsel %vm18107_vm1, %v13459_v30, 0.0  ;;  %v18110_v22 = vpack.c.bf16 %v18108_v9, %v18109_v57  ;;  %v11129_v13 = vmax.f32 %v11017_v46, %v11113_v58  ;;  %v11139_v8 = vmax.f32 %v11026_v25, %v11123_v21  ;;  %vm18113_vm6 = vmmov %vm18107_vm1  ;;  %v18116_v25 = vld [vmem:[#allocation49_spill] sm:$0xff]  ;;  %v11392_v9 = vld [vmem:[#allocation2 + $0x750] sm:$0xff] }
 0x759   : > { %12721 = vmatpush1.bf16.msra.mxu0 %v18105_v56  ;;  %v18112_v0 = vpack.c.bf16 %v16755_v33, %v18111_v36  ;;  %v11025_v23 = vsel %vm18113_vm6, %v13444_v51, %v13463_v5  ;;  %v12600_v30 = vpack.c.bf16 %v11252_v16, %v11250_v17  ;;  %v12728_v56 = vpack.c.bf16 %v11380_v62, %v11378_v40  ;;  %v11256_v16 = vld [vmem:[#allocation2 + $0x310] sm:$0xff]  ;;  %vm18128_vm15 = vmmov %vm18122_vm2 }
 0x75a   : > { %12595 = vmatprep.subr.bf16.mxu1 %v18110_v22  ;;  %v12602_v29 = vpack.c.bf16 %v11257_v6, %v11255_v50  ;;  %v11117_v57 = vsel %vm17814_vm9, %v16849_v53, 0.0  ;;  %v18115_v22 = vld [vmem:[#allocation51_spill] sm:$0xff]  ;;  %v10979_v58 = vmax.f32 %v18116_v25, %v10963_v18  ;;  %v10962_v33 = vsel %vm17617_vm3, %v10929_v10, 0.0  ;;  %v18119_v50 = vld [vmem:[#allocation52_spill] sm:$0xff]  ;;  %vm18129_vm14 = vmmov %vm18122_vm2 }
 0x75b   : > { %12723 = vmatprep.subr.bf16.mxu0 %v18112_v0  ;;  %v10969_v46 = vmax.f32 %v18115_v22, %v10953_v12  ;;  %v10957_v21 = vsel %vm17814_vm9, %v16811_v31, 0.0  ;;  %v11133_v36 = vmax.f32 %v11044_v39, %v11117_v57  ;;  %v18118_v5 = vpack.c.bf16 %v16759_v35, %v16757_v41  ;;  %v11254_v12 = vld [vmem:[#allocation2 + $0x300] sm:$0xff]  ;;  %v11384_v41 = vld [vmem:[#allocation2 + $0x710] sm:$0xff]  ;;  %v11259_v31 = vld [vmem:[#allocation2 + $0x328] sm:$0xff] }
 0x75c   : > { %v11122_v17 = vsel %vm17617_vm3, %v11089_v52, 0.0  ;;  %v12730_v53 = vpack.c.bf16 %v11385_v55, %v11383_v63  ;;  %v11155_v10 = vmax.f32 %v10979_v58, %v11139_v8  ;;  %v11382_v35 = vld [vmem:[#allocation2 + $0x700] sm:$0xff]  ;;  %v10978_v61 = vmax.f32 %v18119_v50, %v10962_v33  ;;  %v11389_v6 = vld [vmem:[#allocation2 + $0x738] sm:$0xff]  ;;  %v18120_v52 = vld [vmem:[#allocation42_spill] sm:$0xff] }
 0x75d   : > { %12597 = vmatpush1.bf16.msra.mxu1 %v18118_v5  ;;  %12725 = vmatpush1.bf16.msra.mxu0 %v12724_v1  ;;  %v11145_v40 = vmax.f32 %v10969_v46, %v11129_v13  ;;  %v11138_v62 = vmax.f32 %v11025_v23, %v11122_v17  ;;  %v11387_v1 = vld [vmem:[#allocation2 + $0x728] sm:$0xff]  ;;  %v10973_v18 = vmax.f32 %v18120_v52, %v10957_v21  ;;  %v11386_v8 = vld [vmem:[#allocation2 + $0x720] sm:$0xff]  ;;  %v11388_v0 = vld [vmem:[#allocation2 + $0x730] sm:$0xff] }
 0x75e   : > { %12599 = vmatprep.subr.bf16.mxu1 %v12598_v54  ;;  %12727 = vmatprep.subr.bf16.mxu0 %v12726_v28  ;;  %v12604_v43 = vpack.c.bf16 %v11256_v16, %v11254_v12  ;;  %v12732_v60 = vpack.c.bf16 %v11384_v41, %v11382_v35  ;;  %v11258_v54 = vld [vmem:[#allocation2 + $0x320] sm:$0xff]  ;;  %v12606_v28 = vpack.c.bf16 %v11261_v3, %v11259_v31  ;;  %v11263_v63 = vld [vmem:[#allocation2 + $0x348] sm:$0xff]  ;;  %v11265_v55 = vld [vmem:[#allocation2 + $0x358] sm:$0xff] }
 0x75f   : > { %11555 = vmatprep.mubr.f32.mxu1 %v11145_v40  ;;  %11638 = vmatprep.mubr.f32.mxu0 %v11155_v10  ;;  %v11154_v39 = vmax.f32 %v10978_v61, %v11138_v62  ;;  %v11149_v4 = vmax.f32 %v10973_v18, %v11133_v36  ;;  %v12734_v13 = vpack.c.bf16 %v11389_v6, %v11387_v1  ;;  %v11391_v23 = vld [vmem:[#allocation2 + $0x748] sm:$0xff]  ;;  %v11393_v57 = vld [vmem:[#allocation2 + $0x758] sm:$0xff]  ;;  %v11262_v22 = vld [vmem:[#allocation2 + $0x340] sm:$0xff] }
 0x760   : > { %v11264_v46 = vld [vmem:[#allocation2 + $0x350] sm:$0xff]  ;;  %v12738_v25 = vpack.c.bf16 %v11393_v57, %v11391_v23  ;;  %v11390_v58 = vld [vmem:[#allocation2 + $0x740] sm:$0xff]  ;;  %v11267_v33 = vld [vmem:[#allocation2 + $0x368] sm:$0xff] }
 0x761   : > { %12601 = vmatpush1.bf16.msra.mxu1 %v12600_v30  ;;  %12729 = vmatpush1.bf16.msra.mxu0 %v12728_v56  ;;  %v12608_v30 = vpack.c.bf16 %v11260_v19, %v11258_v54  ;;  %v12736_v56 = vpack.c.bf16 %v11388_v0, %v11386_v8  ;;  %v11269_v21 = vld [vmem:[#allocation2 + $0x378] sm:$0xff]  ;;  %v11395_v36 = vld [vmem:[#allocation2 + $0x768] sm:$0xff]  ;;  %v12612_v17 = vpack.c.bf16 %v11264_v46, %v11262_v22  ;;  %v11266_v12 = vld [vmem:[#allocation2 + $0x360] sm:$0xff]  ;;  %v16984_v19 = vpop.permute.xlu1 %13466 }
 0x762   : > { %12603 = vmatprep.subr.bf16.mxu1 %v12602_v29  ;;  %12731 = vmatprep.subr.bf16.mxu0 %v12730_v53  ;;  %v12610_v29 = vpack.c.bf16 %v11265_v55, %v11263_v63  ;;  %v11397_v5 = vld [vmem:[#allocation2 + $0x778] sm:$0xff]  ;;  %v12740_v53 = vpack.c.bf16 %v11392_v9, %v11390_v58  ;;  %v11268_v16 = vld [vmem:[#allocation2 + $0x370] sm:$0xff]  ;;  %v12614_v40 = vpack.c.bf16 %v11269_v21, %v11267_v33  ;;  %v11394_v62 = vld [vmem:[#allocation2 + $0x760] sm:$0xff]  ;;  %v13472_v58 = vpop.permute.xlu0 %13471 }
 0x763   : > { %11639 = vmatmul.mubr.f32.gmra.mrb[22].mxu0 %v11154_v39  ;;  %v12742_v10 = vpack.c.bf16 %v11397_v5, %v11395_v36  ;;  %v11396_v35 = vld [vmem:[#allocation2 + $0x770] sm:$0xff]  ;;  %v11271_v41 = vld [vmem:[#allocation2 + $0x388] sm:$0xff]  ;;  %v11273_v31 = vld [vmem:[#allocation2 + $0x398] sm:$0xff]  ;;  %v12616_v3 = vpack.c.bf16 %v11268_v16, %v11266_v12 }
 0x764   : > { %11709 = vmatprep.mubr.f32.mxu0 %v11149_v4  ;;  %v11399_v50 = vld [vmem:[#allocation2 + $0x788] sm:$0xff]  ;;  %v11401_v61 = vld [vmem:[#allocation2 + $0x798] sm:$0xff]  ;;  %v12744_v1 = vpack.c.bf16 %v11396_v35, %v11394_v62  ;;  %v11270_v6 = vld [vmem:[#allocation2 + $0x380] sm:$0xff]  ;;  %v12618_v18 = vpack.c.bf16 %v11273_v31, %v11271_v41  ;;  %v13468_v62 = vunpack.i.l.bf16 %v16984_v19  ;;  %v13474_v35 = vunpack.i.h.bf16 %v13472_v58 }
 0x765   : > { %12605 = vmatpush1.bf16.msra.mxu1 %v12604_v43  ;;  %12733 = vmatpush1.bf16.msra.mxu0 %v12732_v60  ;;  %v11272_v52 = vld [vmem:[#allocation2 + $0x390] sm:$0xff]  ;;  %v12746_v39 = vpack.c.bf16 %v11401_v61, %v11399_v50  ;;  %v11398_v43 = vld [vmem:[#allocation2 + $0x780] sm:$0xff]  ;;  %v11275_v54 = vld [vmem:[#allocation2 + $0x3a8] sm:$0xff]  ;;  %v13477_v9 = vpop.permute.xlu1 %13476  ;;  %v13473_v41 = vunpack.i.l.bf16 %v13472_v58 }
 0x766   : > { %12607 = vmatprep.subr.bf16.mxu1 %v12606_v28  ;;  %12735 = vmatprep.subr.bf16.mxu0 %v12734_v13  ;;  %v11400_v60 = vld [vmem:[#allocation2 + $0x790] sm:$0xff]  ;;  %v11277_v4 = vld [vmem:[#allocation2 + $0x3b8] sm:$0xff]  ;;  %v11403_v28 = vld [vmem:[#allocation2 + $0x7a8] sm:$0xff]  ;;  %v12620_v8 = vpack.c.bf16 %v11272_v52, %v11270_v6 }
 0x767   : > { %v11405_v13 = vld [vmem:[#allocation2 + $0x7b8] sm:$0xff]  ;;  %v12748_v0 = vpack.c.bf16 %v11400_v60, %v11398_v43  ;;  %v11274_v63 = vld [vmem:[#allocation2 + $0x3a0] sm:$0xff]  ;;  %v11276_v55 = vld [vmem:[#allocation2 + $0x3b0] sm:$0xff]  ;;  %v12622_v23 = vpack.c.bf16 %v11277_v4, %v11275_v54 }
 0x768   : > { %v12750_v57 = vpack.c.bf16 %v11405_v13, %v11403_v28  ;;  %v11279_v22 = vld [vmem:[#allocation2 + $0x3c8] sm:$0xff]  ;;  %v11281_v46 = vld [vmem:[#allocation2 + $0x3d8] sm:$0xff]  ;;  %v12624_v33 = vpack.c.bf16 %v11276_v55, %v11274_v63  ;;  %v11278_v36 = vld [vmem:[#allocation2 + $0x3c0] sm:$0xff]  ;;  %v10928_v28 = vsel %vm18122_vm2, %v13468_v62, %v13434_v42  ;;  %v10927_v42 = vsel %vm18128_vm15, %v18127_v32, %v13468_v62 }
 0x769   : > { %12609 = vmatpush1.bf16.msra.mxu1 %v12608_v30  ;;  %12737 = vmatpush1.bf16.msra.mxu0 %v12736_v56  ;;  %v11402_v30 = vld [vmem:[#allocation2 + $0x7a0] sm:$0xff]  ;;  %v11404_v56 = vld [vmem:[#allocation2 + $0x7b0] sm:$0xff]  ;;  %v11285_v31 = vld [vmem:[#allocation2 + $0x3f8] sm:$0xff]  ;;  %v10961_v27 = vsel %vm17995_vm13, %v10928_v28, 0.0 }
 0x76a   : > { %12611 = vmatprep.subr.bf16.mxu1 %v12610_v29  ;;  %12739 = vmatprep.subr.bf16.mxu0 %v12738_v25  ;;  %v11407_v29 = vld [vmem:[#allocation2 + $0x7c8] sm:$0xff]  ;;  %v11409_v25 = vld [vmem:[#allocation2 + $0x7d8] sm:$0xff]  ;;  %v12752_v21 = vpack.c.bf16 %v11404_v56, %v11402_v30  ;;  %v11280_v5 = vld [vmem:[#allocation2 + $0x3d0] sm:$0xff] }
 0x76b   : > { %v12754_v12 = vpack.c.bf16 %v11409_v25, %v11407_v29  ;;  %v11406_v16 = vld [vmem:[#allocation2 + $0x7c0] sm:$0xff]  ;;  %v11411_v50 = vld [vmem:[#allocation2 + $0x7e8] sm:$0xff]  ;;  %v11413_v61 = vld [vmem:[#allocation2 + $0x7f8] sm:$0xff]  ;;  %v12628_v52 = vpack.c.bf16 %v11280_v5, %v11278_v36 }
 0x76c   : > { %v11282_v6 = vld [vmem:[#allocation2 + $0x3e0] sm:$0xff]  ;;  %v11412_v60 = vld [vmem:[#allocation2 + $0x7f0] sm:$0xff]  ;;  %vm18121_vm3 = vmmov %vm18060_vm0  ;;  %v12758_v4 = vpack.c.bf16 %v11413_v61, %v11411_v50 }
 0x76d   : > { %12613 = vmatpush1.bf16.msra.mxu1 %v12612_v17  ;;  %12741 = vmatpush1.bf16.msra.mxu0 %v12740_v53  ;;  %v13469_v17 = vunpack.i.h.bf16 %v16984_v19  ;;  %v12626_v53 = vpack.c.bf16 %v11281_v46, %v11279_v22  ;;  %v11410_v43 = vld [vmem:[#allocation2 + $0x7e0] sm:$0xff]  ;;  %vm18123_vm0 = vmmov %vm18086_vm5  ;;  %v18135_v22 = vunpack.i.h.bf16 %v16876_v20 }
 0x76e   : > { %12615 = vmatprep.subr.bf16.mxu1 %v12614_v40  ;;  %12743 = vmatprep.subr.bf16.mxu0 %v12742_v10  ;;  %v11408_v40 = vld [vmem:[#allocation2 + $0x7d0] sm:$0xff]  ;;  %v11283_v10 = vld [vmem:[#allocation2 + $0x3e8] sm:$0xff]  ;;  %v11109_v13 = vsel %vm18123_vm0, %v13474_v35, 0.0  ;;  %vm18124_vm5 = vmmov %vm18123_vm0 }
 0x76f   : > { %v10949_v54 = vsel %vm18121_vm3, %v13469_v17, 0.0  ;;  %v12630_v19 = vpack.c.bf16 %v11285_v31, %v11283_v10  ;;  %v10931_v45 = vsel %vm18129_vm14, %v13449_v15, %v13469_v17  ;;  %vm18131_vm7 = vmmov %vm18123_vm0  ;;  %v11125_v7 = vsel %vm17814_vm9, %v11109_v13, 0.0  ;;  %v18137_v29 = vld [vmem:[#allocation53_spill] sm:$0xff] }
 0x770   : > { %vm18133_vm10 = vmmov %vm18123_vm0  ;;  %v10964_v20 = vsel %vm18009_vm8, %v10931_v45, 0.0 }
 0x771   : > { %12617 = vmatpush1.bf16.msra.mxu1 %v12616_v3  ;;  %12745 = vmatpush1.bf16.msra.mxu0 %v12744_v1  ;;  %v13479_v3 = vunpack.i.h.bf16 %v13477_v9  ;;  %v13478_v1 = vunpack.i.l.bf16 %v13477_v9  ;;  %vm18136_vm6 = vmmov %vm18107_vm1 }
 0x772   : > { %12619 = vmatprep.subr.bf16.mxu1 %v12618_v18  ;;  %12747 = vmatprep.subr.bf16.mxu0 %v12746_v39  ;;  %v12756_v18 = vpack.c.bf16 %v11408_v40, %v11406_v16  ;;  %v11284_v39 = vld [vmem:[#allocation2 + $0x3f0] sm:$0xff]  ;;  %v10980_v40 = vmax.f32 %v18142_v48, %v10964_v20 }
 0x773   : > { %v11024_v63 = vsel %vm18126_vm4, %v13478_v1, %v13444_v51  ;;  %v12632_v55 = vpack.c.bf16 %v11284_v39, %v11282_v6  ;;  %v18132_v51 = vunpack.i.h.bf16 %v16836_v26  ;;  %v11027_v37 = vsel %vm18136_vm6, %v18135_v22, %v13479_v3 }
 0x775   : > { %12621 = vmatpush1.bf16.msra.mxu1 %v12620_v8  ;;  %12749 = vmatpush1.bf16.msra.mxu0 %v12748_v0  ;;  %v11088_v8 = vsel %vm18124_vm5, %v13473_v41, %v13439_v34  ;;  %v11045_v0 = vsel %vm18125_vm11, %v13479_v3, 0.0  ;;  %v18130_v34 = vunpack.i.h.bf16 %v16649_v59  ;;  %v11091_v56 = vsel %vm18133_vm10, %v18132_v51, %v13474_v35 }
 0x776   : > { %12623 = vmatprep.subr.bf16.mxu1 %v12622_v23  ;;  %12751 = vmatprep.subr.bf16.mxu0 %v12750_v57  ;;  %v12760_v23 = vpack.c.bf16 %v11412_v60, %v11410_v43  ;;  %v10965_v57 = vsel %vm17814_vm9, %v10949_v54, 0.0  ;;  %v11121_v44 = vsel %vm17995_vm13, %v11088_v8, 0.0  ;;  %v18134_v59 = vunpack.i.h.bf16 %v16605_v24 }
 0x777   : > { %v11087_v30 = vsel %vm18131_vm7, %v18130_v34, %v13473_v41  ;;  %v11141_v46 = vmax.f32 %v11045_v0, %v11125_v7  ;;  %v11137_v26 = vmax.f32 %v11024_v63, %v11121_v44  ;;  %v10981_v25 = vmax.f32 %v18137_v29, %v10965_v57 }
 0x778   : > { %v11023_v15 = vsel %vm18107_vm1, %v18134_v59, %v13478_v1  ;;  %v11120_v58 = vsel %vm18000_vm12, %v11087_v30, 0.0  ;;  %v11124_v9 = vsel %vm18009_vm8, %v11091_v56, 0.0  ;;  %v10977_v24 = vmax.f32 %v18138_v47, %v10961_v27 }
 0x779   : > { %12625 = vmatpush1.bf16.msra.mxu1 %v12624_v33  ;;  %12753 = vmatpush1.bf16.msra.mxu0 %v12752_v21  ;;  %v10960_v33 = vsel %vm18000_vm12, %v10927_v42, 0.0  ;;  %v11136_v21 = vmax.f32 %v11023_v15, %v11120_v58  ;;  %v11140_v36 = vmax.f32 %v11027_v37, %v11124_v9  ;;  %v11157_v17 = vmax.f32 %v10981_v25, %v11141_v46 }
 0x77a   : > { %12627 = vmatprep.subr.bf16.mxu1 %v12626_v53  ;;  %12755 = vmatprep.subr.bf16.mxu0 %v12754_v12  ;;  %v11153_v5 = vmax.f32 %v10977_v24, %v11137_v26  ;;  %v18139_v53 = vmax.f32 %v16839_v49, %v16921_v11  ;;  %v18140_v12 = vmax.f32 %v16821_v2, %v16927_v38 }
 0x77b   : > { %v10976_v16 = vmax.f32 %v18141_v14, %v10960_v33  ;;  %v11156_v62 = vmax.f32 %v10980_v40, %v11140_v36 }
 0x77d   : > { %12629 = vmatpush1.bf16.msra.mxu1 %v12628_v52  ;;  %12757 = vmatpush1.bf16.msra.mxu0 %v12756_v18  ;;  %v11152_v10 = vmax.f32 %v10976_v16, %v11136_v21 }
 0x77e   : > { %12631 = vmatprep.subr.bf16.mxu1 %v12630_v19  ;;  %12759 = vmatprep.subr.bf16.mxu0 %v12758_v4 }
 0x781   : > { %12633 = vmatpush1.bf16.msra.mxu1 %v12632_v55  ;;  %12761 = vmatpush1.bf16.msra.mxu0 %v12760_v23 }
 0x784   : > { %11556 = vmatmul.mubr.f32.vlgmr.msra.gmra.mrb[20].mxu1 %v18139_v53  ;;  %11710 = vmatmul.mubr.f32.vlgmr.msra.gmra.mrb[20].mxu0 %v18140_v12 }
 0x785   : > { %11561 = vmatprep.mubr.f32.mxu1 %v11153_v5  ;;  %11715 = vmatprep.mubr.f32.mxu0 %v11157_v17 }
 0x788   : > { %11562 = vmatmul.mubr.f32.gmra.mrb[22].mxu1 %v11152_v10  ;;  %11716 = vmatmul.mubr.f32.gmra.mrb[22].mxu0 %v11156_v62 }
 0x789   : > { %13525 = shalt.err (!%p13522_p7)
}
 0x78a   : > { %s13526_s22 = scalar_lea.hbm %s17048_s23, 2048  ;;  %s13530_s20 = scalar_lea.hbm %s17143_s16, 4096 }
 0x78b   : > { %p13527_p8 = scmp.ne.s32.totalorder %s17048_s23, %s13526_s22  ;;  %p13531_p1 = scmp.lt.u32.totalorder %s17048_s23, %s17143_s16 }
 0x78c   : > { %p13532_p0 = scmp.lt.u32.totalorder %s13530_s20, %s13526_s22  ;;  %p13534_p6 = scmp.lt.u32.totalorder %s13526_s22, %s17048_s23 }
 0x78d   : > { %p13528_p11 = pnand %p13527_p8, %p18143_p9 }
 0x78e   : > { %p13533_p5 = por %p13532_p0, %p13531_p1 }
 0x78f   : > { %p13529_p13 = pneg %p13528_p11 }
 0x790   : > { %p13535_p10 = por %p13534_p6, %p13533_p5 }
 0x792   : > { %p13536_p12 = pnand %p13535_p10, %p13529_p13 }
 0x794   : > { %13539 = shalt.err (!%p13536_p12)
}
 0x795   : > { %s13627_s2 = smov 1024   ;;  %s13628_s0 = smov 64  }
 0x796   : > { %12970 = dma.vmem_to_hbm [thread:$0]  (%p18143_p9), %s17051_s27, 2048, %s17048_s23, %s11727_s26, %s13627_s2, %s13627_s2, %s13628_s0  }
 0x797   : > { %s11874_s24 = sshll.u32 %s14432_s19, 5  ;;  %s12273_s20 = sshll.u32 %s13743_s28, 9 }
 0x798   : > { %s567_s30 = scalar_lea.vmem [#allocation6], %s11874_s24  ;;  %s17084_s26 = scalar_lea.hbm %s17144_s17, %s12273_s20 }
 0x799   : > { %s11761_s22 = sshll.u32 %s567_s30, 4  ;;  %s11732_s28 = scalar_lea.sflag [#allocation7], %s14432_s19  ;;  %s17079_s22 = int_to_ptr.vmem [resolvable:$true] %s11761_s22 }
 0x79a   : > { %s13540_s18 = scalar_lea.vmem %s17079_s22, 512  ;;  %s13629_s21 = smov [#allocation6]  }
 0x79b   : > { %p13541_p2 = scmp.ne.s32.totalorder %s17079_s22, %s13540_s18  ;;  %s13544_s2 = sshll.u32 %s13629_s21, 4  ;;  %s13545_s2 = int_to_ptr.vmem [resolvable:$false] %s13544_s2 }
 0x79c   : > { %s13546_s0 = scalar_lea.vmem %s13545_s2, 1024  ;;  %p13547_p7 = scmp.lt.s32.totalorder %s17079_s22, %s13545_s2 }
 0x79d   : > { %p13542_p3 = pnand %p13541_p2, %p18143_p9  ;;  %p13548_p8 = scmp.lt.s32.totalorder %s13546_s0, %s13540_s18 }
 0x79f   : > { %p13543_p4 = pneg %p13542_p3  ;;  %p13549_p11 = por %p13548_p8, %p13547_p7 }
 0x7a1   : > { %p13550_p13 = pnand %p13549_p11, %p13543_p4 }
 0x857   : > { %v11557_v2 = vpop.f32.mrb[20].mxu1  ;;  %v11711_v49 = vpop.f32.mrb[20].mxu0 }
 0x858   : > { %v12762_v11 = vadd.f32 %v11711_v49, %v11557_v2  ;;  %v11559_v38 = vpop.f32.mrb[21].mxu1  ;;  %v11713_v35 = vpop.f32.mrb[21].mxu0 }
 0x859   : > { %v12763_v41 = vadd.f32 %v11713_v35, %v11559_v38 }
 0x85a   : > { %11722 = vst [vmem:[%s567_s30] sm:$0xff] %v12762_v11 }
 0x85b   : > { %11723 = vst [vmem:[%s567_s30 + $0x8] sm:$0xff] %v12763_v41  ;;  %v11563_v31 = vpop.f32.mrb[22].mxu1  ;;  %v11717_v50 = vpop.f32.mrb[22].mxu0 }
 0x85c   : > { %v12764_v61 = vadd.f32 %v11717_v50, %v11563_v31  ;;  %v11565_v3 = vpop.f32.mrb[23].mxu1  ;;  %v11719_v1 = vpop.f32.mrb[23].mxu0 }
 0x85d   : > { %v12765_v6 = vadd.f32 %v11719_v1, %v11565_v3 }
 0x85e   : > { %11724 = vst [vmem:[%s567_s30 + $0x10] sm:$0xff] %v12764_v61 }
 0x85f   : > { %11725 = vst [vmem:[%s567_s30 + $0x18] sm:$0xff] %v12765_v6 }
 0x860   : > { %13553 = shalt.err (!%p13550_p13)
}
 0x861   : > { %s13554_s24 = scalar_lea.hbm %s17084_s26, 512  ;;  %s13558_s23 = scalar_lea.hbm %s17144_s17, 1024 }
 0x862   : > { %p13555_p1 = scmp.ne.s32.totalorder %s17084_s26, %s13554_s24  ;;  %p13559_p6 = scmp.lt.u32.totalorder %s17084_s26, %s17144_s17 }
 0x863   : > { %p13560_p10 = scmp.lt.u32.totalorder %s13558_s23, %s13554_s24  ;;  %p13562_p2 = scmp.lt.u32.totalorder %s13554_s24, %s17084_s26 }
 0x864   : > { %p13556_p0 = pnand %p13555_p1, %p18143_p9 }
 0x865   : > { %p13561_p12 = por %p13560_p10, %p13559_p6 }
 0x866   : > { %p13557_p5 = pneg %p13556_p0 }
 0x867   : > { %p13563_p3 = por %p13562_p2, %p13561_p12 }
 0x869   : > { %p13564_p4 = pnand %p13563_p3, %p13557_p5 }
 0x86b   : > { %13567 = shalt.err (!%p13564_p4)
}
 0x86c   : > { %s13630_s18 = smov 256   ;;  %s13631_s2 = smov 16  }
 0x86d   : > { %12971 = dma.vmem_to_hbm [thread:$0]  (%p18143_p9), %s17079_s22, 512, %s17084_s26, %s11732_s28, %s13630_s18, %s13630_s18, %s13631_s2  }
 0x86e PF: > { %s18144_s0 = sld [smem:[#allocation13_spill]]  ;;  %s18145_s30 = sld [smem:[#allocation11_spill]] }
 0x86f   : > { %s18146_s20 = sld [smem:[#allocation16_spill]] }
 0x874   : > { %p12987_p7 = scmp.ge.s32.totalorder %s18144_s0, 2  ;;  %s11776_s23 = sand.u32 1, %s18145_s30  }
 0x875   : > { %p18147_p8 = scmp.ne.s32.totalorder %s18146_s20, 0  ;;  %s11777_s24 = scalar_lea.sflag [#allocation4], %s11776_s23 }
 0x877   : > { %p12979_p11 = pnand %p12987_p7, %p18147_p8 }
 0x879   : > { %13589 = dma.done.wait (!%p12979_p11), %s11777_s24, 2048  }
 0x87a   : > { %13591 = vsyncadd (!%p12979_p11), %s11777_s24, 4294965248  ;;  %s11786_s27 = scalar_lea.sflag [#allocation7], %s11776_s23 }
 0x87b   : > { %13593 = dma.done.wait (!%p12979_p11), %s11786_s27, 512  }
 0x87c   : > { %13595 = vsyncadd (!%p12979_p11), %s11786_s27, 4294966784  ;;  %s18148_s27 = sld [smem:[#allocation14_spill]]  ;;  %s18149_s21 = sld [smem:[#allocation12_spill]] }
 0x87d   : > { %s18150_s26 = sld [smem:[#allocation15_spill]]  ;;  %s18151_s24 = smov %s13602_s25 }
 0x882   : > { %p32_p9 = scmp.ge.s32.totalorder %s18148_s27, 4   ;;  %s18152_s25 = smov %s18149_s21 }
 0x884   :  { %34 = sbr.rel (!%p32_p9) target bundleno = 10 (0xa), region = 165 }
 0x88b   :  { %11791 = vsyncpa [#allocation3], 1 }
 0x88c   :  { %11793 = vsyncpa [#allocation3 + $0x1], 1 }
 0x88d   :  { %11794 = vsyncpa [#allocation4], 1 }
 0x88e   :  { %11796 = vsyncpa [#allocation4 + $0x1], 1 }
 0x88f   :  { %11797 = vsyncpa [#allocation7], 1 }
 0x890   :  { %11799 = vsyncpa [#allocation7 + $0x1], 1 }

</bundles_post_ra>
